<compile_context>
chip_gen: v7x
topology: tpu7x:2x2x1
jax: 0.10.0
libtpu: 0.0.40
codegen_flags: <defaults>
</compile_context>

<pallas_src>
import jax
import jax.numpy as jnp
from jax.experimental import pallas as pl
from jax.experimental.pallas import tpu as pltpu

IN_FEATURES = 1280
HIDDEN = 2048
FC_DIM = 64
FC_PAD = 128          # lane-dense output width (sliced back to FC_DIM in wrapper)
MAX_TM = 256          # max batch-tile rows


def _round_up(a, m):
    return ((a + m - 1) // m) * m


def fcs_kernel(x_ref, w1_ref, b1_ref, w2_ref, b2_ref, o_ref):
    # Layer 1: (tm, IN) @ (IN, HIDDEN) -> (tm, HIDDEN), f32 accumulate on MXU.
    h = jnp.dot(x_ref[...].astype(jnp.bfloat16), w1_ref[...],
                preferred_element_type=jnp.float32)
    h = jnp.tanh(h + b1_ref[...])                       # bias + tanh in f32 (EUP)

    # Layer 2: (tm, HIDDEN) @ (HIDDEN, FC_PAD) -> (tm, FC_PAD).
    o = jnp.dot(h.astype(jnp.bfloat16), w2_ref[...],
                preferred_element_type=jnp.float32)
    o_ref[...] = jnp.tanh(o + b2_ref[...]).astype(o_ref.dtype)


def fcs_forward(x, w1t, b1, w2t, b2):
    """x: (B, 1280) f32. w1t: (1280, 2048) bf16. b1: (1, 2048) f32.
    w2t: (2048, 128) bf16 (zero-padded). b2: (1, 128) f32 (zero-padded)."""
    B = x.shape[0]

    # Batch tiling: keep tiles <= MAX_TM rows while minimizing zero-row padding.
    n_tiles = max(1, -(-B // MAX_TM))                    # ceil(B / MAX_TM)
    tm = max(8, _round_up(-(-B // n_tiles), 8))          # round_up(ceil(B/n_tiles), 8)
    b_pad = n_tiles * tm
    if b_pad != B:
        x = jnp.pad(x, ((0, b_pad - B), (0, 0)))

    grid = (n_tiles,)
    # Only shard across TensorCores when there are enough batch tiles that the
    # one-time 2x weight fetch (one copy per core) is amortized.
    semantics = ("parallel",) if n_tiles >= 8 else ("arbitrary",)

    flops = 2 * b_pad * IN_FEATURES * HIDDEN + 2 * b_pad * HIDDEN * FC_PAD
    bytes_accessed = (
        w1t.size * 2 + w2t.size * 2 + b1.size * 4 + b2.size * 4   # weights once
        + b_pad * IN_FEATURES * 4 + b_pad * FC_PAD * 4)           # x in, y out
    cost = pl.CostEstimate(
        flops=flops,
        transcendentals=b_pad * (HIDDEN + FC_PAD),
        bytes_accessed=bytes_accessed)

    out = pl.pallas_call(
        fcs_kernel,
        out_shape=jax.ShapeDtypeStruct((b_pad, FC_PAD), x.dtype),
        grid_spec=pltpu.PrefetchScalarGridSpec(
            num_scalar_prefetch=0,
            grid=grid,
            in_specs=[
                # x tile: the only operand that moves with the grid.
                pl.BlockSpec((tm, IN_FEATURES), lambda i: (i, 0)),
                # W1: full-size block, constant index -> fetched once, VMEM-resident.
                pl.BlockSpec((IN_FEATURES, HIDDEN), lambda i: (0, 0)),
                pl.BlockSpec((1, HIDDEN), lambda i: (0, 0)),
                # W2: full-size block (lane-dense padded output dim), resident.
                pl.BlockSpec((HIDDEN, FC_PAD), lambda i: (0, 0)),
                pl.BlockSpec((1, FC_PAD), lambda i: (0, 0)),
            ],
            out_specs=pl.BlockSpec((tm, FC_PAD), lambda i: (i, 0)),
        ),
        compiler_params=pltpu.CompilerParams(
            dimension_semantics=semantics,
            vmem_limit_bytes=32 * 1024 * 1024,
        ),
        cost_estimate=cost,
    )(x, w1t, b1, w2t, b2)

    return out[:B, :FC_DIM]


def _orthogonal(key, out_f, in_f, dtype=jnp.float32):
    # Deterministic orthogonal init (same spirit as torch.nn.init.orthogonal_).
    if out_f >= in_f:
        a = jax.random.normal(key, (out_f, in_f), dtype=jnp.float32)
        q, _ = jnp.linalg.qr(a)          # (out_f, in_f), orthonormal columns
        w = q
    else:
        a = jax.random.normal(key, (in_f, out_f), dtype=jnp.float32)
        q, _ = jnp.linalg.qr(a)          # (in_f, out_f)
        w = q.T                          # (out_f, in_f), orthonormal rows
    return w.astype(dtype)


def init_params(key):
    k1, k2, k3, k4 = jax.random.split(key, 4)
    w1 = _orthogonal(k1, HIDDEN, IN_FEATURES)            # (2048, 1280)
    w2 = _orthogonal(k2, FC_DIM, HIDDEN)                 # (64, 2048)
    b1 = jax.random.uniform(k3, (HIDDEN,), jnp.float32,
                            -1.0 / jnp.sqrt(IN_FEATURES), 1.0 / jnp.sqrt(IN_FEATURES))
    b2 = jax.random.uniform(k4, (FC_DIM,), jnp.float32,
                            -1.0 / jnp.sqrt(HIDDEN), 1.0 / jnp.sqrt(HIDDEN))
    # Glue for the kernel layout:
    #   * weights pre-transposed to [in, out] and cast to bf16 (f32 MXU accum),
    #   * W2 / b2 zero-padded along the out dim 64 -> 128 (lane-dense stores),
    #   * biases 2-D (1, out) in f32.
    w1t = w1.T.astype(jnp.bfloat16)                                    # (1280, 2048)
    w2t = jnp.pad(w2.T, ((0, 0), (0, FC_PAD - FC_DIM))).astype(jnp.bfloat16)  # (2048, 128)
    b1 = b1.reshape(1, HIDDEN).astype(jnp.float32)
    b2 = jnp.pad(b2.reshape(1, FC_DIM), ((0, 0), (0, FC_PAD - FC_DIM))).astype(jnp.float32)
    return w1t, b1, w2t, b2
    # TODO(synk): on v7x, W1 could be stored fp8 (e4m3) for ~2x less weight traffic.


if __name__ == "__main__":
    key = jax.random.PRNGKey(0)
    kx, kp = jax.random.split(key)

    B = 8                                                # small batch
    x = jax.random.normal(kx, (B, IN_FEATURES), dtype=jnp.float32)
    w1t, b1, w2t, b2 = init_params(kp)

    out = fcs_forward(x, w1t, b1, w2t, b2)
    out = jax.block_until_ready(out)

    # Reference (plain JAX) with identical bf16-weight / f32-accumulate math.
    ref_h = jnp.tanh(
        jnp.dot(x.astype(jnp.bfloat16), w1t, preferred_element_type=jnp.float32) + b1)
    ref = jnp.tanh(
        jnp.dot(ref_h.astype(jnp.bfloat16), w2t, preferred_element_type=jnp.float32) + b2
    )[:, :FC_DIM]

    assert out.shape == (B, FC_DIM)
    assert jnp.allclose(out, ref, atol=2e-3, rtol=2e-3), float(jnp.abs(out - ref).max())

    print("KERNEL_OK")
</pallas_src>

<mosaic_0001>
module attributes {stable_mosaic.version = 11 : i64} {
  func.func @fcs_kernel(%arg0: i32, %arg1: memref<8x1280xf32, #tpu.memory_space<vmem>>, %arg2: memref<1280x2048xbf16, #tpu.memory_space<vmem>>, %arg3: memref<1x2048xf32, #tpu.memory_space<vmem>>, %arg4: memref<2048x128xbf16, #tpu.memory_space<vmem>>, %arg5: memref<1x128xf32, #tpu.memory_space<vmem>>, %arg6: memref<8x128xf32, #tpu.memory_space<vmem>>) attributes {dimension_semantics = [#tpu.dimension_semantics<arbitrary>], iteration_bounds = array<i64: 1>, scalar_prefetch = 0 : i64, scratch_operands = 0 : i64, tpu.core_type = #tpu.core_type<tc>, window_params = [{transform_indices = @transform_0, window_bounds = array<i64: 8, 1280>}, {pipeline_mode = #tpu.pipeline_mode<synchronous>, transform_indices = @transform_1, window_bounds = array<i64: 1280, 2048>}, {pipeline_mode = #tpu.pipeline_mode<synchronous>, transform_indices = @transform_2, window_bounds = array<i64: 1, 2048>}, {pipeline_mode = #tpu.pipeline_mode<synchronous>, transform_indices = @transform_3, window_bounds = array<i64: 2048, 128>}, {pipeline_mode = #tpu.pipeline_mode<synchronous>, transform_indices = @transform_4, window_bounds = array<i64: 1, 128>}, {transform_indices = @transform_5, window_bounds = array<i64: 8, 128>}]} {
    %c0 = arith.constant 0 : index
    %c0_0 = arith.constant 0 : index
    %0 = vector.load %arg1[%c0, %c0_0] : memref<8x1280xf32, #tpu.memory_space<vmem>>, vector<8x1280xf32>
    %1 = arith.truncf %0 : vector<8x1280xf32> to vector<8x1280xbf16>
    %c0_1 = arith.constant 0 : index
    %c0_2 = arith.constant 0 : index
    %2 = vector.load %arg2[%c0_1, %c0_2] : memref<1280x2048xbf16, #tpu.memory_space<vmem>>, vector<1280x2048xbf16>
    %cst = arith.constant dense<0.000000e+00> : vector<8x2048xf32>
    %3 = tpu.matmul %1, %2, %cst {dimension_numbers = #tpu.dot_dimension_numbers<[1], [0], [0], [1], [0, 0, 1, 1], [], []>} : vector<8x1280xbf16>, vector<1280x2048xbf16>, vector<8x2048xf32> -> vector<8x2048xf32>
    %c0_3 = arith.constant 0 : index
    %c0_4 = arith.constant 0 : index
    %4 = vector.load %arg3[%c0_3, %c0_4] : memref<1x2048xf32, #tpu.memory_space<vmem>>, vector<1x2048xf32>
    %5 = vector.broadcast %4 : vector<1x2048xf32> to vector<8x2048xf32>
    %6 = arith.addf %3, %5 : vector<8x2048xf32>
    %7 = math.tanh %6 : vector<8x2048xf32>
    %8 = arith.truncf %7 : vector<8x2048xf32> to vector<8x2048xbf16>
    %c0_5 = arith.constant 0 : index
    %c0_6 = arith.constant 0 : index
    %9 = vector.load %arg4[%c0_5, %c0_6] : memref<2048x128xbf16, #tpu.memory_space<vmem>>, vector<2048x128xbf16>
    %cst_7 = arith.constant dense<0.000000e+00> : vector<8x128xf32>
    %10 = tpu.matmul %8, %9, %cst_7 {dimension_numbers = #tpu.dot_dimension_numbers<[1], [0], [0], [1], [0, 0, 1, 1], [], []>} : vector<8x2048xbf16>, vector<2048x128xbf16>, vector<8x128xf32> -> vector<8x128xf32>
    %c0_8 = arith.constant 0 : index
    %c0_9 = arith.constant 0 : index
    %11 = vector.load %arg5[%c0_8, %c0_9] : memref<1x128xf32, #tpu.memory_space<vmem>>, vector<1x128xf32>
    %12 = vector.broadcast %11 : vector<1x128xf32> to vector<8x128xf32>
    %13 = arith.addf %10, %12 : vector<8x128xf32>
    %14 = math.tanh %13 : vector<8x128xf32>
    %c0_10 = arith.constant 0 : index
    %c0_11 = arith.constant 0 : index
    %15 = vector.load %arg6[%c0_10, %c0_11] : memref<8x128xf32, #tpu.memory_space<vmem>>, vector<8x128xf32>
    tpu.vector_store %arg6[%c0_10, %c0_11], %14 {strides = array<i32>} : memref<8x128xf32, #tpu.memory_space<vmem>>, vector<8x128xf32>,
    return
  }
  func.func @transform_0(%arg0: i32) -> (i32, i32) {
    %c0_i32 = arith.constant 0 : i32
    %c0_i32_0 = arith.constant 0 : i32
    return %arg0, %c0_i32 : i32, i32
  }
  func.func @transform_1(%arg0: i32) -> (i32, i32) {
    %c0_i32 = arith.constant 0 : i32
    %c0_i32_0 = arith.constant 0 : i32
    %c0_i32_1 = arith.constant 0 : i32
    return %c0_i32, %c0_i32_0 : i32, i32
  }
  func.func @transform_2(%arg0: i32) -> (i32, i32) {
    %c0_i32 = arith.constant 0 : i32
    %c0_i32_0 = arith.constant 0 : i32
    %c0_i32_1 = arith.constant 0 : i32
    return %c0_i32, %c0_i32_0 : i32, i32
  }
  func.func @transform_3(%arg0: i32) -> (i32, i32) {
    %c0_i32 = arith.constant 0 : i32
    %c0_i32_0 = arith.constant 0 : i32
    %c0_i32_1 = arith.constant 0 : i32
    return %c0_i32, %c0_i32_0 : i32, i32
  }
  func.func @transform_4(%arg0: i32) -> (i32, i32) {
    %c0_i32 = arith.constant 0 : i32
    %c0_i32_0 = arith.constant 0 : i32
    %c0_i32_1 = arith.constant 0 : i32
    return %c0_i32, %c0_i32_0 : i32, i32
  }
  func.func @transform_5(%arg0: i32) -> (i32, i32) {
    %c0_i32 = arith.constant 0 : i32
    %c0_i32_0 = arith.constant 0 : i32
    return %arg0, %c0_i32 : i32, i32
  }
}

</mosaic_0001>

<bundles_post_ra>
// kernel: tpu_custom_call.1
= control target key start
LH: loop header
LB: loop body
LE: loop exit
PB: predicated region body
PF: predicated region fallthrough
CT: control target
= control target key end

     0   :  { %10 = vsyncpa [#allocation3], 0  ;;  %s13250_s0 = inlined_call_operand.hbm [shape: f32[8,1280], index: 0, kind: input, shape index: {}]   ;;  %s13251_s1 = inlined_call_operand.hbm [shape: bf16[1280,2048], index: 1, kind: input, shape index: {}]   ;;  %s13252_s2 = inlined_call_operand.hbm [shape: f32[1,2048], index: 2, kind: input, shape index: {}]   ;;  %s13253_s3 = inlined_call_operand.hbm [shape: bf16[2048,128], index: 3, kind: input, shape index: {}]   ;;  %s13254_s4 = inlined_call_operand.hbm [shape: f32[1,128], index: 4, kind: input, shape index: {}]   ;;  %s13255_s5 = inlined_call_operand.hbm [shape: f32[8,128], index: 5, kind: output, shape index: {}]  }
   0x1   :  { %11 = vsyncpa [#allocation6], 0 }
   0x2   :  { %12 = vsyncpa [#allocation9], 0 }
   0x3   :  { %13 = vsyncpa [#allocation4], 0  ;;  %s12951_s18 = smov [#allocation5]   ;;  %s12811_s22 = scalar_lea.hbm %s13251_s1, 163840 }
   0x4   :  { %s29_s19 = sshll.u32 %s12951_s18, 4  ;;  %p12812_p0 = scmp.ne.s32.totalorder %s13251_s1, %s12811_s22  ;;  %s30_s19 = int_to_ptr.vmem [resolvable:$true] %s29_s19 }
   0x5   :  { %p12815_p1 = scmp.lt.u32.totalorder %s12811_s22, %s13251_s1 }
   0x7   :  { %p12817_p2 = pnand %p12815_p1, %p12812_p0 }
   0x9   :  { %12820 = shalt.err (!%p12817_p2)
}
   0xa   :  { %s12821_s27 = scalar_lea.vmem %s30_s19, 163840  ;;  %p12826_p4 = scmp.lt.s32.totalorder %s30_s19, %s30_s19 }
   0xb   :  { %p12822_p3 = scmp.ne.s32.totalorder %s30_s19, %s12821_s27  ;;  %p12827_p5 = scmp.lt.s32.totalorder %s12821_s27, %s12821_s27 }
   0xd   :  { %p12828_p6 = por %p12827_p5, %p12826_p4 }
   0xf   :  { %p12829_p7 = pnand %p12828_p6, %p12822_p3 }
  0x11   :  { %12832 = shalt.err (!%p12829_p7)
}
  0x12   :  { %s12952_s28 = smov 1024   ;;  %s12953_s29 = smov 64  }
  0x13   :  { %35 = dma.hbm_to_vmem [thread:$0]  %s13251_s1, 163840, %s30_s19, [#allocation6], %s12952_s28, %s12952_s28, %s12953_s29  }
  0x14   :  { %s12954_s7 = smov [#allocation8]   ;;  %s12833_s11 = scalar_lea.hbm %s13253_s3, 16384 }
  0x15   :  { %s51_s8 = sshll.u32 %s12954_s7, 4  ;;  %p12834_p8 = scmp.ne.s32.totalorder %s13253_s3, %s12833_s11  ;;  %s52_s8 = int_to_ptr.vmem [resolvable:$true] %s51_s8 }
  0x16   :  { %p12837_p9 = scmp.lt.u32.totalorder %s12833_s11, %s13253_s3 }
  0x18   :  { %p12839_p10 = pnand %p12837_p9, %p12834_p8 }
  0x1a   :  { %12842 = shalt.err (!%p12839_p10)
}
  0x1b   :  { %s12843_s16 = scalar_lea.vmem %s52_s8, 16384  ;;  %p12848_p12 = scmp.lt.s32.totalorder %s52_s8, %s52_s8 }
  0x1c   :  { %p12844_p11 = scmp.ne.s32.totalorder %s52_s8, %s12843_s16  ;;  %p12849_p13 = scmp.lt.s32.totalorder %s12843_s16, %s12843_s16 }
  0x1e   :  { %p12850_p0 = por %p12849_p13, %p12848_p12 }
  0x20   :  { %p12851_p1 = pnand %p12850_p0, %p12844_p11 }
  0x22   :  { %12854 = shalt.err (!%p12851_p1)
}
  0x23   :  { %s12955_s1 = smov 4   ;;  %s12956_s19 = smov [#allocation2]  }
  0x24   :  { %57 = dma.hbm_to_vmem [thread:$0]  %s13253_s3, 16384, %s52_s8, [#allocation9], %s12953_s29, %s12953_s29, %s12955_s1  }
  0x25   :  { %s20_s20 = sshll.u32 %s12956_s19, 4  ;;  %s12957_s21 = smov [#allocation7]   ;;  %s21_s20 = int_to_ptr.vmem [resolvable:$true] %s20_s20 }
  0x26   :  { %s42_s22 = sshll.u32 %s12957_s21, 4  ;;  %s12855_s25 = scalar_lea.hbm %s13250_s0, 1280  ;;  %s43_s22 = int_to_ptr.vmem [resolvable:$true] %s42_s22 }
  0x27   :  { %p12856_p2 = scmp.ne.s32.totalorder %s13250_s0, %s12855_s25  ;;  %p12859_p3 = scmp.lt.u32.totalorder %s12855_s25, %s13250_s0 }
  0x29   :  { %p12861_p4 = pnand %p12859_p3, %p12856_p2 }
  0x2b   :  { %12864 = shalt.err (!%p12861_p4)
}
  0x2c   :  { %s12865_s3 = scalar_lea.vmem %s21_s20, 1280  ;;  %p12870_p6 = scmp.lt.s32.totalorder %s21_s20, %s21_s20 }
  0x2d   :  { %p12866_p5 = scmp.ne.s32.totalorder %s21_s20, %s12865_s3  ;;  %p12871_p7 = scmp.lt.s32.totalorder %s12865_s3, %s12865_s3 }
  0x2f   :  { %p12872_p8 = por %p12871_p7, %p12870_p6 }
  0x31   :  { %p12873_p9 = pnand %p12872_p8, %p12866_p5 }
  0x33   :  { %12876 = shalt.err (!%p12873_p9)
}
  0x34   :  { %23 = dma.hbm_to_vmem [thread:$0]  %s13250_s0, 1280, %s21_s20, [#allocation3]  }
  0x35   :  { %s12877_s9 = scalar_lea.hbm %s13252_s2, 256 }
  0x36   :  { %p12878_p10 = scmp.ne.s32.totalorder %s13252_s2, %s12877_s9  ;;  %p12881_p11 = scmp.lt.u32.totalorder %s12877_s9, %s13252_s2 }
  0x38   :  { %p12883_p12 = pnand %p12881_p11, %p12878_p10 }
  0x3a   :  { %12886 = shalt.err (!%p12883_p12)
}
  0x3b   :  { %s12887_s14 = scalar_lea.vmem %s43_s22, 256  ;;  %p12892_p0 = scmp.lt.s32.totalorder %s43_s22, %s43_s22 }
  0x3c   :  { %p12888_p13 = scmp.ne.s32.totalorder %s43_s22, %s12887_s14  ;;  %p12893_p1 = scmp.lt.s32.totalorder %s12887_s14, %s12887_s14 }
  0x3e   :  { %p12894_p2 = por %p12893_p1, %p12892_p0 }
  0x40   :  { %p12895_p3 = pnand %p12894_p2, %p12888_p13 }
  0x42   :  { %12898 = shalt.err (!%p12895_p3)
}
  0x43   :  { %45 = dma.hbm_to_vmem [thread:$0]  %s13252_s2, 256, %s43_s22, [#allocation6]  }
  0x44   :  { %s12958_s16 = smov [#allocation10]   ;;  %s12899_s19 = scalar_lea.hbm %s13254_s4, 16 }
  0x45   :  { %s64_s1 = sshll.u32 %s12958_s16, 4  ;;  %p12900_p4 = scmp.ne.s32.totalorder %s13254_s4, %s12899_s19  ;;  %s65_s1 = int_to_ptr.vmem [resolvable:$true] %s64_s1 }
  0x46   :  { %p12903_p5 = scmp.lt.u32.totalorder %s12899_s19, %s13254_s4 }
  0x48   :  { %p12905_p6 = pnand %p12903_p5, %p12900_p4 }
  0x4a   :  { %12908 = shalt.err (!%p12905_p6)
}
  0x4b   :  { %s12909_s25 = scalar_lea.vmem %s65_s1, 16  ;;  %s12913_s2 = scalar_lea.vmem %s65_s1, 32 }
  0x4c   :  { %p12910_p7 = scmp.ne.s32.totalorder %s65_s1, %s12909_s25  ;;  %p12914_p8 = scmp.lt.s32.totalorder %s65_s1, %s65_s1 }
  0x4d   :  { %p12915_p9 = scmp.lt.s32.totalorder %s12913_s2, %s12909_s25 }
  0x4f   :  { %p12916_p10 = por %p12915_p9, %p12914_p8 }
  0x51   :  { %p12917_p11 = pnand %p12916_p10, %p12910_p7 }
  0x53   :  { %12920 = shalt.err (!%p12917_p11)
}
  0x54   :  { %67 = dma.hbm_to_vmem [thread:$0]  %s13254_s4, 16, %s65_s1, [#allocation9]  }
  0x55   :  { %12943 = dma.done.wait [#allocation3], 1280  }
  0x56   :  { %12944 = vsyncadd [#allocation3], 4294966016 }
  0x57   :  { %12945 = dma.done.wait [#allocation6], 164096  }
  0x58   :  { %12946 = vsyncadd [#allocation6], 4294803200 }
  0x59   :  { %12947 = dma.done.wait [#allocation9], 16400  }
  0x5a   :  { %12948 = vsyncadd [#allocation9], 4294950896  ;;  %v104_v0 = vld [vmem:[#allocation5] sm:$0xff]  ;;  %v105_v2 = vld [vmem:[#allocation5 + $0x8] sm:$0xff]  ;;  %s12959_s4 = smov [#allocation11]  }
  0x5b   :  { %v112_v1 = vld [vmem:[#allocation5 + $0x40] sm:$0xff]  ;;  %v113_v4 = vld [vmem:[#allocation5 + $0x48] sm:$0xff]  ;;  %v85_v53 = vld [vmem:[#allocation2 + $0x8] sm:$0xff]  ;;  %s10899_s27 = sshll.u32 %s12959_s4, 4  ;;  %s10900_s27 = int_to_ptr.vmem [resolvable:$true] %s10899_s27 }
  0x5c   :  { %v10911_v3 = vcombine.high %v104_v0, %v112_v1  ;;  %v10910_v5 = vcombine.low %v104_v0, %v112_v1  ;;  %v120_v6 = vld [vmem:[#allocation5 + $0x80] sm:$0xff]  ;;  %v10913_v8 = vcombine.high %v105_v2, %v113_v4  ;;  %v10912_v9 = vcombine.low %v105_v2, %v113_v4  ;;  %v121_v11 = vld [vmem:[#allocation5 + $0x88] sm:$0xff]  ;;  %s12921_s28 = scalar_lea.vmem %s10900_s27, 128  ;;  %p12926_p13 = scmp.lt.s32.totalorder %s10900_s27, %s10900_s27 }
  0x5d   :  { %v128_v7 = vld [vmem:[#allocation5 + $0xc0] sm:$0xff]  ;;  %v129_v12 = vld [vmem:[#allocation5 + $0xc8] sm:$0xff]  ;;  %v13050_v57 = vpack.c.bf16 %v85_v53, %v85_v53  ;;  %p12922_p12 = scmp.ne.s32.totalorder %s10900_s27, %s12921_s28  ;;  %p12927_p0 = scmp.lt.s32.totalorder %s12921_s28, %s12921_s28 }
  0x5e   :  { %v10927_v10 = vcombine.high %v120_v6, %v128_v7  ;;  %v136_v13 = vld [vmem:[#allocation5 + $0x100] sm:$0xff]  ;;  %7868 = vmatprep.subr.bf16.mxu0 %v10911_v3  ;;  %v10929_v14 = vcombine.high %v121_v11, %v129_v12  ;;  %v137_v16 = vld [vmem:[#allocation5 + $0x108] sm:$0xff]  ;;  %8073 = vmatprep.subr.bf16.mxu1 %v10913_v8  ;;  %v10926_v18 = vcombine.low %v120_v6, %v128_v7 }
  0x5f   :  { %v144_v15 = vld [vmem:[#allocation5 + $0x140] sm:$0xff]  ;;  %v145_v17 = vld [vmem:[#allocation5 + $0x148] sm:$0xff]  ;;  %7869 = vmatpush1.bf16.msra.mxu0 %v10910_v5  ;;  %8074 = vmatpush1.bf16.msra.mxu1 %v10912_v9  ;;  %v10928_v19 = vcombine.low %v121_v11, %v129_v12  ;;  %p12928_p1 = por %p12927_p0, %p12926_p13 }
  0x60   :  { %7870 = vmatprep.subr.bf16.mxu0 %v10927_v10  ;;  %v10943_v20 = vcombine.high %v136_v13, %v144_v15  ;;  %8075 = vmatprep.subr.bf16.mxu1 %v10929_v14  ;;  %v10945_v21 = vcombine.high %v137_v16, %v145_v17  ;;  %v152_v22 = vld [vmem:[#allocation5 + $0x180] sm:$0xff]  ;;  %v153_v24 = vld [vmem:[#allocation5 + $0x188] sm:$0xff]  ;;  %v10942_v26 = vcombine.low %v136_v13, %v144_v15 }
  0x61   :  { %v160_v23 = vld [vmem:[#allocation5 + $0x1c0] sm:$0xff]  ;;  %v161_v25 = vld [vmem:[#allocation5 + $0x1c8] sm:$0xff]  ;;  %v10944_v27 = vcombine.low %v137_v16, %v145_v17  ;;  %7900 = vmatprep.mubr.bf16.mxu0 %v13050_v57  ;;  %8105 = vmatprep.mubr.bf16.mxu1 %v13050_v57  ;;  %p12929_p2 = pnand %p12928_p1, %p12922_p12 }
  0x62   :  { %v10959_v28 = vcombine.high %v152_v22, %v160_v23  ;;  %v10961_v29 = vcombine.high %v153_v24, %v161_v25  ;;  %v168_v30 = vld [vmem:[#allocation5 + $0x200] sm:$0xff]  ;;  %v169_v32 = vld [vmem:[#allocation5 + $0x208] sm:$0xff]  ;;  %v10958_v34 = vcombine.low %v152_v22, %v160_v23  ;;  %v10960_v35 = vcombine.low %v153_v24, %v161_v25 }
  0x63   :  { %7871 = vmatpush1.bf16.msra.mxu0 %v10926_v18  ;;  %8076 = vmatpush1.bf16.msra.mxu1 %v10928_v19  ;;  %v176_v31 = vld [vmem:[#allocation5 + $0x240] sm:$0xff]  ;;  %v177_v33 = vld [vmem:[#allocation5 + $0x248] sm:$0xff] }
  0x64   :  { %7872 = vmatprep.subr.bf16.mxu0 %v10943_v20  ;;  %8077 = vmatprep.subr.bf16.mxu1 %v10945_v21  ;;  %v10975_v36 = vcombine.high %v168_v30, %v176_v31  ;;  %v10977_v37 = vcombine.high %v169_v32, %v177_v33  ;;  %v184_v38 = vld [vmem:[#allocation5 + $0x280] sm:$0xff]  ;;  %v185_v40 = vld [vmem:[#allocation5 + $0x288] sm:$0xff]  ;;  %v10974_v42 = vcombine.low %v168_v30, %v176_v31 }
  0x65   :  { %v192_v39 = vld [vmem:[#allocation5 + $0x2c0] sm:$0xff]  ;;  %v193_v41 = vld [vmem:[#allocation5 + $0x2c8] sm:$0xff]  ;;  %v10976_v43 = vcombine.low %v169_v32, %v177_v33 }
  0x66   :  { %v10991_v44 = vcombine.high %v184_v38, %v192_v39  ;;  %v10993_v45 = vcombine.high %v185_v40, %v193_v41  ;;  %v200_v46 = vld [vmem:[#allocation5 + $0x300] sm:$0xff]  ;;  %v201_v48 = vld [vmem:[#allocation5 + $0x308] sm:$0xff]  ;;  %v10990_v50 = vcombine.low %v184_v38, %v192_v39  ;;  %v10992_v51 = vcombine.low %v185_v40, %v193_v41 }
  0x67   :  { %7873 = vmatpush1.bf16.msra.mxu0 %v10942_v26  ;;  %8078 = vmatpush1.bf16.msra.mxu1 %v10944_v27  ;;  %v208_v47 = vld [vmem:[#allocation5 + $0x340] sm:$0xff]  ;;  %v209_v49 = vld [vmem:[#allocation5 + $0x348] sm:$0xff] }
  0x68   :  { %7874 = vmatprep.subr.bf16.mxu0 %v10959_v28  ;;  %8079 = vmatprep.subr.bf16.mxu1 %v10961_v29  ;;  %v11007_v52 = vcombine.high %v200_v46, %v208_v47  ;;  %v11009_v54 = vcombine.high %v201_v48, %v209_v49  ;;  %v216_v55 = vld [vmem:[#allocation5 + $0x380] sm:$0xff]  ;;  %v217_v58 = vld [vmem:[#allocation5 + $0x388] sm:$0xff]  ;;  %v11006_v60 = vcombine.low %v200_v46, %v208_v47 }
  0x69   :  { %v224_v56 = vld [vmem:[#allocation5 + $0x3c0] sm:$0xff]  ;;  %v225_v59 = vld [vmem:[#allocation5 + $0x3c8] sm:$0xff]  ;;  %v11008_v61 = vcombine.low %v201_v48, %v209_v49 }
  0x6a   :  { %v11023_v62 = vcombine.high %v216_v55, %v224_v56  ;;  %v11025_v63 = vcombine.high %v217_v58, %v225_v59  ;;  %v232_v0 = vld [vmem:[#allocation5 + $0x400] sm:$0xff]  ;;  %v233_v2 = vld [vmem:[#allocation5 + $0x408] sm:$0xff]  ;;  %v11022_v4 = vcombine.low %v216_v55, %v224_v56  ;;  %v11024_v5 = vcombine.low %v217_v58, %v225_v59 }
  0x6b   :  { %7875 = vmatpush1.bf16.msra.mxu0 %v10958_v34  ;;  %8080 = vmatpush1.bf16.msra.mxu1 %v10960_v35  ;;  %v240_v1 = vld [vmem:[#allocation5 + $0x440] sm:$0xff]  ;;  %v241_v3 = vld [vmem:[#allocation5 + $0x448] sm:$0xff] }
  0x6c   :  { %7876 = vmatprep.subr.bf16.mxu0 %v10975_v36  ;;  %8081 = vmatprep.subr.bf16.mxu1 %v10977_v37  ;;  %v11039_v6 = vcombine.high %v232_v0, %v240_v1  ;;  %v11041_v7 = vcombine.high %v233_v2, %v241_v3  ;;  %v248_v8 = vld [vmem:[#allocation5 + $0x480] sm:$0xff]  ;;  %v249_v10 = vld [vmem:[#allocation5 + $0x488] sm:$0xff]  ;;  %v11038_v12 = vcombine.low %v232_v0, %v240_v1 }
  0x6d   :  { %v256_v9 = vld [vmem:[#allocation5 + $0x4c0] sm:$0xff]  ;;  %v257_v11 = vld [vmem:[#allocation5 + $0x4c8] sm:$0xff]  ;;  %v11040_v13 = vcombine.low %v233_v2, %v241_v3 }
  0x6e   :  { %v11055_v14 = vcombine.high %v248_v8, %v256_v9  ;;  %v11057_v15 = vcombine.high %v249_v10, %v257_v11  ;;  %v264_v16 = vld [vmem:[#allocation5 + $0x500] sm:$0xff]  ;;  %v265_v18 = vld [vmem:[#allocation5 + $0x508] sm:$0xff]  ;;  %v11054_v20 = vcombine.low %v248_v8, %v256_v9  ;;  %v11056_v21 = vcombine.low %v249_v10, %v257_v11 }
  0x6f   :  { %7877 = vmatpush1.bf16.msra.mxu0 %v10974_v42  ;;  %8082 = vmatpush1.bf16.msra.mxu1 %v10976_v43  ;;  %v272_v17 = vld [vmem:[#allocation5 + $0x540] sm:$0xff]  ;;  %v273_v19 = vld [vmem:[#allocation5 + $0x548] sm:$0xff] }
  0x70   :  { %7878 = vmatprep.subr.bf16.mxu0 %v10991_v44  ;;  %8083 = vmatprep.subr.bf16.mxu1 %v10993_v45  ;;  %v11071_v22 = vcombine.high %v264_v16, %v272_v17  ;;  %v11073_v23 = vcombine.high %v265_v18, %v273_v19  ;;  %v280_v24 = vld [vmem:[#allocation5 + $0x580] sm:$0xff]  ;;  %v281_v26 = vld [vmem:[#allocation5 + $0x588] sm:$0xff]  ;;  %v11070_v28 = vcombine.low %v264_v16, %v272_v17 }
  0x71   :  { %v288_v25 = vld [vmem:[#allocation5 + $0x5c0] sm:$0xff]  ;;  %v289_v27 = vld [vmem:[#allocation5 + $0x5c8] sm:$0xff]  ;;  %v11072_v29 = vcombine.low %v265_v18, %v273_v19 }
  0x72   :  { %v11087_v30 = vcombine.high %v280_v24, %v288_v25  ;;  %v11089_v31 = vcombine.high %v281_v26, %v289_v27  ;;  %v296_v32 = vld [vmem:[#allocation5 + $0x600] sm:$0xff]  ;;  %v297_v34 = vld [vmem:[#allocation5 + $0x608] sm:$0xff]  ;;  %v11086_v36 = vcombine.low %v280_v24, %v288_v25  ;;  %v11088_v37 = vcombine.low %v281_v26, %v289_v27 }
  0x73   :  { %7879 = vmatpush1.bf16.msra.mxu0 %v10990_v50  ;;  %8084 = vmatpush1.bf16.msra.mxu1 %v10992_v51  ;;  %v304_v33 = vld [vmem:[#allocation5 + $0x640] sm:$0xff]  ;;  %v305_v35 = vld [vmem:[#allocation5 + $0x648] sm:$0xff] }
  0x74   :  { %7880 = vmatprep.subr.bf16.mxu0 %v11007_v52  ;;  %8085 = vmatprep.subr.bf16.mxu1 %v11009_v54  ;;  %v11103_v38 = vcombine.high %v296_v32, %v304_v33  ;;  %v11105_v39 = vcombine.high %v297_v34, %v305_v35  ;;  %v312_v40 = vld [vmem:[#allocation5 + $0x680] sm:$0xff]  ;;  %v313_v42 = vld [vmem:[#allocation5 + $0x688] sm:$0xff]  ;;  %v11102_v44 = vcombine.low %v296_v32, %v304_v33 }
  0x75   :  { %v320_v41 = vld [vmem:[#allocation5 + $0x6c0] sm:$0xff]  ;;  %v321_v43 = vld [vmem:[#allocation5 + $0x6c8] sm:$0xff]  ;;  %v11104_v45 = vcombine.low %v297_v34, %v305_v35 }
  0x76   :  { %v11119_v46 = vcombine.high %v312_v40, %v320_v41  ;;  %v11121_v47 = vcombine.high %v313_v42, %v321_v43  ;;  %v328_v48 = vld [vmem:[#allocation5 + $0x700] sm:$0xff]  ;;  %v329_v50 = vld [vmem:[#allocation5 + $0x708] sm:$0xff]  ;;  %v11118_v52 = vcombine.low %v312_v40, %v320_v41  ;;  %v11120_v53 = vcombine.low %v313_v42, %v321_v43 }
  0x77   :  { %7881 = vmatpush1.bf16.msra.mxu0 %v11006_v60  ;;  %8086 = vmatpush1.bf16.msra.mxu1 %v11008_v61  ;;  %v336_v49 = vld [vmem:[#allocation5 + $0x740] sm:$0xff]  ;;  %v337_v51 = vld [vmem:[#allocation5 + $0x748] sm:$0xff] }
  0x78   :  { %7882 = vmatprep.subr.bf16.mxu0 %v11023_v62  ;;  %8087 = vmatprep.subr.bf16.mxu1 %v11025_v63  ;;  %v11135_v54 = vcombine.high %v328_v48, %v336_v49  ;;  %v11137_v55 = vcombine.high %v329_v50, %v337_v51  ;;  %v344_v56 = vld [vmem:[#allocation5 + $0x780] sm:$0xff]  ;;  %v345_v59 = vld [vmem:[#allocation5 + $0x788] sm:$0xff]  ;;  %v11134_v61 = vcombine.low %v328_v48, %v336_v49 }
  0x79   :  { %v352_v58 = vld [vmem:[#allocation5 + $0x7c0] sm:$0xff]  ;;  %v353_v60 = vld [vmem:[#allocation5 + $0x7c8] sm:$0xff]  ;;  %v11136_v62 = vcombine.low %v329_v50, %v337_v51 }
  0x7a   :  { %v11151_v63 = vcombine.high %v344_v56, %v352_v58  ;;  %v11153_v0 = vcombine.high %v345_v59, %v353_v60  ;;  %v360_v1 = vld [vmem:[#allocation5 + $0x800] sm:$0xff]  ;;  %v361_v3 = vld [vmem:[#allocation5 + $0x808] sm:$0xff] }
  0x7b   :  { %7883 = vmatpush1.bf16.msra.mxu0 %v11022_v4  ;;  %8088 = vmatpush1.bf16.msra.mxu1 %v11024_v5  ;;  %v368_v2 = vld [vmem:[#allocation5 + $0x840] sm:$0xff]  ;;  %v369_v4 = vld [vmem:[#allocation5 + $0x848] sm:$0xff]  ;;  %v11150_v5 = vcombine.low %v344_v56, %v352_v58 }
  0x7c   :  { %7884 = vmatprep.subr.bf16.mxu0 %v11039_v6  ;;  %8089 = vmatprep.subr.bf16.mxu1 %v11041_v7  ;;  %v84_v6 = vld [vmem:[#allocation2] sm:$0xff]  ;;  %v11152_v7 = vcombine.low %v345_v59, %v353_v60  ;;  %v11167_v8 = vcombine.high %v360_v1, %v368_v2  ;;  %v11169_v9 = vcombine.high %v361_v3, %v369_v4  ;;  %v376_v10 = vld [vmem:[#allocation5 + $0x880] sm:$0xff]  ;;  %v401_v24 = vld [vmem:[#allocation5 + $0x948] sm:$0xff] }
  0x7d   :  { %v384_v11 = vld [vmem:[#allocation5 + $0x8c0] sm:$0xff]  ;;  %v11166_v16 = vcombine.low %v360_v1, %v368_v2  ;;  %v11168_v17 = vcombine.low %v361_v3, %v369_v4  ;;  %v417_v32 = vld [vmem:[#allocation5 + $0x9c8] sm:$0xff] }
  0x7e   :  { %v11183_v18 = vcombine.high %v376_v10, %v384_v11  ;;  %v11182_v25 = vcombine.low %v376_v10, %v384_v11  ;;  %v433_v40 = vld [vmem:[#allocation5 + $0xa48] sm:$0xff] }
  0x7f   :  { %7885 = vmatpush1.bf16.msra.mxu0 %v11038_v12  ;;  %8090 = vmatpush1.bf16.msra.mxu1 %v11040_v13  ;;  %v13054_v12 = vpack.c.bf16 %v84_v6, %v84_v6  ;;  %v377_v13 = vld [vmem:[#allocation5 + $0x888] sm:$0xff]  ;;  %v496_v6 = vld [vmem:[#allocation5 + $0xc40] sm:$0xff] }
  0x80   :  { %7886 = vmatprep.subr.bf16.mxu0 %v11055_v14  ;;  %8091 = vmatprep.subr.bf16.mxu1 %v11057_v15  ;;  %v385_v14 = vld [vmem:[#allocation5 + $0x8c8] sm:$0xff] }
  0x81   :  { %v87_v15 = vld [vmem:[#allocation2 + $0x18] sm:$0xff]  ;;  %v11185_v19 = vcombine.high %v377_v13, %v385_v14  ;;  %v11184_v26 = vcombine.low %v377_v13, %v385_v14  ;;  %v504_v14 = vld [vmem:[#allocation5 + $0xc80] sm:$0xff] }
  0x82   :  { %v449_v48 = vld [vmem:[#allocation5 + $0xac8] sm:$0xff] }
  0x83   :  { %7887 = vmatpush1.bf16.msra.mxu0 %v11054_v20  ;;  %8092 = vmatpush1.bf16.msra.mxu1 %v11056_v21  ;;  %v392_v20 = vld [vmem:[#allocation5 + $0x900] sm:$0xff]  ;;  %v465_v56 = vld [vmem:[#allocation5 + $0xb48] sm:$0xff] }
  0x84   :  { %7888 = vmatprep.subr.bf16.mxu0 %v11071_v22  ;;  %8093 = vmatprep.subr.bf16.mxu1 %v11073_v23  ;;  %v400_v21 = vld [vmem:[#allocation5 + $0x940] sm:$0xff]  ;;  %v393_v22 = vld [vmem:[#allocation5 + $0x908] sm:$0xff]  ;;  %v13056_v23 = vpack.c.bf16 %v87_v15, %v87_v15 }
  0x85   :  { %v11199_v27 = vcombine.high %v392_v20, %v400_v21  ;;  %v11198_v33 = vcombine.low %v392_v20, %v400_v21  ;;  %v11200_v34 = vcombine.low %v393_v22, %v401_v24  ;;  %v481_v1 = vld [vmem:[#allocation5 + $0xbc8] sm:$0xff]  ;;  %v512_v15 = vld [vmem:[#allocation5 + $0xcc0] sm:$0xff] }
  0x86   :  { %v11311_v21 = vcombine.high %v504_v14, %v512_v15 }
  0x87   :  { %7889 = vmatpush1.bf16.msra.mxu0 %v11070_v28  ;;  %8094 = vmatpush1.bf16.msra.mxu1 %v11072_v29  ;;  %v408_v28 = vld [vmem:[#allocation5 + $0x980] sm:$0xff] }
  0x88   :  { %7890 = vmatprep.subr.bf16.mxu0 %v11087_v30  ;;  %8095 = vmatprep.subr.bf16.mxu1 %v11089_v31  ;;  %v416_v29 = vld [vmem:[#allocation5 + $0x9c0] sm:$0xff]  ;;  %v409_v30 = vld [vmem:[#allocation5 + $0x988] sm:$0xff]  ;;  %v11201_v31 = vcombine.high %v393_v22, %v401_v24 }
  0x89   :  { %v11215_v35 = vcombine.high %v408_v28, %v416_v29  ;;  %v11214_v41 = vcombine.low %v408_v28, %v416_v29  ;;  %v11216_v42 = vcombine.low %v409_v30, %v417_v32  ;;  %v520_v22 = vld [vmem:[#allocation5 + $0xd00] sm:$0xff]  ;;  %v11310_v28 = vcombine.low %v504_v14, %v512_v15 }
  0x8a   :  { %v528_v24 = vld [vmem:[#allocation5 + $0xd40] sm:$0xff] }
  0x8b   :  { %7891 = vmatpush1.bf16.msra.mxu0 %v11086_v36  ;;  %8096 = vmatpush1.bf16.msra.mxu1 %v11088_v37  ;;  %v424_v36 = vld [vmem:[#allocation5 + $0xa00] sm:$0xff] }
  0x8c   :  { %7892 = vmatprep.subr.bf16.mxu0 %v11103_v38  ;;  %8097 = vmatprep.subr.bf16.mxu1 %v11105_v39  ;;  %v432_v37 = vld [vmem:[#allocation5 + $0xa40] sm:$0xff]  ;;  %v425_v38 = vld [vmem:[#allocation5 + $0xa08] sm:$0xff]  ;;  %v11217_v39 = vcombine.high %v409_v30, %v417_v32  ;;  %v11327_v30 = vcombine.high %v520_v22, %v528_v24 }
  0x8d   :  { %v11231_v43 = vcombine.high %v424_v36, %v432_v37  ;;  %v11230_v49 = vcombine.low %v424_v36, %v432_v37  ;;  %v11232_v50 = vcombine.low %v425_v38, %v433_v40  ;;  %v544_v32 = vld [vmem:[#allocation5 + $0xdc0] sm:$0xff]  ;;  %v11326_v36 = vcombine.low %v520_v22, %v528_v24  ;;  %v89_v24 = vld [vmem:[#allocation2 + $0x28] sm:$0xff] }
  0x8e   :  { %v86_v14 = vld [vmem:[#allocation2 + $0x10] sm:$0xff] }
  0x8f   :  { %7893 = vmatpush1.bf16.msra.mxu0 %v11102_v44  ;;  %8098 = vmatpush1.bf16.msra.mxu1 %v11104_v45  ;;  %v440_v44 = vld [vmem:[#allocation5 + $0xa80] sm:$0xff] }
  0x90   :  { %7894 = vmatprep.subr.bf16.mxu0 %v11119_v46  ;;  %8099 = vmatprep.subr.bf16.mxu1 %v11121_v47  ;;  %v448_v45 = vld [vmem:[#allocation5 + $0xac0] sm:$0xff]  ;;  %v441_v46 = vld [vmem:[#allocation5 + $0xa88] sm:$0xff]  ;;  %v11233_v47 = vcombine.high %v425_v38, %v433_v40 }
  0x91   :  { %v11247_v51 = vcombine.high %v440_v44, %v448_v45  ;;  %v11246_v58 = vcombine.low %v440_v44, %v448_v45  ;;  %v11248_v59 = vcombine.low %v441_v46, %v449_v48  ;;  %v560_v40 = vld [vmem:[#allocation5 + $0xe40] sm:$0xff] }
  0x93   :  { %7895 = vmatpush1.bf16.msra.mxu0 %v11118_v52  ;;  %8100 = vmatpush1.bf16.msra.mxu1 %v11120_v53  ;;  %v456_v52 = vld [vmem:[#allocation5 + $0xb00] sm:$0xff] }
  0x94   :  { %7896 = vmatprep.subr.bf16.mxu0 %v11135_v54  ;;  %8101 = vmatprep.subr.bf16.mxu1 %v11137_v55  ;;  %v464_v53 = vld [vmem:[#allocation5 + $0xb40] sm:$0xff]  ;;  %v457_v54 = vld [vmem:[#allocation5 + $0xb08] sm:$0xff]  ;;  %v11249_v55 = vcombine.high %v441_v46, %v449_v48 }
  0x95   :  { %v11263_v60 = vcombine.high %v456_v52, %v464_v53  ;;  %v11262_v2 = vcombine.low %v456_v52, %v464_v53  ;;  %v11264_v3 = vcombine.low %v457_v54, %v465_v56  ;;  %v576_v48 = vld [vmem:[#allocation5 + $0xec0] sm:$0xff] }
  0x97   :  { %7897 = vmatpush1.bf16.msra.mxu0 %v11134_v61  ;;  %8102 = vmatpush1.bf16.msra.mxu1 %v11136_v62  ;;  %v472_v61 = vld [vmem:[#allocation5 + $0xb80] sm:$0xff] }
  0x98   :  { %7898 = vmatprep.subr.bf16.mxu0 %v11151_v63  ;;  %8103 = vmatprep.subr.bf16.mxu1 %v11153_v0  ;;  %v480_v62 = vld [vmem:[#allocation5 + $0xbc0] sm:$0xff]  ;;  %v473_v63 = vld [vmem:[#allocation5 + $0xb88] sm:$0xff]  ;;  %v11265_v0 = vcombine.high %v457_v54, %v465_v56 }
  0x99   :  { %v11279_v4 = vcombine.high %v472_v61, %v480_v62  ;;  %v11278_v10 = vcombine.low %v472_v61, %v480_v62  ;;  %v11280_v11 = vcombine.low %v473_v63, %v481_v1  ;;  %v592_v56 = vld [vmem:[#allocation5 + $0xf40] sm:$0xff] }
  0x9b   :  { %7899 = vmatpush1.bf16.msra.mxu0 %v11150_v5  ;;  %8104 = vmatpush1.bf16.msra.mxu1 %v11152_v7  ;;  %v488_v5 = vld [vmem:[#allocation5 + $0xc00] sm:$0xff]  ;;  %v489_v7 = vld [vmem:[#allocation5 + $0xc08] sm:$0xff] }
  0x9c   :  { %7909 = vmatprep.subr.bf16.mxu0 %v11167_v8  ;;  %8114 = vmatprep.subr.bf16.mxu1 %v11169_v9  ;;  %v11281_v8 = vcombine.high %v473_v63, %v481_v1  ;;  %v497_v9 = vld [vmem:[#allocation5 + $0xc48] sm:$0xff]  ;;  %v11295_v13 = vcombine.high %v488_v5, %v496_v6  ;;  %v608_v1 = vld [vmem:[#allocation5 + $0xfc0] sm:$0xff] }
  0x9d   :  { %v11296_v20 = vcombine.low %v489_v7, %v497_v9 }
  0x9e   :  { %7901 = vmatmul.mubr.bf16.vlgmr.msra.gmra.mrb[0].mxu0 %v13054_v12  ;;  %8106 = vmatmul.mubr.bf16.vlgmr.msra.gmra.mrb[0].mxu1 %v13054_v12 }
  0x9f   :  { %7910 = vmatpush1.bf16.msra.mxu0 %v11166_v16  ;;  %8115 = vmatpush1.bf16.msra.mxu1 %v11168_v17  ;;  %v505_v16 = vld [vmem:[#allocation5 + $0xc88] sm:$0xff]  ;;  %v11297_v17 = vcombine.high %v489_v7, %v497_v9  ;;  %v624_v9 = vld [vmem:[#allocation5 + $0x1040] sm:$0xff] }
  0xa0   :  { %7911 = vmatprep.subr.bf16.mxu0 %v11183_v18  ;;  %8116 = vmatprep.subr.bf16.mxu1 %v11185_v19  ;;  %v513_v18 = vld [vmem:[#allocation5 + $0xcc8] sm:$0xff]  ;;  %v11294_v19 = vcombine.low %v488_v5, %v496_v6  ;;  %v616_v6 = vld [vmem:[#allocation5 + $0x1000] sm:$0xff] }
  0xa1   :  { %7941 = vmatprep.mubr.bf16.mxu0 %v13056_v23  ;;  %8146 = vmatprep.mubr.bf16.mxu1 %v13056_v23  ;;  %v11312_v29 = vcombine.low %v505_v16, %v513_v18 }
  0xa3   :  { %7912 = vmatpush1.bf16.msra.mxu0 %v11182_v25  ;;  %8117 = vmatpush1.bf16.msra.mxu1 %v11184_v26  ;;  %v521_v25 = vld [vmem:[#allocation5 + $0xd08] sm:$0xff]  ;;  %v11313_v26 = vcombine.high %v505_v16, %v513_v18  ;;  %v632_v16 = vld [vmem:[#allocation5 + $0x1080] sm:$0xff]  ;;  %v11423_v18 = vcombine.high %v616_v6, %v624_v9 }
  0xa4   :  { %7913 = vmatprep.subr.bf16.mxu0 %v11199_v27  ;;  %8118 = vmatprep.subr.bf16.mxu1 %v11201_v31  ;;  %v529_v27 = vld [vmem:[#allocation5 + $0xd48] sm:$0xff]  ;;  %v536_v31 = vld [vmem:[#allocation5 + $0xd80] sm:$0xff] }
  0xa5   :  { %v11328_v37 = vcombine.low %v521_v25, %v529_v27  ;;  %v11343_v38 = vcombine.high %v536_v31, %v544_v32  ;;  %v11342_v44 = vcombine.low %v536_v31, %v544_v32  ;;  %v656_v31 = vld [vmem:[#allocation5 + $0x1140] sm:$0xff]  ;;  %v649_v32 = vld [vmem:[#allocation5 + $0x1108] sm:$0xff] }
  0xa7   :  { %7914 = vmatpush1.bf16.msra.mxu0 %v11198_v33  ;;  %8119 = vmatpush1.bf16.msra.mxu1 %v11200_v34  ;;  %v537_v33 = vld [vmem:[#allocation5 + $0xd88] sm:$0xff]  ;;  %v11329_v34 = vcombine.high %v521_v25, %v529_v27  ;;  %v13062_v25 = vpack.c.bf16 %v86_v14, %v86_v14 }
  0xa8   :  { %7915 = vmatprep.subr.bf16.mxu0 %v11215_v35  ;;  %8120 = vmatprep.subr.bf16.mxu1 %v11217_v39  ;;  %v545_v35 = vld [vmem:[#allocation5 + $0xdc8] sm:$0xff]  ;;  %v552_v39 = vld [vmem:[#allocation5 + $0xe00] sm:$0xff] }
  0xa9   :  { %v11344_v45 = vcombine.low %v537_v33, %v545_v35  ;;  %v11359_v46 = vcombine.high %v552_v39, %v560_v40  ;;  %v11358_v52 = vcombine.low %v552_v39, %v560_v40  ;;  %v672_v39 = vld [vmem:[#allocation5 + $0x11c0] sm:$0xff]  ;;  %v665_v40 = vld [vmem:[#allocation5 + $0x1188] sm:$0xff] }
  0xab   :  { %7916 = vmatpush1.bf16.msra.mxu0 %v11214_v41  ;;  %8121 = vmatpush1.bf16.msra.mxu1 %v11216_v42  ;;  %v553_v41 = vld [vmem:[#allocation5 + $0xe08] sm:$0xff]  ;;  %v11345_v42 = vcombine.high %v537_v33, %v545_v35 }
  0xac   :  { %7917 = vmatprep.subr.bf16.mxu0 %v11231_v43  ;;  %8122 = vmatprep.subr.bf16.mxu1 %v11233_v47  ;;  %v561_v43 = vld [vmem:[#allocation5 + $0xe48] sm:$0xff]  ;;  %v568_v47 = vld [vmem:[#allocation5 + $0xe80] sm:$0xff] }
  0xad   :  { %v11360_v53 = vcombine.low %v553_v41, %v561_v43  ;;  %v11375_v54 = vcombine.high %v568_v47, %v576_v48  ;;  %v11374_v61 = vcombine.low %v568_v47, %v576_v48  ;;  %v657_v33 = vld [vmem:[#allocation5 + $0x1148] sm:$0xff]  ;;  %v688_v47 = vld [vmem:[#allocation5 + $0x1240] sm:$0xff] }
  0xae   :  { %v681_v48 = vld [vmem:[#allocation5 + $0x1208] sm:$0xff] }
  0xaf   :  { %7918 = vmatpush1.bf16.msra.mxu0 %v11230_v49  ;;  %8123 = vmatpush1.bf16.msra.mxu1 %v11232_v50  ;;  %v569_v49 = vld [vmem:[#allocation5 + $0xe88] sm:$0xff]  ;;  %v11361_v50 = vcombine.high %v553_v41, %v561_v43  ;;  %v11457_v41 = vcombine.high %v649_v32, %v657_v33 }
  0xb0   :  { %7919 = vmatprep.subr.bf16.mxu0 %v11247_v51  ;;  %8124 = vmatprep.subr.bf16.mxu1 %v11249_v55  ;;  %v577_v51 = vld [vmem:[#allocation5 + $0xec8] sm:$0xff]  ;;  %v584_v55 = vld [vmem:[#allocation5 + $0xf00] sm:$0xff] }
  0xb1   :  { %v11376_v62 = vcombine.low %v569_v49, %v577_v51  ;;  %v11391_v63 = vcombine.high %v584_v55, %v592_v56  ;;  %v11390_v5 = vcombine.low %v584_v55, %v592_v56  ;;  %v704_v55 = vld [vmem:[#allocation5 + $0x12c0] sm:$0xff]  ;;  %v697_v56 = vld [vmem:[#allocation5 + $0x1288] sm:$0xff] }
  0xb3   :  { %7920 = vmatpush1.bf16.msra.mxu0 %v11246_v58  ;;  %8125 = vmatpush1.bf16.msra.mxu1 %v11248_v59  ;;  %v585_v58 = vld [vmem:[#allocation5 + $0xf08] sm:$0xff]  ;;  %v11377_v59 = vcombine.high %v569_v49, %v577_v51 }
  0xb4   :  { %7921 = vmatprep.subr.bf16.mxu0 %v11263_v60  ;;  %8126 = vmatprep.subr.bf16.mxu1 %v11265_v0  ;;  %v593_v60 = vld [vmem:[#allocation5 + $0xf48] sm:$0xff]  ;;  %v600_v0 = vld [vmem:[#allocation5 + $0xf80] sm:$0xff] }
  0xb5   :  { %v11392_v7 = vcombine.low %v585_v58, %v593_v60  ;;  %v11406_v15 = vcombine.low %v600_v0, %v608_v1 }
  0xb7   :  { %7922 = vmatpush1.bf16.msra.mxu0 %v11262_v2  ;;  %8127 = vmatpush1.bf16.msra.mxu1 %v11264_v3  ;;  %v601_v2 = vld [vmem:[#allocation5 + $0xf88] sm:$0xff]  ;;  %v11393_v3 = vcombine.high %v585_v58, %v593_v60 }
  0xb8   :  { %7923 = vmatprep.subr.bf16.mxu0 %v11279_v4  ;;  %8128 = vmatprep.subr.bf16.mxu1 %v11281_v8  ;;  %v609_v4 = vld [vmem:[#allocation5 + $0xfc8] sm:$0xff]  ;;  %v11407_v8 = vcombine.high %v600_v0, %v608_v1  ;;  %v720_v0 = vld [vmem:[#allocation5 + $0x1340] sm:$0xff] }
  0xb9   :  { %v713_v1 = vld [vmem:[#allocation5 + $0x1308] sm:$0xff] }
  0xbb   :  { %7924 = vmatpush1.bf16.msra.mxu0 %v11278_v10  ;;  %8129 = vmatpush1.bf16.msra.mxu1 %v11280_v11  ;;  %v617_v10 = vld [vmem:[#allocation5 + $0x1008] sm:$0xff] }
  0xbc   :  { %7925 = vmatprep.subr.bf16.mxu0 %v11295_v13  ;;  %8130 = vmatprep.subr.bf16.mxu1 %v11297_v17  ;;  %v625_v11 = vld [vmem:[#allocation5 + $0x1048] sm:$0xff]  ;;  %v11409_v13 = vcombine.high %v601_v2, %v609_v4  ;;  %v11408_v17 = vcombine.low %v601_v2, %v609_v4 }
  0xbd   :  { %v11425_v22 = vcombine.high %v617_v10, %v625_v11  ;;  %v11424_v27 = vcombine.low %v617_v10, %v625_v11  ;;  %v737_v11 = vld [vmem:[#allocation5 + $0x13c8] sm:$0xff] }
  0xbf   :  { %7926 = vmatpush1.bf16.msra.mxu0 %v11294_v19  ;;  %8131 = vmatpush1.bf16.msra.mxu1 %v11296_v20  ;;  %v640_v19 = vld [vmem:[#allocation5 + $0x10c0] sm:$0xff]  ;;  %v633_v20 = vld [vmem:[#allocation5 + $0x1088] sm:$0xff] }
  0xc0   :  { %7927 = vmatprep.subr.bf16.mxu0 %v11311_v21  ;;  %8132 = vmatprep.subr.bf16.mxu1 %v11313_v26  ;;  %v641_v21 = vld [vmem:[#allocation5 + $0x10c8] sm:$0xff]  ;;  %v11422_v26 = vcombine.low %v616_v6, %v624_v9  ;;  %v11438_v35 = vcombine.low %v632_v16, %v640_v19 }
  0xc1   :  { %v729_v9 = vld [vmem:[#allocation5 + $0x1388] sm:$0xff] }
  0xc3   :  { %7928 = vmatpush1.bf16.msra.mxu0 %v11310_v28  ;;  %8133 = vmatpush1.bf16.msra.mxu1 %v11312_v29  ;;  %v11439_v28 = vcombine.high %v632_v16, %v640_v19  ;;  %v648_v29 = vld [vmem:[#allocation5 + $0x1100] sm:$0xff]  ;;  %v11537_v19 = vcombine.high %v729_v9, %v737_v11 }
  0xc4   :  { %7929 = vmatprep.subr.bf16.mxu0 %v11327_v30  ;;  %8134 = vmatprep.subr.bf16.mxu1 %v11329_v34  ;;  %v11441_v30 = vcombine.high %v633_v20, %v641_v21  ;;  %v13064_v34 = vpack.c.bf16 %v89_v24, %v89_v24  ;;  %v11454_v43 = vcombine.low %v648_v29, %v656_v31  ;;  %v744_v16 = vld [vmem:[#allocation5 + $0x1400] sm:$0xff] }
  0xc7   :  { %7930 = vmatpush1.bf16.msra.mxu0 %v11326_v36  ;;  %8135 = vmatpush1.bf16.msra.mxu1 %v11328_v37  ;;  %v11440_v36 = vcombine.low %v633_v20, %v641_v21  ;;  %v11455_v37 = vcombine.high %v648_v29, %v656_v31  ;;  %v753_v20 = vld [vmem:[#allocation5 + $0x1448] sm:$0xff] }
  0xc8   :  { %7931 = vmatprep.subr.bf16.mxu0 %v11343_v38  ;;  %8136 = vmatprep.subr.bf16.mxu1 %v11345_v42  ;;  %v664_v38 = vld [vmem:[#allocation5 + $0x1180] sm:$0xff]  ;;  %v673_v42 = vld [vmem:[#allocation5 + $0x11c8] sm:$0xff] }
  0xc9   :  { %v11473_v49 = vcombine.high %v665_v40, %v673_v42  ;;  %v11470_v51 = vcombine.low %v664_v38, %v672_v39 }
  0xcb   :  { %7932 = vmatpush1.bf16.msra.mxu0 %v11342_v44  ;;  %8137 = vmatpush1.bf16.msra.mxu1 %v11344_v45  ;;  %v11456_v44 = vcombine.low %v649_v32, %v657_v33  ;;  %v11471_v45 = vcombine.high %v664_v38, %v672_v39  ;;  %v785_v39 = vld [vmem:[#allocation5 + $0x1548] sm:$0xff] }
  0xcc   :  { %7933 = vmatprep.subr.bf16.mxu0 %v11359_v46  ;;  %8138 = vmatprep.subr.bf16.mxu1 %v11361_v50  ;;  %v680_v46 = vld [vmem:[#allocation5 + $0x1200] sm:$0xff]  ;;  %v689_v50 = vld [vmem:[#allocation5 + $0x1248] sm:$0xff] }
  0xcd   :  { %v11489_v58 = vcombine.high %v681_v48, %v689_v50  ;;  %v11486_v60 = vcombine.low %v680_v46, %v688_v47 }
  0xcf   :  { %7934 = vmatpush1.bf16.msra.mxu0 %v11358_v52  ;;  %8139 = vmatpush1.bf16.msra.mxu1 %v11360_v53  ;;  %v11472_v52 = vcombine.low %v665_v40, %v673_v42  ;;  %v11487_v53 = vcombine.high %v680_v46, %v688_v47  ;;  %v801_v47 = vld [vmem:[#allocation5 + $0x15c8] sm:$0xff] }
  0xd0   :  { %7935 = vmatprep.subr.bf16.mxu0 %v11375_v54  ;;  %8140 = vmatprep.subr.bf16.mxu1 %v11377_v59  ;;  %v696_v54 = vld [vmem:[#allocation5 + $0x1280] sm:$0xff]  ;;  %v705_v59 = vld [vmem:[#allocation5 + $0x12c8] sm:$0xff] }
  0xd1   :  { %v11505_v2 = vcombine.high %v697_v56, %v705_v59  ;;  %v11502_v4 = vcombine.low %v696_v54, %v704_v55 }
  0xd3   :  { %7936 = vmatpush1.bf16.msra.mxu0 %v11374_v61  ;;  %8141 = vmatpush1.bf16.msra.mxu1 %v11376_v62  ;;  %v11488_v61 = vcombine.low %v681_v48, %v689_v50  ;;  %v11503_v62 = vcombine.high %v696_v54, %v704_v55  ;;  %v817_v55 = vld [vmem:[#allocation5 + $0x1648] sm:$0xff] }
  0xd4   :  { %7937 = vmatprep.subr.bf16.mxu0 %v11391_v63  ;;  %8142 = vmatprep.subr.bf16.mxu1 %v11393_v3  ;;  %v712_v63 = vld [vmem:[#allocation5 + $0x1300] sm:$0xff]  ;;  %v721_v3 = vld [vmem:[#allocation5 + $0x1348] sm:$0xff] }
  0xd5   :  { %v11519_v6 = vcombine.high %v712_v63, %v720_v0  ;;  %v11521_v10 = vcombine.high %v713_v1, %v721_v3  ;;  %v11520_v14 = vcombine.low %v713_v1, %v721_v3 }
  0xd7   :  { %7938 = vmatpush1.bf16.msra.mxu0 %v11390_v5  ;;  %8143 = vmatpush1.bf16.msra.mxu1 %v11392_v7  ;;  %v11504_v5 = vcombine.low %v697_v56, %v705_v59  ;;  %v728_v7 = vld [vmem:[#allocation5 + $0x1380] sm:$0xff] }
  0xd8   :  { %7939 = vmatprep.subr.bf16.mxu0 %v11407_v8  ;;  %8144 = vmatprep.subr.bf16.mxu1 %v11409_v13  ;;  %v736_v8 = vld [vmem:[#allocation5 + $0x13c0] sm:$0xff]  ;;  %v11518_v13 = vcombine.low %v712_v63, %v720_v0  ;;  %v833_v0 = vld [vmem:[#allocation5 + $0x16c8] sm:$0xff] }
  0xd9   :  { %v11534_v21 = vcombine.low %v728_v7, %v736_v8 }
  0xdb   :  { %7940 = vmatpush1.bf16.msra.mxu0 %v11406_v15  ;;  %8145 = vmatpush1.bf16.msra.mxu1 %v11408_v17  ;;  %v11535_v15 = vcombine.high %v728_v7, %v736_v8  ;;  %v752_v17 = vld [vmem:[#allocation5 + $0x1440] sm:$0xff]  ;;  %v849_v8 = vld [vmem:[#allocation5 + $0x1748] sm:$0xff] }
  0xdc   :  { %7950 = vmatprep.subr.bf16.mxu0 %v11423_v18  ;;  %8155 = vmatprep.subr.bf16.mxu1 %v11425_v22  ;;  %v745_v18 = vld [vmem:[#allocation5 + $0x1408] sm:$0xff]  ;;  %v11536_v22 = vcombine.low %v729_v9, %v737_v11  ;;  %v11551_v24 = vcombine.high %v744_v16, %v752_v17  ;;  %v11550_v31 = vcombine.low %v744_v16, %v752_v17 }
  0xdd   :  { %v11553_v29 = vcombine.high %v745_v18, %v753_v20  ;;  %v11552_v32 = vcombine.low %v745_v18, %v753_v20  ;;  %v865_v17 = vld [vmem:[#allocation5 + $0x17c8] sm:$0xff] }
  0xde   :  { %7942 = vmatmul.mubr.bf16.vlgmr.msra.gmra.mrb[0].mxu0 %v13062_v25  ;;  %8147 = vmatmul.mubr.bf16.vlgmr.msra.gmra.mrb[0].mxu1 %v13062_v25 }
  0xdf   :  { %7951 = vmatpush1.bf16.msra.mxu0 %v11422_v26  ;;  %8156 = vmatpush1.bf16.msra.mxu1 %v11424_v27  ;;  %v760_v26 = vld [vmem:[#allocation5 + $0x1480] sm:$0xff] }
  0xe0   :  { %7952 = vmatprep.subr.bf16.mxu0 %v11439_v28  ;;  %8157 = vmatprep.subr.bf16.mxu1 %v11441_v30  ;;  %v768_v27 = vld [vmem:[#allocation5 + $0x14c0] sm:$0xff]  ;;  %v761_v28 = vld [vmem:[#allocation5 + $0x1488] sm:$0xff] }
  0xe1   :  { %7982 = vmatprep.mubr.bf16.mxu0 %v13064_v34  ;;  %8187 = vmatprep.mubr.bf16.mxu1 %v13064_v34  ;;  %v769_v30 = vld [vmem:[#allocation5 + $0x14c8] sm:$0xff]  ;;  %v11567_v33 = vcombine.high %v760_v26, %v768_v27  ;;  %v11566_v40 = vcombine.low %v760_v26, %v768_v27 }
  0xe2   :  { %v11569_v38 = vcombine.high %v761_v28, %v769_v30  ;;  %v881_v26 = vld [vmem:[#allocation5 + $0x1848] sm:$0xff] }
  0xe3   :  { %7953 = vmatpush1.bf16.msra.mxu0 %v11438_v35  ;;  %8158 = vmatpush1.bf16.msra.mxu1 %v11440_v36  ;;  %v776_v35 = vld [vmem:[#allocation5 + $0x1500] sm:$0xff] }
  0xe4   :  { %7954 = vmatprep.subr.bf16.mxu0 %v11455_v37  ;;  %8159 = vmatprep.subr.bf16.mxu1 %v11457_v41  ;;  %v784_v36 = vld [vmem:[#allocation5 + $0x1540] sm:$0xff]  ;;  %v777_v37 = vld [vmem:[#allocation5 + $0x1508] sm:$0xff]  ;;  %v11568_v41 = vcombine.low %v761_v28, %v769_v30  ;;  %v88_v28 = vld [vmem:[#allocation2 + $0x20] sm:$0xff] }
  0xe5   :  { %v11583_v42 = vcombine.high %v776_v35, %v784_v36  ;;  %v11585_v46 = vcombine.high %v777_v37, %v785_v39  ;;  %v11582_v48 = vcombine.low %v776_v35, %v784_v36  ;;  %v888_v30 = vld [vmem:[#allocation5 + $0x1880] sm:$0xff]  ;;  %v889_v35 = vld [vmem:[#allocation5 + $0x1888] sm:$0xff] }
  0xe6   :  { %v897_v36 = vld [vmem:[#allocation5 + $0x18c8] sm:$0xff] }
  0xe7   :  { %7955 = vmatpush1.bf16.msra.mxu0 %v11454_v43  ;;  %8160 = vmatpush1.bf16.msra.mxu1 %v11456_v44  ;;  %v792_v43 = vld [vmem:[#allocation5 + $0x1580] sm:$0xff] }
  0xe8   :  { %7956 = vmatprep.subr.bf16.mxu0 %v11471_v45  ;;  %8161 = vmatprep.subr.bf16.mxu1 %v11473_v49  ;;  %v800_v44 = vld [vmem:[#allocation5 + $0x15c0] sm:$0xff]  ;;  %v793_v45 = vld [vmem:[#allocation5 + $0x1588] sm:$0xff]  ;;  %v11584_v49 = vcombine.low %v777_v37, %v785_v39  ;;  %v13070_v39 = vpack.c.bf16 %v88_v28, %v88_v28 }
  0xe9   :  { %v11599_v50 = vcombine.high %v792_v43, %v800_v44  ;;  %v11601_v54 = vcombine.high %v793_v45, %v801_v47  ;;  %v11598_v56 = vcombine.low %v792_v43, %v800_v44  ;;  %v904_v43 = vld [vmem:[#allocation5 + $0x1900] sm:$0xff]  ;;  %v993_v28 = vld [vmem:[#allocation5 + $0x1bc8] sm:$0xff] }
  0xea   :  { %v912_v44 = vld [vmem:[#allocation5 + $0x1940] sm:$0xff] }
  0xeb   :  { %7957 = vmatpush1.bf16.msra.mxu0 %v11470_v51  ;;  %8162 = vmatpush1.bf16.msra.mxu1 %v11472_v52  ;;  %v808_v51 = vld [vmem:[#allocation5 + $0x1600] sm:$0xff] }
  0xec   :  { %7958 = vmatprep.subr.bf16.mxu0 %v11487_v53  ;;  %8163 = vmatprep.subr.bf16.mxu1 %v11489_v58  ;;  %v816_v52 = vld [vmem:[#allocation5 + $0x1640] sm:$0xff]  ;;  %v809_v53 = vld [vmem:[#allocation5 + $0x1608] sm:$0xff]  ;;  %v11600_v58 = vcombine.low %v793_v45, %v801_v47  ;;  %v11697_v45 = vcombine.high %v889_v35, %v897_v36 }
  0xed   :  { %v11615_v59 = vcombine.high %v808_v51, %v816_v52  ;;  %v11617_v63 = vcombine.high %v809_v53, %v817_v55  ;;  %v11614_v1 = vcombine.low %v808_v51, %v816_v52  ;;  %v913_v47 = vld [vmem:[#allocation5 + $0x1948] sm:$0xff]  ;;  %v11711_v51 = vcombine.high %v904_v43, %v912_v44 }
  0xef   :  { %7959 = vmatpush1.bf16.msra.mxu0 %v11486_v60  ;;  %8164 = vmatpush1.bf16.msra.mxu1 %v11488_v61  ;;  %v824_v60 = vld [vmem:[#allocation5 + $0x1680] sm:$0xff] }
  0xf0   :  { %7960 = vmatprep.subr.bf16.mxu0 %v11503_v62  ;;  %8165 = vmatprep.subr.bf16.mxu1 %v11505_v2  ;;  %v832_v61 = vld [vmem:[#allocation5 + $0x16c0] sm:$0xff]  ;;  %v825_v62 = vld [vmem:[#allocation5 + $0x1688] sm:$0xff]  ;;  %v11616_v2 = vcombine.low %v809_v53, %v817_v55 }
  0xf1   :  { %v11631_v3 = vcombine.high %v824_v60, %v832_v61  ;;  %v11633_v7 = vcombine.high %v825_v62, %v833_v0  ;;  %v11630_v9 = vcombine.low %v824_v60, %v832_v61  ;;  %v920_v53 = vld [vmem:[#allocation5 + $0x1980] sm:$0xff]  ;;  %v921_v55 = vld [vmem:[#allocation5 + $0x1988] sm:$0xff] }
  0xf3   :  { %7961 = vmatpush1.bf16.msra.mxu0 %v11502_v4  ;;  %8166 = vmatpush1.bf16.msra.mxu1 %v11504_v5  ;;  %v840_v4 = vld [vmem:[#allocation5 + $0x1700] sm:$0xff] }
  0xf4   :  { %7962 = vmatprep.subr.bf16.mxu0 %v11519_v6  ;;  %8167 = vmatprep.subr.bf16.mxu1 %v11521_v10  ;;  %v848_v5 = vld [vmem:[#allocation5 + $0x1740] sm:$0xff]  ;;  %v841_v6 = vld [vmem:[#allocation5 + $0x1708] sm:$0xff]  ;;  %v11632_v10 = vcombine.low %v825_v62, %v833_v0 }
  0xf5   :  { %v11647_v11 = vcombine.high %v840_v4, %v848_v5  ;;  %v11649_v16 = vcombine.high %v841_v6, %v849_v8  ;;  %v11646_v18 = vcombine.low %v840_v4, %v848_v5  ;;  %v11648_v20 = vcombine.low %v841_v6, %v849_v8  ;;  %v936_v62 = vld [vmem:[#allocation5 + $0x1a00] sm:$0xff]  ;;  %v937_v0 = vld [vmem:[#allocation5 + $0x1a08] sm:$0xff] }
  0xf6   :  { %v952_v6 = vld [vmem:[#allocation5 + $0x1a80] sm:$0xff]  ;;  %v953_v8 = vld [vmem:[#allocation5 + $0x1a88] sm:$0xff] }
  0xf7   :  { %7963 = vmatpush1.bf16.msra.mxu0 %v11518_v13  ;;  %8168 = vmatpush1.bf16.msra.mxu1 %v11520_v14  ;;  %v856_v13 = vld [vmem:[#allocation5 + $0x1780] sm:$0xff] }
  0xf8   :  { %7964 = vmatprep.subr.bf16.mxu0 %v11535_v15  ;;  %8169 = vmatprep.subr.bf16.mxu1 %v11537_v19  ;;  %v864_v14 = vld [vmem:[#allocation5 + $0x17c0] sm:$0xff]  ;;  %v857_v15 = vld [vmem:[#allocation5 + $0x1788] sm:$0xff] }
  0xf9   :  { %v872_v19 = vld [vmem:[#allocation5 + $0x1800] sm:$0xff]  ;;  %v11665_v27 = vcombine.high %v857_v15, %v865_v17 }
  0xfb   :  { %7965 = vmatpush1.bf16.msra.mxu0 %v11534_v21  ;;  %8170 = vmatpush1.bf16.msra.mxu1 %v11536_v22  ;;  %v11663_v21 = vcombine.high %v856_v13, %v864_v14  ;;  %v880_v22 = vld [vmem:[#allocation5 + $0x1840] sm:$0xff] }
  0xfc   :  { %7966 = vmatprep.subr.bf16.mxu0 %v11551_v24  ;;  %8171 = vmatprep.subr.bf16.mxu1 %v11553_v29  ;;  %v873_v24 = vld [vmem:[#allocation5 + $0x1808] sm:$0xff]  ;;  %v11662_v29 = vcombine.low %v856_v13, %v864_v14 }
  0xfd   :  { %v11681_v37 = vcombine.high %v873_v24, %v881_v26 }
  0xff   :  { %7967 = vmatpush1.bf16.msra.mxu0 %v11550_v31  ;;  %8172 = vmatpush1.bf16.msra.mxu1 %v11552_v32  ;;  %v11664_v31 = vcombine.low %v857_v15, %v865_v17  ;;  %v11679_v32 = vcombine.high %v872_v19, %v880_v22  ;;  %v968_v15 = vld [vmem:[#allocation5 + $0x1b00] sm:$0xff]  ;;  %v969_v17 = vld [vmem:[#allocation5 + $0x1b08] sm:$0xff] }
 0x100   :  { %7968 = vmatprep.subr.bf16.mxu0 %v11567_v33  ;;  %8173 = vmatprep.subr.bf16.mxu1 %v11569_v38  ;;  %v896_v33 = vld [vmem:[#allocation5 + $0x18c0] sm:$0xff]  ;;  %v91_v38 = vld [vmem:[#allocation2 + $0x38] sm:$0xff] }
 0x103   :  { %7969 = vmatpush1.bf16.msra.mxu0 %v11566_v40  ;;  %8174 = vmatpush1.bf16.msra.mxu1 %v11568_v41  ;;  %v11678_v40 = vcombine.low %v872_v19, %v880_v22  ;;  %v11680_v41 = vcombine.low %v873_v24, %v881_v26  ;;  %v984_v24 = vld [vmem:[#allocation5 + $0x1b80] sm:$0xff] }
 0x104   :  { %7970 = vmatprep.subr.bf16.mxu0 %v11583_v42  ;;  %8175 = vmatprep.subr.bf16.mxu1 %v11585_v46  ;;  %v11695_v42 = vcombine.high %v888_v30, %v896_v33  ;;  %v905_v46 = vld [vmem:[#allocation5 + $0x1908] sm:$0xff]  ;;  %v992_v26 = vld [vmem:[#allocation5 + $0x1bc0] sm:$0xff] }
 0x105   :  { %v11713_v52 = vcombine.high %v905_v46, %v913_v47 }
 0x107   :  { %7971 = vmatpush1.bf16.msra.mxu0 %v11582_v48  ;;  %8176 = vmatpush1.bf16.msra.mxu1 %v11584_v49  ;;  %v13072_v48 = vpack.c.bf16 %v91_v38, %v91_v38  ;;  %v11694_v49 = vcombine.low %v888_v30, %v896_v33  ;;  %v1000_v33 = vld [vmem:[#allocation5 + $0x1c00] sm:$0xff]  ;;  %v11790_v38 = vcombine.low %v984_v24, %v992_v26 }
 0x108   :  { %7972 = vmatprep.subr.bf16.mxu0 %v11599_v50  ;;  %8177 = vmatprep.subr.bf16.mxu1 %v11601_v54  ;;  %v11696_v50 = vcombine.low %v889_v35, %v897_v36  ;;  %v928_v54 = vld [vmem:[#allocation5 + $0x19c0] sm:$0xff]  ;;  %v1001_v36 = vld [vmem:[#allocation5 + $0x1c08] sm:$0xff] }
 0x109   :  { %v11727_v60 = vcombine.high %v920_v53, %v928_v54  ;;  %v1008_v35 = vld [vmem:[#allocation5 + $0x1c40] sm:$0xff] }
 0x10b   :  { %7973 = vmatpush1.bf16.msra.mxu0 %v11598_v56  ;;  %8178 = vmatpush1.bf16.msra.mxu1 %v11600_v58  ;;  %v929_v56 = vld [vmem:[#allocation5 + $0x19c8] sm:$0xff]  ;;  %v11710_v58 = vcombine.low %v904_v43, %v912_v44  ;;  %v1016_v43 = vld [vmem:[#allocation5 + $0x1c80] sm:$0xff] }
 0x10c   :  { %7974 = vmatprep.subr.bf16.mxu0 %v11615_v59  ;;  %8179 = vmatprep.subr.bf16.mxu1 %v11617_v63  ;;  %v11712_v59 = vcombine.low %v905_v46, %v913_v47  ;;  %v11729_v61 = vcombine.high %v921_v55, %v929_v56  ;;  %v944_v63 = vld [vmem:[#allocation5 + $0x1a40] sm:$0xff]  ;;  %v1025_v46 = vld [vmem:[#allocation5 + $0x1cc8] sm:$0xff]  ;;  %v11806_v47 = vcombine.low %v1000_v33, %v1008_v35 }
 0x10d   :  { %v11743_v4 = vcombine.high %v936_v62, %v944_v63  ;;  %v1024_v44 = vld [vmem:[#allocation5 + $0x1cc0] sm:$0xff] }
 0x10f   :  { %7975 = vmatpush1.bf16.msra.mxu0 %v11614_v1  ;;  %8180 = vmatpush1.bf16.msra.mxu1 %v11616_v2  ;;  %v945_v1 = vld [vmem:[#allocation5 + $0x1a48] sm:$0xff]  ;;  %v11726_v2 = vcombine.low %v920_v53, %v928_v54  ;;  %v1040_v53 = vld [vmem:[#allocation5 + $0x1d40] sm:$0xff] }
 0x110   :  { %7976 = vmatprep.subr.bf16.mxu0 %v11631_v3  ;;  %8181 = vmatprep.subr.bf16.mxu1 %v11633_v7  ;;  %v11728_v3 = vcombine.low %v921_v55, %v929_v56  ;;  %v11745_v5 = vcombine.high %v937_v0, %v945_v1  ;;  %v960_v7 = vld [vmem:[#allocation5 + $0x1ac0] sm:$0xff]  ;;  %v1033_v54 = vld [vmem:[#allocation5 + $0x1d08] sm:$0xff]  ;;  %v11822_v56 = vcombine.low %v1016_v43, %v1024_v44 }
 0x111   :  { %v11759_v13 = vcombine.high %v952_v6, %v960_v7  ;;  %v11758_v19 = vcombine.low %v952_v6, %v960_v7  ;;  %v1041_v55 = vld [vmem:[#allocation5 + $0x1d48] sm:$0xff]  ;;  %v1072_v6 = vld [vmem:[#allocation5 + $0x1e40] sm:$0xff] }
 0x112   :  { %v1065_v7 = vld [vmem:[#allocation5 + $0x1e08] sm:$0xff] }
 0x113   :  { %7977 = vmatpush1.bf16.msra.mxu0 %v11630_v9  ;;  %8182 = vmatpush1.bf16.msra.mxu1 %v11632_v10  ;;  %v961_v9 = vld [vmem:[#allocation5 + $0x1ac8] sm:$0xff]  ;;  %v11742_v10 = vcombine.low %v936_v62, %v944_v63  ;;  %v1056_v62 = vld [vmem:[#allocation5 + $0x1dc0] sm:$0xff] }
 0x114   :  { %7978 = vmatprep.subr.bf16.mxu0 %v11647_v11  ;;  %8183 = vmatprep.subr.bf16.mxu1 %v11649_v16  ;;  %v11744_v11 = vcombine.low %v937_v0, %v945_v1  ;;  %v11761_v14 = vcombine.high %v953_v8, %v961_v9  ;;  %v976_v16 = vld [vmem:[#allocation5 + $0x1b40] sm:$0xff]  ;;  %v1049_v63 = vld [vmem:[#allocation5 + $0x1d88] sm:$0xff] }
 0x115   :  { %v1057_v0 = vld [vmem:[#allocation5 + $0x1dc8] sm:$0xff] }
 0x117   :  { %7979 = vmatpush1.bf16.msra.mxu0 %v11646_v18  ;;  %8184 = vmatpush1.bf16.msra.mxu1 %v11648_v20  ;;  %v977_v18 = vld [vmem:[#allocation5 + $0x1b48] sm:$0xff]  ;;  %v11760_v20 = vcombine.low %v953_v8, %v961_v9 }
 0x118   :  { %7980 = vmatprep.subr.bf16.mxu0 %v11663_v21  ;;  %8185 = vmatprep.subr.bf16.mxu1 %v11665_v27  ;;  %v11775_v21 = vcombine.high %v968_v15, %v976_v16  ;;  %v11777_v22 = vcombine.high %v969_v17, %v977_v18  ;;  %v985_v27 = vld [vmem:[#allocation5 + $0x1b88] sm:$0xff]  ;;  %v11776_v30 = vcombine.low %v969_v17, %v977_v18 }
 0x119   :  { %v1073_v8 = vld [vmem:[#allocation5 + $0x1e48] sm:$0xff] }
 0x11a   :  { %v1089_v17 = vld [vmem:[#allocation5 + $0x1ec8] sm:$0xff] }
 0x11b   :  { %7981 = vmatpush1.bf16.msra.mxu0 %v11662_v29  ;;  %8186 = vmatpush1.bf16.msra.mxu1 %v11664_v31  ;;  %v11774_v29 = vcombine.low %v968_v15, %v976_v16  ;;  %v11791_v31 = vcombine.high %v984_v24, %v992_v26  ;;  %v1088_v15 = vld [vmem:[#allocation5 + $0x1ec0] sm:$0xff]  ;;  %v1081_v16 = vld [vmem:[#allocation5 + $0x1e88] sm:$0xff] }
 0x11c   :  { %7991 = vmatprep.subr.bf16.mxu0 %v11679_v32  ;;  %8196 = vmatprep.subr.bf16.mxu1 %v11681_v37  ;;  %v11793_v32 = vcombine.high %v985_v27, %v993_v28  ;;  %v1009_v37 = vld [vmem:[#allocation5 + $0x1c48] sm:$0xff]  ;;  %v1104_v24 = vld [vmem:[#allocation5 + $0x1f40] sm:$0xff] }
 0x11d   :  { %v1097_v26 = vld [vmem:[#allocation5 + $0x1f08] sm:$0xff] }
 0x11e   :  { %7983 = vmatmul.mubr.bf16.vlgmr.msra.gmra.mrb[0].mxu0 %v13070_v39  ;;  %8188 = vmatmul.mubr.bf16.vlgmr.msra.gmra.mrb[0].mxu1 %v13070_v39 }
 0x11f   :  { %7992 = vmatpush1.bf16.msra.mxu0 %v11678_v40  ;;  %8197 = vmatpush1.bf16.msra.mxu1 %v11680_v41  ;;  %v11792_v40 = vcombine.low %v985_v27, %v993_v28  ;;  %v11807_v41 = vcombine.high %v1000_v33, %v1008_v35  ;;  %v1105_v27 = vld [vmem:[#allocation5 + $0x1f48] sm:$0xff]  ;;  %v1120_v33 = vld [vmem:[#allocation5 + $0x1fc0] sm:$0xff] }
 0x120   :  { %7993 = vmatprep.subr.bf16.mxu0 %v11695_v42  ;;  %8198 = vmatprep.subr.bf16.mxu1 %v11697_v45  ;;  %v11809_v42 = vcombine.high %v1001_v36, %v1009_v37  ;;  %v1017_v45 = vld [vmem:[#allocation5 + $0x1c88] sm:$0xff] }
 0x121   :  { %8023 = vmatprep.mubr.bf16.mxu0 %v13072_v48  ;;  %8228 = vmatprep.mubr.bf16.mxu1 %v13072_v48  ;;  %v1113_v35 = vld [vmem:[#allocation5 + $0x1f88] sm:$0xff] }
 0x123   :  { %7994 = vmatpush1.bf16.msra.mxu0 %v11694_v49  ;;  %8199 = vmatpush1.bf16.msra.mxu1 %v11696_v50  ;;  %v11808_v49 = vcombine.low %v1001_v36, %v1009_v37  ;;  %v11823_v50 = vcombine.high %v1016_v43, %v1024_v44  ;;  %v1121_v36 = vld [vmem:[#allocation5 + $0x1fc8] sm:$0xff]  ;;  %v1136_v43 = vld [vmem:[#allocation5 + $0x2040] sm:$0xff] }
 0x124   :  { %7995 = vmatprep.subr.bf16.mxu0 %v11711_v51  ;;  %8200 = vmatprep.subr.bf16.mxu1 %v11713_v52  ;;  %v11825_v51 = vcombine.high %v1017_v45, %v1025_v46  ;;  %v1032_v52 = vld [vmem:[#allocation5 + $0x1d00] sm:$0xff]  ;;  %v1129_v44 = vld [vmem:[#allocation5 + $0x2008] sm:$0xff] }
 0x125   :  { %v11838_v1 = vcombine.low %v1032_v52, %v1040_v53 }
 0x127   :  { %7996 = vmatpush1.bf16.msra.mxu0 %v11710_v58  ;;  %8201 = vmatpush1.bf16.msra.mxu1 %v11712_v59  ;;  %v11824_v58 = vcombine.low %v1017_v45, %v1025_v46  ;;  %v11839_v59 = vcombine.high %v1032_v52, %v1040_v53  ;;  %v1137_v45 = vld [vmem:[#allocation5 + $0x2048] sm:$0xff]  ;;  %v1144_v52 = vld [vmem:[#allocation5 + $0x2080] sm:$0xff] }
 0x128   :  { %7997 = vmatprep.subr.bf16.mxu0 %v11727_v60  ;;  %8202 = vmatprep.subr.bf16.mxu1 %v11729_v61  ;;  %v11841_v60 = vcombine.high %v1033_v54, %v1041_v55  ;;  %v1048_v61 = vld [vmem:[#allocation5 + $0x1d80] sm:$0xff] }
 0x129   :  { %v11854_v9 = vcombine.low %v1048_v61, %v1056_v62  ;;  %v1152_v53 = vld [vmem:[#allocation5 + $0x20c0] sm:$0xff] }
 0x12b   :  { %7998 = vmatpush1.bf16.msra.mxu0 %v11726_v2  ;;  %8203 = vmatpush1.bf16.msra.mxu1 %v11728_v3  ;;  %v11840_v2 = vcombine.low %v1033_v54, %v1041_v55  ;;  %v11855_v3 = vcombine.high %v1048_v61, %v1056_v62  ;;  %v1145_v55 = vld [vmem:[#allocation5 + $0x2088] sm:$0xff]  ;;  %v11951_v61 = vcombine.high %v1144_v52, %v1152_v53 }
 0x12c   :  { %7999 = vmatprep.subr.bf16.mxu0 %v11743_v4  ;;  %8204 = vmatprep.subr.bf16.mxu1 %v11745_v5  ;;  %v11857_v4 = vcombine.high %v1049_v63, %v1057_v0  ;;  %v1064_v5 = vld [vmem:[#allocation5 + $0x1e00] sm:$0xff] }
 0x12d   :  { %v11870_v18 = vcombine.low %v1064_v5, %v1072_v6 }
 0x12f   :  { %8000 = vmatpush1.bf16.msra.mxu0 %v11742_v10  ;;  %8205 = vmatpush1.bf16.msra.mxu1 %v11744_v11  ;;  %v11856_v10 = vcombine.low %v1049_v63, %v1057_v0  ;;  %v11871_v11 = vcombine.high %v1064_v5, %v1072_v6  ;;  %v1160_v63 = vld [vmem:[#allocation5 + $0x2100] sm:$0xff] }
 0x130   :  { %8001 = vmatprep.subr.bf16.mxu0 %v11759_v13  ;;  %8206 = vmatprep.subr.bf16.mxu1 %v11761_v14  ;;  %v11873_v13 = vcombine.high %v1065_v7, %v1073_v8  ;;  %v1080_v14 = vld [vmem:[#allocation5 + $0x1e80] sm:$0xff] }
 0x131   :  { %v11886_v28 = vcombine.low %v1080_v14, %v1088_v15  ;;  %v1168_v0 = vld [vmem:[#allocation5 + $0x2140] sm:$0xff] }
 0x132   :  { %v11967_v6 = vcombine.high %v1160_v63, %v1168_v0 }
 0x133   :  { %8002 = vmatpush1.bf16.msra.mxu0 %v11758_v19  ;;  %8207 = vmatpush1.bf16.msra.mxu1 %v11760_v20  ;;  %v11872_v19 = vcombine.low %v1065_v7, %v1073_v8  ;;  %v11887_v20 = vcombine.high %v1080_v14, %v1088_v15  ;;  %v1176_v8 = vld [vmem:[#allocation5 + $0x2180] sm:$0xff] }
 0x134   :  { %8003 = vmatprep.subr.bf16.mxu0 %v11775_v21  ;;  %8208 = vmatprep.subr.bf16.mxu1 %v11777_v22  ;;  %v11889_v21 = vcombine.high %v1081_v16, %v1089_v17  ;;  %v1096_v22 = vld [vmem:[#allocation5 + $0x1f00] sm:$0xff] }
 0x135   :  { %v11902_v37 = vcombine.low %v1096_v22, %v1104_v24 }
 0x137   :  { %8004 = vmatpush1.bf16.msra.mxu0 %v11774_v29  ;;  %8209 = vmatpush1.bf16.msra.mxu1 %v11776_v30  ;;  %v11888_v29 = vcombine.low %v1081_v16, %v1089_v17  ;;  %v11903_v30 = vcombine.high %v1096_v22, %v1104_v24  ;;  %v1192_v17 = vld [vmem:[#allocation5 + $0x2200] sm:$0xff] }
 0x138   :  { %8005 = vmatprep.subr.bf16.mxu0 %v11791_v31  ;;  %8210 = vmatprep.subr.bf16.mxu1 %v11793_v32  ;;  %v11905_v31 = vcombine.high %v1097_v26, %v1105_v27  ;;  %v1112_v32 = vld [vmem:[#allocation5 + $0x1f80] sm:$0xff] }
 0x139   :  { %v11918_v46 = vcombine.low %v1112_v32, %v1120_v33 }
 0x13b   :  { %8006 = vmatpush1.bf16.msra.mxu0 %v11790_v38  ;;  %8211 = vmatpush1.bf16.msra.mxu1 %v11792_v40  ;;  %v11904_v38 = vcombine.low %v1097_v26, %v1105_v27  ;;  %v11919_v40 = vcombine.high %v1112_v32, %v1120_v33  ;;  %v1208_v27 = vld [vmem:[#allocation5 + $0x2280] sm:$0xff] }
 0x13c   :  { %8007 = vmatprep.subr.bf16.mxu0 %v11807_v41  ;;  %8212 = vmatprep.subr.bf16.mxu1 %v11809_v42  ;;  %v11921_v41 = vcombine.high %v1113_v35, %v1121_v36  ;;  %v1128_v42 = vld [vmem:[#allocation5 + $0x2000] sm:$0xff] }
 0x13f   :  { %8008 = vmatpush1.bf16.msra.mxu0 %v11806_v47  ;;  %8213 = vmatpush1.bf16.msra.mxu1 %v11808_v49  ;;  %v90_v47 = vld [vmem:[#allocation2 + $0x30] sm:$0xff]  ;;  %v11920_v49 = vcombine.low %v1113_v35, %v1121_v36 }
 0x140   :  { %8009 = vmatprep.subr.bf16.mxu0 %v11823_v50  ;;  %8214 = vmatprep.subr.bf16.mxu1 %v11825_v51  ;;  %v11935_v50 = vcombine.high %v1128_v42, %v1136_v43  ;;  %v11937_v51 = vcombine.high %v1129_v44, %v1137_v45  ;;  %v13078_v54 = vpack.c.bf16 %v90_v47, %v90_v47  ;;  %v1224_v36 = vld [vmem:[#allocation5 + $0x2300] sm:$0xff]  ;;  %v1241_v47 = vld [vmem:[#allocation5 + $0x2388] sm:$0xff] }
 0x143   :  { %8010 = vmatpush1.bf16.msra.mxu0 %v11822_v56  ;;  %8215 = vmatpush1.bf16.msra.mxu1 %v11824_v58  ;;  %v1153_v56 = vld [vmem:[#allocation5 + $0x20c8] sm:$0xff]  ;;  %v93_v58 = vld [vmem:[#allocation2 + $0x48] sm:$0xff] }
 0x144   :  { %8011 = vmatprep.subr.bf16.mxu0 %v11839_v59  ;;  %8216 = vmatprep.subr.bf16.mxu1 %v11841_v60  ;;  %v11934_v59 = vcombine.low %v1128_v42, %v1136_v43  ;;  %v11936_v60 = vcombine.low %v1129_v44, %v1137_v45  ;;  %v11953_v62 = vcombine.high %v1145_v55, %v1153_v56  ;;  %v1240_v45 = vld [vmem:[#allocation5 + $0x2380] sm:$0xff] }
 0x145   :  { %v11952_v5 = vcombine.low %v1145_v55, %v1153_v56  ;;  %v1256_v55 = vld [vmem:[#allocation5 + $0x2400] sm:$0xff] }
 0x146   :  { %v1264_v56 = vld [vmem:[#allocation5 + $0x2440] sm:$0xff] }
 0x147   :  { %8012 = vmatpush1.bf16.msra.mxu0 %v11838_v1  ;;  %8217 = vmatpush1.bf16.msra.mxu1 %v11840_v2  ;;  %v13080_v1 = vpack.c.bf16 %v93_v58, %v93_v58  ;;  %v1161_v2 = vld [vmem:[#allocation5 + $0x2108] sm:$0xff] }
 0x148   :  { %8013 = vmatprep.subr.bf16.mxu0 %v11855_v3  ;;  %8218 = vmatprep.subr.bf16.mxu1 %v11857_v4  ;;  %v1169_v3 = vld [vmem:[#allocation5 + $0x2148] sm:$0xff]  ;;  %v11950_v4 = vcombine.low %v1144_v52, %v1152_v53 }
 0x149   :  { %v11969_v7 = vcombine.high %v1161_v2, %v1169_v3  ;;  %v11968_v14 = vcombine.low %v1161_v2, %v1169_v3  ;;  %v1257_v58 = vld [vmem:[#allocation5 + $0x2408] sm:$0xff]  ;;  %v1280_v2 = vld [vmem:[#allocation5 + $0x24c0] sm:$0xff] }
 0x14a   :  { %v1273_v3 = vld [vmem:[#allocation5 + $0x2488] sm:$0xff] }
 0x14b   :  { %8014 = vmatpush1.bf16.msra.mxu0 %v11854_v9  ;;  %8219 = vmatpush1.bf16.msra.mxu1 %v11856_v10  ;;  %v1184_v9 = vld [vmem:[#allocation5 + $0x21c0] sm:$0xff]  ;;  %v1177_v10 = vld [vmem:[#allocation5 + $0x2188] sm:$0xff] }
 0x14c   :  { %8015 = vmatprep.subr.bf16.mxu0 %v11871_v11  ;;  %8220 = vmatprep.subr.bf16.mxu1 %v11873_v13  ;;  %v1185_v11 = vld [vmem:[#allocation5 + $0x21c8] sm:$0xff]  ;;  %v11966_v13 = vcombine.low %v1160_v63, %v1168_v0  ;;  %v11983_v15 = vcombine.high %v1176_v8, %v1184_v9  ;;  %v1272_v0 = vld [vmem:[#allocation5 + $0x2480] sm:$0xff] }
 0x14d   :  { %v11985_v16 = vcombine.high %v1177_v10, %v1185_v11  ;;  %v11984_v22 = vcombine.low %v1177_v10, %v1185_v11  ;;  %v1296_v10 = vld [vmem:[#allocation5 + $0x2540] sm:$0xff]  ;;  %v1289_v11 = vld [vmem:[#allocation5 + $0x2508] sm:$0xff] }
 0x14f   :  { %8016 = vmatpush1.bf16.msra.mxu0 %v11870_v18  ;;  %8221 = vmatpush1.bf16.msra.mxu1 %v11872_v19  ;;  %v1200_v18 = vld [vmem:[#allocation5 + $0x2240] sm:$0xff]  ;;  %v1193_v19 = vld [vmem:[#allocation5 + $0x2208] sm:$0xff] }
 0x150   :  { %8017 = vmatprep.subr.bf16.mxu0 %v11887_v20  ;;  %8222 = vmatprep.subr.bf16.mxu1 %v11889_v21  ;;  %v1201_v20 = vld [vmem:[#allocation5 + $0x2248] sm:$0xff]  ;;  %v11982_v21 = vcombine.low %v1176_v8, %v1184_v9  ;;  %v11999_v24 = vcombine.high %v1192_v17, %v1200_v18  ;;  %v1288_v9 = vld [vmem:[#allocation5 + $0x2500] sm:$0xff] }
 0x151   :  { %v12001_v26 = vcombine.high %v1193_v19, %v1201_v20  ;;  %v12000_v32 = vcombine.low %v1193_v19, %v1201_v20  ;;  %v1312_v19 = vld [vmem:[#allocation5 + $0x25c0] sm:$0xff]  ;;  %v1305_v20 = vld [vmem:[#allocation5 + $0x2588] sm:$0xff] }
 0x153   :  { %8018 = vmatpush1.bf16.msra.mxu0 %v11886_v28  ;;  %8223 = vmatpush1.bf16.msra.mxu1 %v11888_v29  ;;  %v1216_v28 = vld [vmem:[#allocation5 + $0x22c0] sm:$0xff]  ;;  %v1209_v29 = vld [vmem:[#allocation5 + $0x2288] sm:$0xff] }
 0x154   :  { %8019 = vmatprep.subr.bf16.mxu0 %v11903_v30  ;;  %8224 = vmatprep.subr.bf16.mxu1 %v11905_v31  ;;  %v1217_v30 = vld [vmem:[#allocation5 + $0x22c8] sm:$0xff]  ;;  %v11998_v31 = vcombine.low %v1192_v17, %v1200_v18  ;;  %v12015_v33 = vcombine.high %v1208_v27, %v1216_v28  ;;  %v1304_v18 = vld [vmem:[#allocation5 + $0x2580] sm:$0xff] }
 0x155   :  { %v12017_v35 = vcombine.high %v1209_v29, %v1217_v30  ;;  %v12016_v42 = vcombine.low %v1209_v29, %v1217_v30  ;;  %v1328_v29 = vld [vmem:[#allocation5 + $0x2640] sm:$0xff]  ;;  %v1321_v30 = vld [vmem:[#allocation5 + $0x2608] sm:$0xff] }
 0x157   :  { %8020 = vmatpush1.bf16.msra.mxu0 %v11902_v37  ;;  %8225 = vmatpush1.bf16.msra.mxu1 %v11904_v38  ;;  %v1232_v37 = vld [vmem:[#allocation5 + $0x2340] sm:$0xff]  ;;  %v1225_v38 = vld [vmem:[#allocation5 + $0x2308] sm:$0xff] }
 0x158   :  { %8021 = vmatprep.subr.bf16.mxu0 %v11919_v40  ;;  %8226 = vmatprep.subr.bf16.mxu1 %v11921_v41  ;;  %v1233_v40 = vld [vmem:[#allocation5 + $0x2348] sm:$0xff]  ;;  %v12014_v41 = vcombine.low %v1208_v27, %v1216_v28  ;;  %v12031_v43 = vcombine.high %v1224_v36, %v1232_v37  ;;  %v1320_v28 = vld [vmem:[#allocation5 + $0x2600] sm:$0xff] }
 0x159   :  { %v12033_v44 = vcombine.high %v1225_v38, %v1233_v40 }
 0x15b   :  { %8022 = vmatpush1.bf16.msra.mxu0 %v11918_v46  ;;  %8227 = vmatpush1.bf16.msra.mxu1 %v11920_v49  ;;  %v1248_v46 = vld [vmem:[#allocation5 + $0x23c0] sm:$0xff]  ;;  %v1249_v49 = vld [vmem:[#allocation5 + $0x23c8] sm:$0xff] }
 0x15c   :  { %8032 = vmatprep.subr.bf16.mxu0 %v11935_v50  ;;  %8237 = vmatprep.subr.bf16.mxu1 %v11937_v51  ;;  %v12030_v50 = vcombine.low %v1224_v36, %v1232_v37  ;;  %v12032_v51 = vcombine.low %v1225_v38, %v1233_v40  ;;  %v12047_v52 = vcombine.high %v1240_v45, %v1248_v46  ;;  %v1336_v37 = vld [vmem:[#allocation5 + $0x2680] sm:$0xff]  ;;  %v1337_v40 = vld [vmem:[#allocation5 + $0x2688] sm:$0xff] }
 0x15d   :  { %v12049_v53 = vcombine.high %v1241_v47, %v1249_v49  ;;  %v1344_v38 = vld [vmem:[#allocation5 + $0x26c0] sm:$0xff] }
 0x15e   :  { %8024 = vmatmul.mubr.bf16.vlgmr.msra.gmra.mrb[0].mxu0 %v13078_v54  ;;  %8229 = vmatmul.mubr.bf16.vlgmr.msra.gmra.mrb[0].mxu1 %v13078_v54 }
 0x15f   :  { %8033 = vmatpush1.bf16.msra.mxu0 %v11934_v59  ;;  %8238 = vmatpush1.bf16.msra.mxu1 %v11936_v60  ;;  %v1265_v59 = vld [vmem:[#allocation5 + $0x2448] sm:$0xff]  ;;  %v12046_v60 = vcombine.low %v1240_v45, %v1248_v46  ;;  %v1352_v46 = vld [vmem:[#allocation5 + $0x2700] sm:$0xff] }
 0x160   :  { %8034 = vmatprep.subr.bf16.mxu0 %v11951_v61  ;;  %8239 = vmatprep.subr.bf16.mxu1 %v11953_v62  ;;  %v12048_v61 = vcombine.low %v1241_v47, %v1249_v49  ;;  %v12063_v62 = vcombine.high %v1256_v55, %v1264_v56  ;;  %v12065_v63 = vcombine.high %v1257_v58, %v1265_v59  ;;  %v1360_v47 = vld [vmem:[#allocation5 + $0x2740] sm:$0xff]  ;;  %v1353_v49 = vld [vmem:[#allocation5 + $0x2708] sm:$0xff] }
 0x161   :  { %8064 = vmatprep.mubr.bf16.mxu0 %v13080_v1  ;;  %8269 = vmatprep.mubr.bf16.mxu1 %v13080_v1 }
 0x163   :  { %8035 = vmatpush1.bf16.msra.mxu0 %v11950_v4  ;;  %8240 = vmatpush1.bf16.msra.mxu1 %v11952_v5  ;;  %v1281_v4 = vld [vmem:[#allocation5 + $0x24c8] sm:$0xff]  ;;  %v12062_v5 = vcombine.low %v1256_v55, %v1264_v56  ;;  %v1368_v56 = vld [vmem:[#allocation5 + $0x2780] sm:$0xff] }
 0x164   :  { %8036 = vmatprep.subr.bf16.mxu0 %v11967_v6  ;;  %8241 = vmatprep.subr.bf16.mxu1 %v11969_v7  ;;  %v12064_v6 = vcombine.low %v1257_v58, %v1265_v59  ;;  %v12079_v7 = vcombine.high %v1272_v0, %v1280_v2  ;;  %v12081_v8 = vcombine.high %v1273_v3, %v1281_v4  ;;  %v1376_v58 = vld [vmem:[#allocation5 + $0x27c0] sm:$0xff]  ;;  %v1369_v59 = vld [vmem:[#allocation5 + $0x2788] sm:$0xff] }
 0x167   :  { %8037 = vmatpush1.bf16.msra.mxu0 %v11966_v13  ;;  %8242 = vmatpush1.bf16.msra.mxu1 %v11968_v14  ;;  %v1297_v13 = vld [vmem:[#allocation5 + $0x2548] sm:$0xff]  ;;  %v12078_v14 = vcombine.low %v1272_v0, %v1280_v2  ;;  %v106_v2 = vld [vmem:[#allocation5 + $0x10] sm:$0xff] }
 0x168   :  { %8038 = vmatprep.subr.bf16.mxu0 %v11983_v15  ;;  %8243 = vmatprep.subr.bf16.mxu1 %v11985_v16  ;;  %v12080_v15 = vcombine.low %v1273_v3, %v1281_v4  ;;  %v12095_v16 = vcombine.high %v1288_v9, %v1296_v10  ;;  %v12097_v17 = vcombine.high %v1289_v11, %v1297_v13  ;;  %v114_v3 = vld [vmem:[#allocation5 + $0x50] sm:$0xff]  ;;  %v107_v4 = vld [vmem:[#allocation5 + $0x18] sm:$0xff] }
 0x16b   :  { %8039 = vmatpush1.bf16.msra.mxu0 %v11982_v21  ;;  %8244 = vmatpush1.bf16.msra.mxu1 %v11984_v22  ;;  %v1313_v21 = vld [vmem:[#allocation5 + $0x25c8] sm:$0xff]  ;;  %v12094_v22 = vcombine.low %v1288_v9, %v1296_v10  ;;  %v10915_v9 = vcombine.high %v106_v2, %v114_v3 }
 0x16c   :  { %8040 = vmatprep.subr.bf16.mxu0 %v11999_v24  ;;  %8245 = vmatprep.subr.bf16.mxu1 %v12001_v26  ;;  %v12096_v24 = vcombine.low %v1289_v11, %v1297_v13  ;;  %v12111_v26 = vcombine.high %v1304_v18, %v1312_v19  ;;  %v12113_v27 = vcombine.high %v1305_v20, %v1313_v21  ;;  %v122_v11 = vld [vmem:[#allocation5 + $0x90] sm:$0xff] }
 0x16d   :  { %v130_v13 = vld [vmem:[#allocation5 + $0xd0] sm:$0xff] }
 0x16f   :  { %8041 = vmatpush1.bf16.msra.mxu0 %v11998_v31  ;;  %8246 = vmatpush1.bf16.msra.mxu1 %v12000_v32  ;;  %v1329_v31 = vld [vmem:[#allocation5 + $0x2648] sm:$0xff]  ;;  %v12110_v32 = vcombine.low %v1304_v18, %v1312_v19  ;;  %v10931_v19 = vcombine.high %v122_v11, %v130_v13 }
 0x170   :  { %8042 = vmatprep.subr.bf16.mxu0 %v12015_v33  ;;  %8247 = vmatprep.subr.bf16.mxu1 %v12017_v35  ;;  %v12112_v33 = vcombine.low %v1305_v20, %v1313_v21  ;;  %v12127_v35 = vcombine.high %v1320_v28, %v1328_v29  ;;  %v12129_v36 = vcombine.high %v1321_v30, %v1329_v31  ;;  %v138_v21 = vld [vmem:[#allocation5 + $0x110] sm:$0xff] }
 0x173   :  { %8043 = vmatpush1.bf16.msra.mxu0 %v12014_v41  ;;  %8248 = vmatpush1.bf16.msra.mxu1 %v12016_v42  ;;  %v1345_v41 = vld [vmem:[#allocation5 + $0x26c8] sm:$0xff]  ;;  %v12126_v42 = vcombine.low %v1320_v28, %v1328_v29 }
 0x174   :  { %8044 = vmatprep.subr.bf16.mxu0 %v12031_v43  ;;  %8249 = vmatprep.subr.bf16.mxu1 %v12033_v44  ;;  %v12128_v43 = vcombine.low %v1321_v30, %v1329_v31  ;;  %v12143_v44 = vcombine.high %v1336_v37, %v1344_v38  ;;  %v12145_v45 = vcombine.high %v1337_v40, %v1345_v41  ;;  %v154_v31 = vld [vmem:[#allocation5 + $0x190] sm:$0xff] }
 0x177   :  { %8045 = vmatpush1.bf16.msra.mxu0 %v12030_v50  ;;  %8250 = vmatpush1.bf16.msra.mxu1 %v12032_v51  ;;  %v1361_v50 = vld [vmem:[#allocation5 + $0x2748] sm:$0xff]  ;;  %v12142_v51 = vcombine.low %v1336_v37, %v1344_v38 }
 0x178   :  { %8046 = vmatprep.subr.bf16.mxu0 %v12047_v52  ;;  %8251 = vmatprep.subr.bf16.mxu1 %v12049_v53  ;;  %v12144_v52 = vcombine.low %v1337_v40, %v1345_v41  ;;  %v12159_v53 = vcombine.high %v1352_v46, %v1360_v47  ;;  %v12161_v55 = vcombine.high %v1353_v49, %v1361_v50  ;;  %v170_v41 = vld [vmem:[#allocation5 + $0x210] sm:$0xff] }
 0x17b   :  { %8047 = vmatpush1.bf16.msra.mxu0 %v12046_v60  ;;  %8252 = vmatpush1.bf16.msra.mxu1 %v12048_v61  ;;  %v1377_v60 = vld [vmem:[#allocation5 + $0x27c8] sm:$0xff]  ;;  %v12158_v61 = vcombine.low %v1352_v46, %v1360_v47 }
 0x17c   :  { %8048 = vmatprep.subr.bf16.mxu0 %v12063_v62  ;;  %8253 = vmatprep.subr.bf16.mxu1 %v12065_v63  ;;  %v12160_v62 = vcombine.low %v1353_v49, %v1361_v50  ;;  %v12175_v63 = vcombine.high %v1368_v56, %v1376_v58  ;;  %v12177_v0 = vcombine.high %v1369_v59, %v1377_v60  ;;  %v186_v50 = vld [vmem:[#allocation5 + $0x290] sm:$0xff] }
 0x17f   :  { %8049 = vmatpush1.bf16.msra.mxu0 %v12062_v5  ;;  %8254 = vmatpush1.bf16.msra.mxu1 %v12064_v6  ;;  %v115_v5 = vld [vmem:[#allocation5 + $0x58] sm:$0xff]  ;;  %v12174_v6 = vcombine.low %v1368_v56, %v1376_v58 }
 0x180   :  { %8050 = vmatprep.subr.bf16.mxu0 %v12079_v7  ;;  %8255 = vmatprep.subr.bf16.mxu1 %v12081_v8  ;;  %v92_v7 = vld [vmem:[#allocation2 + $0x40] sm:$0xff]  ;;  %v12176_v8 = vcombine.low %v1369_v59, %v1377_v60  ;;  %v10917_v10 = vcombine.high %v107_v4, %v115_v5  ;;  %v10916_v18 = vcombine.low %v107_v4, %v115_v5 }
 0x181   :  { %v202_v60 = vld [vmem:[#allocation5 + $0x310] sm:$0xff] }
 0x182   :  { %v218_v5 = vld [vmem:[#allocation5 + $0x390] sm:$0xff] }
 0x183   :  { %8051 = vmatpush1.bf16.msra.mxu0 %v12078_v14  ;;  %8256 = vmatpush1.bf16.msra.mxu1 %v12080_v15  ;;  %v13086_v14 = vpack.c.bf16 %v92_v7, %v92_v7  ;;  %v123_v15 = vld [vmem:[#allocation5 + $0x98] sm:$0xff] }
 0x184   :  { %8052 = vmatprep.subr.bf16.mxu0 %v12095_v16  ;;  %8257 = vmatprep.subr.bf16.mxu1 %v12097_v17  ;;  %v131_v16 = vld [vmem:[#allocation5 + $0xd8] sm:$0xff]  ;;  %v10914_v17 = vcombine.low %v106_v2, %v114_v3 }
 0x185   :  { %v10933_v20 = vcombine.high %v123_v15, %v131_v16  ;;  %v10932_v28 = vcombine.low %v123_v15, %v131_v16  ;;  %v219_v7 = vld [vmem:[#allocation5 + $0x398] sm:$0xff]  ;;  %v234_v15 = vld [vmem:[#allocation5 + $0x410] sm:$0xff] }
 0x186   :  { %v242_v16 = vld [vmem:[#allocation5 + $0x450] sm:$0xff] }
 0x187   :  { %8053 = vmatpush1.bf16.msra.mxu0 %v12094_v22  ;;  %8258 = vmatpush1.bf16.msra.mxu1 %v12096_v24  ;;  %v146_v22 = vld [vmem:[#allocation5 + $0x150] sm:$0xff]  ;;  %v139_v24 = vld [vmem:[#allocation5 + $0x118] sm:$0xff] }
 0x188   :  { %8054 = vmatprep.subr.bf16.mxu0 %v12111_v26  ;;  %8259 = vmatprep.subr.bf16.mxu1 %v12113_v27  ;;  %v147_v26 = vld [vmem:[#allocation5 + $0x158] sm:$0xff]  ;;  %v10930_v27 = vcombine.low %v122_v11, %v130_v13  ;;  %v10947_v29 = vcombine.high %v138_v21, %v146_v22 }
 0x189   :  { %v10949_v30 = vcombine.high %v139_v24, %v147_v26  ;;  %v10948_v37 = vcombine.low %v139_v24, %v147_v26  ;;  %v250_v24 = vld [vmem:[#allocation5 + $0x490] sm:$0xff] }
 0x18a   :  { %v258_v26 = vld [vmem:[#allocation5 + $0x4d0] sm:$0xff] }
 0x18b   :  { %8055 = vmatpush1.bf16.msra.mxu0 %v12110_v32  ;;  %8260 = vmatpush1.bf16.msra.mxu1 %v12112_v33  ;;  %v162_v32 = vld [vmem:[#allocation5 + $0x1d0] sm:$0xff]  ;;  %v155_v33 = vld [vmem:[#allocation5 + $0x198] sm:$0xff] }
 0x18c   :  { %8056 = vmatprep.subr.bf16.mxu0 %v12127_v35  ;;  %8261 = vmatprep.subr.bf16.mxu1 %v12129_v36  ;;  %v163_v35 = vld [vmem:[#allocation5 + $0x1d8] sm:$0xff]  ;;  %v10946_v36 = vcombine.low %v138_v21, %v146_v22  ;;  %v10963_v38 = vcombine.high %v154_v31, %v162_v32  ;;  %v11043_v21 = vcombine.high %v234_v15, %v242_v16 }
 0x18d   :  { %v10965_v40 = vcombine.high %v155_v33, %v163_v35  ;;  %v10964_v46 = vcombine.low %v155_v33, %v163_v35  ;;  %v266_v33 = vld [vmem:[#allocation5 + $0x510] sm:$0xff] }
 0x18e   :  { %v274_v35 = vld [vmem:[#allocation5 + $0x550] sm:$0xff] }
 0x18f   :  { %8057 = vmatpush1.bf16.msra.mxu0 %v12126_v42  ;;  %8262 = vmatpush1.bf16.msra.mxu1 %v12128_v43  ;;  %v178_v42 = vld [vmem:[#allocation5 + $0x250] sm:$0xff]  ;;  %v171_v43 = vld [vmem:[#allocation5 + $0x218] sm:$0xff] }
 0x190   :  { %8058 = vmatprep.subr.bf16.mxu0 %v12143_v44  ;;  %8263 = vmatprep.subr.bf16.mxu1 %v12145_v45  ;;  %v179_v44 = vld [vmem:[#allocation5 + $0x258] sm:$0xff]  ;;  %v10962_v45 = vcombine.low %v154_v31, %v162_v32  ;;  %v10979_v47 = vcombine.high %v170_v41, %v178_v42  ;;  %v11059_v31 = vcombine.high %v250_v24, %v258_v26 }
 0x191   :  { %v10981_v49 = vcombine.high %v171_v43, %v179_v44  ;;  %v10980_v56 = vcombine.low %v171_v43, %v179_v44  ;;  %v282_v43 = vld [vmem:[#allocation5 + $0x590] sm:$0xff] }
 0x192   :  { %v290_v44 = vld [vmem:[#allocation5 + $0x5d0] sm:$0xff] }
 0x193   :  { %8059 = vmatpush1.bf16.msra.mxu0 %v12142_v51  ;;  %8264 = vmatpush1.bf16.msra.mxu1 %v12144_v52  ;;  %v194_v51 = vld [vmem:[#allocation5 + $0x2d0] sm:$0xff]  ;;  %v187_v52 = vld [vmem:[#allocation5 + $0x298] sm:$0xff] }
 0x194   :  { %8060 = vmatprep.subr.bf16.mxu0 %v12159_v53  ;;  %8265 = vmatprep.subr.bf16.mxu1 %v12161_v55  ;;  %v195_v53 = vld [vmem:[#allocation5 + $0x2d8] sm:$0xff]  ;;  %v10978_v55 = vcombine.low %v170_v41, %v178_v42  ;;  %v10995_v58 = vcombine.high %v186_v50, %v194_v51  ;;  %v11075_v41 = vcombine.high %v266_v33, %v274_v35 }
 0x195   :  { %v10997_v59 = vcombine.high %v187_v52, %v195_v53  ;;  %v10996_v2 = vcombine.low %v187_v52, %v195_v53  ;;  %v298_v52 = vld [vmem:[#allocation5 + $0x610] sm:$0xff] }
 0x196   :  { %v306_v53 = vld [vmem:[#allocation5 + $0x650] sm:$0xff] }
 0x197   :  { %8061 = vmatpush1.bf16.msra.mxu0 %v12158_v61  ;;  %8266 = vmatpush1.bf16.msra.mxu1 %v12160_v62  ;;  %v210_v61 = vld [vmem:[#allocation5 + $0x350] sm:$0xff]  ;;  %v203_v62 = vld [vmem:[#allocation5 + $0x318] sm:$0xff] }
 0x198   :  { %8062 = vmatprep.subr.bf16.mxu0 %v12175_v63  ;;  %8267 = vmatprep.subr.bf16.mxu1 %v12177_v0  ;;  %v211_v63 = vld [vmem:[#allocation5 + $0x358] sm:$0xff]  ;;  %v10994_v0 = vcombine.low %v186_v50, %v194_v51  ;;  %v11011_v3 = vcombine.high %v202_v60, %v210_v61  ;;  %v11091_v50 = vcombine.high %v282_v43, %v290_v44 }
 0x199   :  { %v11013_v4 = vcombine.high %v203_v62, %v211_v63 }
 0x19b   :  { %8063 = vmatpush1.bf16.msra.mxu0 %v12174_v6  ;;  %8268 = vmatpush1.bf16.msra.mxu1 %v12176_v8  ;;  %v226_v6 = vld [vmem:[#allocation5 + $0x3d0] sm:$0xff]  ;;  %v227_v8 = vld [vmem:[#allocation5 + $0x3d8] sm:$0xff] }
 0x19c   :  { %8278 = vmatprep.subr.bf16.mxu0 %v10915_v9  ;;  %8483 = vmatprep.subr.bf16.mxu1 %v10917_v10  ;;  %v11010_v9 = vcombine.low %v202_v60, %v210_v61  ;;  %v11012_v10 = vcombine.low %v203_v62, %v211_v63  ;;  %v11027_v11 = vcombine.high %v218_v5, %v226_v6  ;;  %v314_v62 = vld [vmem:[#allocation5 + $0x690] sm:$0xff] }
 0x19d   :  { %v11029_v13 = vcombine.high %v219_v7, %v227_v8  ;;  %v11107_v60 = vcombine.high %v298_v52, %v306_v53  ;;  %v322_v63 = vld [vmem:[#allocation5 + $0x6d0] sm:$0xff] }
 0x19e   :  { %8065 = vmatmul.mubr.bf16.vlgmr.msra.gmra.mrb[0].mxu0 %v13086_v14  ;;  %8270 = vmatmul.mubr.bf16.vlgmr.msra.gmra.mrb[0].mxu1 %v13086_v14 }
 0x19f   :  { %8279 = vmatpush1.bf16.msra.mxu0 %v10914_v17  ;;  %8484 = vmatpush1.bf16.msra.mxu1 %v10916_v18  ;;  %v235_v17 = vld [vmem:[#allocation5 + $0x418] sm:$0xff] }
 0x1a0   :  { %8280 = vmatprep.subr.bf16.mxu0 %v10931_v19  ;;  %8485 = vmatprep.subr.bf16.mxu1 %v10933_v20  ;;  %v243_v18 = vld [vmem:[#allocation5 + $0x458] sm:$0xff]  ;;  %v11026_v19 = vcombine.low %v218_v5, %v226_v6  ;;  %v11028_v20 = vcombine.low %v219_v7, %v227_v8  ;;  %v11123_v5 = vcombine.high %v314_v62, %v322_v63  ;;  %v330_v7 = vld [vmem:[#allocation5 + $0x710] sm:$0xff] }
 0x1a1   :  { %8310 = vmatprep.mubr.bf16.mxu0 %v13050_v57  ;;  %8515 = vmatprep.mubr.bf16.mxu1 %v13050_v57  ;;  %v11045_v22 = vcombine.high %v235_v17, %v243_v18  ;;  %v338_v8 = vld [vmem:[#allocation5 + $0x750] sm:$0xff] }
 0x1a3   :  { %8281 = vmatpush1.bf16.msra.mxu0 %v10930_v27  ;;  %8486 = vmatpush1.bf16.msra.mxu1 %v10932_v28  ;;  %v251_v27 = vld [vmem:[#allocation5 + $0x498] sm:$0xff] }
 0x1a4   :  { %8282 = vmatprep.subr.bf16.mxu0 %v10947_v29  ;;  %8487 = vmatprep.subr.bf16.mxu1 %v10949_v30  ;;  %v259_v28 = vld [vmem:[#allocation5 + $0x4d8] sm:$0xff]  ;;  %v11042_v29 = vcombine.low %v234_v15, %v242_v16  ;;  %v11044_v30 = vcombine.low %v235_v17, %v243_v18  ;;  %v11139_v15 = vcombine.high %v330_v7, %v338_v8  ;;  %v346_v17 = vld [vmem:[#allocation5 + $0x790] sm:$0xff] }
 0x1a5   :  { %v11061_v32 = vcombine.high %v251_v27, %v259_v28  ;;  %v354_v18 = vld [vmem:[#allocation5 + $0x7d0] sm:$0xff] }
 0x1a7   :  { %8283 = vmatpush1.bf16.msra.mxu0 %v10946_v36  ;;  %8488 = vmatpush1.bf16.msra.mxu1 %v10948_v37  ;;  %v267_v36 = vld [vmem:[#allocation5 + $0x518] sm:$0xff] }
 0x1a8   :  { %8284 = vmatprep.subr.bf16.mxu0 %v10963_v38  ;;  %8489 = vmatprep.subr.bf16.mxu1 %v10965_v40  ;;  %v275_v37 = vld [vmem:[#allocation5 + $0x558] sm:$0xff]  ;;  %v11058_v38 = vcombine.low %v250_v24, %v258_v26  ;;  %v11060_v40 = vcombine.low %v251_v27, %v259_v28  ;;  %v11155_v24 = vcombine.high %v346_v17, %v354_v18  ;;  %v362_v27 = vld [vmem:[#allocation5 + $0x810] sm:$0xff] }
 0x1a9   :  { %v11077_v42 = vcombine.high %v267_v36, %v275_v37  ;;  %v370_v28 = vld [vmem:[#allocation5 + $0x850] sm:$0xff] }
 0x1ab   :  { %8285 = vmatpush1.bf16.msra.mxu0 %v10962_v45  ;;  %8490 = vmatpush1.bf16.msra.mxu1 %v10964_v46  ;;  %v283_v45 = vld [vmem:[#allocation5 + $0x598] sm:$0xff] }
 0x1ac   :  { %8286 = vmatprep.subr.bf16.mxu0 %v10979_v47  ;;  %8491 = vmatprep.subr.bf16.mxu1 %v10981_v49  ;;  %v291_v46 = vld [vmem:[#allocation5 + $0x5d8] sm:$0xff]  ;;  %v11074_v47 = vcombine.low %v266_v33, %v274_v35  ;;  %v11076_v49 = vcombine.low %v267_v36, %v275_v37  ;;  %v11171_v33 = vcombine.high %v362_v27, %v370_v28  ;;  %v378_v36 = vld [vmem:[#allocation5 + $0x890] sm:$0xff] }
 0x1ad   :  { %v11093_v51 = vcombine.high %v283_v45, %v291_v46  ;;  %v386_v37 = vld [vmem:[#allocation5 + $0x8d0] sm:$0xff] }
 0x1af   :  { %8287 = vmatpush1.bf16.msra.mxu0 %v10978_v55  ;;  %8492 = vmatpush1.bf16.msra.mxu1 %v10980_v56  ;;  %v299_v55 = vld [vmem:[#allocation5 + $0x618] sm:$0xff] }
 0x1b0   :  { %8288 = vmatprep.subr.bf16.mxu0 %v10995_v58  ;;  %8493 = vmatprep.subr.bf16.mxu1 %v10997_v59  ;;  %v307_v56 = vld [vmem:[#allocation5 + $0x658] sm:$0xff]  ;;  %v11090_v58 = vcombine.low %v282_v43, %v290_v44  ;;  %v11092_v59 = vcombine.low %v283_v45, %v291_v46  ;;  %v11187_v43 = vcombine.high %v378_v36, %v386_v37  ;;  %v394_v45 = vld [vmem:[#allocation5 + $0x910] sm:$0xff] }
 0x1b1   :  { %v11109_v61 = vcombine.high %v299_v55, %v307_v56  ;;  %v402_v46 = vld [vmem:[#allocation5 + $0x950] sm:$0xff] }
 0x1b3   :  { %8289 = vmatpush1.bf16.msra.mxu0 %v10994_v0  ;;  %8494 = vmatpush1.bf16.msra.mxu1 %v10996_v2  ;;  %v315_v0 = vld [vmem:[#allocation5 + $0x698] sm:$0xff] }
 0x1b4   :  { %8290 = vmatprep.subr.bf16.mxu0 %v11011_v3  ;;  %8495 = vmatprep.subr.bf16.mxu1 %v11013_v4  ;;  %v323_v2 = vld [vmem:[#allocation5 + $0x6d8] sm:$0xff]  ;;  %v11106_v3 = vcombine.low %v298_v52, %v306_v53  ;;  %v11108_v4 = vcombine.low %v299_v55, %v307_v56  ;;  %v11203_v52 = vcombine.high %v394_v45, %v402_v46  ;;  %v410_v55 = vld [vmem:[#allocation5 + $0x990] sm:$0xff] }
 0x1b5   :  { %v11125_v6 = vcombine.high %v315_v0, %v323_v2  ;;  %v418_v56 = vld [vmem:[#allocation5 + $0x9d0] sm:$0xff] }
 0x1b7   :  { %8291 = vmatpush1.bf16.msra.mxu0 %v11010_v9  ;;  %8496 = vmatpush1.bf16.msra.mxu1 %v11012_v10  ;;  %v331_v9 = vld [vmem:[#allocation5 + $0x718] sm:$0xff] }
 0x1b8   :  { %8292 = vmatprep.subr.bf16.mxu0 %v11027_v11  ;;  %8497 = vmatprep.subr.bf16.mxu1 %v11029_v13  ;;  %v339_v10 = vld [vmem:[#allocation5 + $0x758] sm:$0xff]  ;;  %v11122_v11 = vcombine.low %v314_v62, %v322_v63  ;;  %v11124_v13 = vcombine.low %v315_v0, %v323_v2  ;;  %v11219_v62 = vcombine.high %v410_v55, %v418_v56  ;;  %v426_v0 = vld [vmem:[#allocation5 + $0xa10] sm:$0xff] }
 0x1b9   :  { %v11141_v16 = vcombine.high %v331_v9, %v339_v10  ;;  %v434_v2 = vld [vmem:[#allocation5 + $0xa50] sm:$0xff] }
 0x1bb   :  { %8293 = vmatpush1.bf16.msra.mxu0 %v11026_v19  ;;  %8498 = vmatpush1.bf16.msra.mxu1 %v11028_v20  ;;  %v347_v19 = vld [vmem:[#allocation5 + $0x798] sm:$0xff] }
 0x1bc   :  { %8294 = vmatprep.subr.bf16.mxu0 %v11043_v21  ;;  %8499 = vmatprep.subr.bf16.mxu1 %v11045_v22  ;;  %v355_v20 = vld [vmem:[#allocation5 + $0x7d8] sm:$0xff]  ;;  %v11138_v21 = vcombine.low %v330_v7, %v338_v8  ;;  %v11140_v22 = vcombine.low %v331_v9, %v339_v10  ;;  %v11235_v7 = vcombine.high %v426_v0, %v434_v2  ;;  %v442_v9 = vld [vmem:[#allocation5 + $0xa90] sm:$0xff] }
 0x1bd   :  { %v11157_v26 = vcombine.high %v347_v19, %v355_v20  ;;  %v450_v10 = vld [vmem:[#allocation5 + $0xad0] sm:$0xff] }
 0x1bf   :  { %8295 = vmatpush1.bf16.msra.mxu0 %v11042_v29  ;;  %8500 = vmatpush1.bf16.msra.mxu1 %v11044_v30  ;;  %v363_v29 = vld [vmem:[#allocation5 + $0x818] sm:$0xff] }
 0x1c0   :  { %8296 = vmatprep.subr.bf16.mxu0 %v11059_v31  ;;  %8501 = vmatprep.subr.bf16.mxu1 %v11061_v32  ;;  %v371_v30 = vld [vmem:[#allocation5 + $0x858] sm:$0xff]  ;;  %v11154_v31 = vcombine.low %v346_v17, %v354_v18  ;;  %v11156_v32 = vcombine.low %v347_v19, %v355_v20  ;;  %v11251_v17 = vcombine.high %v442_v9, %v450_v10  ;;  %v458_v19 = vld [vmem:[#allocation5 + $0xb10] sm:$0xff] }
 0x1c1   :  { %v11173_v35 = vcombine.high %v363_v29, %v371_v30  ;;  %v466_v20 = vld [vmem:[#allocation5 + $0xb50] sm:$0xff] }
 0x1c3   :  { %8297 = vmatpush1.bf16.msra.mxu0 %v11058_v38  ;;  %8502 = vmatpush1.bf16.msra.mxu1 %v11060_v40  ;;  %v379_v38 = vld [vmem:[#allocation5 + $0x898] sm:$0xff] }
 0x1c4   :  { %8298 = vmatprep.subr.bf16.mxu0 %v11075_v41  ;;  %8503 = vmatprep.subr.bf16.mxu1 %v11077_v42  ;;  %v387_v40 = vld [vmem:[#allocation5 + $0x8d8] sm:$0xff]  ;;  %v11170_v41 = vcombine.low %v362_v27, %v370_v28  ;;  %v11172_v42 = vcombine.low %v363_v29, %v371_v30  ;;  %v11267_v27 = vcombine.high %v458_v19, %v466_v20  ;;  %v474_v29 = vld [vmem:[#allocation5 + $0xb90] sm:$0xff] }
 0x1c5   :  { %v11189_v44 = vcombine.high %v379_v38, %v387_v40  ;;  %v482_v30 = vld [vmem:[#allocation5 + $0xbd0] sm:$0xff] }
 0x1c7   :  { %8299 = vmatpush1.bf16.msra.mxu0 %v11074_v47  ;;  %8504 = vmatpush1.bf16.msra.mxu1 %v11076_v49  ;;  %v395_v47 = vld [vmem:[#allocation5 + $0x918] sm:$0xff] }
 0x1c8   :  { %8300 = vmatprep.subr.bf16.mxu0 %v11091_v50  ;;  %8505 = vmatprep.subr.bf16.mxu1 %v11093_v51  ;;  %v403_v49 = vld [vmem:[#allocation5 + $0x958] sm:$0xff]  ;;  %v11186_v50 = vcombine.low %v378_v36, %v386_v37  ;;  %v11188_v51 = vcombine.low %v379_v38, %v387_v40  ;;  %v11283_v36 = vcombine.high %v474_v29, %v482_v30  ;;  %v490_v38 = vld [vmem:[#allocation5 + $0xc10] sm:$0xff] }
 0x1c9   :  { %v11205_v53 = vcombine.high %v395_v47, %v403_v49  ;;  %v498_v40 = vld [vmem:[#allocation5 + $0xc50] sm:$0xff] }
 0x1cb   :  { %8301 = vmatpush1.bf16.msra.mxu0 %v11090_v58  ;;  %8506 = vmatpush1.bf16.msra.mxu1 %v11092_v59  ;;  %v411_v58 = vld [vmem:[#allocation5 + $0x998] sm:$0xff] }
 0x1cc   :  { %8302 = vmatprep.subr.bf16.mxu0 %v11107_v60  ;;  %8507 = vmatprep.subr.bf16.mxu1 %v11109_v61  ;;  %v419_v59 = vld [vmem:[#allocation5 + $0x9d8] sm:$0xff]  ;;  %v11202_v60 = vcombine.low %v394_v45, %v402_v46  ;;  %v11204_v61 = vcombine.low %v395_v47, %v403_v49  ;;  %v11299_v45 = vcombine.high %v490_v38, %v498_v40  ;;  %v506_v47 = vld [vmem:[#allocation5 + $0xc90] sm:$0xff] }
 0x1cd   :  { %v11221_v63 = vcombine.high %v411_v58, %v419_v59  ;;  %v514_v49 = vld [vmem:[#allocation5 + $0xcd0] sm:$0xff] }
 0x1cf   :  { %8303 = vmatpush1.bf16.msra.mxu0 %v11106_v3  ;;  %8508 = vmatpush1.bf16.msra.mxu1 %v11108_v4  ;;  %v427_v3 = vld [vmem:[#allocation5 + $0xa18] sm:$0xff] }
 0x1d0   :  { %8304 = vmatprep.subr.bf16.mxu0 %v11123_v5  ;;  %8509 = vmatprep.subr.bf16.mxu1 %v11125_v6  ;;  %v435_v4 = vld [vmem:[#allocation5 + $0xa58] sm:$0xff]  ;;  %v11218_v5 = vcombine.low %v410_v55, %v418_v56  ;;  %v11220_v6 = vcombine.low %v411_v58, %v419_v59  ;;  %v11315_v55 = vcombine.high %v506_v47, %v514_v49  ;;  %v522_v58 = vld [vmem:[#allocation5 + $0xd10] sm:$0xff] }
 0x1d1   :  { %v11237_v8 = vcombine.high %v427_v3, %v435_v4  ;;  %v530_v59 = vld [vmem:[#allocation5 + $0xd50] sm:$0xff] }
 0x1d3   :  { %8305 = vmatpush1.bf16.msra.mxu0 %v11122_v11  ;;  %8510 = vmatpush1.bf16.msra.mxu1 %v11124_v13  ;;  %v443_v11 = vld [vmem:[#allocation5 + $0xa98] sm:$0xff] }
 0x1d4   :  { %8306 = vmatprep.subr.bf16.mxu0 %v11139_v15  ;;  %8511 = vmatprep.subr.bf16.mxu1 %v11141_v16  ;;  %v451_v13 = vld [vmem:[#allocation5 + $0xad8] sm:$0xff]  ;;  %v11234_v15 = vcombine.low %v426_v0, %v434_v2  ;;  %v11236_v16 = vcombine.low %v427_v3, %v435_v4  ;;  %v11331_v0 = vcombine.high %v522_v58, %v530_v59  ;;  %v538_v3 = vld [vmem:[#allocation5 + $0xd90] sm:$0xff] }
 0x1d5   :  { %v11253_v18 = vcombine.high %v443_v11, %v451_v13  ;;  %v546_v4 = vld [vmem:[#allocation5 + $0xdd0] sm:$0xff] }
 0x1d7   :  { %8307 = vmatpush1.bf16.msra.mxu0 %v11138_v21  ;;  %8512 = vmatpush1.bf16.msra.mxu1 %v11140_v22  ;;  %v459_v21 = vld [vmem:[#allocation5 + $0xb18] sm:$0xff] }
 0x1d8   :  { %8308 = vmatprep.subr.bf16.mxu0 %v11155_v24  ;;  %8513 = vmatprep.subr.bf16.mxu1 %v11157_v26  ;;  %v467_v22 = vld [vmem:[#allocation5 + $0xb58] sm:$0xff]  ;;  %v11250_v24 = vcombine.low %v442_v9, %v450_v10  ;;  %v11252_v26 = vcombine.low %v443_v11, %v451_v13  ;;  %v11347_v9 = vcombine.high %v538_v3, %v546_v4  ;;  %v554_v11 = vld [vmem:[#allocation5 + $0xe10] sm:$0xff] }
 0x1d9   :  { %v11269_v28 = vcombine.high %v459_v21, %v467_v22  ;;  %v562_v13 = vld [vmem:[#allocation5 + $0xe50] sm:$0xff] }
 0x1db   :  { %8309 = vmatpush1.bf16.msra.mxu0 %v11154_v31  ;;  %8514 = vmatpush1.bf16.msra.mxu1 %v11156_v32  ;;  %v475_v31 = vld [vmem:[#allocation5 + $0xb98] sm:$0xff] }
 0x1dc   :  { %8319 = vmatprep.subr.bf16.mxu0 %v11171_v33  ;;  %8524 = vmatprep.subr.bf16.mxu1 %v11173_v35  ;;  %v483_v32 = vld [vmem:[#allocation5 + $0xbd8] sm:$0xff]  ;;  %v11266_v33 = vcombine.low %v458_v19, %v466_v20  ;;  %v11268_v35 = vcombine.low %v459_v21, %v467_v22  ;;  %v11363_v19 = vcombine.high %v554_v11, %v562_v13  ;;  %v570_v21 = vld [vmem:[#allocation5 + $0xe90] sm:$0xff] }
 0x1dd   :  { %v11285_v37 = vcombine.high %v475_v31, %v483_v32  ;;  %v578_v22 = vld [vmem:[#allocation5 + $0xed0] sm:$0xff] }
 0x1de   :  { %8311 = vmatmul.mubr.bf16.vlgmr.msra.gmra.mrb[4].mxu0 %v13054_v12  ;;  %8516 = vmatmul.mubr.bf16.vlgmr.msra.gmra.mrb[4].mxu1 %v13054_v12 }
 0x1df   :  { %8320 = vmatpush1.bf16.msra.mxu0 %v11170_v41  ;;  %8525 = vmatpush1.bf16.msra.mxu1 %v11172_v42  ;;  %v491_v41 = vld [vmem:[#allocation5 + $0xc18] sm:$0xff] }
 0x1e0   :  { %8321 = vmatprep.subr.bf16.mxu0 %v11187_v43  ;;  %8526 = vmatprep.subr.bf16.mxu1 %v11189_v44  ;;  %v499_v42 = vld [vmem:[#allocation5 + $0xc58] sm:$0xff]  ;;  %v11282_v43 = vcombine.low %v474_v29, %v482_v30  ;;  %v11284_v44 = vcombine.low %v475_v31, %v483_v32  ;;  %v11379_v29 = vcombine.high %v570_v21, %v578_v22  ;;  %v586_v31 = vld [vmem:[#allocation5 + $0xf10] sm:$0xff] }
 0x1e1   :  { %8351 = vmatprep.mubr.bf16.mxu0 %v13056_v23  ;;  %8556 = vmatprep.mubr.bf16.mxu1 %v13056_v23  ;;  %v11301_v46 = vcombine.high %v491_v41, %v499_v42  ;;  %v594_v32 = vld [vmem:[#allocation5 + $0xf50] sm:$0xff] }
 0x1e3   :  { %8322 = vmatpush1.bf16.msra.mxu0 %v11186_v50  ;;  %8527 = vmatpush1.bf16.msra.mxu1 %v11188_v51  ;;  %v507_v50 = vld [vmem:[#allocation5 + $0xc98] sm:$0xff] }
 0x1e4   :  { %8323 = vmatprep.subr.bf16.mxu0 %v11203_v52  ;;  %8528 = vmatprep.subr.bf16.mxu1 %v11205_v53  ;;  %v515_v51 = vld [vmem:[#allocation5 + $0xcd8] sm:$0xff]  ;;  %v11298_v52 = vcombine.low %v490_v38, %v498_v40  ;;  %v11300_v53 = vcombine.low %v491_v41, %v499_v42  ;;  %v11395_v38 = vcombine.high %v586_v31, %v594_v32  ;;  %v602_v41 = vld [vmem:[#allocation5 + $0xf90] sm:$0xff] }
 0x1e5   :  { %v11317_v56 = vcombine.high %v507_v50, %v515_v51  ;;  %v610_v42 = vld [vmem:[#allocation5 + $0xfd0] sm:$0xff] }
 0x1e7   :  { %8324 = vmatpush1.bf16.msra.mxu0 %v11202_v60  ;;  %8529 = vmatpush1.bf16.msra.mxu1 %v11204_v61  ;;  %v523_v60 = vld [vmem:[#allocation5 + $0xd18] sm:$0xff] }
 0x1e8   :  { %8325 = vmatprep.subr.bf16.mxu0 %v11219_v62  ;;  %8530 = vmatprep.subr.bf16.mxu1 %v11221_v63  ;;  %v531_v61 = vld [vmem:[#allocation5 + $0xd58] sm:$0xff]  ;;  %v11314_v62 = vcombine.low %v506_v47, %v514_v49  ;;  %v11316_v63 = vcombine.low %v507_v50, %v515_v51  ;;  %v11411_v47 = vcombine.high %v602_v41, %v610_v42  ;;  %v618_v50 = vld [vmem:[#allocation5 + $0x1010] sm:$0xff] }
 0x1e9   :  { %v11333_v2 = vcombine.high %v523_v60, %v531_v61  ;;  %v626_v51 = vld [vmem:[#allocation5 + $0x1050] sm:$0xff] }
 0x1eb   :  { %8326 = vmatpush1.bf16.msra.mxu0 %v11218_v5  ;;  %8531 = vmatpush1.bf16.msra.mxu1 %v11220_v6  ;;  %v539_v5 = vld [vmem:[#allocation5 + $0xd98] sm:$0xff] }
 0x1ec   :  { %8327 = vmatprep.subr.bf16.mxu0 %v11235_v7  ;;  %8532 = vmatprep.subr.bf16.mxu1 %v11237_v8  ;;  %v547_v6 = vld [vmem:[#allocation5 + $0xdd8] sm:$0xff]  ;;  %v11330_v7 = vcombine.low %v522_v58, %v530_v59  ;;  %v11332_v8 = vcombine.low %v523_v60, %v531_v61  ;;  %v11427_v58 = vcombine.high %v618_v50, %v626_v51  ;;  %v634_v60 = vld [vmem:[#allocation5 + $0x1090] sm:$0xff] }
 0x1ed   :  { %v11349_v10 = vcombine.high %v539_v5, %v547_v6  ;;  %v642_v61 = vld [vmem:[#allocation5 + $0x10d0] sm:$0xff] }
 0x1ef   :  { %8328 = vmatpush1.bf16.msra.mxu0 %v11234_v15  ;;  %8533 = vmatpush1.bf16.msra.mxu1 %v11236_v16  ;;  %v555_v15 = vld [vmem:[#allocation5 + $0xe18] sm:$0xff] }
 0x1f0   :  { %8329 = vmatprep.subr.bf16.mxu0 %v11251_v17  ;;  %8534 = vmatprep.subr.bf16.mxu1 %v11253_v18  ;;  %v563_v16 = vld [vmem:[#allocation5 + $0xe58] sm:$0xff]  ;;  %v11346_v17 = vcombine.low %v538_v3, %v546_v4  ;;  %v11348_v18 = vcombine.low %v539_v5, %v547_v6  ;;  %v11443_v3 = vcombine.high %v634_v60, %v642_v61  ;;  %v650_v5 = vld [vmem:[#allocation5 + $0x1110] sm:$0xff] }
 0x1f1   :  { %v11365_v20 = vcombine.high %v555_v15, %v563_v16  ;;  %v658_v6 = vld [vmem:[#allocation5 + $0x1150] sm:$0xff] }
 0x1f3   :  { %8330 = vmatpush1.bf16.msra.mxu0 %v11250_v24  ;;  %8535 = vmatpush1.bf16.msra.mxu1 %v11252_v26  ;;  %v571_v24 = vld [vmem:[#allocation5 + $0xe98] sm:$0xff] }
 0x1f4   :  { %8331 = vmatprep.subr.bf16.mxu0 %v11267_v27  ;;  %8536 = vmatprep.subr.bf16.mxu1 %v11269_v28  ;;  %v579_v26 = vld [vmem:[#allocation5 + $0xed8] sm:$0xff]  ;;  %v11362_v27 = vcombine.low %v554_v11, %v562_v13  ;;  %v11364_v28 = vcombine.low %v555_v15, %v563_v16  ;;  %v11459_v11 = vcombine.high %v650_v5, %v658_v6  ;;  %v666_v15 = vld [vmem:[#allocation5 + $0x1190] sm:$0xff] }
 0x1f5   :  { %v11381_v30 = vcombine.high %v571_v24, %v579_v26  ;;  %v674_v16 = vld [vmem:[#allocation5 + $0x11d0] sm:$0xff] }
 0x1f7   :  { %8332 = vmatpush1.bf16.msra.mxu0 %v11266_v33  ;;  %8537 = vmatpush1.bf16.msra.mxu1 %v11268_v35  ;;  %v587_v33 = vld [vmem:[#allocation5 + $0xf18] sm:$0xff] }
 0x1f8   :  { %8333 = vmatprep.subr.bf16.mxu0 %v11283_v36  ;;  %8538 = vmatprep.subr.bf16.mxu1 %v11285_v37  ;;  %v595_v35 = vld [vmem:[#allocation5 + $0xf58] sm:$0xff]  ;;  %v11378_v36 = vcombine.low %v570_v21, %v578_v22  ;;  %v11380_v37 = vcombine.low %v571_v24, %v579_v26  ;;  %v11475_v21 = vcombine.high %v666_v15, %v674_v16  ;;  %v682_v24 = vld [vmem:[#allocation5 + $0x1210] sm:$0xff] }
 0x1f9   :  { %v11397_v40 = vcombine.high %v587_v33, %v595_v35  ;;  %v690_v26 = vld [vmem:[#allocation5 + $0x1250] sm:$0xff] }
 0x1fb   :  { %8334 = vmatpush1.bf16.msra.mxu0 %v11282_v43  ;;  %8539 = vmatpush1.bf16.msra.mxu1 %v11284_v44  ;;  %v603_v43 = vld [vmem:[#allocation5 + $0xf98] sm:$0xff] }
 0x1fc   :  { %8335 = vmatprep.subr.bf16.mxu0 %v11299_v45  ;;  %8540 = vmatprep.subr.bf16.mxu1 %v11301_v46  ;;  %v611_v44 = vld [vmem:[#allocation5 + $0xfd8] sm:$0xff]  ;;  %v11394_v45 = vcombine.low %v586_v31, %v594_v32  ;;  %v11396_v46 = vcombine.low %v587_v33, %v595_v35  ;;  %v11491_v31 = vcombine.high %v682_v24, %v690_v26  ;;  %v698_v33 = vld [vmem:[#allocation5 + $0x1290] sm:$0xff] }
 0x1fd   :  { %v11413_v49 = vcombine.high %v603_v43, %v611_v44  ;;  %v706_v35 = vld [vmem:[#allocation5 + $0x12d0] sm:$0xff] }
 0x1ff   :  { %8336 = vmatpush1.bf16.msra.mxu0 %v11298_v52  ;;  %8541 = vmatpush1.bf16.msra.mxu1 %v11300_v53  ;;  %v619_v52 = vld [vmem:[#allocation5 + $0x1018] sm:$0xff] }
 0x200   :  { %8337 = vmatprep.subr.bf16.mxu0 %v11315_v55  ;;  %8542 = vmatprep.subr.bf16.mxu1 %v11317_v56  ;;  %v627_v53 = vld [vmem:[#allocation5 + $0x1058] sm:$0xff]  ;;  %v11410_v55 = vcombine.low %v602_v41, %v610_v42  ;;  %v11412_v56 = vcombine.low %v603_v43, %v611_v44  ;;  %v11507_v41 = vcombine.high %v698_v33, %v706_v35  ;;  %v714_v43 = vld [vmem:[#allocation5 + $0x1310] sm:$0xff] }
 0x201   :  { %v11429_v59 = vcombine.high %v619_v52, %v627_v53  ;;  %v722_v44 = vld [vmem:[#allocation5 + $0x1350] sm:$0xff] }
 0x203   :  { %8338 = vmatpush1.bf16.msra.mxu0 %v11314_v62  ;;  %8543 = vmatpush1.bf16.msra.mxu1 %v11316_v63  ;;  %v635_v62 = vld [vmem:[#allocation5 + $0x1098] sm:$0xff] }
 0x204   :  { %8339 = vmatprep.subr.bf16.mxu0 %v11331_v0  ;;  %8544 = vmatprep.subr.bf16.mxu1 %v11333_v2  ;;  %v643_v63 = vld [vmem:[#allocation5 + $0x10d8] sm:$0xff]  ;;  %v11426_v0 = vcombine.low %v618_v50, %v626_v51  ;;  %v11428_v2 = vcombine.low %v619_v52, %v627_v53  ;;  %v11523_v50 = vcombine.high %v714_v43, %v722_v44  ;;  %v730_v52 = vld [vmem:[#allocation5 + $0x1390] sm:$0xff] }
 0x205   :  { %v11445_v4 = vcombine.high %v635_v62, %v643_v63  ;;  %v738_v53 = vld [vmem:[#allocation5 + $0x13d0] sm:$0xff] }
 0x207   :  { %8340 = vmatpush1.bf16.msra.mxu0 %v11330_v7  ;;  %8545 = vmatpush1.bf16.msra.mxu1 %v11332_v8  ;;  %v651_v7 = vld [vmem:[#allocation5 + $0x1118] sm:$0xff] }
 0x208   :  { %8341 = vmatprep.subr.bf16.mxu0 %v11347_v9  ;;  %8546 = vmatprep.subr.bf16.mxu1 %v11349_v10  ;;  %v659_v8 = vld [vmem:[#allocation5 + $0x1158] sm:$0xff]  ;;  %v11442_v9 = vcombine.low %v634_v60, %v642_v61  ;;  %v11444_v10 = vcombine.low %v635_v62, %v643_v63  ;;  %v11539_v60 = vcombine.high %v730_v52, %v738_v53  ;;  %v746_v62 = vld [vmem:[#allocation5 + $0x1410] sm:$0xff] }
 0x209   :  { %v11461_v13 = vcombine.high %v651_v7, %v659_v8  ;;  %v754_v63 = vld [vmem:[#allocation5 + $0x1450] sm:$0xff] }
 0x20b   :  { %8342 = vmatpush1.bf16.msra.mxu0 %v11346_v17  ;;  %8547 = vmatpush1.bf16.msra.mxu1 %v11348_v18  ;;  %v667_v17 = vld [vmem:[#allocation5 + $0x1198] sm:$0xff] }
 0x20c   :  { %8343 = vmatprep.subr.bf16.mxu0 %v11363_v19  ;;  %8548 = vmatprep.subr.bf16.mxu1 %v11365_v20  ;;  %v675_v18 = vld [vmem:[#allocation5 + $0x11d8] sm:$0xff]  ;;  %v11458_v19 = vcombine.low %v650_v5, %v658_v6  ;;  %v11460_v20 = vcombine.low %v651_v7, %v659_v8  ;;  %v11555_v5 = vcombine.high %v746_v62, %v754_v63  ;;  %v762_v7 = vld [vmem:[#allocation5 + $0x1490] sm:$0xff] }
 0x20d   :  { %v11477_v22 = vcombine.high %v667_v17, %v675_v18  ;;  %v770_v8 = vld [vmem:[#allocation5 + $0x14d0] sm:$0xff] }
 0x20f   :  { %8344 = vmatpush1.bf16.msra.mxu0 %v11362_v27  ;;  %8549 = vmatpush1.bf16.msra.mxu1 %v11364_v28  ;;  %v683_v27 = vld [vmem:[#allocation5 + $0x1218] sm:$0xff] }
 0x210   :  { %8345 = vmatprep.subr.bf16.mxu0 %v11379_v29  ;;  %8550 = vmatprep.subr.bf16.mxu1 %v11381_v30  ;;  %v691_v28 = vld [vmem:[#allocation5 + $0x1258] sm:$0xff]  ;;  %v11474_v29 = vcombine.low %v666_v15, %v674_v16  ;;  %v11476_v30 = vcombine.low %v667_v17, %v675_v18  ;;  %v11571_v15 = vcombine.high %v762_v7, %v770_v8  ;;  %v778_v17 = vld [vmem:[#allocation5 + $0x1510] sm:$0xff] }
 0x211   :  { %v11493_v32 = vcombine.high %v683_v27, %v691_v28  ;;  %v786_v18 = vld [vmem:[#allocation5 + $0x1550] sm:$0xff] }
 0x213   :  { %8346 = vmatpush1.bf16.msra.mxu0 %v11378_v36  ;;  %8551 = vmatpush1.bf16.msra.mxu1 %v11380_v37  ;;  %v699_v36 = vld [vmem:[#allocation5 + $0x1298] sm:$0xff] }
 0x214   :  { %8347 = vmatprep.subr.bf16.mxu0 %v11395_v38  ;;  %8552 = vmatprep.subr.bf16.mxu1 %v11397_v40  ;;  %v707_v37 = vld [vmem:[#allocation5 + $0x12d8] sm:$0xff]  ;;  %v11490_v38 = vcombine.low %v682_v24, %v690_v26  ;;  %v11492_v40 = vcombine.low %v683_v27, %v691_v28  ;;  %v11587_v24 = vcombine.high %v778_v17, %v786_v18  ;;  %v794_v27 = vld [vmem:[#allocation5 + $0x1590] sm:$0xff] }
 0x215   :  { %v11509_v42 = vcombine.high %v699_v36, %v707_v37  ;;  %v802_v28 = vld [vmem:[#allocation5 + $0x15d0] sm:$0xff] }
 0x217   :  { %8348 = vmatpush1.bf16.msra.mxu0 %v11394_v45  ;;  %8553 = vmatpush1.bf16.msra.mxu1 %v11396_v46  ;;  %v715_v45 = vld [vmem:[#allocation5 + $0x1318] sm:$0xff] }
 0x218   :  { %8349 = vmatprep.subr.bf16.mxu0 %v11411_v47  ;;  %8554 = vmatprep.subr.bf16.mxu1 %v11413_v49  ;;  %v723_v46 = vld [vmem:[#allocation5 + $0x1358] sm:$0xff]  ;;  %v11506_v47 = vcombine.low %v698_v33, %v706_v35  ;;  %v11508_v49 = vcombine.low %v699_v36, %v707_v37  ;;  %v11603_v33 = vcombine.high %v794_v27, %v802_v28  ;;  %v810_v36 = vld [vmem:[#allocation5 + $0x1610] sm:$0xff] }
 0x219   :  { %v11525_v51 = vcombine.high %v715_v45, %v723_v46  ;;  %v818_v37 = vld [vmem:[#allocation5 + $0x1650] sm:$0xff] }
 0x21b   :  { %8350 = vmatpush1.bf16.msra.mxu0 %v11410_v55  ;;  %8555 = vmatpush1.bf16.msra.mxu1 %v11412_v56  ;;  %v731_v55 = vld [vmem:[#allocation5 + $0x1398] sm:$0xff] }
 0x21c   :  { %8360 = vmatprep.subr.bf16.mxu0 %v11427_v58  ;;  %8565 = vmatprep.subr.bf16.mxu1 %v11429_v59  ;;  %v739_v56 = vld [vmem:[#allocation5 + $0x13d8] sm:$0xff]  ;;  %v11522_v58 = vcombine.low %v714_v43, %v722_v44  ;;  %v11524_v59 = vcombine.low %v715_v45, %v723_v46  ;;  %v11619_v43 = vcombine.high %v810_v36, %v818_v37  ;;  %v826_v45 = vld [vmem:[#allocation5 + $0x1690] sm:$0xff] }
 0x21d   :  { %v11541_v61 = vcombine.high %v731_v55, %v739_v56  ;;  %v834_v46 = vld [vmem:[#allocation5 + $0x16d0] sm:$0xff] }
 0x21e   :  { %8352 = vmatmul.mubr.bf16.vlgmr.msra.gmra.mrb[4].mxu0 %v13062_v25  ;;  %8557 = vmatmul.mubr.bf16.vlgmr.msra.gmra.mrb[4].mxu1 %v13062_v25 }
 0x21f   :  { %8361 = vmatpush1.bf16.msra.mxu0 %v11426_v0  ;;  %8566 = vmatpush1.bf16.msra.mxu1 %v11428_v2  ;;  %v747_v0 = vld [vmem:[#allocation5 + $0x1418] sm:$0xff] }
 0x220   :  { %8362 = vmatprep.subr.bf16.mxu0 %v11443_v3  ;;  %8567 = vmatprep.subr.bf16.mxu1 %v11445_v4  ;;  %v755_v2 = vld [vmem:[#allocation5 + $0x1458] sm:$0xff]  ;;  %v11538_v3 = vcombine.low %v730_v52, %v738_v53  ;;  %v11540_v4 = vcombine.low %v731_v55, %v739_v56  ;;  %v11635_v52 = vcombine.high %v826_v45, %v834_v46  ;;  %v842_v55 = vld [vmem:[#allocation5 + $0x1710] sm:$0xff] }
 0x221   :  { %8392 = vmatprep.mubr.bf16.mxu0 %v13064_v34  ;;  %8597 = vmatprep.mubr.bf16.mxu1 %v13064_v34  ;;  %v11557_v6 = vcombine.high %v747_v0, %v755_v2  ;;  %v850_v56 = vld [vmem:[#allocation5 + $0x1750] sm:$0xff] }
 0x223   :  { %8363 = vmatpush1.bf16.msra.mxu0 %v11442_v9  ;;  %8568 = vmatpush1.bf16.msra.mxu1 %v11444_v10  ;;  %v763_v9 = vld [vmem:[#allocation5 + $0x1498] sm:$0xff] }
 0x224   :  { %8364 = vmatprep.subr.bf16.mxu0 %v11459_v11  ;;  %8569 = vmatprep.subr.bf16.mxu1 %v11461_v13  ;;  %v771_v10 = vld [vmem:[#allocation5 + $0x14d8] sm:$0xff]  ;;  %v11554_v11 = vcombine.low %v746_v62, %v754_v63  ;;  %v11556_v13 = vcombine.low %v747_v0, %v755_v2  ;;  %v11651_v62 = vcombine.high %v842_v55, %v850_v56  ;;  %v858_v0 = vld [vmem:[#allocation5 + $0x1790] sm:$0xff] }
 0x225   :  { %v11573_v16 = vcombine.high %v763_v9, %v771_v10  ;;  %v866_v2 = vld [vmem:[#allocation5 + $0x17d0] sm:$0xff] }
 0x227   :  { %8365 = vmatpush1.bf16.msra.mxu0 %v11458_v19  ;;  %8570 = vmatpush1.bf16.msra.mxu1 %v11460_v20  ;;  %v779_v19 = vld [vmem:[#allocation5 + $0x1518] sm:$0xff] }
 0x228   :  { %8366 = vmatprep.subr.bf16.mxu0 %v11475_v21  ;;  %8571 = vmatprep.subr.bf16.mxu1 %v11477_v22  ;;  %v787_v20 = vld [vmem:[#allocation5 + $0x1558] sm:$0xff]  ;;  %v11570_v21 = vcombine.low %v762_v7, %v770_v8  ;;  %v11572_v22 = vcombine.low %v763_v9, %v771_v10  ;;  %v11667_v7 = vcombine.high %v858_v0, %v866_v2  ;;  %v874_v9 = vld [vmem:[#allocation5 + $0x1810] sm:$0xff] }
 0x229   :  { %v11589_v26 = vcombine.high %v779_v19, %v787_v20  ;;  %v882_v10 = vld [vmem:[#allocation5 + $0x1850] sm:$0xff] }
 0x22b   :  { %8367 = vmatpush1.bf16.msra.mxu0 %v11474_v29  ;;  %8572 = vmatpush1.bf16.msra.mxu1 %v11476_v30  ;;  %v795_v29 = vld [vmem:[#allocation5 + $0x1598] sm:$0xff] }
 0x22c   :  { %8368 = vmatprep.subr.bf16.mxu0 %v11491_v31  ;;  %8573 = vmatprep.subr.bf16.mxu1 %v11493_v32  ;;  %v803_v30 = vld [vmem:[#allocation5 + $0x15d8] sm:$0xff]  ;;  %v11586_v31 = vcombine.low %v778_v17, %v786_v18  ;;  %v11588_v32 = vcombine.low %v779_v19, %v787_v20  ;;  %v11683_v17 = vcombine.high %v874_v9, %v882_v10  ;;  %v890_v19 = vld [vmem:[#allocation5 + $0x1890] sm:$0xff] }
 0x22d   :  { %v11605_v35 = vcombine.high %v795_v29, %v803_v30  ;;  %v898_v20 = vld [vmem:[#allocation5 + $0x18d0] sm:$0xff] }
 0x22f   :  { %8369 = vmatpush1.bf16.msra.mxu0 %v11490_v38  ;;  %8574 = vmatpush1.bf16.msra.mxu1 %v11492_v40  ;;  %v811_v38 = vld [vmem:[#allocation5 + $0x1618] sm:$0xff] }
 0x230   :  { %8370 = vmatprep.subr.bf16.mxu0 %v11507_v41  ;;  %8575 = vmatprep.subr.bf16.mxu1 %v11509_v42  ;;  %v819_v40 = vld [vmem:[#allocation5 + $0x1658] sm:$0xff]  ;;  %v11602_v41 = vcombine.low %v794_v27, %v802_v28  ;;  %v11604_v42 = vcombine.low %v795_v29, %v803_v30  ;;  %v11699_v27 = vcombine.high %v890_v19, %v898_v20  ;;  %v906_v29 = vld [vmem:[#allocation5 + $0x1910] sm:$0xff] }
 0x231   :  { %v11621_v44 = vcombine.high %v811_v38, %v819_v40  ;;  %v914_v30 = vld [vmem:[#allocation5 + $0x1950] sm:$0xff] }
 0x233   :  { %8371 = vmatpush1.bf16.msra.mxu0 %v11506_v47  ;;  %8576 = vmatpush1.bf16.msra.mxu1 %v11508_v49  ;;  %v827_v47 = vld [vmem:[#allocation5 + $0x1698] sm:$0xff] }
 0x234   :  { %8372 = vmatprep.subr.bf16.mxu0 %v11523_v50  ;;  %8577 = vmatprep.subr.bf16.mxu1 %v11525_v51  ;;  %v835_v49 = vld [vmem:[#allocation5 + $0x16d8] sm:$0xff]  ;;  %v11618_v50 = vcombine.low %v810_v36, %v818_v37  ;;  %v11620_v51 = vcombine.low %v811_v38, %v819_v40  ;;  %v11715_v36 = vcombine.high %v906_v29, %v914_v30  ;;  %v922_v38 = vld [vmem:[#allocation5 + $0x1990] sm:$0xff] }
 0x235   :  { %v11637_v53 = vcombine.high %v827_v47, %v835_v49  ;;  %v930_v40 = vld [vmem:[#allocation5 + $0x19d0] sm:$0xff] }
 0x237   :  { %8373 = vmatpush1.bf16.msra.mxu0 %v11522_v58  ;;  %8578 = vmatpush1.bf16.msra.mxu1 %v11524_v59  ;;  %v843_v58 = vld [vmem:[#allocation5 + $0x1718] sm:$0xff] }
 0x238   :  { %8374 = vmatprep.subr.bf16.mxu0 %v11539_v60  ;;  %8579 = vmatprep.subr.bf16.mxu1 %v11541_v61  ;;  %v851_v59 = vld [vmem:[#allocation5 + $0x1758] sm:$0xff]  ;;  %v11634_v60 = vcombine.low %v826_v45, %v834_v46  ;;  %v11636_v61 = vcombine.low %v827_v47, %v835_v49  ;;  %v11731_v45 = vcombine.high %v922_v38, %v930_v40  ;;  %v938_v47 = vld [vmem:[#allocation5 + $0x1a10] sm:$0xff] }
 0x239   :  { %v11653_v63 = vcombine.high %v843_v58, %v851_v59  ;;  %v946_v49 = vld [vmem:[#allocation5 + $0x1a50] sm:$0xff] }
 0x23b   :  { %8375 = vmatpush1.bf16.msra.mxu0 %v11538_v3  ;;  %8580 = vmatpush1.bf16.msra.mxu1 %v11540_v4  ;;  %v859_v3 = vld [vmem:[#allocation5 + $0x1798] sm:$0xff] }
 0x23c   :  { %8376 = vmatprep.subr.bf16.mxu0 %v11555_v5  ;;  %8581 = vmatprep.subr.bf16.mxu1 %v11557_v6  ;;  %v867_v4 = vld [vmem:[#allocation5 + $0x17d8] sm:$0xff]  ;;  %v11650_v5 = vcombine.low %v842_v55, %v850_v56  ;;  %v11652_v6 = vcombine.low %v843_v58, %v851_v59  ;;  %v11747_v55 = vcombine.high %v938_v47, %v946_v49  ;;  %v954_v58 = vld [vmem:[#allocation5 + $0x1a90] sm:$0xff] }
 0x23d   :  { %v11669_v8 = vcombine.high %v859_v3, %v867_v4  ;;  %v962_v59 = vld [vmem:[#allocation5 + $0x1ad0] sm:$0xff] }
 0x23f   :  { %8377 = vmatpush1.bf16.msra.mxu0 %v11554_v11  ;;  %8582 = vmatpush1.bf16.msra.mxu1 %v11556_v13  ;;  %v875_v11 = vld [vmem:[#allocation5 + $0x1818] sm:$0xff] }
 0x240   :  { %8378 = vmatprep.subr.bf16.mxu0 %v11571_v15  ;;  %8583 = vmatprep.subr.bf16.mxu1 %v11573_v16  ;;  %v883_v13 = vld [vmem:[#allocation5 + $0x1858] sm:$0xff]  ;;  %v11666_v15 = vcombine.low %v858_v0, %v866_v2  ;;  %v11668_v16 = vcombine.low %v859_v3, %v867_v4  ;;  %v11763_v0 = vcombine.high %v954_v58, %v962_v59  ;;  %v970_v3 = vld [vmem:[#allocation5 + $0x1b10] sm:$0xff] }
 0x241   :  { %v11685_v18 = vcombine.high %v875_v11, %v883_v13  ;;  %v978_v4 = vld [vmem:[#allocation5 + $0x1b50] sm:$0xff] }
 0x243   :  { %8379 = vmatpush1.bf16.msra.mxu0 %v11570_v21  ;;  %8584 = vmatpush1.bf16.msra.mxu1 %v11572_v22  ;;  %v891_v21 = vld [vmem:[#allocation5 + $0x1898] sm:$0xff] }
 0x244   :  { %8380 = vmatprep.subr.bf16.mxu0 %v11587_v24  ;;  %8585 = vmatprep.subr.bf16.mxu1 %v11589_v26  ;;  %v899_v22 = vld [vmem:[#allocation5 + $0x18d8] sm:$0xff]  ;;  %v11682_v24 = vcombine.low %v874_v9, %v882_v10  ;;  %v11684_v26 = vcombine.low %v875_v11, %v883_v13  ;;  %v11779_v9 = vcombine.high %v970_v3, %v978_v4  ;;  %v986_v13 = vld [vmem:[#allocation5 + $0x1b90] sm:$0xff] }
 0x245   :  { %v11701_v28 = vcombine.high %v891_v21, %v899_v22 }
 0x247   :  { %8381 = vmatpush1.bf16.msra.mxu0 %v11586_v31  ;;  %8586 = vmatpush1.bf16.msra.mxu1 %v11588_v32  ;;  %v907_v31 = vld [vmem:[#allocation5 + $0x1918] sm:$0xff] }
 0x248   :  { %8382 = vmatprep.subr.bf16.mxu0 %v11603_v33  ;;  %8587 = vmatprep.subr.bf16.mxu1 %v11605_v35  ;;  %v915_v32 = vld [vmem:[#allocation5 + $0x1958] sm:$0xff]  ;;  %v11698_v33 = vcombine.low %v890_v19, %v898_v20  ;;  %v11700_v35 = vcombine.low %v891_v21, %v899_v22  ;;  %v11778_v22 = vcombine.low %v970_v3, %v978_v4 }
 0x249   :  { %v11717_v37 = vcombine.high %v907_v31, %v915_v32  ;;  %v995_v19 = vld [vmem:[#allocation5 + $0x1bd8] sm:$0xff] }
 0x24b   :  { %8383 = vmatpush1.bf16.msra.mxu0 %v11602_v41  ;;  %8588 = vmatpush1.bf16.msra.mxu1 %v11604_v42  ;;  %v923_v41 = vld [vmem:[#allocation5 + $0x1998] sm:$0xff] }
 0x24c   :  { %8384 = vmatprep.subr.bf16.mxu0 %v11619_v43  ;;  %8589 = vmatprep.subr.bf16.mxu1 %v11621_v44  ;;  %v931_v42 = vld [vmem:[#allocation5 + $0x19d8] sm:$0xff]  ;;  %v11714_v43 = vcombine.low %v906_v29, %v914_v30  ;;  %v11716_v44 = vcombine.low %v907_v31, %v915_v32  ;;  %v1002_v31 = vld [vmem:[#allocation5 + $0x1c10] sm:$0xff] }
 0x24d   :  { %v11733_v46 = vcombine.high %v923_v41, %v931_v42  ;;  %v1010_v32 = vld [vmem:[#allocation5 + $0x1c50] sm:$0xff] }
 0x24f   :  { %8385 = vmatpush1.bf16.msra.mxu0 %v11618_v50  ;;  %8590 = vmatpush1.bf16.msra.mxu1 %v11620_v51  ;;  %v939_v50 = vld [vmem:[#allocation5 + $0x1a18] sm:$0xff] }
 0x250   :  { %8386 = vmatprep.subr.bf16.mxu0 %v11635_v52  ;;  %8591 = vmatprep.subr.bf16.mxu1 %v11637_v53  ;;  %v947_v51 = vld [vmem:[#allocation5 + $0x1a58] sm:$0xff]  ;;  %v11730_v52 = vcombine.low %v922_v38, %v930_v40  ;;  %v11732_v53 = vcombine.low %v923_v41, %v931_v42  ;;  %v11811_v38 = vcombine.high %v1002_v31, %v1010_v32  ;;  %v1018_v41 = vld [vmem:[#allocation5 + $0x1c90] sm:$0xff] }
 0x251   :  { %v11749_v56 = vcombine.high %v939_v50, %v947_v51  ;;  %v1026_v42 = vld [vmem:[#allocation5 + $0x1cd0] sm:$0xff] }
 0x253   :  { %8387 = vmatpush1.bf16.msra.mxu0 %v11634_v60  ;;  %8592 = vmatpush1.bf16.msra.mxu1 %v11636_v61  ;;  %v955_v60 = vld [vmem:[#allocation5 + $0x1a98] sm:$0xff] }
 0x254   :  { %8388 = vmatprep.subr.bf16.mxu0 %v11651_v62  ;;  %8593 = vmatprep.subr.bf16.mxu1 %v11653_v63  ;;  %v963_v61 = vld [vmem:[#allocation5 + $0x1ad8] sm:$0xff]  ;;  %v11746_v62 = vcombine.low %v938_v47, %v946_v49  ;;  %v11748_v63 = vcombine.low %v939_v50, %v947_v51  ;;  %v11827_v47 = vcombine.high %v1018_v41, %v1026_v42  ;;  %v1034_v50 = vld [vmem:[#allocation5 + $0x1d10] sm:$0xff] }
 0x255   :  { %v11765_v2 = vcombine.high %v955_v60, %v963_v61  ;;  %v1042_v51 = vld [vmem:[#allocation5 + $0x1d50] sm:$0xff] }
 0x257   :  { %8389 = vmatpush1.bf16.msra.mxu0 %v11650_v5  ;;  %8594 = vmatpush1.bf16.msra.mxu1 %v11652_v6  ;;  %v971_v5 = vld [vmem:[#allocation5 + $0x1b18] sm:$0xff] }
 0x258   :  { %8390 = vmatprep.subr.bf16.mxu0 %v11667_v7  ;;  %8595 = vmatprep.subr.bf16.mxu1 %v11669_v8  ;;  %v979_v6 = vld [vmem:[#allocation5 + $0x1b58] sm:$0xff]  ;;  %v11762_v7 = vcombine.low %v954_v58, %v962_v59  ;;  %v11764_v8 = vcombine.low %v955_v60, %v963_v61  ;;  %v11843_v58 = vcombine.high %v1034_v50, %v1042_v51  ;;  %v1050_v60 = vld [vmem:[#allocation5 + $0x1d90] sm:$0xff] }
 0x259   :  { %v11781_v11 = vcombine.high %v971_v5, %v979_v6  ;;  %v1058_v61 = vld [vmem:[#allocation5 + $0x1dd0] sm:$0xff] }
 0x25a   :  { %v11859_v3 = vcombine.high %v1050_v60, %v1058_v61 }
 0x25b   :  { %8391 = vmatpush1.bf16.msra.mxu0 %v11666_v15  ;;  %8596 = vmatpush1.bf16.msra.mxu1 %v11668_v16  ;;  %v994_v15 = vld [vmem:[#allocation5 + $0x1bd0] sm:$0xff] }
 0x25c   :  { %8401 = vmatprep.subr.bf16.mxu0 %v11683_v17  ;;  %8606 = vmatprep.subr.bf16.mxu1 %v11685_v18  ;;  %v987_v18 = vld [vmem:[#allocation5 + $0x1b98] sm:$0xff] }
 0x25d   :  { %v11797_v30 = vcombine.high %v987_v18, %v995_v19 }
 0x25e   :  { %8393 = vmatmul.mubr.bf16.vlgmr.msra.gmra.mrb[4].mxu0 %v13070_v39  ;;  %8598 = vmatmul.mubr.bf16.vlgmr.msra.gmra.mrb[4].mxu1 %v13070_v39 }
 0x25f   :  { %8402 = vmatpush1.bf16.msra.mxu0 %v11682_v24  ;;  %8607 = vmatpush1.bf16.msra.mxu1 %v11684_v26 }
 0x260   :  { %8403 = vmatprep.subr.bf16.mxu0 %v11699_v27  ;;  %8608 = vmatprep.subr.bf16.mxu1 %v11701_v28  ;;  %v11780_v27 = vcombine.low %v971_v5, %v979_v6  ;;  %v11795_v28 = vcombine.high %v986_v13, %v994_v15  ;;  %v1066_v5 = vld [vmem:[#allocation5 + $0x1e10] sm:$0xff] }
 0x261   :  { %8433 = vmatprep.mubr.bf16.mxu0 %v13072_v48  ;;  %8638 = vmatprep.mubr.bf16.mxu1 %v13072_v48  ;;  %v1074_v6 = vld [vmem:[#allocation5 + $0x1e50] sm:$0xff] }
 0x263   :  { %8404 = vmatpush1.bf16.msra.mxu0 %v11698_v33  ;;  %8609 = vmatpush1.bf16.msra.mxu1 %v11700_v35  ;;  %v1003_v33 = vld [vmem:[#allocation5 + $0x1c18] sm:$0xff] }
 0x264   :  { %8405 = vmatprep.subr.bf16.mxu0 %v11715_v36  ;;  %8610 = vmatprep.subr.bf16.mxu1 %v11717_v37  ;;  %v1011_v35 = vld [vmem:[#allocation5 + $0x1c58] sm:$0xff]  ;;  %v11794_v36 = vcombine.low %v986_v13, %v994_v15  ;;  %v11796_v37 = vcombine.low %v987_v18, %v995_v19  ;;  %v11875_v13 = vcombine.high %v1066_v5, %v1074_v6  ;;  %v1082_v18 = vld [vmem:[#allocation5 + $0x1e90] sm:$0xff] }
 0x265   :  { %v11813_v40 = vcombine.high %v1003_v33, %v1011_v35  ;;  %v1090_v19 = vld [vmem:[#allocation5 + $0x1ed0] sm:$0xff] }
 0x267   :  { %8406 = vmatpush1.bf16.msra.mxu0 %v11714_v43  ;;  %8611 = vmatpush1.bf16.msra.mxu1 %v11716_v44  ;;  %v1019_v43 = vld [vmem:[#allocation5 + $0x1c98] sm:$0xff] }
 0x268   :  { %8407 = vmatprep.subr.bf16.mxu0 %v11731_v45  ;;  %8612 = vmatprep.subr.bf16.mxu1 %v11733_v46  ;;  %v1027_v44 = vld [vmem:[#allocation5 + $0x1cd8] sm:$0xff]  ;;  %v11810_v45 = vcombine.low %v1002_v31, %v1010_v32  ;;  %v11812_v46 = vcombine.low %v1003_v33, %v1011_v35  ;;  %v11890_v33 = vcombine.low %v1082_v18, %v1090_v19 }
 0x269   :  { %v11829_v49 = vcombine.high %v1019_v43, %v1027_v44  ;;  %v1099_v31 = vld [vmem:[#allocation5 + $0x1f18] sm:$0xff] }
 0x26a   :  { %v1107_v32 = vld [vmem:[#allocation5 + $0x1f58] sm:$0xff] }
 0x26b   :  { %8408 = vmatpush1.bf16.msra.mxu0 %v11730_v52  ;;  %8613 = vmatpush1.bf16.msra.mxu1 %v11732_v53  ;;  %v1035_v52 = vld [vmem:[#allocation5 + $0x1d18] sm:$0xff] }
 0x26c   :  { %8409 = vmatprep.subr.bf16.mxu0 %v11747_v55  ;;  %8614 = vmatprep.subr.bf16.mxu1 %v11749_v56  ;;  %v1043_v53 = vld [vmem:[#allocation5 + $0x1d58] sm:$0xff]  ;;  %v11826_v55 = vcombine.low %v1018_v41, %v1026_v42  ;;  %v11828_v56 = vcombine.low %v1019_v43, %v1027_v44  ;;  %v11908_v44 = vcombine.low %v1099_v31, %v1107_v32 }
 0x26d   :  { %v11845_v59 = vcombine.high %v1035_v52, %v1043_v53  ;;  %v1115_v41 = vld [vmem:[#allocation5 + $0x1f98] sm:$0xff] }
 0x26e   :  { %v1123_v42 = vld [vmem:[#allocation5 + $0x1fd8] sm:$0xff] }
 0x26f   :  { %8410 = vmatpush1.bf16.msra.mxu0 %v11746_v62  ;;  %8615 = vmatpush1.bf16.msra.mxu1 %v11748_v63  ;;  %v1051_v62 = vld [vmem:[#allocation5 + $0x1d98] sm:$0xff] }
 0x270   :  { %8411 = vmatprep.subr.bf16.mxu0 %v11763_v0  ;;  %8616 = vmatprep.subr.bf16.mxu1 %v11765_v2  ;;  %v1059_v63 = vld [vmem:[#allocation5 + $0x1dd8] sm:$0xff]  ;;  %v11842_v0 = vcombine.low %v1034_v50, %v1042_v51  ;;  %v11844_v2 = vcombine.low %v1035_v52, %v1043_v53  ;;  %v11924_v53 = vcombine.low %v1115_v41, %v1123_v42 }
 0x271   :  { %v13104_v10 = vpop.f32.mrb[0].mxu0  ;;  %v13106_v16 = vpop.f32.mrb[0].mxu1  ;;  %v11861_v4 = vcombine.high %v1051_v62, %v1059_v63  ;;  %v1131_v50 = vld [vmem:[#allocation5 + $0x2018] sm:$0xff] }
 0x272   :  { %v13108_v17 = vpop.f32.mrb[1].mxu0  ;;  %v13110_v20 = vpop.f32.mrb[1].mxu1  ;;  %v1139_v51 = vld [vmem:[#allocation5 + $0x2058] sm:$0xff] }
 0x273   :  { %v8070_v21 = vpop.f32.mrb[2].mxu0  ;;  %8412 = vmatpush1.bf16.msra.mxu0 %v11762_v7  ;;  %v8275_v24 = vpop.f32.mrb[2].mxu1  ;;  %8617 = vmatpush1.bf16.msra.mxu1 %v11764_v8  ;;  %v1067_v7 = vld [vmem:[#allocation5 + $0x1e18] sm:$0xff] }
 0x274   :  { %v8071_v26 = vpop.f32.mrb[3].mxu0  ;;  %8413 = vmatprep.subr.bf16.mxu0 %v11779_v9  ;;  %v8276_v29 = vpop.f32.mrb[3].mxu1  ;;  %8618 = vmatprep.subr.bf16.mxu1 %v11781_v11  ;;  %v1075_v8 = vld [vmem:[#allocation5 + $0x1e58] sm:$0xff]  ;;  %v11858_v9 = vcombine.low %v1050_v60, %v1058_v61  ;;  %v11860_v11 = vcombine.low %v1051_v62, %v1059_v63  ;;  %v11874_v24 = vcombine.low %v1066_v5, %v1074_v6 }
 0x275   :  { %v11877_v15 = vcombine.high %v1067_v7, %v1075_v8  ;;  %v1083_v21 = vld [vmem:[#allocation5 + $0x1e98] sm:$0xff]  ;;  %v11876_v26 = vcombine.low %v1067_v7, %v1075_v8  ;;  %v1098_v29 = vld [vmem:[#allocation5 + $0x1f10] sm:$0xff]  ;;  %v11940_v63 = vcombine.low %v1131_v50, %v1139_v51 }
 0x276   :  { %v1147_v60 = vld [vmem:[#allocation5 + $0x2098] sm:$0xff] }
 0x277   :  { %8414 = vmatpush1.bf16.msra.mxu0 %v11778_v22  ;;  %8619 = vmatpush1.bf16.msra.mxu1 %v11780_v27  ;;  %v1091_v22 = vld [vmem:[#allocation5 + $0x1ed8] sm:$0xff]  ;;  %v11891_v27 = vcombine.high %v1082_v18, %v1090_v19 }
 0x278   :  { %8415 = vmatprep.subr.bf16.mxu0 %v11795_v28  ;;  %8620 = vmatprep.subr.bf16.mxu1 %v11797_v30  ;;  %v11893_v28 = vcombine.high %v1083_v21, %v1091_v22  ;;  %v1106_v30 = vld [vmem:[#allocation5 + $0x1f50] sm:$0xff]  ;;  %v11892_v35 = vcombine.low %v1083_v21, %v1091_v22  ;;  %v1155_v61 = vld [vmem:[#allocation5 + $0x20d8] sm:$0xff] }
 0x279   :  { %v11906_v43 = vcombine.low %v1098_v29, %v1106_v30  ;;  %v1163_v5 = vld [vmem:[#allocation5 + $0x2118] sm:$0xff]  ;;  %v11956_v8 = vcombine.low %v1147_v60, %v1155_v61 }
 0x27a   :  { %v1171_v6 = vld [vmem:[#allocation5 + $0x2158] sm:$0xff] }
 0x27b   :  { %8416 = vmatpush1.bf16.msra.mxu0 %v11794_v36  ;;  %8621 = vmatpush1.bf16.msra.mxu1 %v11796_v37  ;;  %v11907_v36 = vcombine.high %v1098_v29, %v1106_v30  ;;  %v11909_v37 = vcombine.high %v1099_v31, %v1107_v32  ;;  %v1179_v18 = vld [vmem:[#allocation5 + $0x2198] sm:$0xff]  ;;  %v11972_v22 = vcombine.low %v1163_v5, %v1171_v6 }
 0x27c   :  { %8417 = vmatprep.subr.bf16.mxu0 %v11811_v38  ;;  %8622 = vmatprep.subr.bf16.mxu1 %v11813_v40  ;;  %v1114_v38 = vld [vmem:[#allocation5 + $0x1f90] sm:$0xff]  ;;  %v1187_v19 = vld [vmem:[#allocation5 + $0x21d8] sm:$0xff] }
 0x27d   :  { %v1122_v40 = vld [vmem:[#allocation5 + $0x1fd0] sm:$0xff]  ;;  %v1195_v29 = vld [vmem:[#allocation5 + $0x2218] sm:$0xff]  ;;  %v11988_v32 = vcombine.low %v1179_v18, %v1187_v19 }
 0x27e   :  { %v11922_v52 = vcombine.low %v1114_v38, %v1122_v40  ;;  %v1203_v30 = vld [vmem:[#allocation5 + $0x2258] sm:$0xff] }
 0x27f   :  { %8418 = vmatpush1.bf16.msra.mxu0 %v11810_v45  ;;  %8623 = vmatpush1.bf16.msra.mxu1 %v11812_v46  ;;  %v11923_v45 = vcombine.high %v1114_v38, %v1122_v40  ;;  %v11925_v46 = vcombine.high %v1115_v41, %v1123_v42  ;;  %v1211_v38 = vld [vmem:[#allocation5 + $0x2298] sm:$0xff]  ;;  %v12004_v42 = vcombine.low %v1195_v29, %v1203_v30 }
 0x280   :  { %8419 = vmatprep.subr.bf16.mxu0 %v11827_v47  ;;  %8624 = vmatprep.subr.bf16.mxu1 %v11829_v49  ;;  %v1130_v47 = vld [vmem:[#allocation5 + $0x2010] sm:$0xff]  ;;  %v1219_v40 = vld [vmem:[#allocation5 + $0x22d8] sm:$0xff] }
 0x281   :  { %v1138_v49 = vld [vmem:[#allocation5 + $0x2050] sm:$0xff] }
 0x282   :  { %v11938_v62 = vcombine.low %v1130_v47, %v1138_v49 }
 0x283   :  { %8420 = vmatpush1.bf16.msra.mxu0 %v11826_v55  ;;  %8625 = vmatpush1.bf16.msra.mxu1 %v11828_v56  ;;  %v11939_v55 = vcombine.high %v1130_v47, %v1138_v49  ;;  %v11941_v56 = vcombine.high %v1131_v50, %v1139_v51  ;;  %v1227_v47 = vld [vmem:[#allocation5 + $0x2318] sm:$0xff]  ;;  %v12020_v51 = vcombine.low %v1211_v38, %v1219_v40 }
 0x284   :  { %8421 = vmatprep.subr.bf16.mxu0 %v11843_v58  ;;  %8626 = vmatprep.subr.bf16.mxu1 %v11845_v59  ;;  %v1146_v58 = vld [vmem:[#allocation5 + $0x2090] sm:$0xff]  ;;  %v1235_v49 = vld [vmem:[#allocation5 + $0x2358] sm:$0xff] }
 0x285   :  { %v1154_v59 = vld [vmem:[#allocation5 + $0x20d0] sm:$0xff] }
 0x286   :  { %v11954_v7 = vcombine.low %v1146_v58, %v1154_v59 }
 0x287   :  { %8422 = vmatpush1.bf16.msra.mxu0 %v11842_v0  ;;  %8627 = vmatpush1.bf16.msra.mxu1 %v11844_v2  ;;  %v11955_v0 = vcombine.high %v1146_v58, %v1154_v59  ;;  %v11957_v2 = vcombine.high %v1147_v60, %v1155_v61  ;;  %v1243_v58 = vld [vmem:[#allocation5 + $0x2398] sm:$0xff]  ;;  %v12036_v61 = vcombine.low %v1227_v47, %v1235_v49 }
 0x288   :  { %8423 = vmatprep.subr.bf16.mxu0 %v11859_v3  ;;  %8628 = vmatprep.subr.bf16.mxu1 %v11861_v4  ;;  %v1162_v3 = vld [vmem:[#allocation5 + $0x2110] sm:$0xff]  ;;  %v1251_v59 = vld [vmem:[#allocation5 + $0x23d8] sm:$0xff] }
 0x289   :  { %v1170_v4 = vld [vmem:[#allocation5 + $0x2150] sm:$0xff] }
 0x28a   :  { %v11970_v21 = vcombine.low %v1162_v3, %v1170_v4 }
 0x28b   :  { %8424 = vmatpush1.bf16.msra.mxu0 %v11858_v9  ;;  %8629 = vmatpush1.bf16.msra.mxu1 %v11860_v11  ;;  %v11971_v9 = vcombine.high %v1162_v3, %v1170_v4  ;;  %v11973_v11 = vcombine.high %v1163_v5, %v1171_v6  ;;  %v1259_v3 = vld [vmem:[#allocation5 + $0x2418] sm:$0xff]  ;;  %v12052_v6 = vcombine.low %v1243_v58, %v1251_v59 }
 0x28c   :  { %8425 = vmatprep.subr.bf16.mxu0 %v11875_v13  ;;  %8630 = vmatprep.subr.bf16.mxu1 %v11877_v15  ;;  %v1178_v13 = vld [vmem:[#allocation5 + $0x2190] sm:$0xff]  ;;  %v1267_v4 = vld [vmem:[#allocation5 + $0x2458] sm:$0xff] }
 0x28d   :  { %v1186_v15 = vld [vmem:[#allocation5 + $0x21d0] sm:$0xff] }
 0x28e   :  { %v11986_v31 = vcombine.low %v1178_v13, %v1186_v15 }
 0x28f   :  { %8426 = vmatpush1.bf16.msra.mxu0 %v11874_v24  ;;  %8631 = vmatpush1.bf16.msra.mxu1 %v11876_v26  ;;  %v11987_v24 = vcombine.high %v1178_v13, %v1186_v15  ;;  %v11989_v26 = vcombine.high %v1179_v18, %v1187_v19  ;;  %v1275_v13 = vld [vmem:[#allocation5 + $0x2498] sm:$0xff]  ;;  %v12068_v19 = vcombine.low %v1259_v3, %v1267_v4 }
 0x290   :  { %8427 = vmatprep.subr.bf16.mxu0 %v11891_v27  ;;  %8632 = vmatprep.subr.bf16.mxu1 %v11893_v28  ;;  %v1194_v27 = vld [vmem:[#allocation5 + $0x2210] sm:$0xff]  ;;  %v1283_v15 = vld [vmem:[#allocation5 + $0x24d8] sm:$0xff] }
 0x291   :  { %v1202_v28 = vld [vmem:[#allocation5 + $0x2250] sm:$0xff] }
 0x292   :  { %v12002_v41 = vcombine.low %v1194_v27, %v1202_v28 }
 0x293   :  { %8428 = vmatpush1.bf16.msra.mxu0 %v11890_v33  ;;  %8633 = vmatpush1.bf16.msra.mxu1 %v11892_v35  ;;  %v12003_v33 = vcombine.high %v1194_v27, %v1202_v28  ;;  %v12005_v35 = vcombine.high %v1195_v29, %v1203_v30  ;;  %v1291_v27 = vld [vmem:[#allocation5 + $0x2518] sm:$0xff]  ;;  %v12084_v30 = vcombine.low %v1275_v13, %v1283_v15 }
 0x294   :  { %8429 = vmatprep.subr.bf16.mxu0 %v11907_v36  ;;  %8634 = vmatprep.subr.bf16.mxu1 %v11909_v37  ;;  %v1210_v36 = vld [vmem:[#allocation5 + $0x2290] sm:$0xff]  ;;  %v1299_v28 = vld [vmem:[#allocation5 + $0x2558] sm:$0xff] }
 0x295   :  { %v1218_v37 = vld [vmem:[#allocation5 + $0x22d0] sm:$0xff] }
 0x296   :  { %v12018_v50 = vcombine.low %v1210_v36, %v1218_v37 }
 0x297   :  { %8430 = vmatpush1.bf16.msra.mxu0 %v11906_v43  ;;  %8635 = vmatpush1.bf16.msra.mxu1 %v11908_v44  ;;  %v12019_v43 = vcombine.high %v1210_v36, %v1218_v37  ;;  %v12021_v44 = vcombine.high %v1211_v38, %v1219_v40  ;;  %v1307_v36 = vld [vmem:[#allocation5 + $0x2598] sm:$0xff]  ;;  %v12100_v40 = vcombine.low %v1291_v27, %v1299_v28 }
 0x298   :  { %8431 = vmatprep.subr.bf16.mxu0 %v11923_v45  ;;  %8636 = vmatprep.subr.bf16.mxu1 %v11925_v46  ;;  %v1226_v45 = vld [vmem:[#allocation5 + $0x2310] sm:$0xff]  ;;  %v1315_v37 = vld [vmem:[#allocation5 + $0x25d8] sm:$0xff] }
 0x299   :  { %v1234_v46 = vld [vmem:[#allocation5 + $0x2350] sm:$0xff] }
 0x29a   :  { %v12034_v60 = vcombine.low %v1226_v45, %v1234_v46 }
 0x29b   :  { %8432 = vmatpush1.bf16.msra.mxu0 %v11922_v52  ;;  %8637 = vmatpush1.bf16.msra.mxu1 %v11924_v53  ;;  %v12035_v52 = vcombine.high %v1226_v45, %v1234_v46  ;;  %v12037_v53 = vcombine.high %v1227_v47, %v1235_v49  ;;  %v1323_v45 = vld [vmem:[#allocation5 + $0x2618] sm:$0xff]  ;;  %v12116_v49 = vcombine.low %v1307_v36, %v1315_v37 }
 0x29c   :  { %8442 = vmatprep.subr.bf16.mxu0 %v11939_v55  ;;  %8647 = vmatprep.subr.bf16.mxu1 %v11941_v56  ;;  %v1242_v55 = vld [vmem:[#allocation5 + $0x2390] sm:$0xff]  ;;  %v1331_v46 = vld [vmem:[#allocation5 + $0x2658] sm:$0xff] }
 0x29d   :  { %v1250_v56 = vld [vmem:[#allocation5 + $0x23d0] sm:$0xff] }
 0x29e   :  { %8434 = vmatmul.mubr.bf16.vlgmr.msra.gmra.mrb[4].mxu0 %v13078_v54  ;;  %8639 = vmatmul.mubr.bf16.vlgmr.msra.gmra.mrb[4].mxu1 %v13078_v54  ;;  %v12050_v5 = vcombine.low %v1242_v55, %v1250_v56 }
 0x29f   :  { %8443 = vmatpush1.bf16.msra.mxu0 %v11938_v62  ;;  %8648 = vmatpush1.bf16.msra.mxu1 %v11940_v63  ;;  %v12051_v62 = vcombine.high %v1242_v55, %v1250_v56  ;;  %v12053_v63 = vcombine.high %v1243_v58, %v1251_v59  ;;  %v1339_v55 = vld [vmem:[#allocation5 + $0x2698] sm:$0xff]  ;;  %v12132_v59 = vcombine.low %v1323_v45, %v1331_v46 }
 0x2a0   :  { %8444 = vmatprep.subr.bf16.mxu0 %v11955_v0  ;;  %8649 = vmatprep.subr.bf16.mxu1 %v11957_v2  ;;  %v1258_v0 = vld [vmem:[#allocation5 + $0x2410] sm:$0xff]  ;;  %v1347_v56 = vld [vmem:[#allocation5 + $0x26d8] sm:$0xff] }
 0x2a1   :  { %8474 = vmatprep.mubr.bf16.mxu0 %v13080_v1  ;;  %8679 = vmatprep.mubr.bf16.mxu1 %v13080_v1  ;;  %v1266_v2 = vld [vmem:[#allocation5 + $0x2450] sm:$0xff] }
 0x2a2   :  { %v12066_v18 = vcombine.low %v1258_v0, %v1266_v2 }
 0x2a3   :  { %8445 = vmatpush1.bf16.msra.mxu0 %v11954_v7  ;;  %8650 = vmatpush1.bf16.msra.mxu1 %v11956_v8  ;;  %v12067_v7 = vcombine.high %v1258_v0, %v1266_v2  ;;  %v12069_v8 = vcombine.high %v1259_v3, %v1267_v4  ;;  %v1355_v0 = vld [vmem:[#allocation5 + $0x2718] sm:$0xff]  ;;  %v12148_v4 = vcombine.low %v1339_v55, %v1347_v56 }
 0x2a4   :  { %8446 = vmatprep.subr.bf16.mxu0 %v11971_v9  ;;  %8651 = vmatprep.subr.bf16.mxu1 %v11973_v11  ;;  %v1274_v9 = vld [vmem:[#allocation5 + $0x2490] sm:$0xff]  ;;  %v1363_v2 = vld [vmem:[#allocation5 + $0x2758] sm:$0xff] }
 0x2a5   :  { %v1282_v11 = vld [vmem:[#allocation5 + $0x24d0] sm:$0xff] }
 0x2a6   :  { %v12082_v29 = vcombine.low %v1274_v9, %v1282_v11 }
 0x2a7   :  { %8447 = vmatpush1.bf16.msra.mxu0 %v11970_v21  ;;  %8652 = vmatpush1.bf16.msra.mxu1 %v11972_v22  ;;  %v12083_v21 = vcombine.high %v1274_v9, %v1282_v11  ;;  %v12085_v22 = vcombine.high %v1275_v13, %v1283_v15  ;;  %v1371_v9 = vld [vmem:[#allocation5 + $0x2798] sm:$0xff]  ;;  %v12164_v15 = vcombine.low %v1355_v0, %v1363_v2 }
 0x2a8   :  { %8448 = vmatprep.subr.bf16.mxu0 %v11987_v24  ;;  %8653 = vmatprep.subr.bf16.mxu1 %v11989_v26  ;;  %v1290_v24 = vld [vmem:[#allocation5 + $0x2510] sm:$0xff]  ;;  %v1379_v11 = vld [vmem:[#allocation5 + $0x27d8] sm:$0xff] }
 0x2a9   :  { %v1298_v26 = vld [vmem:[#allocation5 + $0x2550] sm:$0xff] }
 0x2aa   :  { %v12098_v38 = vcombine.low %v1290_v24, %v1298_v26 }
 0x2ab   :  { %8449 = vmatpush1.bf16.msra.mxu0 %v11986_v31  ;;  %8654 = vmatpush1.bf16.msra.mxu1 %v11988_v32  ;;  %v12099_v31 = vcombine.high %v1290_v24, %v1298_v26  ;;  %v12101_v32 = vcombine.high %v1291_v27, %v1299_v28  ;;  %v109_v24 = vld [vmem:[#allocation5 + $0x28] sm:$0xff]  ;;  %v12180_v28 = vcombine.low %v1371_v9, %v1379_v11 }
 0x2ac   :  { %8450 = vmatprep.subr.bf16.mxu0 %v12003_v33  ;;  %8655 = vmatprep.subr.bf16.mxu1 %v12005_v35  ;;  %v1306_v33 = vld [vmem:[#allocation5 + $0x2590] sm:$0xff]  ;;  %v117_v26 = vld [vmem:[#allocation5 + $0x68] sm:$0xff] }
 0x2ad   :  { %v1314_v35 = vld [vmem:[#allocation5 + $0x25d0] sm:$0xff] }
 0x2ae   :  { %v12114_v47 = vcombine.low %v1306_v33, %v1314_v35 }
 0x2af   :  { %8451 = vmatpush1.bf16.msra.mxu0 %v12002_v41  ;;  %8656 = vmatpush1.bf16.msra.mxu1 %v12004_v42  ;;  %v12115_v41 = vcombine.high %v1306_v33, %v1314_v35  ;;  %v12117_v42 = vcombine.high %v1307_v36, %v1315_v37  ;;  %v125_v33 = vld [vmem:[#allocation5 + $0xa8] sm:$0xff]  ;;  %v10920_v37 = vcombine.low %v109_v24, %v117_v26 }
 0x2b0   :  { %8452 = vmatprep.subr.bf16.mxu0 %v12019_v43  ;;  %8657 = vmatprep.subr.bf16.mxu1 %v12021_v44  ;;  %v1322_v43 = vld [vmem:[#allocation5 + $0x2610] sm:$0xff]  ;;  %v133_v35 = vld [vmem:[#allocation5 + $0xe8] sm:$0xff] }
 0x2b1   :  { %v1330_v44 = vld [vmem:[#allocation5 + $0x2650] sm:$0xff] }
 0x2b2   :  { %v12130_v58 = vcombine.low %v1322_v43, %v1330_v44 }
 0x2b3   :  { %8453 = vmatpush1.bf16.msra.mxu0 %v12018_v50  ;;  %8658 = vmatpush1.bf16.msra.mxu1 %v12020_v51  ;;  %v12131_v50 = vcombine.high %v1322_v43, %v1330_v44  ;;  %v12133_v51 = vcombine.high %v1323_v45, %v1331_v46  ;;  %v141_v43 = vld [vmem:[#allocation5 + $0x128] sm:$0xff]  ;;  %v10936_v46 = vcombine.low %v125_v33, %v133_v35 }
 0x2b4   :  { %8454 = vmatprep.subr.bf16.mxu0 %v12035_v52  ;;  %8659 = vmatprep.subr.bf16.mxu1 %v12037_v53  ;;  %v1338_v52 = vld [vmem:[#allocation5 + $0x2690] sm:$0xff]  ;;  %v149_v44 = vld [vmem:[#allocation5 + $0x168] sm:$0xff] }
 0x2b5   :  { %v1346_v53 = vld [vmem:[#allocation5 + $0x26d0] sm:$0xff] }
 0x2b6   :  { %v12146_v3 = vcombine.low %v1338_v52, %v1346_v53 }
 0x2b7   :  { %8455 = vmatpush1.bf16.msra.mxu0 %v12034_v60  ;;  %8660 = vmatpush1.bf16.msra.mxu1 %v12036_v61  ;;  %v12147_v60 = vcombine.high %v1338_v52, %v1346_v53  ;;  %v12149_v61 = vcombine.high %v1339_v55, %v1347_v56  ;;  %v157_v52 = vld [vmem:[#allocation5 + $0x1a8] sm:$0xff]  ;;  %v10952_v56 = vcombine.low %v141_v43, %v149_v44 }
 0x2b8   :  { %8456 = vmatprep.subr.bf16.mxu0 %v12051_v62  ;;  %8661 = vmatprep.subr.bf16.mxu1 %v12053_v63  ;;  %v1354_v62 = vld [vmem:[#allocation5 + $0x2710] sm:$0xff]  ;;  %v165_v53 = vld [vmem:[#allocation5 + $0x1e8] sm:$0xff] }
 0x2b9   :  { %v1362_v63 = vld [vmem:[#allocation5 + $0x2750] sm:$0xff] }
 0x2ba   :  { %v12162_v13 = vcombine.low %v1354_v62, %v1362_v63 }
 0x2bb   :  { %8457 = vmatpush1.bf16.msra.mxu0 %v12050_v5  ;;  %8662 = vmatpush1.bf16.msra.mxu1 %v12052_v6  ;;  %v12163_v5 = vcombine.high %v1354_v62, %v1362_v63  ;;  %v12165_v6 = vcombine.high %v1355_v0, %v1363_v2  ;;  %v173_v62 = vld [vmem:[#allocation5 + $0x228] sm:$0xff]  ;;  %v10968_v2 = vcombine.low %v157_v52, %v165_v53 }
 0x2bc   :  { %8458 = vmatprep.subr.bf16.mxu0 %v12067_v7  ;;  %8663 = vmatprep.subr.bf16.mxu1 %v12069_v8  ;;  %v1370_v7 = vld [vmem:[#allocation5 + $0x2790] sm:$0xff]  ;;  %v181_v63 = vld [vmem:[#allocation5 + $0x268] sm:$0xff] }
 0x2bd   :  { %v1378_v8 = vld [vmem:[#allocation5 + $0x27d0] sm:$0xff] }
 0x2be   :  { %v12178_v27 = vcombine.low %v1370_v7, %v1378_v8 }
 0x2bf   :  { %8459 = vmatpush1.bf16.msra.mxu0 %v12066_v18  ;;  %8664 = vmatpush1.bf16.msra.mxu1 %v12068_v19  ;;  %v12179_v18 = vcombine.high %v1370_v7, %v1378_v8  ;;  %v12181_v19 = vcombine.high %v1371_v9, %v1379_v11  ;;  %v189_v7 = vld [vmem:[#allocation5 + $0x2a8] sm:$0xff]  ;;  %v10984_v11 = vcombine.low %v173_v62, %v181_v63 }
 0x2c0   :  { %8460 = vmatprep.subr.bf16.mxu0 %v12083_v21  ;;  %8665 = vmatprep.subr.bf16.mxu1 %v12085_v22  ;;  %v108_v21 = vld [vmem:[#allocation5 + $0x20] sm:$0xff]  ;;  %v197_v8 = vld [vmem:[#allocation5 + $0x2e8] sm:$0xff] }
 0x2c1   :  { %v116_v22 = vld [vmem:[#allocation5 + $0x60] sm:$0xff] }
 0x2c2   :  { %v10918_v36 = vcombine.low %v108_v21, %v116_v22 }
 0x2c3   :  { %8461 = vmatpush1.bf16.msra.mxu0 %v12082_v29  ;;  %8666 = vmatpush1.bf16.msra.mxu1 %v12084_v30  ;;  %v10919_v29 = vcombine.high %v108_v21, %v116_v22  ;;  %v10921_v30 = vcombine.high %v109_v24, %v117_v26  ;;  %v205_v21 = vld [vmem:[#allocation5 + $0x328] sm:$0xff]  ;;  %v11000_v26 = vcombine.low %v189_v7, %v197_v8 }
 0x2c4   :  { %8462 = vmatprep.subr.bf16.mxu0 %v12099_v31  ;;  %8667 = vmatprep.subr.bf16.mxu1 %v12101_v32  ;;  %v124_v31 = vld [vmem:[#allocation5 + $0xa0] sm:$0xff]  ;;  %v213_v22 = vld [vmem:[#allocation5 + $0x368] sm:$0xff] }
 0x2c5   :  { %v132_v32 = vld [vmem:[#allocation5 + $0xe0] sm:$0xff] }
 0x2c6   :  { %v10934_v45 = vcombine.low %v124_v31, %v132_v32 }
 0x2c7   :  { %8463 = vmatpush1.bf16.msra.mxu0 %v12098_v38  ;;  %8668 = vmatpush1.bf16.msra.mxu1 %v12100_v40  ;;  %v10935_v38 = vcombine.high %v124_v31, %v132_v32  ;;  %v10937_v40 = vcombine.high %v125_v33, %v133_v35  ;;  %v221_v31 = vld [vmem:[#allocation5 + $0x3a8] sm:$0xff]  ;;  %v11016_v35 = vcombine.low %v205_v21, %v213_v22 }
 0x2c8   :  { %8464 = vmatprep.subr.bf16.mxu0 %v12115_v41  ;;  %8669 = vmatprep.subr.bf16.mxu1 %v12117_v42  ;;  %v140_v41 = vld [vmem:[#allocation5 + $0x120] sm:$0xff]  ;;  %v229_v32 = vld [vmem:[#allocation5 + $0x3e8] sm:$0xff] }
 0x2c9   :  { %v148_v42 = vld [vmem:[#allocation5 + $0x160] sm:$0xff] }
 0x2ca   :  { %v10950_v55 = vcombine.low %v140_v41, %v148_v42 }
 0x2cb   :  { %8465 = vmatpush1.bf16.msra.mxu0 %v12114_v47  ;;  %8670 = vmatpush1.bf16.msra.mxu1 %v12116_v49  ;;  %v10951_v47 = vcombine.high %v140_v41, %v148_v42  ;;  %v10953_v49 = vcombine.high %v141_v43, %v149_v44  ;;  %v237_v41 = vld [vmem:[#allocation5 + $0x428] sm:$0xff]  ;;  %v11032_v44 = vcombine.low %v221_v31, %v229_v32 }
 0x2cc   :  { %8466 = vmatprep.subr.bf16.mxu0 %v12131_v50  ;;  %8671 = vmatprep.subr.bf16.mxu1 %v12133_v51  ;;  %v156_v50 = vld [vmem:[#allocation5 + $0x1a0] sm:$0xff]  ;;  %v245_v42 = vld [vmem:[#allocation5 + $0x468] sm:$0xff] }
 0x2cd   :  { %v164_v51 = vld [vmem:[#allocation5 + $0x1e0] sm:$0xff] }
 0x2ce   :  { %v10966_v0 = vcombine.low %v156_v50, %v164_v51 }
 0x2cf   :  { %8467 = vmatpush1.bf16.msra.mxu0 %v12130_v58  ;;  %8672 = vmatpush1.bf16.msra.mxu1 %v12132_v59  ;;  %v10967_v58 = vcombine.high %v156_v50, %v164_v51  ;;  %v10969_v59 = vcombine.high %v157_v52, %v165_v53  ;;  %v253_v50 = vld [vmem:[#allocation5 + $0x4a8] sm:$0xff]  ;;  %v11048_v53 = vcombine.low %v237_v41, %v245_v42 }
 0x2d0   :  { %8468 = vmatprep.subr.bf16.mxu0 %v12147_v60  ;;  %8673 = vmatprep.subr.bf16.mxu1 %v12149_v61  ;;  %v172_v60 = vld [vmem:[#allocation5 + $0x220] sm:$0xff]  ;;  %v261_v51 = vld [vmem:[#allocation5 + $0x4e8] sm:$0xff] }
 0x2d1   :  { %v180_v61 = vld [vmem:[#allocation5 + $0x260] sm:$0xff] }
 0x2d2   :  { %v10982_v9 = vcombine.low %v172_v60, %v180_v61 }
 0x2d3   :  { %8469 = vmatpush1.bf16.msra.mxu0 %v12146_v3  ;;  %8674 = vmatpush1.bf16.msra.mxu1 %v12148_v4  ;;  %v10983_v3 = vcombine.high %v172_v60, %v180_v61  ;;  %v10985_v4 = vcombine.high %v173_v62, %v181_v63  ;;  %v269_v60 = vld [vmem:[#allocation5 + $0x528] sm:$0xff]  ;;  %v11064_v63 = vcombine.low %v253_v50, %v261_v51 }
 0x2d4   :  { %8470 = vmatprep.subr.bf16.mxu0 %v12163_v5  ;;  %8675 = vmatprep.subr.bf16.mxu1 %v12165_v6  ;;  %v188_v5 = vld [vmem:[#allocation5 + $0x2a0] sm:$0xff]  ;;  %v277_v61 = vld [vmem:[#allocation5 + $0x568] sm:$0xff] }
 0x2d5   :  { %v196_v6 = vld [vmem:[#allocation5 + $0x2e0] sm:$0xff] }
 0x2d6   :  { %v10998_v24 = vcombine.low %v188_v5, %v196_v6 }
 0x2d7   :  { %8471 = vmatpush1.bf16.msra.mxu0 %v12162_v13  ;;  %8676 = vmatpush1.bf16.msra.mxu1 %v12164_v15  ;;  %v10999_v13 = vcombine.high %v188_v5, %v196_v6  ;;  %v11001_v15 = vcombine.high %v189_v7, %v197_v8  ;;  %v285_v5 = vld [vmem:[#allocation5 + $0x5a8] sm:$0xff]  ;;  %v11080_v8 = vcombine.low %v269_v60, %v277_v61 }
 0x2d8   :  { %8472 = vmatprep.subr.bf16.mxu0 %v12179_v18  ;;  %8677 = vmatprep.subr.bf16.mxu1 %v12181_v19  ;;  %v204_v18 = vld [vmem:[#allocation5 + $0x320] sm:$0xff]  ;;  %v293_v6 = vld [vmem:[#allocation5 + $0x5e8] sm:$0xff] }
 0x2d9   :  { %v212_v19 = vld [vmem:[#allocation5 + $0x360] sm:$0xff] }
 0x2da   :  { %v11014_v33 = vcombine.low %v204_v18, %v212_v19 }
 0x2db   :  { %8473 = vmatpush1.bf16.msra.mxu0 %v12178_v27  ;;  %8678 = vmatpush1.bf16.msra.mxu1 %v12180_v28  ;;  %v11015_v27 = vcombine.high %v204_v18, %v212_v19  ;;  %v11017_v28 = vcombine.high %v205_v21, %v213_v22  ;;  %v301_v18 = vld [vmem:[#allocation5 + $0x628] sm:$0xff]  ;;  %v11096_v22 = vcombine.low %v285_v5, %v293_v6 }
 0x2dc   :  { %8688 = vmatprep.subr.bf16.mxu0 %v10919_v29  ;;  %8893 = vmatprep.subr.bf16.mxu1 %v10921_v30  ;;  %v220_v29 = vld [vmem:[#allocation5 + $0x3a0] sm:$0xff]  ;;  %v309_v19 = vld [vmem:[#allocation5 + $0x668] sm:$0xff] }
 0x2dd   :  { %v228_v30 = vld [vmem:[#allocation5 + $0x3e0] sm:$0xff] }
 0x2de   :  { %8475 = vmatmul.mubr.bf16.vlgmr.msra.gmra.mrb[4].mxu0 %v13086_v14  ;;  %8680 = vmatmul.mubr.bf16.vlgmr.msra.gmra.mrb[4].mxu1 %v13086_v14  ;;  %v11030_v43 = vcombine.low %v220_v29, %v228_v30 }
 0x2df   :  { %8689 = vmatpush1.bf16.msra.mxu0 %v10918_v36  ;;  %8894 = vmatpush1.bf16.msra.mxu1 %v10920_v37  ;;  %v11031_v36 = vcombine.high %v220_v29, %v228_v30  ;;  %v11033_v37 = vcombine.high %v221_v31, %v229_v32  ;;  %v317_v29 = vld [vmem:[#allocation5 + $0x6a8] sm:$0xff]  ;;  %v11112_v32 = vcombine.low %v301_v18, %v309_v19 }
 0x2e0   :  { %8690 = vmatprep.subr.bf16.mxu0 %v10935_v38  ;;  %8895 = vmatprep.subr.bf16.mxu1 %v10937_v40  ;;  %v236_v38 = vld [vmem:[#allocation5 + $0x420] sm:$0xff]  ;;  %v325_v30 = vld [vmem:[#allocation5 + $0x6e8] sm:$0xff] }
 0x2e1   :  { %8720 = vmatprep.mubr.bf16.mxu0 %v13050_v57  ;;  %8925 = vmatprep.mubr.bf16.mxu1 %v13050_v57  ;;  %v244_v40 = vld [vmem:[#allocation5 + $0x460] sm:$0xff] }
 0x2e2   :  { %v11046_v52 = vcombine.low %v236_v38, %v244_v40 }
 0x2e3   :  { %8691 = vmatpush1.bf16.msra.mxu0 %v10934_v45  ;;  %8896 = vmatpush1.bf16.msra.mxu1 %v10936_v46  ;;  %v11047_v45 = vcombine.high %v236_v38, %v244_v40  ;;  %v11049_v46 = vcombine.high %v237_v41, %v245_v42  ;;  %v333_v38 = vld [vmem:[#allocation5 + $0x728] sm:$0xff]  ;;  %v11128_v42 = vcombine.low %v317_v29, %v325_v30 }
 0x2e4   :  { %8692 = vmatprep.subr.bf16.mxu0 %v10951_v47  ;;  %8897 = vmatprep.subr.bf16.mxu1 %v10953_v49  ;;  %v252_v47 = vld [vmem:[#allocation5 + $0x4a0] sm:$0xff]  ;;  %v341_v40 = vld [vmem:[#allocation5 + $0x768] sm:$0xff] }
 0x2e5   :  { %v260_v49 = vld [vmem:[#allocation5 + $0x4e0] sm:$0xff] }
 0x2e6   :  { %v11062_v62 = vcombine.low %v252_v47, %v260_v49 }
 0x2e7   :  { %8693 = vmatpush1.bf16.msra.mxu0 %v10950_v55  ;;  %8898 = vmatpush1.bf16.msra.mxu1 %v10952_v56  ;;  %v11063_v55 = vcombine.high %v252_v47, %v260_v49  ;;  %v11065_v56 = vcombine.high %v253_v50, %v261_v51  ;;  %v349_v47 = vld [vmem:[#allocation5 + $0x7a8] sm:$0xff]  ;;  %v11144_v51 = vcombine.low %v333_v38, %v341_v40 }
 0x2e8   :  { %8694 = vmatprep.subr.bf16.mxu0 %v10967_v58  ;;  %8899 = vmatprep.subr.bf16.mxu1 %v10969_v59  ;;  %v268_v58 = vld [vmem:[#allocation5 + $0x520] sm:$0xff]  ;;  %v357_v49 = vld [vmem:[#allocation5 + $0x7e8] sm:$0xff] }
 0x2e9   :  { %v276_v59 = vld [vmem:[#allocation5 + $0x560] sm:$0xff] }
 0x2ea   :  { %v11078_v7 = vcombine.low %v268_v58, %v276_v59 }
 0x2eb   :  { %8695 = vmatpush1.bf16.msra.mxu0 %v10966_v0  ;;  %8900 = vmatpush1.bf16.msra.mxu1 %v10968_v2  ;;  %v11079_v0 = vcombine.high %v268_v58, %v276_v59  ;;  %v11081_v2 = vcombine.high %v269_v60, %v277_v61  ;;  %v365_v58 = vld [vmem:[#allocation5 + $0x828] sm:$0xff]  ;;  %v11160_v61 = vcombine.low %v349_v47, %v357_v49 }
 0x2ec   :  { %8696 = vmatprep.subr.bf16.mxu0 %v10983_v3  ;;  %8901 = vmatprep.subr.bf16.mxu1 %v10985_v4  ;;  %v284_v3 = vld [vmem:[#allocation5 + $0x5a0] sm:$0xff]  ;;  %v373_v59 = vld [vmem:[#allocation5 + $0x868] sm:$0xff] }
 0x2ed   :  { %v292_v4 = vld [vmem:[#allocation5 + $0x5e0] sm:$0xff] }
 0x2ee   :  { %v11094_v21 = vcombine.low %v284_v3, %v292_v4 }
 0x2ef   :  { %8697 = vmatpush1.bf16.msra.mxu0 %v10982_v9  ;;  %8902 = vmatpush1.bf16.msra.mxu1 %v10984_v11  ;;  %v11095_v9 = vcombine.high %v284_v3, %v292_v4  ;;  %v11097_v11 = vcombine.high %v285_v5, %v293_v6  ;;  %v381_v3 = vld [vmem:[#allocation5 + $0x8a8] sm:$0xff]  ;;  %v11176_v6 = vcombine.low %v365_v58, %v373_v59 }
 0x2f0   :  { %8698 = vmatprep.subr.bf16.mxu0 %v10999_v13  ;;  %8903 = vmatprep.subr.bf16.mxu1 %v11001_v15  ;;  %v300_v13 = vld [vmem:[#allocation5 + $0x620] sm:$0xff]  ;;  %v389_v4 = vld [vmem:[#allocation5 + $0x8e8] sm:$0xff] }
 0x2f1   :  { %v308_v15 = vld [vmem:[#allocation5 + $0x660] sm:$0xff] }
 0x2f2   :  { %v11110_v31 = vcombine.low %v300_v13, %v308_v15 }
 0x2f3   :  { %8699 = vmatpush1.bf16.msra.mxu0 %v10998_v24  ;;  %8904 = vmatpush1.bf16.msra.mxu1 %v11000_v26  ;;  %v11111_v24 = vcombine.high %v300_v13, %v308_v15  ;;  %v11113_v26 = vcombine.high %v301_v18, %v309_v19  ;;  %v397_v13 = vld [vmem:[#allocation5 + $0x928] sm:$0xff]  ;;  %v11192_v19 = vcombine.low %v381_v3, %v389_v4 }
 0x2f4   :  { %8700 = vmatprep.subr.bf16.mxu0 %v11015_v27  ;;  %8905 = vmatprep.subr.bf16.mxu1 %v11017_v28  ;;  %v316_v27 = vld [vmem:[#allocation5 + $0x6a0] sm:$0xff]  ;;  %v405_v15 = vld [vmem:[#allocation5 + $0x968] sm:$0xff] }
 0x2f5   :  { %v324_v28 = vld [vmem:[#allocation5 + $0x6e0] sm:$0xff] }
 0x2f6   :  { %v11126_v41 = vcombine.low %v316_v27, %v324_v28 }
 0x2f7   :  { %8701 = vmatpush1.bf16.msra.mxu0 %v11014_v33  ;;  %8906 = vmatpush1.bf16.msra.mxu1 %v11016_v35  ;;  %v11127_v33 = vcombine.high %v316_v27, %v324_v28  ;;  %v11129_v35 = vcombine.high %v317_v29, %v325_v30  ;;  %v413_v27 = vld [vmem:[#allocation5 + $0x9a8] sm:$0xff]  ;;  %v11208_v30 = vcombine.low %v397_v13, %v405_v15 }
 0x2f8   :  { %8702 = vmatprep.subr.bf16.mxu0 %v11031_v36  ;;  %8907 = vmatprep.subr.bf16.mxu1 %v11033_v37  ;;  %v332_v36 = vld [vmem:[#allocation5 + $0x720] sm:$0xff]  ;;  %v421_v28 = vld [vmem:[#allocation5 + $0x9e8] sm:$0xff] }
 0x2f9   :  { %v340_v37 = vld [vmem:[#allocation5 + $0x760] sm:$0xff] }
 0x2fa   :  { %v11142_v50 = vcombine.low %v332_v36, %v340_v37 }
 0x2fb   :  { %8703 = vmatpush1.bf16.msra.mxu0 %v11030_v43  ;;  %8908 = vmatpush1.bf16.msra.mxu1 %v11032_v44  ;;  %v11143_v43 = vcombine.high %v332_v36, %v340_v37  ;;  %v11145_v44 = vcombine.high %v333_v38, %v341_v40  ;;  %v429_v36 = vld [vmem:[#allocation5 + $0xa28] sm:$0xff]  ;;  %v11224_v40 = vcombine.low %v413_v27, %v421_v28 }
 0x2fc   :  { %8704 = vmatprep.subr.bf16.mxu0 %v11047_v45  ;;  %8909 = vmatprep.subr.bf16.mxu1 %v11049_v46  ;;  %v348_v45 = vld [vmem:[#allocation5 + $0x7a0] sm:$0xff]  ;;  %v437_v37 = vld [vmem:[#allocation5 + $0xa68] sm:$0xff] }
 0x2fd   :  { %v356_v46 = vld [vmem:[#allocation5 + $0x7e0] sm:$0xff] }
 0x2fe   :  { %v11158_v60 = vcombine.low %v348_v45, %v356_v46 }
 0x2ff   :  { %8705 = vmatpush1.bf16.msra.mxu0 %v11046_v52  ;;  %8910 = vmatpush1.bf16.msra.mxu1 %v11048_v53  ;;  %v11159_v52 = vcombine.high %v348_v45, %v356_v46  ;;  %v11161_v53 = vcombine.high %v349_v47, %v357_v49  ;;  %v445_v45 = vld [vmem:[#allocation5 + $0xaa8] sm:$0xff]  ;;  %v11240_v49 = vcombine.low %v429_v36, %v437_v37 }
 0x300   :  { %8706 = vmatprep.subr.bf16.mxu0 %v11063_v55  ;;  %8911 = vmatprep.subr.bf16.mxu1 %v11065_v56  ;;  %v364_v55 = vld [vmem:[#allocation5 + $0x820] sm:$0xff]  ;;  %v453_v46 = vld [vmem:[#allocation5 + $0xae8] sm:$0xff] }
 0x301   :  { %v372_v56 = vld [vmem:[#allocation5 + $0x860] sm:$0xff] }
 0x302   :  { %v11174_v5 = vcombine.low %v364_v55, %v372_v56 }
 0x303   :  { %8707 = vmatpush1.bf16.msra.mxu0 %v11062_v62  ;;  %8912 = vmatpush1.bf16.msra.mxu1 %v11064_v63  ;;  %v11175_v62 = vcombine.high %v364_v55, %v372_v56  ;;  %v11177_v63 = vcombine.high %v365_v58, %v373_v59  ;;  %v461_v55 = vld [vmem:[#allocation5 + $0xb28] sm:$0xff]  ;;  %v11256_v59 = vcombine.low %v445_v45, %v453_v46 }
 0x304   :  { %8708 = vmatprep.subr.bf16.mxu0 %v11079_v0  ;;  %8913 = vmatprep.subr.bf16.mxu1 %v11081_v2  ;;  %v380_v0 = vld [vmem:[#allocation5 + $0x8a0] sm:$0xff]  ;;  %v469_v56 = vld [vmem:[#allocation5 + $0xb68] sm:$0xff] }
 0x305   :  { %v388_v2 = vld [vmem:[#allocation5 + $0x8e0] sm:$0xff] }
 0x306   :  { %v11190_v18 = vcombine.low %v380_v0, %v388_v2 }
 0x307   :  { %8709 = vmatpush1.bf16.msra.mxu0 %v11078_v7  ;;  %8914 = vmatpush1.bf16.msra.mxu1 %v11080_v8  ;;  %v11191_v7 = vcombine.high %v380_v0, %v388_v2  ;;  %v11193_v8 = vcombine.high %v381_v3, %v389_v4  ;;  %v477_v0 = vld [vmem:[#allocation5 + $0xba8] sm:$0xff]  ;;  %v11272_v4 = vcombine.low %v461_v55, %v469_v56 }
 0x308   :  { %8710 = vmatprep.subr.bf16.mxu0 %v11095_v9  ;;  %8915 = vmatprep.subr.bf16.mxu1 %v11097_v11  ;;  %v396_v9 = vld [vmem:[#allocation5 + $0x920] sm:$0xff]  ;;  %v485_v2 = vld [vmem:[#allocation5 + $0xbe8] sm:$0xff] }
 0x309   :  { %v404_v11 = vld [vmem:[#allocation5 + $0x960] sm:$0xff] }
 0x30a   :  { %v11206_v29 = vcombine.low %v396_v9, %v404_v11 }
 0x30b   :  { %8711 = vmatpush1.bf16.msra.mxu0 %v11094_v21  ;;  %8916 = vmatpush1.bf16.msra.mxu1 %v11096_v22  ;;  %v11207_v21 = vcombine.high %v396_v9, %v404_v11  ;;  %v11209_v22 = vcombine.high %v397_v13, %v405_v15  ;;  %v493_v9 = vld [vmem:[#allocation5 + $0xc28] sm:$0xff]  ;;  %v11288_v15 = vcombine.low %v477_v0, %v485_v2 }
 0x30c   :  { %8712 = vmatprep.subr.bf16.mxu0 %v11111_v24  ;;  %8917 = vmatprep.subr.bf16.mxu1 %v11113_v26  ;;  %v412_v24 = vld [vmem:[#allocation5 + $0x9a0] sm:$0xff]  ;;  %v501_v11 = vld [vmem:[#allocation5 + $0xc68] sm:$0xff] }
 0x30d   :  { %v420_v26 = vld [vmem:[#allocation5 + $0x9e0] sm:$0xff] }
 0x30e   :  { %v11222_v38 = vcombine.low %v412_v24, %v420_v26 }
 0x30f   :  { %8713 = vmatpush1.bf16.msra.mxu0 %v11110_v31  ;;  %8918 = vmatpush1.bf16.msra.mxu1 %v11112_v32  ;;  %v11223_v31 = vcombine.high %v412_v24, %v420_v26  ;;  %v11225_v32 = vcombine.high %v413_v27, %v421_v28  ;;  %v509_v24 = vld [vmem:[#allocation5 + $0xca8] sm:$0xff]  ;;  %v11304_v28 = vcombine.low %v493_v9, %v501_v11 }
 0x310   :  { %8714 = vmatprep.subr.bf16.mxu0 %v11127_v33  ;;  %8919 = vmatprep.subr.bf16.mxu1 %v11129_v35  ;;  %v428_v33 = vld [vmem:[#allocation5 + $0xa20] sm:$0xff]  ;;  %v517_v26 = vld [vmem:[#allocation5 + $0xce8] sm:$0xff] }
 0x311   :  { %v436_v35 = vld [vmem:[#allocation5 + $0xa60] sm:$0xff] }
 0x312   :  { %v11238_v47 = vcombine.low %v428_v33, %v436_v35 }
 0x313   :  { %8715 = vmatpush1.bf16.msra.mxu0 %v11126_v41  ;;  %8920 = vmatpush1.bf16.msra.mxu1 %v11128_v42  ;;  %v11239_v41 = vcombine.high %v428_v33, %v436_v35  ;;  %v11241_v42 = vcombine.high %v429_v36, %v437_v37  ;;  %v525_v33 = vld [vmem:[#allocation5 + $0xd28] sm:$0xff]  ;;  %v11320_v37 = vcombine.low %v509_v24, %v517_v26 }
 0x314   :  { %8716 = vmatprep.subr.bf16.mxu0 %v11143_v43  ;;  %8921 = vmatprep.subr.bf16.mxu1 %v11145_v44  ;;  %v444_v43 = vld [vmem:[#allocation5 + $0xaa0] sm:$0xff]  ;;  %v533_v35 = vld [vmem:[#allocation5 + $0xd68] sm:$0xff] }
 0x315   :  { %v452_v44 = vld [vmem:[#allocation5 + $0xae0] sm:$0xff] }
 0x316   :  { %v11254_v58 = vcombine.low %v444_v43, %v452_v44 }
 0x317   :  { %8717 = vmatpush1.bf16.msra.mxu0 %v11142_v50  ;;  %8922 = vmatpush1.bf16.msra.mxu1 %v11144_v51  ;;  %v11255_v50 = vcombine.high %v444_v43, %v452_v44  ;;  %v11257_v51 = vcombine.high %v445_v45, %v453_v46  ;;  %v541_v43 = vld [vmem:[#allocation5 + $0xda8] sm:$0xff]  ;;  %v11336_v46 = vcombine.low %v525_v33, %v533_v35 }
 0x318   :  { %8718 = vmatprep.subr.bf16.mxu0 %v11159_v52  ;;  %8923 = vmatprep.subr.bf16.mxu1 %v11161_v53  ;;  %v460_v52 = vld [vmem:[#allocation5 + $0xb20] sm:$0xff]  ;;  %v549_v44 = vld [vmem:[#allocation5 + $0xde8] sm:$0xff] }
 0x319   :  { %v468_v53 = vld [vmem:[#allocation5 + $0xb60] sm:$0xff] }
 0x31a   :  { %v11270_v3 = vcombine.low %v460_v52, %v468_v53 }
 0x31b   :  { %8719 = vmatpush1.bf16.msra.mxu0 %v11158_v60  ;;  %8924 = vmatpush1.bf16.msra.mxu1 %v11160_v61  ;;  %v11271_v60 = vcombine.high %v460_v52, %v468_v53  ;;  %v11273_v61 = vcombine.high %v461_v55, %v469_v56  ;;  %v557_v52 = vld [vmem:[#allocation5 + $0xe28] sm:$0xff]  ;;  %v11352_v56 = vcombine.low %v541_v43, %v549_v44 }
 0x31c   :  { %8729 = vmatprep.subr.bf16.mxu0 %v11175_v62  ;;  %8934 = vmatprep.subr.bf16.mxu1 %v11177_v63  ;;  %v476_v62 = vld [vmem:[#allocation5 + $0xba0] sm:$0xff]  ;;  %v565_v53 = vld [vmem:[#allocation5 + $0xe68] sm:$0xff] }
 0x31d   :  { %v484_v63 = vld [vmem:[#allocation5 + $0xbe0] sm:$0xff] }
 0x31e   :  { %8721 = vmatmul.mubr.bf16.vlgmr.msra.gmra.mrb[8].mxu0 %v13054_v12  ;;  %8926 = vmatmul.mubr.bf16.vlgmr.msra.gmra.mrb[8].mxu1 %v13054_v12  ;;  %v11286_v13 = vcombine.low %v476_v62, %v484_v63 }
 0x31f   :  { %8730 = vmatpush1.bf16.msra.mxu0 %v11174_v5  ;;  %8935 = vmatpush1.bf16.msra.mxu1 %v11176_v6  ;;  %v11287_v5 = vcombine.high %v476_v62, %v484_v63  ;;  %v11289_v6 = vcombine.high %v477_v0, %v485_v2  ;;  %v573_v62 = vld [vmem:[#allocation5 + $0xea8] sm:$0xff]  ;;  %v11368_v2 = vcombine.low %v557_v52, %v565_v53 }
 0x320   :  { %8731 = vmatprep.subr.bf16.mxu0 %v11191_v7  ;;  %8936 = vmatprep.subr.bf16.mxu1 %v11193_v8  ;;  %v492_v7 = vld [vmem:[#allocation5 + $0xc20] sm:$0xff]  ;;  %v581_v63 = vld [vmem:[#allocation5 + $0xee8] sm:$0xff] }
 0x321   :  { %8761 = vmatprep.mubr.bf16.mxu0 %v13056_v23  ;;  %8966 = vmatprep.mubr.bf16.mxu1 %v13056_v23  ;;  %v500_v8 = vld [vmem:[#allocation5 + $0xc60] sm:$0xff] }
 0x322   :  { %v11302_v27 = vcombine.low %v492_v7, %v500_v8 }
 0x323   :  { %8732 = vmatpush1.bf16.msra.mxu0 %v11190_v18  ;;  %8937 = vmatpush1.bf16.msra.mxu1 %v11192_v19  ;;  %v11303_v18 = vcombine.high %v492_v7, %v500_v8  ;;  %v11305_v19 = vcombine.high %v493_v9, %v501_v11  ;;  %v589_v7 = vld [vmem:[#allocation5 + $0xf28] sm:$0xff]  ;;  %v11384_v11 = vcombine.low %v573_v62, %v581_v63 }
 0x324   :  { %8733 = vmatprep.subr.bf16.mxu0 %v11207_v21  ;;  %8938 = vmatprep.subr.bf16.mxu1 %v11209_v22  ;;  %v508_v21 = vld [vmem:[#allocation5 + $0xca0] sm:$0xff]  ;;  %v597_v8 = vld [vmem:[#allocation5 + $0xf68] sm:$0xff] }
 0x325   :  { %v516_v22 = vld [vmem:[#allocation5 + $0xce0] sm:$0xff] }
 0x326   :  { %v11318_v36 = vcombine.low %v508_v21, %v516_v22 }
 0x327   :  { %8734 = vmatpush1.bf16.msra.mxu0 %v11206_v29  ;;  %8939 = vmatpush1.bf16.msra.mxu1 %v11208_v30  ;;  %v11319_v29 = vcombine.high %v508_v21, %v516_v22  ;;  %v11321_v30 = vcombine.high %v509_v24, %v517_v26  ;;  %v605_v21 = vld [vmem:[#allocation5 + $0xfa8] sm:$0xff]  ;;  %v11400_v26 = vcombine.low %v589_v7, %v597_v8 }
 0x328   :  { %8735 = vmatprep.subr.bf16.mxu0 %v11223_v31  ;;  %8940 = vmatprep.subr.bf16.mxu1 %v11225_v32  ;;  %v524_v31 = vld [vmem:[#allocation5 + $0xd20] sm:$0xff]  ;;  %v613_v22 = vld [vmem:[#allocation5 + $0xfe8] sm:$0xff] }
 0x329   :  { %v532_v32 = vld [vmem:[#allocation5 + $0xd60] sm:$0xff] }
 0x32a   :  { %v11334_v45 = vcombine.low %v524_v31, %v532_v32 }
 0x32b   :  { %8736 = vmatpush1.bf16.msra.mxu0 %v11222_v38  ;;  %8941 = vmatpush1.bf16.msra.mxu1 %v11224_v40  ;;  %v11335_v38 = vcombine.high %v524_v31, %v532_v32  ;;  %v11337_v40 = vcombine.high %v525_v33, %v533_v35  ;;  %v621_v31 = vld [vmem:[#allocation5 + $0x1028] sm:$0xff]  ;;  %v11416_v35 = vcombine.low %v605_v21, %v613_v22 }
 0x32c   :  { %8737 = vmatprep.subr.bf16.mxu0 %v11239_v41  ;;  %8942 = vmatprep.subr.bf16.mxu1 %v11241_v42  ;;  %v540_v41 = vld [vmem:[#allocation5 + $0xda0] sm:$0xff]  ;;  %v629_v32 = vld [vmem:[#allocation5 + $0x1068] sm:$0xff] }
 0x32d   :  { %v548_v42 = vld [vmem:[#allocation5 + $0xde0] sm:$0xff] }
 0x32e   :  { %v11350_v55 = vcombine.low %v540_v41, %v548_v42 }
 0x32f   :  { %8738 = vmatpush1.bf16.msra.mxu0 %v11238_v47  ;;  %8943 = vmatpush1.bf16.msra.mxu1 %v11240_v49  ;;  %v11351_v47 = vcombine.high %v540_v41, %v548_v42  ;;  %v11353_v49 = vcombine.high %v541_v43, %v549_v44  ;;  %v637_v41 = vld [vmem:[#allocation5 + $0x10a8] sm:$0xff]  ;;  %v11432_v44 = vcombine.low %v621_v31, %v629_v32 }
 0x330   :  { %8739 = vmatprep.subr.bf16.mxu0 %v11255_v50  ;;  %8944 = vmatprep.subr.bf16.mxu1 %v11257_v51  ;;  %v556_v50 = vld [vmem:[#allocation5 + $0xe20] sm:$0xff]  ;;  %v645_v42 = vld [vmem:[#allocation5 + $0x10e8] sm:$0xff] }
 0x331   :  { %v564_v51 = vld [vmem:[#allocation5 + $0xe60] sm:$0xff] }
 0x332   :  { %v11366_v0 = vcombine.low %v556_v50, %v564_v51 }
 0x333   :  { %8740 = vmatpush1.bf16.msra.mxu0 %v11254_v58  ;;  %8945 = vmatpush1.bf16.msra.mxu1 %v11256_v59  ;;  %v11367_v58 = vcombine.high %v556_v50, %v564_v51  ;;  %v11369_v59 = vcombine.high %v557_v52, %v565_v53  ;;  %v653_v50 = vld [vmem:[#allocation5 + $0x1128] sm:$0xff]  ;;  %v11448_v53 = vcombine.low %v637_v41, %v645_v42 }
 0x334   :  { %8741 = vmatprep.subr.bf16.mxu0 %v11271_v60  ;;  %8946 = vmatprep.subr.bf16.mxu1 %v11273_v61  ;;  %v572_v60 = vld [vmem:[#allocation5 + $0xea0] sm:$0xff]  ;;  %v661_v51 = vld [vmem:[#allocation5 + $0x1168] sm:$0xff] }
 0x335   :  { %v580_v61 = vld [vmem:[#allocation5 + $0xee0] sm:$0xff] }
 0x336   :  { %v11382_v9 = vcombine.low %v572_v60, %v580_v61 }
 0x337   :  { %8742 = vmatpush1.bf16.msra.mxu0 %v11270_v3  ;;  %8947 = vmatpush1.bf16.msra.mxu1 %v11272_v4  ;;  %v11383_v3 = vcombine.high %v572_v60, %v580_v61  ;;  %v11385_v4 = vcombine.high %v573_v62, %v581_v63  ;;  %v669_v60 = vld [vmem:[#allocation5 + $0x11a8] sm:$0xff]  ;;  %v11464_v63 = vcombine.low %v653_v50, %v661_v51 }
 0x338   :  { %8743 = vmatprep.subr.bf16.mxu0 %v11287_v5  ;;  %8948 = vmatprep.subr.bf16.mxu1 %v11289_v6  ;;  %v588_v5 = vld [vmem:[#allocation5 + $0xf20] sm:$0xff]  ;;  %v677_v61 = vld [vmem:[#allocation5 + $0x11e8] sm:$0xff] }
 0x339   :  { %v596_v6 = vld [vmem:[#allocation5 + $0xf60] sm:$0xff] }
 0x33a   :  { %v11398_v24 = vcombine.low %v588_v5, %v596_v6 }
 0x33b   :  { %8744 = vmatpush1.bf16.msra.mxu0 %v11286_v13  ;;  %8949 = vmatpush1.bf16.msra.mxu1 %v11288_v15  ;;  %v11399_v13 = vcombine.high %v588_v5, %v596_v6  ;;  %v11401_v15 = vcombine.high %v589_v7, %v597_v8  ;;  %v685_v5 = vld [vmem:[#allocation5 + $0x1228] sm:$0xff]  ;;  %v11480_v8 = vcombine.low %v669_v60, %v677_v61 }
 0x33c   :  { %8745 = vmatprep.subr.bf16.mxu0 %v11303_v18  ;;  %8950 = vmatprep.subr.bf16.mxu1 %v11305_v19  ;;  %v604_v18 = vld [vmem:[#allocation5 + $0xfa0] sm:$0xff]  ;;  %v693_v6 = vld [vmem:[#allocation5 + $0x1268] sm:$0xff] }
 0x33d   :  { %v612_v19 = vld [vmem:[#allocation5 + $0xfe0] sm:$0xff] }
 0x33e   :  { %v11414_v33 = vcombine.low %v604_v18, %v612_v19 }
 0x33f   :  { %8746 = vmatpush1.bf16.msra.mxu0 %v11302_v27  ;;  %8951 = vmatpush1.bf16.msra.mxu1 %v11304_v28  ;;  %v11415_v27 = vcombine.high %v604_v18, %v612_v19  ;;  %v11417_v28 = vcombine.high %v605_v21, %v613_v22  ;;  %v701_v18 = vld [vmem:[#allocation5 + $0x12a8] sm:$0xff]  ;;  %v11496_v22 = vcombine.low %v685_v5, %v693_v6 }
 0x340   :  { %8747 = vmatprep.subr.bf16.mxu0 %v11319_v29  ;;  %8952 = vmatprep.subr.bf16.mxu1 %v11321_v30  ;;  %v620_v29 = vld [vmem:[#allocation5 + $0x1020] sm:$0xff]  ;;  %v709_v19 = vld [vmem:[#allocation5 + $0x12e8] sm:$0xff] }
 0x341   :  { %v628_v30 = vld [vmem:[#allocation5 + $0x1060] sm:$0xff] }
 0x342   :  { %v11430_v43 = vcombine.low %v620_v29, %v628_v30 }
 0x343   :  { %8748 = vmatpush1.bf16.msra.mxu0 %v11318_v36  ;;  %8953 = vmatpush1.bf16.msra.mxu1 %v11320_v37  ;;  %v11431_v36 = vcombine.high %v620_v29, %v628_v30  ;;  %v11433_v37 = vcombine.high %v621_v31, %v629_v32  ;;  %v717_v29 = vld [vmem:[#allocation5 + $0x1328] sm:$0xff]  ;;  %v11512_v32 = vcombine.low %v701_v18, %v709_v19 }
 0x344   :  { %8749 = vmatprep.subr.bf16.mxu0 %v11335_v38  ;;  %8954 = vmatprep.subr.bf16.mxu1 %v11337_v40  ;;  %v636_v38 = vld [vmem:[#allocation5 + $0x10a0] sm:$0xff]  ;;  %v725_v30 = vld [vmem:[#allocation5 + $0x1368] sm:$0xff] }
 0x345   :  { %v644_v40 = vld [vmem:[#allocation5 + $0x10e0] sm:$0xff] }
 0x346   :  { %v11446_v52 = vcombine.low %v636_v38, %v644_v40 }
 0x347   :  { %8750 = vmatpush1.bf16.msra.mxu0 %v11334_v45  ;;  %8955 = vmatpush1.bf16.msra.mxu1 %v11336_v46  ;;  %v11447_v45 = vcombine.high %v636_v38, %v644_v40  ;;  %v11449_v46 = vcombine.high %v637_v41, %v645_v42  ;;  %v733_v38 = vld [vmem:[#allocation5 + $0x13a8] sm:$0xff]  ;;  %v11528_v42 = vcombine.low %v717_v29, %v725_v30 }
 0x348   :  { %8751 = vmatprep.subr.bf16.mxu0 %v11351_v47  ;;  %8956 = vmatprep.subr.bf16.mxu1 %v11353_v49  ;;  %v652_v47 = vld [vmem:[#allocation5 + $0x1120] sm:$0xff]  ;;  %v741_v40 = vld [vmem:[#allocation5 + $0x13e8] sm:$0xff] }
 0x349   :  { %v660_v49 = vld [vmem:[#allocation5 + $0x1160] sm:$0xff] }
 0x34a   :  { %v11462_v62 = vcombine.low %v652_v47, %v660_v49 }
 0x34b   :  { %8752 = vmatpush1.bf16.msra.mxu0 %v11350_v55  ;;  %8957 = vmatpush1.bf16.msra.mxu1 %v11352_v56  ;;  %v11463_v55 = vcombine.high %v652_v47, %v660_v49  ;;  %v11465_v56 = vcombine.high %v653_v50, %v661_v51  ;;  %v749_v47 = vld [vmem:[#allocation5 + $0x1428] sm:$0xff]  ;;  %v11544_v51 = vcombine.low %v733_v38, %v741_v40 }
 0x34c   :  { %8753 = vmatprep.subr.bf16.mxu0 %v11367_v58  ;;  %8958 = vmatprep.subr.bf16.mxu1 %v11369_v59  ;;  %v668_v58 = vld [vmem:[#allocation5 + $0x11a0] sm:$0xff]  ;;  %v757_v49 = vld [vmem:[#allocation5 + $0x1468] sm:$0xff] }
 0x34d   :  { %v676_v59 = vld [vmem:[#allocation5 + $0x11e0] sm:$0xff] }
 0x34e   :  { %v11478_v7 = vcombine.low %v668_v58, %v676_v59 }
 0x34f   :  { %8754 = vmatpush1.bf16.msra.mxu0 %v11366_v0  ;;  %8959 = vmatpush1.bf16.msra.mxu1 %v11368_v2  ;;  %v11479_v0 = vcombine.high %v668_v58, %v676_v59  ;;  %v11481_v2 = vcombine.high %v669_v60, %v677_v61  ;;  %v765_v58 = vld [vmem:[#allocation5 + $0x14a8] sm:$0xff]  ;;  %v11560_v61 = vcombine.low %v749_v47, %v757_v49 }
 0x350   :  { %8755 = vmatprep.subr.bf16.mxu0 %v11383_v3  ;;  %8960 = vmatprep.subr.bf16.mxu1 %v11385_v4  ;;  %v684_v3 = vld [vmem:[#allocation5 + $0x1220] sm:$0xff]  ;;  %v773_v59 = vld [vmem:[#allocation5 + $0x14e8] sm:$0xff] }
 0x351   :  { %v692_v4 = vld [vmem:[#allocation5 + $0x1260] sm:$0xff] }
 0x352   :  { %v11494_v21 = vcombine.low %v684_v3, %v692_v4 }
 0x353   :  { %8756 = vmatpush1.bf16.msra.mxu0 %v11382_v9  ;;  %8961 = vmatpush1.bf16.msra.mxu1 %v11384_v11  ;;  %v11495_v9 = vcombine.high %v684_v3, %v692_v4  ;;  %v11497_v11 = vcombine.high %v685_v5, %v693_v6  ;;  %v781_v3 = vld [vmem:[#allocation5 + $0x1528] sm:$0xff]  ;;  %v11576_v6 = vcombine.low %v765_v58, %v773_v59 }
 0x354   :  { %8757 = vmatprep.subr.bf16.mxu0 %v11399_v13  ;;  %8962 = vmatprep.subr.bf16.mxu1 %v11401_v15  ;;  %v700_v13 = vld [vmem:[#allocation5 + $0x12a0] sm:$0xff]  ;;  %v789_v4 = vld [vmem:[#allocation5 + $0x1568] sm:$0xff] }
 0x355   :  { %v708_v15 = vld [vmem:[#allocation5 + $0x12e0] sm:$0xff] }
 0x356   :  { %v11510_v31 = vcombine.low %v700_v13, %v708_v15 }
 0x357   :  { %8758 = vmatpush1.bf16.msra.mxu0 %v11398_v24  ;;  %8963 = vmatpush1.bf16.msra.mxu1 %v11400_v26  ;;  %v11511_v24 = vcombine.high %v700_v13, %v708_v15  ;;  %v11513_v26 = vcombine.high %v701_v18, %v709_v19  ;;  %v797_v13 = vld [vmem:[#allocation5 + $0x15a8] sm:$0xff]  ;;  %v11592_v19 = vcombine.low %v781_v3, %v789_v4 }
 0x358   :  { %8759 = vmatprep.subr.bf16.mxu0 %v11415_v27  ;;  %8964 = vmatprep.subr.bf16.mxu1 %v11417_v28  ;;  %v716_v27 = vld [vmem:[#allocation5 + $0x1320] sm:$0xff]  ;;  %v805_v15 = vld [vmem:[#allocation5 + $0x15e8] sm:$0xff] }
 0x359   :  { %v724_v28 = vld [vmem:[#allocation5 + $0x1360] sm:$0xff] }
 0x35a   :  { %v11526_v41 = vcombine.low %v716_v27, %v724_v28 }
 0x35b   :  { %8760 = vmatpush1.bf16.msra.mxu0 %v11414_v33  ;;  %8965 = vmatpush1.bf16.msra.mxu1 %v11416_v35  ;;  %v11527_v33 = vcombine.high %v716_v27, %v724_v28  ;;  %v11529_v35 = vcombine.high %v717_v29, %v725_v30  ;;  %v813_v27 = vld [vmem:[#allocation5 + $0x1628] sm:$0xff]  ;;  %v11608_v30 = vcombine.low %v797_v13, %v805_v15 }
 0x35c   :  { %8770 = vmatprep.subr.bf16.mxu0 %v11431_v36  ;;  %8975 = vmatprep.subr.bf16.mxu1 %v11433_v37  ;;  %v732_v36 = vld [vmem:[#allocation5 + $0x13a0] sm:$0xff]  ;;  %v821_v28 = vld [vmem:[#allocation5 + $0x1668] sm:$0xff] }
 0x35d   :  { %v740_v37 = vld [vmem:[#allocation5 + $0x13e0] sm:$0xff] }
 0x35e   :  { %8762 = vmatmul.mubr.bf16.vlgmr.msra.gmra.mrb[8].mxu0 %v13062_v25  ;;  %8967 = vmatmul.mubr.bf16.vlgmr.msra.gmra.mrb[8].mxu1 %v13062_v25  ;;  %v11542_v50 = vcombine.low %v732_v36, %v740_v37 }
 0x35f   :  { %8771 = vmatpush1.bf16.msra.mxu0 %v11430_v43  ;;  %8976 = vmatpush1.bf16.msra.mxu1 %v11432_v44  ;;  %v11543_v43 = vcombine.high %v732_v36, %v740_v37  ;;  %v11545_v44 = vcombine.high %v733_v38, %v741_v40  ;;  %v829_v36 = vld [vmem:[#allocation5 + $0x16a8] sm:$0xff]  ;;  %v11624_v40 = vcombine.low %v813_v27, %v821_v28 }
 0x360   :  { %8772 = vmatprep.subr.bf16.mxu0 %v11447_v45  ;;  %8977 = vmatprep.subr.bf16.mxu1 %v11449_v46  ;;  %v748_v45 = vld [vmem:[#allocation5 + $0x1420] sm:$0xff]  ;;  %v837_v37 = vld [vmem:[#allocation5 + $0x16e8] sm:$0xff] }
 0x361   :  { %8802 = vmatprep.mubr.bf16.mxu0 %v13064_v34  ;;  %9007 = vmatprep.mubr.bf16.mxu1 %v13064_v34  ;;  %v756_v46 = vld [vmem:[#allocation5 + $0x1460] sm:$0xff] }
 0x362   :  { %v11558_v60 = vcombine.low %v748_v45, %v756_v46 }
 0x363   :  { %8773 = vmatpush1.bf16.msra.mxu0 %v11446_v52  ;;  %8978 = vmatpush1.bf16.msra.mxu1 %v11448_v53  ;;  %v11559_v52 = vcombine.high %v748_v45, %v756_v46  ;;  %v11561_v53 = vcombine.high %v749_v47, %v757_v49  ;;  %v845_v45 = vld [vmem:[#allocation5 + $0x1728] sm:$0xff]  ;;  %v11640_v49 = vcombine.low %v829_v36, %v837_v37 }
 0x364   :  { %8774 = vmatprep.subr.bf16.mxu0 %v11463_v55  ;;  %8979 = vmatprep.subr.bf16.mxu1 %v11465_v56  ;;  %v764_v55 = vld [vmem:[#allocation5 + $0x14a0] sm:$0xff]  ;;  %v853_v46 = vld [vmem:[#allocation5 + $0x1768] sm:$0xff] }
 0x365   :  { %v772_v56 = vld [vmem:[#allocation5 + $0x14e0] sm:$0xff] }
 0x366   :  { %v11574_v5 = vcombine.low %v764_v55, %v772_v56 }
 0x367   :  { %8775 = vmatpush1.bf16.msra.mxu0 %v11462_v62  ;;  %8980 = vmatpush1.bf16.msra.mxu1 %v11464_v63  ;;  %v11575_v62 = vcombine.high %v764_v55, %v772_v56  ;;  %v11577_v63 = vcombine.high %v765_v58, %v773_v59  ;;  %v861_v55 = vld [vmem:[#allocation5 + $0x17a8] sm:$0xff]  ;;  %v11656_v59 = vcombine.low %v845_v45, %v853_v46 }
 0x368   :  { %8776 = vmatprep.subr.bf16.mxu0 %v11479_v0  ;;  %8981 = vmatprep.subr.bf16.mxu1 %v11481_v2  ;;  %v780_v0 = vld [vmem:[#allocation5 + $0x1520] sm:$0xff]  ;;  %v869_v56 = vld [vmem:[#allocation5 + $0x17e8] sm:$0xff] }
 0x369   :  { %v788_v2 = vld [vmem:[#allocation5 + $0x1560] sm:$0xff] }
 0x36a   :  { %v11590_v18 = vcombine.low %v780_v0, %v788_v2 }
 0x36b   :  { %8777 = vmatpush1.bf16.msra.mxu0 %v11478_v7  ;;  %8982 = vmatpush1.bf16.msra.mxu1 %v11480_v8  ;;  %v11591_v7 = vcombine.high %v780_v0, %v788_v2  ;;  %v11593_v8 = vcombine.high %v781_v3, %v789_v4  ;;  %v877_v0 = vld [vmem:[#allocation5 + $0x1828] sm:$0xff]  ;;  %v11672_v4 = vcombine.low %v861_v55, %v869_v56 }
 0x36c   :  { %8778 = vmatprep.subr.bf16.mxu0 %v11495_v9  ;;  %8983 = vmatprep.subr.bf16.mxu1 %v11497_v11  ;;  %v796_v9 = vld [vmem:[#allocation5 + $0x15a0] sm:$0xff]  ;;  %v885_v2 = vld [vmem:[#allocation5 + $0x1868] sm:$0xff] }
 0x36d   :  { %v804_v11 = vld [vmem:[#allocation5 + $0x15e0] sm:$0xff] }
 0x36e   :  { %v11606_v29 = vcombine.low %v796_v9, %v804_v11 }
 0x36f   :  { %8779 = vmatpush1.bf16.msra.mxu0 %v11494_v21  ;;  %8984 = vmatpush1.bf16.msra.mxu1 %v11496_v22  ;;  %v11607_v21 = vcombine.high %v796_v9, %v804_v11  ;;  %v11609_v22 = vcombine.high %v797_v13, %v805_v15  ;;  %v893_v9 = vld [vmem:[#allocation5 + $0x18a8] sm:$0xff]  ;;  %v11688_v15 = vcombine.low %v877_v0, %v885_v2 }
 0x370   :  { %8780 = vmatprep.subr.bf16.mxu0 %v11511_v24  ;;  %8985 = vmatprep.subr.bf16.mxu1 %v11513_v26  ;;  %v812_v24 = vld [vmem:[#allocation5 + $0x1620] sm:$0xff]  ;;  %v901_v11 = vld [vmem:[#allocation5 + $0x18e8] sm:$0xff] }
 0x371   :  { %v820_v26 = vld [vmem:[#allocation5 + $0x1660] sm:$0xff] }
 0x372   :  { %v11622_v38 = vcombine.low %v812_v24, %v820_v26 }
 0x373   :  { %8781 = vmatpush1.bf16.msra.mxu0 %v11510_v31  ;;  %8986 = vmatpush1.bf16.msra.mxu1 %v11512_v32  ;;  %v11623_v31 = vcombine.high %v812_v24, %v820_v26  ;;  %v11625_v32 = vcombine.high %v813_v27, %v821_v28  ;;  %v909_v24 = vld [vmem:[#allocation5 + $0x1928] sm:$0xff]  ;;  %v11704_v28 = vcombine.low %v893_v9, %v901_v11 }
 0x374   :  { %8782 = vmatprep.subr.bf16.mxu0 %v11527_v33  ;;  %8987 = vmatprep.subr.bf16.mxu1 %v11529_v35  ;;  %v828_v33 = vld [vmem:[#allocation5 + $0x16a0] sm:$0xff]  ;;  %v917_v26 = vld [vmem:[#allocation5 + $0x1968] sm:$0xff] }
 0x375   :  { %v836_v35 = vld [vmem:[#allocation5 + $0x16e0] sm:$0xff] }
 0x376   :  { %v11638_v47 = vcombine.low %v828_v33, %v836_v35 }
 0x377   :  { %8783 = vmatpush1.bf16.msra.mxu0 %v11526_v41  ;;  %8988 = vmatpush1.bf16.msra.mxu1 %v11528_v42  ;;  %v11639_v41 = vcombine.high %v828_v33, %v836_v35  ;;  %v11641_v42 = vcombine.high %v829_v36, %v837_v37  ;;  %v925_v33 = vld [vmem:[#allocation5 + $0x19a8] sm:$0xff]  ;;  %v11720_v37 = vcombine.low %v909_v24, %v917_v26 }
 0x378   :  { %8784 = vmatprep.subr.bf16.mxu0 %v11543_v43  ;;  %8989 = vmatprep.subr.bf16.mxu1 %v11545_v44  ;;  %v844_v43 = vld [vmem:[#allocation5 + $0x1720] sm:$0xff]  ;;  %v933_v35 = vld [vmem:[#allocation5 + $0x19e8] sm:$0xff] }
 0x379   :  { %v852_v44 = vld [vmem:[#allocation5 + $0x1760] sm:$0xff] }
 0x37a   :  { %v11654_v58 = vcombine.low %v844_v43, %v852_v44 }
 0x37b   :  { %8785 = vmatpush1.bf16.msra.mxu0 %v11542_v50  ;;  %8990 = vmatpush1.bf16.msra.mxu1 %v11544_v51  ;;  %v11655_v50 = vcombine.high %v844_v43, %v852_v44  ;;  %v11657_v51 = vcombine.high %v845_v45, %v853_v46  ;;  %v941_v43 = vld [vmem:[#allocation5 + $0x1a28] sm:$0xff]  ;;  %v11736_v46 = vcombine.low %v925_v33, %v933_v35 }
 0x37c   :  { %8786 = vmatprep.subr.bf16.mxu0 %v11559_v52  ;;  %8991 = vmatprep.subr.bf16.mxu1 %v11561_v53  ;;  %v860_v52 = vld [vmem:[#allocation5 + $0x17a0] sm:$0xff]  ;;  %v949_v44 = vld [vmem:[#allocation5 + $0x1a68] sm:$0xff] }
 0x37d   :  { %v868_v53 = vld [vmem:[#allocation5 + $0x17e0] sm:$0xff] }
 0x37e   :  { %v11670_v3 = vcombine.low %v860_v52, %v868_v53 }
 0x37f   :  { %8787 = vmatpush1.bf16.msra.mxu0 %v11558_v60  ;;  %8992 = vmatpush1.bf16.msra.mxu1 %v11560_v61  ;;  %v11671_v60 = vcombine.high %v860_v52, %v868_v53  ;;  %v11673_v61 = vcombine.high %v861_v55, %v869_v56  ;;  %v957_v52 = vld [vmem:[#allocation5 + $0x1aa8] sm:$0xff]  ;;  %v11752_v56 = vcombine.low %v941_v43, %v949_v44 }
 0x380   :  { %8788 = vmatprep.subr.bf16.mxu0 %v11575_v62  ;;  %8993 = vmatprep.subr.bf16.mxu1 %v11577_v63  ;;  %v876_v62 = vld [vmem:[#allocation5 + $0x1820] sm:$0xff]  ;;  %v965_v53 = vld [vmem:[#allocation5 + $0x1ae8] sm:$0xff] }
 0x381   :  { %v884_v63 = vld [vmem:[#allocation5 + $0x1860] sm:$0xff] }
 0x382   :  { %v11686_v13 = vcombine.low %v876_v62, %v884_v63 }
 0x383   :  { %8789 = vmatpush1.bf16.msra.mxu0 %v11574_v5  ;;  %8994 = vmatpush1.bf16.msra.mxu1 %v11576_v6  ;;  %v11687_v5 = vcombine.high %v876_v62, %v884_v63  ;;  %v11689_v6 = vcombine.high %v877_v0, %v885_v2  ;;  %v973_v62 = vld [vmem:[#allocation5 + $0x1b28] sm:$0xff]  ;;  %v11768_v2 = vcombine.low %v957_v52, %v965_v53 }
 0x384   :  { %8790 = vmatprep.subr.bf16.mxu0 %v11591_v7  ;;  %8995 = vmatprep.subr.bf16.mxu1 %v11593_v8  ;;  %v892_v7 = vld [vmem:[#allocation5 + $0x18a0] sm:$0xff]  ;;  %v981_v63 = vld [vmem:[#allocation5 + $0x1b68] sm:$0xff] }
 0x385   :  { %v900_v8 = vld [vmem:[#allocation5 + $0x18e0] sm:$0xff] }
 0x386   :  { %v11702_v27 = vcombine.low %v892_v7, %v900_v8 }
 0x387   :  { %8791 = vmatpush1.bf16.msra.mxu0 %v11590_v18  ;;  %8996 = vmatpush1.bf16.msra.mxu1 %v11592_v19  ;;  %v11703_v18 = vcombine.high %v892_v7, %v900_v8  ;;  %v11705_v19 = vcombine.high %v893_v9, %v901_v11  ;;  %v996_v7 = vld [vmem:[#allocation5 + $0x1be0] sm:$0xff]  ;;  %v989_v11 = vld [vmem:[#allocation5 + $0x1ba8] sm:$0xff] }
 0x388   :  { %8792 = vmatprep.subr.bf16.mxu0 %v11607_v21  ;;  %8997 = vmatprep.subr.bf16.mxu1 %v11609_v22  ;;  %v908_v21 = vld [vmem:[#allocation5 + $0x1920] sm:$0xff] }
 0x389   :  { %v916_v22 = vld [vmem:[#allocation5 + $0x1960] sm:$0xff] }
 0x38a   :  { %v11718_v36 = vcombine.low %v908_v21, %v916_v22 }
 0x38b   :  { %8793 = vmatpush1.bf16.msra.mxu0 %v11606_v29  ;;  %8998 = vmatpush1.bf16.msra.mxu1 %v11608_v30  ;;  %v11719_v29 = vcombine.high %v908_v21, %v916_v22  ;;  %v11721_v30 = vcombine.high %v909_v24, %v917_v26  ;;  %v11784_v24 = vcombine.low %v973_v62, %v981_v63 }
 0x38c   :  { %8794 = vmatprep.subr.bf16.mxu0 %v11623_v31  ;;  %8999 = vmatprep.subr.bf16.mxu1 %v11625_v32  ;;  %v924_v31 = vld [vmem:[#allocation5 + $0x19a0] sm:$0xff] }
 0x38d   :  { %v932_v32 = vld [vmem:[#allocation5 + $0x19e0] sm:$0xff] }
 0x38e   :  { %v11734_v45 = vcombine.low %v924_v31, %v932_v32 }
 0x38f   :  { %8795 = vmatpush1.bf16.msra.mxu0 %v11622_v38  ;;  %9000 = vmatpush1.bf16.msra.mxu1 %v11624_v40  ;;  %v11735_v38 = vcombine.high %v924_v31, %v932_v32  ;;  %v11737_v40 = vcombine.high %v925_v33, %v933_v35  ;;  %v1005_v31 = vld [vmem:[#allocation5 + $0x1c28] sm:$0xff] }
 0x390   :  { %8796 = vmatprep.subr.bf16.mxu0 %v11639_v41  ;;  %9001 = vmatprep.subr.bf16.mxu1 %v11641_v42  ;;  %v940_v41 = vld [vmem:[#allocation5 + $0x1a20] sm:$0xff]  ;;  %v1013_v32 = vld [vmem:[#allocation5 + $0x1c68] sm:$0xff] }
 0x391   :  { %v948_v42 = vld [vmem:[#allocation5 + $0x1a60] sm:$0xff] }
 0x392   :  { %v11750_v55 = vcombine.low %v940_v41, %v948_v42 }
 0x393   :  { %8797 = vmatpush1.bf16.msra.mxu0 %v11638_v47  ;;  %9002 = vmatpush1.bf16.msra.mxu1 %v11640_v49  ;;  %v11751_v47 = vcombine.high %v940_v41, %v948_v42  ;;  %v11753_v49 = vcombine.high %v941_v43, %v949_v44  ;;  %v1021_v41 = vld [vmem:[#allocation5 + $0x1ca8] sm:$0xff]  ;;  %v11816_v44 = vcombine.low %v1005_v31, %v1013_v32 }
 0x394   :  { %8798 = vmatprep.subr.bf16.mxu0 %v11655_v50  ;;  %9003 = vmatprep.subr.bf16.mxu1 %v11657_v51  ;;  %v956_v50 = vld [vmem:[#allocation5 + $0x1aa0] sm:$0xff]  ;;  %v1029_v42 = vld [vmem:[#allocation5 + $0x1ce8] sm:$0xff] }
 0x395   :  { %v964_v51 = vld [vmem:[#allocation5 + $0x1ae0] sm:$0xff] }
 0x396   :  { %v11766_v0 = vcombine.low %v956_v50, %v964_v51 }
 0x397   :  { %8799 = vmatpush1.bf16.msra.mxu0 %v11654_v58  ;;  %9004 = vmatpush1.bf16.msra.mxu1 %v11656_v59  ;;  %v11767_v58 = vcombine.high %v956_v50, %v964_v51  ;;  %v11769_v59 = vcombine.high %v957_v52, %v965_v53  ;;  %v1037_v50 = vld [vmem:[#allocation5 + $0x1d28] sm:$0xff]  ;;  %v11832_v53 = vcombine.low %v1021_v41, %v1029_v42 }
 0x398   :  { %8800 = vmatprep.subr.bf16.mxu0 %v11671_v60  ;;  %9005 = vmatprep.subr.bf16.mxu1 %v11673_v61  ;;  %v972_v60 = vld [vmem:[#allocation5 + $0x1b20] sm:$0xff]  ;;  %v1045_v51 = vld [vmem:[#allocation5 + $0x1d68] sm:$0xff] }
 0x399   :  { %v980_v61 = vld [vmem:[#allocation5 + $0x1b60] sm:$0xff] }
 0x39b   :  { %8801 = vmatpush1.bf16.msra.mxu0 %v11670_v3  ;;  %9006 = vmatpush1.bf16.msra.mxu1 %v11672_v4  ;;  %v11783_v3 = vcombine.high %v972_v60, %v980_v61 }
 0x39c   :  { %8811 = vmatprep.subr.bf16.mxu0 %v11687_v5  ;;  %9016 = vmatprep.subr.bf16.mxu1 %v11689_v6  ;;  %v11785_v5 = vcombine.high %v973_v62, %v981_v63  ;;  %v988_v6 = vld [vmem:[#allocation5 + $0x1ba0] sm:$0xff]  ;;  %v11848_v63 = vcombine.low %v1037_v50, %v1045_v51 }
 0x39d   :  { %v11799_v26 = vcombine.high %v988_v6, %v996_v7  ;;  %v11798_v33 = vcombine.low %v988_v6, %v996_v7  ;;  %v1069_v6 = vld [vmem:[#allocation5 + $0x1e28] sm:$0xff] }
 0x39e   :  { %8803 = vmatmul.mubr.bf16.vlgmr.msra.gmra.mrb[8].mxu0 %v13070_v39  ;;  %9008 = vmatmul.mubr.bf16.vlgmr.msra.gmra.mrb[8].mxu1 %v13070_v39  ;;  %v1077_v7 = vld [vmem:[#allocation5 + $0x1e68] sm:$0xff] }
 0x39f   :  { %8812 = vmatpush1.bf16.msra.mxu0 %v11686_v13  ;;  %9017 = vmatpush1.bf16.msra.mxu1 %v11688_v15  ;;  %v997_v13 = vld [vmem:[#allocation5 + $0x1be8] sm:$0xff] }
 0x3a0   :  { %8813 = vmatprep.subr.bf16.mxu0 %v11703_v18  ;;  %9018 = vmatprep.subr.bf16.mxu1 %v11705_v19  ;;  %v11782_v19 = vcombine.low %v972_v60, %v980_v61  ;;  %v11800_v35 = vcombine.low %v989_v11, %v997_v13  ;;  %v1053_v60 = vld [vmem:[#allocation5 + $0x1da8] sm:$0xff] }
 0x3a1   :  { %8843 = vmatprep.mubr.bf16.mxu0 %v13072_v48  ;;  %9048 = vmatprep.mubr.bf16.mxu1 %v13072_v48  ;;  %v1061_v61 = vld [vmem:[#allocation5 + $0x1de8] sm:$0xff] }
 0x3a3   :  { %8814 = vmatpush1.bf16.msra.mxu0 %v11702_v27  ;;  %9019 = vmatpush1.bf16.msra.mxu1 %v11704_v28  ;;  %v11801_v28 = vcombine.high %v989_v11, %v997_v13  ;;  %v11864_v13 = vcombine.low %v1053_v60, %v1061_v61 }
 0x3a4   :  { %8815 = vmatprep.subr.bf16.mxu0 %v11719_v29  ;;  %9020 = vmatprep.subr.bf16.mxu1 %v11721_v30  ;;  %v1004_v29 = vld [vmem:[#allocation5 + $0x1c20] sm:$0xff] }
 0x3a5   :  { %v1012_v30 = vld [vmem:[#allocation5 + $0x1c60] sm:$0xff] }
 0x3a6   :  { %v11814_v43 = vcombine.low %v1004_v29, %v1012_v30 }
 0x3a7   :  { %8816 = vmatpush1.bf16.msra.mxu0 %v11718_v36  ;;  %9021 = vmatpush1.bf16.msra.mxu1 %v11720_v37  ;;  %v11815_v36 = vcombine.high %v1004_v29, %v1012_v30  ;;  %v11817_v37 = vcombine.high %v1005_v31, %v1013_v32  ;;  %v1100_v31 = vld [vmem:[#allocation5 + $0x1f20] sm:$0xff] }
 0x3a8   :  { %8817 = vmatprep.subr.bf16.mxu0 %v11735_v38  ;;  %9022 = vmatprep.subr.bf16.mxu1 %v11737_v40  ;;  %v1020_v38 = vld [vmem:[#allocation5 + $0x1ca0] sm:$0xff] }
 0x3a9   :  { %v1028_v40 = vld [vmem:[#allocation5 + $0x1ce0] sm:$0xff] }
 0x3aa   :  { %v11830_v52 = vcombine.low %v1020_v38, %v1028_v40  ;;  %v1108_v32 = vld [vmem:[#allocation5 + $0x1f60] sm:$0xff] }
 0x3ab   :  { %8818 = vmatpush1.bf16.msra.mxu0 %v11734_v45  ;;  %9023 = vmatpush1.bf16.msra.mxu1 %v11736_v46  ;;  %v11831_v45 = vcombine.high %v1020_v38, %v1028_v40  ;;  %v11833_v46 = vcombine.high %v1021_v41, %v1029_v42  ;;  %v11911_v38 = vcombine.high %v1100_v31, %v1108_v32  ;;  %v1116_v41 = vld [vmem:[#allocation5 + $0x1fa0] sm:$0xff] }
 0x3ac   :  { %8819 = vmatprep.subr.bf16.mxu0 %v11751_v47  ;;  %9024 = vmatprep.subr.bf16.mxu1 %v11753_v49  ;;  %v1036_v47 = vld [vmem:[#allocation5 + $0x1d20] sm:$0xff] }
 0x3ad   :  { %v1044_v49 = vld [vmem:[#allocation5 + $0x1d60] sm:$0xff] }
 0x3ae   :  { %v11846_v62 = vcombine.low %v1036_v47, %v1044_v49  ;;  %v1124_v42 = vld [vmem:[#allocation5 + $0x1fe0] sm:$0xff] }
 0x3af   :  { %8820 = vmatpush1.bf16.msra.mxu0 %v11750_v55  ;;  %9025 = vmatpush1.bf16.msra.mxu1 %v11752_v56  ;;  %v11847_v55 = vcombine.high %v1036_v47, %v1044_v49  ;;  %v11849_v56 = vcombine.high %v1037_v50, %v1045_v51  ;;  %v11927_v47 = vcombine.high %v1116_v41, %v1124_v42  ;;  %v1132_v50 = vld [vmem:[#allocation5 + $0x2020] sm:$0xff] }
 0x3b0   :  { %8821 = vmatprep.subr.bf16.mxu0 %v11767_v58  ;;  %9026 = vmatprep.subr.bf16.mxu1 %v11769_v59  ;;  %v1052_v58 = vld [vmem:[#allocation5 + $0x1da0] sm:$0xff] }
 0x3b1   :  { %v13132_v4 = vpop.f32.mrb[4].mxu0  ;;  %v13134_v8 = vpop.f32.mrb[4].mxu1  ;;  %v1060_v59 = vld [vmem:[#allocation5 + $0x1de0] sm:$0xff] }
 0x3b2   :  { %v13136_v9 = vpop.f32.mrb[5].mxu0  ;;  %v13138_v15 = vpop.f32.mrb[5].mxu1  ;;  %v11862_v11 = vcombine.low %v1052_v58, %v1060_v59  ;;  %v1140_v51 = vld [vmem:[#allocation5 + $0x2060] sm:$0xff] }
 0x3b3   :  { %v8480_v18 = vpop.f32.mrb[6].mxu0  ;;  %8822 = vmatpush1.bf16.msra.mxu0 %v11766_v0  ;;  %v8685_v21 = vpop.f32.mrb[6].mxu1  ;;  %9027 = vmatpush1.bf16.msra.mxu1 %v11768_v2  ;;  %v11863_v0 = vcombine.high %v1052_v58, %v1060_v59  ;;  %v11865_v2 = vcombine.high %v1053_v60, %v1061_v61  ;;  %v11943_v58 = vcombine.high %v1132_v50, %v1140_v51  ;;  %v1148_v60 = vld [vmem:[#allocation5 + $0x20a0] sm:$0xff] }
 0x3b4   :  { %v8481_v22 = vpop.f32.mrb[7].mxu0  ;;  %8823 = vmatprep.subr.bf16.mxu0 %v11783_v3  ;;  %v8686_v27 = vpop.f32.mrb[7].mxu1  ;;  %9028 = vmatprep.subr.bf16.mxu1 %v11785_v5  ;;  %v1068_v3 = vld [vmem:[#allocation5 + $0x1e20] sm:$0xff] }
 0x3b5   :  { %v1076_v5 = vld [vmem:[#allocation5 + $0x1e60] sm:$0xff] }
 0x3b6   :  { %v11879_v18 = vcombine.high %v1068_v3, %v1076_v5  ;;  %v1084_v21 = vld [vmem:[#allocation5 + $0x1ea0] sm:$0xff]  ;;  %v11878_v27 = vcombine.low %v1068_v3, %v1076_v5 }
 0x3b7   :  { %8824 = vmatpush1.bf16.msra.mxu0 %v11782_v19  ;;  %9029 = vmatpush1.bf16.msra.mxu1 %v11784_v24  ;;  %v11881_v19 = vcombine.high %v1069_v6, %v1077_v7  ;;  %v1092_v22 = vld [vmem:[#allocation5 + $0x1ee0] sm:$0xff]  ;;  %v1085_v24 = vld [vmem:[#allocation5 + $0x1ea8] sm:$0xff] }
 0x3b8   :  { %8825 = vmatprep.subr.bf16.mxu0 %v11799_v26  ;;  %9030 = vmatprep.subr.bf16.mxu1 %v11801_v28  ;;  %v1093_v26 = vld [vmem:[#allocation5 + $0x1ee8] sm:$0xff]  ;;  %v11880_v28 = vcombine.low %v1069_v6, %v1077_v7  ;;  %v11895_v29 = vcombine.high %v1084_v21, %v1092_v22  ;;  %v1156_v61 = vld [vmem:[#allocation5 + $0x20e0] sm:$0xff] }
 0x3b9   :  { %v11897_v30 = vcombine.high %v1085_v24, %v1093_v26  ;;  %v11959_v3 = vcombine.high %v1148_v60, %v1156_v61  ;;  %v1164_v6 = vld [vmem:[#allocation5 + $0x2120] sm:$0xff] }
 0x3ba   :  { %v1172_v7 = vld [vmem:[#allocation5 + $0x2160] sm:$0xff] }
 0x3bb   :  { %8826 = vmatpush1.bf16.msra.mxu0 %v11798_v33  ;;  %9031 = vmatpush1.bf16.msra.mxu1 %v11800_v35  ;;  %v1101_v33 = vld [vmem:[#allocation5 + $0x1f28] sm:$0xff] }
 0x3bc   :  { %8827 = vmatprep.subr.bf16.mxu0 %v11815_v36  ;;  %9032 = vmatprep.subr.bf16.mxu1 %v11817_v37  ;;  %v1109_v35 = vld [vmem:[#allocation5 + $0x1f68] sm:$0xff]  ;;  %v11894_v36 = vcombine.low %v1084_v21, %v1092_v22  ;;  %v11896_v37 = vcombine.low %v1085_v24, %v1093_v26  ;;  %v11975_v21 = vcombine.high %v1164_v6, %v1172_v7  ;;  %v1180_v24 = vld [vmem:[#allocation5 + $0x21a0] sm:$0xff] }
 0x3bd   :  { %v11913_v40 = vcombine.high %v1101_v33, %v1109_v35  ;;  %v1188_v26 = vld [vmem:[#allocation5 + $0x21e0] sm:$0xff] }
 0x3bf   :  { %8828 = vmatpush1.bf16.msra.mxu0 %v11814_v43  ;;  %9033 = vmatpush1.bf16.msra.mxu1 %v11816_v44  ;;  %v1117_v43 = vld [vmem:[#allocation5 + $0x1fa8] sm:$0xff] }
 0x3c0   :  { %8829 = vmatprep.subr.bf16.mxu0 %v11831_v45  ;;  %9034 = vmatprep.subr.bf16.mxu1 %v11833_v46  ;;  %v1125_v44 = vld [vmem:[#allocation5 + $0x1fe8] sm:$0xff]  ;;  %v11910_v45 = vcombine.low %v1100_v31, %v1108_v32  ;;  %v11912_v46 = vcombine.low %v1101_v33, %v1109_v35  ;;  %v11991_v31 = vcombine.high %v1180_v24, %v1188_v26  ;;  %v1196_v33 = vld [vmem:[#allocation5 + $0x2220] sm:$0xff] }
 0x3c1   :  { %v11929_v49 = vcombine.high %v1117_v43, %v1125_v44  ;;  %v1204_v35 = vld [vmem:[#allocation5 + $0x2260] sm:$0xff] }
 0x3c3   :  { %8830 = vmatpush1.bf16.msra.mxu0 %v11830_v52  ;;  %9035 = vmatpush1.bf16.msra.mxu1 %v11832_v53  ;;  %v1133_v52 = vld [vmem:[#allocation5 + $0x2028] sm:$0xff] }
 0x3c4   :  { %8831 = vmatprep.subr.bf16.mxu0 %v11847_v55  ;;  %9036 = vmatprep.subr.bf16.mxu1 %v11849_v56  ;;  %v1141_v53 = vld [vmem:[#allocation5 + $0x2068] sm:$0xff]  ;;  %v11926_v55 = vcombine.low %v1116_v41, %v1124_v42  ;;  %v11928_v56 = vcombine.low %v1117_v43, %v1125_v44  ;;  %v12007_v41 = vcombine.high %v1196_v33, %v1204_v35  ;;  %v1212_v43 = vld [vmem:[#allocation5 + $0x22a0] sm:$0xff] }
 0x3c5   :  { %v11945_v59 = vcombine.high %v1133_v52, %v1141_v53  ;;  %v1220_v44 = vld [vmem:[#allocation5 + $0x22e0] sm:$0xff] }
 0x3c7   :  { %8832 = vmatpush1.bf16.msra.mxu0 %v11846_v62  ;;  %9037 = vmatpush1.bf16.msra.mxu1 %v11848_v63  ;;  %v1149_v62 = vld [vmem:[#allocation5 + $0x20a8] sm:$0xff] }
 0x3c8   :  { %8833 = vmatprep.subr.bf16.mxu0 %v11863_v0  ;;  %9038 = vmatprep.subr.bf16.mxu1 %v11865_v2  ;;  %v1157_v63 = vld [vmem:[#allocation5 + $0x20e8] sm:$0xff]  ;;  %v11942_v0 = vcombine.low %v1132_v50, %v1140_v51  ;;  %v11944_v2 = vcombine.low %v1133_v52, %v1141_v53  ;;  %v12023_v50 = vcombine.high %v1212_v43, %v1220_v44  ;;  %v1228_v52 = vld [vmem:[#allocation5 + $0x2320] sm:$0xff] }
 0x3c9   :  { %v11961_v5 = vcombine.high %v1149_v62, %v1157_v63  ;;  %v1236_v53 = vld [vmem:[#allocation5 + $0x2360] sm:$0xff] }
 0x3cb   :  { %8834 = vmatpush1.bf16.msra.mxu0 %v11862_v11  ;;  %9039 = vmatpush1.bf16.msra.mxu1 %v11864_v13  ;;  %v1165_v11 = vld [vmem:[#allocation5 + $0x2128] sm:$0xff] }
 0x3cc   :  { %8835 = vmatprep.subr.bf16.mxu0 %v11879_v18  ;;  %9040 = vmatprep.subr.bf16.mxu1 %v11881_v19  ;;  %v1173_v13 = vld [vmem:[#allocation5 + $0x2168] sm:$0xff]  ;;  %v11958_v18 = vcombine.low %v1148_v60, %v1156_v61  ;;  %v11960_v19 = vcombine.low %v1149_v62, %v1157_v63  ;;  %v12039_v60 = vcombine.high %v1228_v52, %v1236_v53  ;;  %v1244_v62 = vld [vmem:[#allocation5 + $0x23a0] sm:$0xff] }
 0x3cd   :  { %v11977_v22 = vcombine.high %v1165_v11, %v1173_v13  ;;  %v1252_v63 = vld [vmem:[#allocation5 + $0x23e0] sm:$0xff] }
 0x3cf   :  { %8836 = vmatpush1.bf16.msra.mxu0 %v11878_v27  ;;  %9041 = vmatpush1.bf16.msra.mxu1 %v11880_v28  ;;  %v1181_v27 = vld [vmem:[#allocation5 + $0x21a8] sm:$0xff] }
 0x3d0   :  { %8837 = vmatprep.subr.bf16.mxu0 %v11895_v29  ;;  %9042 = vmatprep.subr.bf16.mxu1 %v11897_v30  ;;  %v1189_v28 = vld [vmem:[#allocation5 + $0x21e8] sm:$0xff]  ;;  %v11974_v29 = vcombine.low %v1164_v6, %v1172_v7  ;;  %v11976_v30 = vcombine.low %v1165_v11, %v1173_v13  ;;  %v12055_v6 = vcombine.high %v1244_v62, %v1252_v63  ;;  %v1260_v11 = vld [vmem:[#allocation5 + $0x2420] sm:$0xff] }
 0x3d1   :  { %v11993_v32 = vcombine.high %v1181_v27, %v1189_v28  ;;  %v1268_v13 = vld [vmem:[#allocation5 + $0x2460] sm:$0xff] }
 0x3d3   :  { %8838 = vmatpush1.bf16.msra.mxu0 %v11894_v36  ;;  %9043 = vmatpush1.bf16.msra.mxu1 %v11896_v37  ;;  %v1197_v36 = vld [vmem:[#allocation5 + $0x2228] sm:$0xff] }
 0x3d4   :  { %8839 = vmatprep.subr.bf16.mxu0 %v11911_v38  ;;  %9044 = vmatprep.subr.bf16.mxu1 %v11913_v40  ;;  %v1205_v37 = vld [vmem:[#allocation5 + $0x2268] sm:$0xff]  ;;  %v11990_v38 = vcombine.low %v1180_v24, %v1188_v26  ;;  %v11992_v40 = vcombine.low %v1181_v27, %v1189_v28  ;;  %v12071_v24 = vcombine.high %v1260_v11, %v1268_v13  ;;  %v1276_v27 = vld [vmem:[#allocation5 + $0x24a0] sm:$0xff] }
 0x3d5   :  { %v12009_v42 = vcombine.high %v1197_v36, %v1205_v37  ;;  %v1284_v28 = vld [vmem:[#allocation5 + $0x24e0] sm:$0xff] }
 0x3d7   :  { %8840 = vmatpush1.bf16.msra.mxu0 %v11910_v45  ;;  %9045 = vmatpush1.bf16.msra.mxu1 %v11912_v46  ;;  %v1213_v45 = vld [vmem:[#allocation5 + $0x22a8] sm:$0xff] }
 0x3d8   :  { %8841 = vmatprep.subr.bf16.mxu0 %v11927_v47  ;;  %9046 = vmatprep.subr.bf16.mxu1 %v11929_v49  ;;  %v1221_v46 = vld [vmem:[#allocation5 + $0x22e8] sm:$0xff]  ;;  %v12006_v47 = vcombine.low %v1196_v33, %v1204_v35  ;;  %v12008_v49 = vcombine.low %v1197_v36, %v1205_v37  ;;  %v12087_v33 = vcombine.high %v1276_v27, %v1284_v28  ;;  %v1292_v36 = vld [vmem:[#allocation5 + $0x2520] sm:$0xff] }
 0x3d9   :  { %v12025_v51 = vcombine.high %v1213_v45, %v1221_v46  ;;  %v1300_v37 = vld [vmem:[#allocation5 + $0x2560] sm:$0xff] }
 0x3db   :  { %8842 = vmatpush1.bf16.msra.mxu0 %v11926_v55  ;;  %9047 = vmatpush1.bf16.msra.mxu1 %v11928_v56  ;;  %v1229_v55 = vld [vmem:[#allocation5 + $0x2328] sm:$0xff] }
 0x3dc   :  { %8852 = vmatprep.subr.bf16.mxu0 %v11943_v58  ;;  %9057 = vmatprep.subr.bf16.mxu1 %v11945_v59  ;;  %v1237_v56 = vld [vmem:[#allocation5 + $0x2368] sm:$0xff]  ;;  %v12022_v58 = vcombine.low %v1212_v43, %v1220_v44  ;;  %v12024_v59 = vcombine.low %v1213_v45, %v1221_v46  ;;  %v12103_v43 = vcombine.high %v1292_v36, %v1300_v37  ;;  %v1308_v45 = vld [vmem:[#allocation5 + $0x25a0] sm:$0xff] }
 0x3dd   :  { %v12041_v61 = vcombine.high %v1229_v55, %v1237_v56  ;;  %v1316_v46 = vld [vmem:[#allocation5 + $0x25e0] sm:$0xff] }
 0x3de   :  { %8844 = vmatmul.mubr.bf16.vlgmr.msra.gmra.mrb[8].mxu0 %v13078_v54  ;;  %9049 = vmatmul.mubr.bf16.vlgmr.msra.gmra.mrb[8].mxu1 %v13078_v54 }
 0x3df   :  { %8853 = vmatpush1.bf16.msra.mxu0 %v11942_v0  ;;  %9058 = vmatpush1.bf16.msra.mxu1 %v11944_v2  ;;  %v1245_v0 = vld [vmem:[#allocation5 + $0x23a8] sm:$0xff] }
 0x3e0   :  { %8854 = vmatprep.subr.bf16.mxu0 %v11959_v3  ;;  %9059 = vmatprep.subr.bf16.mxu1 %v11961_v5  ;;  %v1253_v2 = vld [vmem:[#allocation5 + $0x23e8] sm:$0xff]  ;;  %v12038_v3 = vcombine.low %v1228_v52, %v1236_v53  ;;  %v12040_v5 = vcombine.low %v1229_v55, %v1237_v56  ;;  %v12119_v52 = vcombine.high %v1308_v45, %v1316_v46  ;;  %v1324_v55 = vld [vmem:[#allocation5 + $0x2620] sm:$0xff] }
 0x3e1   :  { %8884 = vmatprep.mubr.bf16.mxu0 %v13080_v1  ;;  %9089 = vmatprep.mubr.bf16.mxu1 %v13080_v1  ;;  %v12057_v7 = vcombine.high %v1245_v0, %v1253_v2  ;;  %v1332_v56 = vld [vmem:[#allocation5 + $0x2660] sm:$0xff] }
 0x3e3   :  { %8855 = vmatpush1.bf16.msra.mxu0 %v11958_v18  ;;  %9060 = vmatpush1.bf16.msra.mxu1 %v11960_v19  ;;  %v1261_v18 = vld [vmem:[#allocation5 + $0x2428] sm:$0xff] }
 0x3e4   :  { %8856 = vmatprep.subr.bf16.mxu0 %v11975_v21  ;;  %9061 = vmatprep.subr.bf16.mxu1 %v11977_v22  ;;  %v1269_v19 = vld [vmem:[#allocation5 + $0x2468] sm:$0xff]  ;;  %v12054_v21 = vcombine.low %v1244_v62, %v1252_v63  ;;  %v12056_v22 = vcombine.low %v1245_v0, %v1253_v2  ;;  %v12135_v62 = vcombine.high %v1324_v55, %v1332_v56  ;;  %v1340_v0 = vld [vmem:[#allocation5 + $0x26a0] sm:$0xff] }
 0x3e5   :  { %v12073_v26 = vcombine.high %v1261_v18, %v1269_v19  ;;  %v1348_v2 = vld [vmem:[#allocation5 + $0x26e0] sm:$0xff] }
 0x3e7   :  { %8857 = vmatpush1.bf16.msra.mxu0 %v11974_v29  ;;  %9062 = vmatpush1.bf16.msra.mxu1 %v11976_v30  ;;  %v1277_v29 = vld [vmem:[#allocation5 + $0x24a8] sm:$0xff] }
 0x3e8   :  { %8858 = vmatprep.subr.bf16.mxu0 %v11991_v31  ;;  %9063 = vmatprep.subr.bf16.mxu1 %v11993_v32  ;;  %v1285_v30 = vld [vmem:[#allocation5 + $0x24e8] sm:$0xff]  ;;  %v12070_v31 = vcombine.low %v1260_v11, %v1268_v13  ;;  %v12072_v32 = vcombine.low %v1261_v18, %v1269_v19  ;;  %v12151_v11 = vcombine.high %v1340_v0, %v1348_v2  ;;  %v1356_v18 = vld [vmem:[#allocation5 + $0x2720] sm:$0xff] }
 0x3e9   :  { %v12089_v35 = vcombine.high %v1277_v29, %v1285_v30  ;;  %v1364_v19 = vld [vmem:[#allocation5 + $0x2760] sm:$0xff] }
 0x3eb   :  { %8859 = vmatpush1.bf16.msra.mxu0 %v11990_v38  ;;  %9064 = vmatpush1.bf16.msra.mxu1 %v11992_v40  ;;  %v1293_v38 = vld [vmem:[#allocation5 + $0x2528] sm:$0xff] }
 0x3ec   :  { %8860 = vmatprep.subr.bf16.mxu0 %v12007_v41  ;;  %9065 = vmatprep.subr.bf16.mxu1 %v12009_v42  ;;  %v1301_v40 = vld [vmem:[#allocation5 + $0x2568] sm:$0xff]  ;;  %v12086_v41 = vcombine.low %v1276_v27, %v1284_v28  ;;  %v12088_v42 = vcombine.low %v1277_v29, %v1285_v30  ;;  %v12167_v27 = vcombine.high %v1356_v18, %v1364_v19  ;;  %v1372_v29 = vld [vmem:[#allocation5 + $0x27a0] sm:$0xff] }
 0x3ed   :  { %v12105_v44 = vcombine.high %v1293_v38, %v1301_v40  ;;  %v1380_v30 = vld [vmem:[#allocation5 + $0x27e0] sm:$0xff] }
 0x3ef   :  { %8861 = vmatpush1.bf16.msra.mxu0 %v12006_v47  ;;  %9066 = vmatpush1.bf16.msra.mxu1 %v12008_v49  ;;  %v1309_v47 = vld [vmem:[#allocation5 + $0x25a8] sm:$0xff] }
 0x3f0   :  { %8862 = vmatprep.subr.bf16.mxu0 %v12023_v50  ;;  %9067 = vmatprep.subr.bf16.mxu1 %v12025_v51  ;;  %v1317_v49 = vld [vmem:[#allocation5 + $0x25e8] sm:$0xff]  ;;  %v12102_v50 = vcombine.low %v1292_v36, %v1300_v37  ;;  %v12104_v51 = vcombine.low %v1293_v38, %v1301_v40  ;;  %v12183_v36 = vcombine.high %v1372_v29, %v1380_v30  ;;  %v110_v38 = vld [vmem:[#allocation5 + $0x30] sm:$0xff] }
 0x3f1   :  { %v12121_v53 = vcombine.high %v1309_v47, %v1317_v49  ;;  %v118_v40 = vld [vmem:[#allocation5 + $0x70] sm:$0xff] }
 0x3f3   :  { %8863 = vmatpush1.bf16.msra.mxu0 %v12022_v58  ;;  %9068 = vmatpush1.bf16.msra.mxu1 %v12024_v59  ;;  %v1325_v58 = vld [vmem:[#allocation5 + $0x2628] sm:$0xff] }
 0x3f4   :  { %8864 = vmatprep.subr.bf16.mxu0 %v12039_v60  ;;  %9069 = vmatprep.subr.bf16.mxu1 %v12041_v61  ;;  %v1333_v59 = vld [vmem:[#allocation5 + $0x2668] sm:$0xff]  ;;  %v12118_v60 = vcombine.low %v1308_v45, %v1316_v46  ;;  %v12120_v61 = vcombine.low %v1309_v47, %v1317_v49  ;;  %v10923_v45 = vcombine.high %v110_v38, %v118_v40  ;;  %v126_v47 = vld [vmem:[#allocation5 + $0xb0] sm:$0xff] }
 0x3f5   :  { %v12137_v63 = vcombine.high %v1325_v58, %v1333_v59  ;;  %v134_v49 = vld [vmem:[#allocation5 + $0xf0] sm:$0xff] }
 0x3f7   :  { %8865 = vmatpush1.bf16.msra.mxu0 %v12038_v3  ;;  %9070 = vmatpush1.bf16.msra.mxu1 %v12040_v5  ;;  %v1341_v3 = vld [vmem:[#allocation5 + $0x26a8] sm:$0xff] }
 0x3f8   :  { %8866 = vmatprep.subr.bf16.mxu0 %v12055_v6  ;;  %9071 = vmatprep.subr.bf16.mxu1 %v12057_v7  ;;  %v1349_v5 = vld [vmem:[#allocation5 + $0x26e8] sm:$0xff]  ;;  %v12134_v6 = vcombine.low %v1324_v55, %v1332_v56  ;;  %v12136_v7 = vcombine.low %v1325_v58, %v1333_v59  ;;  %v10939_v55 = vcombine.high %v126_v47, %v134_v49  ;;  %v142_v58 = vld [vmem:[#allocation5 + $0x130] sm:$0xff] }
 0x3f9   :  { %v12153_v13 = vcombine.high %v1341_v3, %v1349_v5  ;;  %v150_v59 = vld [vmem:[#allocation5 + $0x170] sm:$0xff] }
 0x3fb   :  { %8867 = vmatpush1.bf16.msra.mxu0 %v12054_v21  ;;  %9072 = vmatpush1.bf16.msra.mxu1 %v12056_v22  ;;  %v1357_v21 = vld [vmem:[#allocation5 + $0x2728] sm:$0xff] }
 0x3fc   :  { %8868 = vmatprep.subr.bf16.mxu0 %v12071_v24  ;;  %9073 = vmatprep.subr.bf16.mxu1 %v12073_v26  ;;  %v1365_v22 = vld [vmem:[#allocation5 + $0x2768] sm:$0xff]  ;;  %v12150_v24 = vcombine.low %v1340_v0, %v1348_v2  ;;  %v12152_v26 = vcombine.low %v1341_v3, %v1349_v5  ;;  %v10955_v0 = vcombine.high %v142_v58, %v150_v59  ;;  %v158_v3 = vld [vmem:[#allocation5 + $0x1b0] sm:$0xff] }
 0x3fd   :  { %v12169_v28 = vcombine.high %v1357_v21, %v1365_v22  ;;  %v166_v5 = vld [vmem:[#allocation5 + $0x1f0] sm:$0xff] }
 0x3ff   :  { %8869 = vmatpush1.bf16.msra.mxu0 %v12070_v31  ;;  %9074 = vmatpush1.bf16.msra.mxu1 %v12072_v32  ;;  %v1373_v31 = vld [vmem:[#allocation5 + $0x27a8] sm:$0xff] }
 0x400   :  { %8870 = vmatprep.subr.bf16.mxu0 %v12087_v33  ;;  %9075 = vmatprep.subr.bf16.mxu1 %v12089_v35  ;;  %v1381_v32 = vld [vmem:[#allocation5 + $0x27e8] sm:$0xff]  ;;  %v12166_v33 = vcombine.low %v1356_v18, %v1364_v19  ;;  %v12168_v35 = vcombine.low %v1357_v21, %v1365_v22  ;;  %v10971_v18 = vcombine.high %v158_v3, %v166_v5  ;;  %v174_v21 = vld [vmem:[#allocation5 + $0x230] sm:$0xff] }
 0x401   :  { %v12185_v37 = vcombine.high %v1373_v31, %v1381_v32  ;;  %v182_v22 = vld [vmem:[#allocation5 + $0x270] sm:$0xff] }
 0x403   :  { %8871 = vmatpush1.bf16.msra.mxu0 %v12086_v41  ;;  %9076 = vmatpush1.bf16.msra.mxu1 %v12088_v42  ;;  %v111_v41 = vld [vmem:[#allocation5 + $0x38] sm:$0xff] }
 0x404   :  { %8872 = vmatprep.subr.bf16.mxu0 %v12103_v43  ;;  %9077 = vmatprep.subr.bf16.mxu1 %v12105_v44  ;;  %v119_v42 = vld [vmem:[#allocation5 + $0x78] sm:$0xff]  ;;  %v12182_v43 = vcombine.low %v1372_v29, %v1380_v30  ;;  %v12184_v44 = vcombine.low %v1373_v31, %v1381_v32  ;;  %v10987_v29 = vcombine.high %v174_v21, %v182_v22  ;;  %v190_v30 = vld [vmem:[#allocation5 + $0x2b0] sm:$0xff] }
 0x405   :  { %v10925_v46 = vcombine.high %v111_v41, %v119_v42  ;;  %v198_v31 = vld [vmem:[#allocation5 + $0x2f0] sm:$0xff]  ;;  %v191_v32 = vld [vmem:[#allocation5 + $0x2b8] sm:$0xff] }
 0x407   :  { %8873 = vmatpush1.bf16.msra.mxu0 %v12102_v50  ;;  %9078 = vmatpush1.bf16.msra.mxu1 %v12104_v51  ;;  %v127_v50 = vld [vmem:[#allocation5 + $0xb8] sm:$0xff] }
 0x408   :  { %8874 = vmatprep.subr.bf16.mxu0 %v12119_v52  ;;  %9079 = vmatprep.subr.bf16.mxu1 %v12121_v53  ;;  %v135_v51 = vld [vmem:[#allocation5 + $0xf8] sm:$0xff]  ;;  %v10922_v52 = vcombine.low %v110_v38, %v118_v40  ;;  %v10924_v53 = vcombine.low %v111_v41, %v119_v42  ;;  %v206_v40 = vld [vmem:[#allocation5 + $0x330] sm:$0xff] }
 0x409   :  { %v10941_v56 = vcombine.high %v127_v50, %v135_v51  ;;  %v214_v41 = vld [vmem:[#allocation5 + $0x370] sm:$0xff]  ;;  %v207_v42 = vld [vmem:[#allocation5 + $0x338] sm:$0xff] }
 0x40b   :  { %8875 = vmatpush1.bf16.msra.mxu0 %v12118_v60  ;;  %9080 = vmatpush1.bf16.msra.mxu1 %v12120_v61  ;;  %v143_v60 = vld [vmem:[#allocation5 + $0x138] sm:$0xff] }
 0x40c   :  { %8876 = vmatprep.subr.bf16.mxu0 %v12135_v62  ;;  %9081 = vmatprep.subr.bf16.mxu1 %v12137_v63  ;;  %v151_v61 = vld [vmem:[#allocation5 + $0x178] sm:$0xff]  ;;  %v10938_v62 = vcombine.low %v126_v47, %v134_v49  ;;  %v10940_v63 = vcombine.low %v127_v50, %v135_v51  ;;  %v222_v49 = vld [vmem:[#allocation5 + $0x3b0] sm:$0xff] }
 0x40d   :  { %v10957_v2 = vcombine.high %v143_v60, %v151_v61  ;;  %v230_v50 = vld [vmem:[#allocation5 + $0x3f0] sm:$0xff]  ;;  %v223_v51 = vld [vmem:[#allocation5 + $0x3b8] sm:$0xff] }
 0x40f   :  { %8877 = vmatpush1.bf16.msra.mxu0 %v12134_v6  ;;  %9082 = vmatpush1.bf16.msra.mxu1 %v12136_v7  ;;  %v159_v6 = vld [vmem:[#allocation5 + $0x1b8] sm:$0xff] }
 0x410   :  { %8878 = vmatprep.subr.bf16.mxu0 %v12151_v11  ;;  %9083 = vmatprep.subr.bf16.mxu1 %v12153_v13  ;;  %v167_v7 = vld [vmem:[#allocation5 + $0x1f8] sm:$0xff]  ;;  %v10954_v11 = vcombine.low %v142_v58, %v150_v59  ;;  %v10956_v13 = vcombine.low %v143_v60, %v151_v61  ;;  %v238_v59 = vld [vmem:[#allocation5 + $0x430] sm:$0xff] }
 0x411   :  { %v10973_v19 = vcombine.high %v159_v6, %v167_v7  ;;  %v246_v60 = vld [vmem:[#allocation5 + $0x470] sm:$0xff]  ;;  %v239_v61 = vld [vmem:[#allocation5 + $0x438] sm:$0xff] }
 0x413   :  { %8879 = vmatpush1.bf16.msra.mxu0 %v12150_v24  ;;  %9084 = vmatpush1.bf16.msra.mxu1 %v12152_v26  ;;  %v175_v24 = vld [vmem:[#allocation5 + $0x238] sm:$0xff] }
 0x414   :  { %8880 = vmatprep.subr.bf16.mxu0 %v12167_v27  ;;  %9085 = vmatprep.subr.bf16.mxu1 %v12169_v28  ;;  %v183_v26 = vld [vmem:[#allocation5 + $0x278] sm:$0xff]  ;;  %v10970_v27 = vcombine.low %v158_v3, %v166_v5  ;;  %v10972_v28 = vcombine.low %v159_v6, %v167_v7  ;;  %v254_v5 = vld [vmem:[#allocation5 + $0x4b0] sm:$0xff] }
 0x415   :  { %v262_v6 = vld [vmem:[#allocation5 + $0x4f0] sm:$0xff]  ;;  %v255_v7 = vld [vmem:[#allocation5 + $0x4b8] sm:$0xff] }
 0x417   :  { %8881 = vmatpush1.bf16.msra.mxu0 %v12166_v33  ;;  %9086 = vmatpush1.bf16.msra.mxu1 %v12168_v35  ;;  %v199_v33 = vld [vmem:[#allocation5 + $0x2f8] sm:$0xff]  ;;  %v10986_v35 = vcombine.low %v174_v21, %v182_v22  ;;  %v270_v22 = vld [vmem:[#allocation5 + $0x530] sm:$0xff] }
 0x418   :  { %8882 = vmatprep.subr.bf16.mxu0 %v12183_v36  ;;  %9087 = vmatprep.subr.bf16.mxu1 %v12185_v37  ;;  %v10988_v36 = vcombine.low %v175_v24, %v183_v26  ;;  %v11003_v37 = vcombine.high %v190_v30, %v198_v31  ;;  %v11005_v38 = vcombine.high %v191_v32, %v199_v33 }
 0x41b   :  { %8883 = vmatpush1.bf16.msra.mxu0 %v12182_v43  ;;  %9088 = vmatpush1.bf16.msra.mxu1 %v12184_v44  ;;  %v215_v43 = vld [vmem:[#allocation5 + $0x378] sm:$0xff]  ;;  %v11002_v44 = vcombine.low %v190_v30, %v198_v31  ;;  %v286_v31 = vld [vmem:[#allocation5 + $0x5b0] sm:$0xff] }
 0x41c   :  { %9098 = vmatprep.subr.bf16.mxu0 %v10923_v45  ;;  %9303 = vmatprep.subr.bf16.mxu1 %v10925_v46  ;;  %v11004_v45 = vcombine.low %v191_v32, %v199_v33  ;;  %v11019_v46 = vcombine.high %v206_v40, %v214_v41  ;;  %v11021_v47 = vcombine.high %v207_v42, %v215_v43  ;;  %v294_v32 = vld [vmem:[#allocation5 + $0x5f0] sm:$0xff]  ;;  %v287_v33 = vld [vmem:[#allocation5 + $0x5b8] sm:$0xff] }
 0x41e   :  { %8885 = vmatmul.mubr.bf16.vlgmr.msra.gmra.mrb[8].mxu0 %v13086_v14  ;;  %9090 = vmatmul.mubr.bf16.vlgmr.msra.gmra.mrb[8].mxu1 %v13086_v14 }
 0x41f   :  { %9099 = vmatpush1.bf16.msra.mxu0 %v10922_v52  ;;  %9304 = vmatpush1.bf16.msra.mxu1 %v10924_v53  ;;  %v231_v52 = vld [vmem:[#allocation5 + $0x3f8] sm:$0xff]  ;;  %v11018_v53 = vcombine.low %v206_v40, %v214_v41  ;;  %v302_v41 = vld [vmem:[#allocation5 + $0x630] sm:$0xff] }
 0x420   :  { %9100 = vmatprep.subr.bf16.mxu0 %v10939_v55  ;;  %9305 = vmatprep.subr.bf16.mxu1 %v10941_v56  ;;  %v11020_v55 = vcombine.low %v207_v42, %v215_v43  ;;  %v11035_v56 = vcombine.high %v222_v49, %v230_v50  ;;  %v11037_v58 = vcombine.high %v223_v51, %v231_v52  ;;  %v310_v42 = vld [vmem:[#allocation5 + $0x670] sm:$0xff]  ;;  %v303_v43 = vld [vmem:[#allocation5 + $0x638] sm:$0xff] }
 0x421   :  { %9130 = vmatprep.mubr.bf16.mxu0 %v13050_v57  ;;  %9335 = vmatprep.mubr.bf16.mxu1 %v13050_v57  ;;  %v10989_v57 = vcombine.high %v175_v24, %v183_v26  ;;  %v278_v24 = vld [vmem:[#allocation5 + $0x570] sm:$0xff]  ;;  %v271_v26 = vld [vmem:[#allocation5 + $0x538] sm:$0xff] }
 0x423   :  { %9101 = vmatpush1.bf16.msra.mxu0 %v10938_v62  ;;  %9306 = vmatpush1.bf16.msra.mxu1 %v10940_v63  ;;  %v247_v62 = vld [vmem:[#allocation5 + $0x478] sm:$0xff]  ;;  %v11034_v63 = vcombine.low %v222_v49, %v230_v50  ;;  %v318_v50 = vld [vmem:[#allocation5 + $0x6b0] sm:$0xff] }
 0x424   :  { %9102 = vmatprep.subr.bf16.mxu0 %v10955_v0  ;;  %9307 = vmatprep.subr.bf16.mxu1 %v10957_v2  ;;  %v11036_v0 = vcombine.low %v223_v51, %v231_v52  ;;  %v11051_v2 = vcombine.high %v238_v59, %v246_v60  ;;  %v11053_v3 = vcombine.high %v239_v61, %v247_v62  ;;  %v326_v51 = vld [vmem:[#allocation5 + $0x6f0] sm:$0xff]  ;;  %v319_v52 = vld [vmem:[#allocation5 + $0x6b8] sm:$0xff] }
 0x427   :  { %9103 = vmatpush1.bf16.msra.mxu0 %v10954_v11  ;;  %9308 = vmatpush1.bf16.msra.mxu1 %v10956_v13  ;;  %v263_v11 = vld [vmem:[#allocation5 + $0x4f8] sm:$0xff]  ;;  %v11050_v13 = vcombine.low %v238_v59, %v246_v60  ;;  %v334_v60 = vld [vmem:[#allocation5 + $0x730] sm:$0xff] }
 0x428   :  { %9104 = vmatprep.subr.bf16.mxu0 %v10971_v18  ;;  %9309 = vmatprep.subr.bf16.mxu1 %v10973_v19  ;;  %v11052_v18 = vcombine.low %v239_v61, %v247_v62  ;;  %v11067_v19 = vcombine.high %v254_v5, %v262_v6  ;;  %v11069_v21 = vcombine.high %v255_v7, %v263_v11  ;;  %v342_v61 = vld [vmem:[#allocation5 + $0x770] sm:$0xff]  ;;  %v335_v62 = vld [vmem:[#allocation5 + $0x738] sm:$0xff] }
 0x42b   :  { %9105 = vmatpush1.bf16.msra.mxu0 %v10970_v27  ;;  %9310 = vmatpush1.bf16.msra.mxu1 %v10972_v28  ;;  %v279_v27 = vld [vmem:[#allocation5 + $0x578] sm:$0xff]  ;;  %v11066_v28 = vcombine.low %v254_v5, %v262_v6  ;;  %v350_v6 = vld [vmem:[#allocation5 + $0x7b0] sm:$0xff] }
 0x42c   :  { %9106 = vmatprep.subr.bf16.mxu0 %v10987_v29  ;;  %9311 = vmatprep.subr.bf16.mxu1 %v10989_v57  ;;  %v11068_v29 = vcombine.low %v255_v7, %v263_v11  ;;  %v11083_v57 = vcombine.high %v270_v22, %v278_v24  ;;  %v11085_v30 = vcombine.high %v271_v26, %v279_v27  ;;  %v358_v7 = vld [vmem:[#allocation5 + $0x7f0] sm:$0xff]  ;;  %v351_v11 = vld [vmem:[#allocation5 + $0x7b8] sm:$0xff] }
 0x42f   :  { %9107 = vmatpush1.bf16.msra.mxu0 %v10986_v35  ;;  %9312 = vmatpush1.bf16.msra.mxu1 %v10988_v36  ;;  %v295_v35 = vld [vmem:[#allocation5 + $0x5f8] sm:$0xff]  ;;  %v11082_v36 = vcombine.low %v270_v22, %v278_v24  ;;  %v366_v24 = vld [vmem:[#allocation5 + $0x830] sm:$0xff] }
 0x430   :  { %9108 = vmatprep.subr.bf16.mxu0 %v11003_v37  ;;  %9313 = vmatprep.subr.bf16.mxu1 %v11005_v38  ;;  %v11084_v37 = vcombine.low %v271_v26, %v279_v27  ;;  %v11099_v38 = vcombine.high %v286_v31, %v294_v32  ;;  %v11101_v40 = vcombine.high %v287_v33, %v295_v35  ;;  %v374_v26 = vld [vmem:[#allocation5 + $0x870] sm:$0xff]  ;;  %v367_v27 = vld [vmem:[#allocation5 + $0x838] sm:$0xff] }
 0x433   :  { %9109 = vmatpush1.bf16.msra.mxu0 %v11002_v44  ;;  %9314 = vmatpush1.bf16.msra.mxu1 %v11004_v45  ;;  %v311_v44 = vld [vmem:[#allocation5 + $0x678] sm:$0xff]  ;;  %v11098_v45 = vcombine.low %v286_v31, %v294_v32  ;;  %v382_v32 = vld [vmem:[#allocation5 + $0x8b0] sm:$0xff] }
 0x434   :  { %9110 = vmatprep.subr.bf16.mxu0 %v11019_v46  ;;  %9315 = vmatprep.subr.bf16.mxu1 %v11021_v47  ;;  %v11100_v46 = vcombine.low %v287_v33, %v295_v35  ;;  %v11115_v47 = vcombine.high %v302_v41, %v310_v42  ;;  %v11117_v49 = vcombine.high %v303_v43, %v311_v44  ;;  %v390_v33 = vld [vmem:[#allocation5 + $0x8f0] sm:$0xff]  ;;  %v383_v35 = vld [vmem:[#allocation5 + $0x8b8] sm:$0xff] }
 0x437   :  { %9111 = vmatpush1.bf16.msra.mxu0 %v11018_v53  ;;  %9316 = vmatpush1.bf16.msra.mxu1 %v11020_v55  ;;  %v327_v53 = vld [vmem:[#allocation5 + $0x6f8] sm:$0xff]  ;;  %v11114_v55 = vcombine.low %v302_v41, %v310_v42  ;;  %v398_v42 = vld [vmem:[#allocation5 + $0x930] sm:$0xff] }
 0x438   :  { %9112 = vmatprep.subr.bf16.mxu0 %v11035_v56  ;;  %9317 = vmatprep.subr.bf16.mxu1 %v11037_v58  ;;  %v11116_v56 = vcombine.low %v303_v43, %v311_v44  ;;  %v11131_v58 = vcombine.high %v318_v50, %v326_v51  ;;  %v11133_v59 = vcombine.high %v319_v52, %v327_v53  ;;  %v406_v43 = vld [vmem:[#allocation5 + $0x970] sm:$0xff]  ;;  %v399_v44 = vld [vmem:[#allocation5 + $0x938] sm:$0xff] }
 0x43b   :  { %9113 = vmatpush1.bf16.msra.mxu0 %v11034_v63  ;;  %9318 = vmatpush1.bf16.msra.mxu1 %v11036_v0  ;;  %v343_v63 = vld [vmem:[#allocation5 + $0x778] sm:$0xff]  ;;  %v11130_v0 = vcombine.low %v318_v50, %v326_v51  ;;  %v414_v51 = vld [vmem:[#allocation5 + $0x9b0] sm:$0xff] }
 0x43c   :  { %9114 = vmatprep.subr.bf16.mxu0 %v11051_v2  ;;  %9319 = vmatprep.subr.bf16.mxu1 %v11053_v3  ;;  %v11132_v2 = vcombine.low %v319_v52, %v327_v53  ;;  %v11147_v3 = vcombine.high %v334_v60, %v342_v61  ;;  %v11149_v5 = vcombine.high %v335_v62, %v343_v63  ;;  %v422_v52 = vld [vmem:[#allocation5 + $0x9f0] sm:$0xff]  ;;  %v415_v53 = vld [vmem:[#allocation5 + $0x9b8] sm:$0xff] }
 0x43f   :  { %9115 = vmatpush1.bf16.msra.mxu0 %v11050_v13  ;;  %9320 = vmatpush1.bf16.msra.mxu1 %v11052_v18  ;;  %v359_v13 = vld [vmem:[#allocation5 + $0x7f8] sm:$0xff]  ;;  %v11146_v18 = vcombine.low %v334_v60, %v342_v61  ;;  %v430_v60 = vld [vmem:[#allocation5 + $0xa30] sm:$0xff] }
 0x440   :  { %9116 = vmatprep.subr.bf16.mxu0 %v11067_v19  ;;  %9321 = vmatprep.subr.bf16.mxu1 %v11069_v21  ;;  %v11148_v19 = vcombine.low %v335_v62, %v343_v63  ;;  %v11163_v21 = vcombine.high %v350_v6, %v358_v7  ;;  %v11165_v22 = vcombine.high %v351_v11, %v359_v13  ;;  %v438_v61 = vld [vmem:[#allocation5 + $0xa70] sm:$0xff]  ;;  %v431_v62 = vld [vmem:[#allocation5 + $0xa38] sm:$0xff] }
 0x441   :  { %v439_v63 = vld [vmem:[#allocation5 + $0xa78] sm:$0xff] }
 0x443   :  { %9117 = vmatpush1.bf16.msra.mxu0 %v11066_v28  ;;  %9322 = vmatpush1.bf16.msra.mxu1 %v11068_v29  ;;  %v375_v28 = vld [vmem:[#allocation5 + $0x878] sm:$0xff]  ;;  %v11162_v29 = vcombine.low %v350_v6, %v358_v7  ;;  %v454_v6 = vld [vmem:[#allocation5 + $0xaf0] sm:$0xff] }
 0x444   :  { %9118 = vmatprep.subr.bf16.mxu0 %v11083_v57  ;;  %9323 = vmatprep.subr.bf16.mxu1 %v11085_v30  ;;  %v11164_v57 = vcombine.low %v351_v11, %v359_v13  ;;  %v11179_v30 = vcombine.high %v366_v24, %v374_v26  ;;  %v11181_v31 = vcombine.high %v367_v27, %v375_v28  ;;  %v447_v7 = vld [vmem:[#allocation5 + $0xab8] sm:$0xff] }
 0x445   :  { %v455_v11 = vld [vmem:[#allocation5 + $0xaf8] sm:$0xff]  ;;  %v11242_v13 = vcombine.low %v430_v60, %v438_v61 }
 0x447   :  { %9119 = vmatpush1.bf16.msra.mxu0 %v11082_v36  ;;  %9324 = vmatpush1.bf16.msra.mxu1 %v11084_v37  ;;  %v391_v36 = vld [vmem:[#allocation5 + $0x8f8] sm:$0xff]  ;;  %v11178_v37 = vcombine.low %v366_v24, %v374_v26  ;;  %v470_v24 = vld [vmem:[#allocation5 + $0xb70] sm:$0xff] }
 0x448   :  { %9120 = vmatprep.subr.bf16.mxu0 %v11099_v38  ;;  %9325 = vmatprep.subr.bf16.mxu1 %v11101_v40  ;;  %v11180_v38 = vcombine.low %v367_v27, %v375_v28  ;;  %v11195_v40 = vcombine.high %v382_v32, %v390_v33  ;;  %v11197_v41 = vcombine.high %v383_v35, %v391_v36  ;;  %v463_v26 = vld [vmem:[#allocation5 + $0xb38] sm:$0xff] }
 0x449   :  { %v471_v27 = vld [vmem:[#allocation5 + $0xb78] sm:$0xff] }
 0x44b   :  { %9121 = vmatpush1.bf16.msra.mxu0 %v11098_v45  ;;  %9326 = vmatpush1.bf16.msra.mxu1 %v11100_v46  ;;  %v407_v45 = vld [vmem:[#allocation5 + $0x978] sm:$0xff]  ;;  %v11194_v46 = vcombine.low %v382_v32, %v390_v33  ;;  %v486_v32 = vld [vmem:[#allocation5 + $0xbf0] sm:$0xff] }
 0x44c   :  { %9122 = vmatprep.subr.bf16.mxu0 %v11115_v47  ;;  %9327 = vmatprep.subr.bf16.mxu1 %v11117_v49  ;;  %v11196_v47 = vcombine.low %v383_v35, %v391_v36  ;;  %v11211_v49 = vcombine.high %v398_v42, %v406_v43  ;;  %v11213_v50 = vcombine.high %v399_v44, %v407_v45  ;;  %v479_v33 = vld [vmem:[#allocation5 + $0xbb8] sm:$0xff] }
 0x44d   :  { %v487_v35 = vld [vmem:[#allocation5 + $0xbf8] sm:$0xff] }
 0x44f   :  { %9123 = vmatpush1.bf16.msra.mxu0 %v11114_v55  ;;  %9328 = vmatpush1.bf16.msra.mxu1 %v11116_v56  ;;  %v423_v55 = vld [vmem:[#allocation5 + $0x9f8] sm:$0xff]  ;;  %v11210_v56 = vcombine.low %v398_v42, %v406_v43  ;;  %v502_v42 = vld [vmem:[#allocation5 + $0xc70] sm:$0xff] }
 0x450   :  { %9124 = vmatprep.subr.bf16.mxu0 %v11131_v58  ;;  %9329 = vmatprep.subr.bf16.mxu1 %v11133_v59  ;;  %v11227_v58 = vcombine.high %v414_v51, %v422_v52  ;;  %v11229_v59 = vcombine.high %v415_v53, %v423_v55  ;;  %v495_v43 = vld [vmem:[#allocation5 + $0xc38] sm:$0xff] }
 0x453   :  { %9125 = vmatpush1.bf16.msra.mxu0 %v11130_v0  ;;  %9330 = vmatpush1.bf16.msra.mxu1 %v11132_v2  ;;  %v11226_v0 = vcombine.low %v414_v51, %v422_v52  ;;  %v11228_v2 = vcombine.low %v415_v53, %v423_v55  ;;  %v518_v51 = vld [vmem:[#allocation5 + $0xcf0] sm:$0xff]  ;;  %v511_v52 = vld [vmem:[#allocation5 + $0xcb8] sm:$0xff] }
 0x454   :  { %9126 = vmatprep.subr.bf16.mxu0 %v11147_v3  ;;  %9331 = vmatprep.subr.bf16.mxu1 %v11149_v5  ;;  %v11243_v3 = vcombine.high %v430_v60, %v438_v61  ;;  %v446_v5 = vld [vmem:[#allocation5 + $0xab0] sm:$0xff]  ;;  %v519_v53 = vld [vmem:[#allocation5 + $0xcf8] sm:$0xff] }
 0x455   :  { %v11258_v28 = vcombine.low %v446_v5, %v454_v6  ;;  %v534_v60 = vld [vmem:[#allocation5 + $0xd70] sm:$0xff]  ;;  %v527_v61 = vld [vmem:[#allocation5 + $0xd38] sm:$0xff] }
 0x457   :  { %9127 = vmatpush1.bf16.msra.mxu0 %v11146_v18  ;;  %9332 = vmatpush1.bf16.msra.mxu1 %v11148_v19  ;;  %v11244_v18 = vcombine.low %v431_v62, %v439_v63  ;;  %v11259_v19 = vcombine.high %v446_v5, %v454_v6  ;;  %v550_v5 = vld [vmem:[#allocation5 + $0xdf0] sm:$0xff]  ;;  %v543_v6 = vld [vmem:[#allocation5 + $0xdb8] sm:$0xff] }
 0x458   :  { %9128 = vmatprep.subr.bf16.mxu0 %v11163_v21  ;;  %9333 = vmatprep.subr.bf16.mxu1 %v11165_v22  ;;  %v11261_v21 = vcombine.high %v447_v7, %v455_v11  ;;  %v462_v22 = vld [vmem:[#allocation5 + $0xb30] sm:$0xff] }
 0x459   :  { %v11274_v36 = vcombine.low %v462_v22, %v470_v24 }
 0x45b   :  { %9129 = vmatpush1.bf16.msra.mxu0 %v11162_v29  ;;  %9334 = vmatpush1.bf16.msra.mxu1 %v11164_v57  ;;  %v11260_v29 = vcombine.low %v447_v7, %v455_v11  ;;  %v11275_v57 = vcombine.high %v462_v22, %v470_v24  ;;  %v551_v7 = vld [vmem:[#allocation5 + $0xdf8] sm:$0xff]  ;;  %v566_v22 = vld [vmem:[#allocation5 + $0xe70] sm:$0xff] }
 0x45c   :  { %9139 = vmatprep.subr.bf16.mxu0 %v11179_v30  ;;  %9344 = vmatprep.subr.bf16.mxu1 %v11181_v31  ;;  %v11277_v30 = vcombine.high %v463_v26, %v471_v27  ;;  %v478_v31 = vld [vmem:[#allocation5 + $0xbb0] sm:$0xff]  ;;  %v559_v24 = vld [vmem:[#allocation5 + $0xe38] sm:$0xff] }
 0x45e   :  { %9131 = vmatmul.mubr.bf16.vlgmr.msra.gmra.mrb[12].mxu0 %v13054_v12  ;;  %9336 = vmatmul.mubr.bf16.vlgmr.msra.gmra.mrb[12].mxu1 %v13054_v12  ;;  %v11212_v12 = vcombine.low %v399_v44, %v407_v45  ;;  %v503_v44 = vld [vmem:[#allocation5 + $0xc78] sm:$0xff]  ;;  %v11290_v45 = vcombine.low %v478_v31, %v486_v32 }
 0x45f   :  { %9140 = vmatpush1.bf16.msra.mxu0 %v11178_v37  ;;  %9345 = vmatpush1.bf16.msra.mxu1 %v11180_v38  ;;  %v11276_v37 = vcombine.low %v463_v26, %v471_v27  ;;  %v11291_v38 = vcombine.high %v478_v31, %v486_v32  ;;  %v567_v26 = vld [vmem:[#allocation5 + $0xe78] sm:$0xff]  ;;  %v582_v31 = vld [vmem:[#allocation5 + $0xef0] sm:$0xff] }
 0x460   :  { %9141 = vmatprep.subr.bf16.mxu0 %v11195_v40  ;;  %9346 = vmatprep.subr.bf16.mxu1 %v11197_v41  ;;  %v11293_v40 = vcombine.high %v479_v33, %v487_v35  ;;  %v494_v41 = vld [vmem:[#allocation5 + $0xc30] sm:$0xff]  ;;  %v575_v32 = vld [vmem:[#allocation5 + $0xeb8] sm:$0xff] }
 0x461   :  { %9171 = vmatprep.mubr.bf16.mxu0 %v13056_v23  ;;  %9376 = vmatprep.mubr.bf16.mxu1 %v13056_v23  ;;  %v11245_v23 = vcombine.high %v431_v62, %v439_v63  ;;  %v11306_v55 = vcombine.low %v494_v41, %v502_v42  ;;  %v535_v62 = vld [vmem:[#allocation5 + $0xd78] sm:$0xff] }
 0x463   :  { %9142 = vmatpush1.bf16.msra.mxu0 %v11194_v46  ;;  %9347 = vmatpush1.bf16.msra.mxu1 %v11196_v47  ;;  %v11292_v46 = vcombine.low %v479_v33, %v487_v35  ;;  %v11307_v47 = vcombine.high %v494_v41, %v502_v42  ;;  %v583_v33 = vld [vmem:[#allocation5 + $0xef8] sm:$0xff]  ;;  %v598_v41 = vld [vmem:[#allocation5 + $0xf70] sm:$0xff] }
 0x464   :  { %9143 = vmatprep.subr.bf16.mxu0 %v11211_v49  ;;  %9348 = vmatprep.subr.bf16.mxu1 %v11213_v50  ;;  %v11309_v49 = vcombine.high %v495_v43, %v503_v44  ;;  %v510_v50 = vld [vmem:[#allocation5 + $0xcb0] sm:$0xff]  ;;  %v591_v42 = vld [vmem:[#allocation5 + $0xf38] sm:$0xff] }
 0x465   :  { %v11322_v63 = vcombine.low %v510_v50, %v518_v51 }
 0x467   :  { %9144 = vmatpush1.bf16.msra.mxu0 %v11210_v56  ;;  %9349 = vmatpush1.bf16.msra.mxu1 %v11212_v12  ;;  %v11308_v56 = vcombine.low %v495_v43, %v503_v44  ;;  %v11323_v12 = vcombine.high %v510_v50, %v518_v51  ;;  %v599_v43 = vld [vmem:[#allocation5 + $0xf78] sm:$0xff]  ;;  %v614_v50 = vld [vmem:[#allocation5 + $0xff0] sm:$0xff] }
 0x468   :  { %9145 = vmatprep.subr.bf16.mxu0 %v11227_v58  ;;  %9350 = vmatprep.subr.bf16.mxu1 %v11229_v59  ;;  %v11325_v58 = vcombine.high %v511_v52, %v519_v53  ;;  %v526_v59 = vld [vmem:[#allocation5 + $0xd30] sm:$0xff]  ;;  %v607_v51 = vld [vmem:[#allocation5 + $0xfb8] sm:$0xff] }
 0x469   :  { %v11338_v11 = vcombine.low %v526_v59, %v534_v60 }
 0x46b   :  { %9146 = vmatpush1.bf16.msra.mxu0 %v11226_v0  ;;  %9351 = vmatpush1.bf16.msra.mxu1 %v11228_v2  ;;  %v11324_v0 = vcombine.low %v511_v52, %v519_v53  ;;  %v11339_v2 = vcombine.high %v526_v59, %v534_v60  ;;  %v615_v52 = vld [vmem:[#allocation5 + $0xff8] sm:$0xff]  ;;  %v630_v59 = vld [vmem:[#allocation5 + $0x1070] sm:$0xff] }
 0x46c   :  { %9147 = vmatprep.subr.bf16.mxu0 %v11243_v3  ;;  %9352 = vmatprep.subr.bf16.mxu1 %v11245_v23  ;;  %v11341_v3 = vcombine.high %v527_v61, %v535_v62  ;;  %v542_v23 = vld [vmem:[#allocation5 + $0xdb0] sm:$0xff]  ;;  %v623_v60 = vld [vmem:[#allocation5 + $0x1038] sm:$0xff] }
 0x46d   :  { %v11354_v27 = vcombine.low %v542_v23, %v550_v5 }
 0x46f   :  { %9148 = vmatpush1.bf16.msra.mxu0 %v11242_v13  ;;  %9353 = vmatpush1.bf16.msra.mxu1 %v11244_v18  ;;  %v11340_v13 = vcombine.low %v527_v61, %v535_v62  ;;  %v11355_v18 = vcombine.high %v542_v23, %v550_v5  ;;  %v631_v61 = vld [vmem:[#allocation5 + $0x1078] sm:$0xff]  ;;  %v646_v23 = vld [vmem:[#allocation5 + $0x10f0] sm:$0xff] }
 0x470   :  { %9149 = vmatprep.subr.bf16.mxu0 %v11259_v19  ;;  %9354 = vmatprep.subr.bf16.mxu1 %v11261_v21  ;;  %v11357_v19 = vcombine.high %v543_v6, %v551_v7  ;;  %v558_v21 = vld [vmem:[#allocation5 + $0xe30] sm:$0xff]  ;;  %v639_v5 = vld [vmem:[#allocation5 + $0x10b8] sm:$0xff] }
 0x471   :  { %v11370_v35 = vcombine.low %v558_v21, %v566_v22 }
 0x473   :  { %9150 = vmatpush1.bf16.msra.mxu0 %v11258_v28  ;;  %9355 = vmatpush1.bf16.msra.mxu1 %v11260_v29  ;;  %v11356_v28 = vcombine.low %v543_v6, %v551_v7  ;;  %v11371_v29 = vcombine.high %v558_v21, %v566_v22  ;;  %v647_v6 = vld [vmem:[#allocation5 + $0x10f8] sm:$0xff]  ;;  %v662_v21 = vld [vmem:[#allocation5 + $0x1170] sm:$0xff] }
 0x474   :  { %9151 = vmatprep.subr.bf16.mxu0 %v11275_v57  ;;  %9356 = vmatprep.subr.bf16.mxu1 %v11277_v30  ;;  %v11373_v57 = vcombine.high %v559_v24, %v567_v26  ;;  %v574_v30 = vld [vmem:[#allocation5 + $0xeb0] sm:$0xff]  ;;  %v655_v22 = vld [vmem:[#allocation5 + $0x1138] sm:$0xff] }
 0x475   :  { %v11386_v44 = vcombine.low %v574_v30, %v582_v31 }
 0x477   :  { %9152 = vmatpush1.bf16.msra.mxu0 %v11274_v36  ;;  %9357 = vmatpush1.bf16.msra.mxu1 %v11276_v37  ;;  %v11372_v36 = vcombine.low %v559_v24, %v567_v26  ;;  %v11387_v37 = vcombine.high %v574_v30, %v582_v31  ;;  %v663_v24 = vld [vmem:[#allocation5 + $0x1178] sm:$0xff]  ;;  %v678_v30 = vld [vmem:[#allocation5 + $0x11f0] sm:$0xff] }
 0x478   :  { %9153 = vmatprep.subr.bf16.mxu0 %v11291_v38  ;;  %9358 = vmatprep.subr.bf16.mxu1 %v11293_v40  ;;  %v11389_v38 = vcombine.high %v575_v32, %v583_v33  ;;  %v590_v40 = vld [vmem:[#allocation5 + $0xf30] sm:$0xff]  ;;  %v671_v31 = vld [vmem:[#allocation5 + $0x11b8] sm:$0xff] }
 0x479   :  { %v11402_v53 = vcombine.low %v590_v40, %v598_v41 }
 0x47b   :  { %9154 = vmatpush1.bf16.msra.mxu0 %v11290_v45  ;;  %9359 = vmatpush1.bf16.msra.mxu1 %v11292_v46  ;;  %v11388_v45 = vcombine.low %v575_v32, %v583_v33  ;;  %v11403_v46 = vcombine.high %v590_v40, %v598_v41  ;;  %v679_v32 = vld [vmem:[#allocation5 + $0x11f8] sm:$0xff] }
 0x47c   :  { %9155 = vmatprep.subr.bf16.mxu0 %v11307_v47  ;;  %9360 = vmatprep.subr.bf16.mxu1 %v11309_v49  ;;  %v11405_v47 = vcombine.high %v591_v42, %v599_v43  ;;  %v606_v49 = vld [vmem:[#allocation5 + $0xfb0] sm:$0xff]  ;;  %v687_v40 = vld [vmem:[#allocation5 + $0x1238] sm:$0xff] }
 0x47d   :  { %v11418_v62 = vcombine.low %v606_v49, %v614_v50  ;;  %v695_v41 = vld [vmem:[#allocation5 + $0x1278] sm:$0xff] }
 0x47f   :  { %9156 = vmatpush1.bf16.msra.mxu0 %v11306_v55  ;;  %9361 = vmatpush1.bf16.msra.mxu1 %v11308_v56  ;;  %v11404_v55 = vcombine.low %v591_v42, %v599_v43  ;;  %v11419_v56 = vcombine.high %v606_v49, %v614_v50  ;;  %v11484_v43 = vcombine.low %v671_v31, %v679_v32  ;;  %v711_v49 = vld [vmem:[#allocation5 + $0x12f8] sm:$0xff] }
 0x480   :  { %9157 = vmatprep.subr.bf16.mxu0 %v11323_v12  ;;  %9362 = vmatprep.subr.bf16.mxu1 %v11325_v58  ;;  %v11421_v12 = vcombine.high %v607_v51, %v615_v52  ;;  %v622_v58 = vld [vmem:[#allocation5 + $0x1030] sm:$0xff] }
 0x481   :  { %v11434_v7 = vcombine.low %v622_v58, %v630_v59 }
 0x483   :  { %9158 = vmatpush1.bf16.msra.mxu0 %v11322_v63  ;;  %9363 = vmatpush1.bf16.msra.mxu1 %v11324_v0  ;;  %v11420_v63 = vcombine.low %v607_v51, %v615_v52  ;;  %v11435_v0 = vcombine.high %v622_v58, %v630_v59  ;;  %v11500_v51 = vcombine.low %v687_v40, %v695_v41  ;;  %v727_v58 = vld [vmem:[#allocation5 + $0x1378] sm:$0xff] }
 0x484   :  { %9159 = vmatprep.subr.bf16.mxu0 %v11339_v2  ;;  %9364 = vmatprep.subr.bf16.mxu1 %v11341_v3  ;;  %v11437_v2 = vcombine.high %v623_v60, %v631_v61  ;;  %v638_v3 = vld [vmem:[#allocation5 + $0x10b0] sm:$0xff] }
 0x485   :  { %v11450_v26 = vcombine.low %v638_v3, %v646_v23 }
 0x487   :  { %9160 = vmatpush1.bf16.msra.mxu0 %v11338_v11  ;;  %9365 = vmatpush1.bf16.msra.mxu1 %v11340_v13  ;;  %v11436_v11 = vcombine.low %v623_v60, %v631_v61  ;;  %v11451_v13 = vcombine.high %v638_v3, %v646_v23  ;;  %v743_v3 = vld [vmem:[#allocation5 + $0x13f8] sm:$0xff] }
 0x488   :  { %9161 = vmatprep.subr.bf16.mxu0 %v11355_v18  ;;  %9366 = vmatprep.subr.bf16.mxu1 %v11357_v19  ;;  %v11453_v18 = vcombine.high %v639_v5, %v647_v6  ;;  %v654_v19 = vld [vmem:[#allocation5 + $0x1130] sm:$0xff] }
 0x489   :  { %v11466_v33 = vcombine.low %v654_v19, %v662_v21 }
 0x48b   :  { %9162 = vmatpush1.bf16.msra.mxu0 %v11354_v27  ;;  %9367 = vmatpush1.bf16.msra.mxu1 %v11356_v28  ;;  %v11452_v27 = vcombine.low %v639_v5, %v647_v6  ;;  %v11467_v28 = vcombine.high %v654_v19, %v662_v21  ;;  %v759_v19 = vld [vmem:[#allocation5 + $0x1478] sm:$0xff] }
 0x48c   :  { %9163 = vmatprep.subr.bf16.mxu0 %v11371_v29  ;;  %9368 = vmatprep.subr.bf16.mxu1 %v11373_v57  ;;  %v11469_v29 = vcombine.high %v655_v22, %v663_v24  ;;  %v670_v57 = vld [vmem:[#allocation5 + $0x11b0] sm:$0xff] }
 0x48d   :  { %v11482_v42 = vcombine.low %v670_v57, %v678_v30 }
 0x48f   :  { %9164 = vmatpush1.bf16.msra.mxu0 %v11370_v35  ;;  %9369 = vmatpush1.bf16.msra.mxu1 %v11372_v36  ;;  %v11483_v35 = vcombine.high %v670_v57, %v678_v30  ;;  %v11485_v36 = vcombine.high %v671_v31, %v679_v32  ;;  %v775_v57 = vld [vmem:[#allocation5 + $0x14f8] sm:$0xff] }
 0x490   :  { %9165 = vmatprep.subr.bf16.mxu0 %v11387_v37  ;;  %9370 = vmatprep.subr.bf16.mxu1 %v11389_v38  ;;  %v686_v37 = vld [vmem:[#allocation5 + $0x1230] sm:$0xff] }
 0x491   :  { %v694_v38 = vld [vmem:[#allocation5 + $0x1270] sm:$0xff] }
 0x492   :  { %v11498_v50 = vcombine.low %v686_v37, %v694_v38 }
 0x493   :  { %9166 = vmatpush1.bf16.msra.mxu0 %v11386_v44  ;;  %9371 = vmatpush1.bf16.msra.mxu1 %v11388_v45  ;;  %v11499_v44 = vcombine.high %v686_v37, %v694_v38  ;;  %v702_v45 = vld [vmem:[#allocation5 + $0x12b0] sm:$0xff]  ;;  %v791_v37 = vld [vmem:[#allocation5 + $0x1578] sm:$0xff] }
 0x494   :  { %9167 = vmatprep.subr.bf16.mxu0 %v11403_v46  ;;  %9372 = vmatprep.subr.bf16.mxu1 %v11405_v47  ;;  %v710_v46 = vld [vmem:[#allocation5 + $0x12f0] sm:$0xff]  ;;  %v703_v47 = vld [vmem:[#allocation5 + $0x12b8] sm:$0xff] }
 0x495   :  { %v11515_v52 = vcombine.high %v702_v45, %v710_v46  ;;  %v11514_v59 = vcombine.low %v702_v45, %v710_v46  ;;  %v11516_v60 = vcombine.low %v703_v47, %v711_v49  ;;  %v807_v45 = vld [vmem:[#allocation5 + $0x15f8] sm:$0xff] }
 0x497   :  { %9168 = vmatpush1.bf16.msra.mxu0 %v11402_v53  ;;  %9373 = vmatpush1.bf16.msra.mxu1 %v11404_v55  ;;  %v11517_v53 = vcombine.high %v703_v47, %v711_v49  ;;  %v718_v55 = vld [vmem:[#allocation5 + $0x1330] sm:$0xff] }
 0x498   :  { %9169 = vmatprep.subr.bf16.mxu0 %v11419_v56  ;;  %9374 = vmatprep.subr.bf16.mxu1 %v11421_v12  ;;  %v726_v56 = vld [vmem:[#allocation5 + $0x1370] sm:$0xff]  ;;  %v719_v12 = vld [vmem:[#allocation5 + $0x1338] sm:$0xff] }
 0x499   :  { %v11531_v61 = vcombine.high %v718_v55, %v726_v56  ;;  %v11530_v23 = vcombine.low %v718_v55, %v726_v56  ;;  %v11532_v5 = vcombine.low %v719_v12, %v727_v58  ;;  %v823_v55 = vld [vmem:[#allocation5 + $0x1678] sm:$0xff] }
 0x49b   :  { %9170 = vmatpush1.bf16.msra.mxu0 %v11418_v62  ;;  %9375 = vmatpush1.bf16.msra.mxu1 %v11420_v63  ;;  %v11533_v62 = vcombine.high %v719_v12, %v727_v58  ;;  %v734_v63 = vld [vmem:[#allocation5 + $0x13b0] sm:$0xff] }
 0x49c   :  { %9180 = vmatprep.subr.bf16.mxu0 %v11435_v0  ;;  %9385 = vmatprep.subr.bf16.mxu1 %v11437_v2  ;;  %v742_v0 = vld [vmem:[#allocation5 + $0x13f0] sm:$0xff]  ;;  %v735_v2 = vld [vmem:[#allocation5 + $0x13b8] sm:$0xff] }
 0x49d   :  { %v11547_v6 = vcombine.high %v734_v63, %v742_v0  ;;  %v11546_v21 = vcombine.low %v734_v63, %v742_v0  ;;  %v839_v63 = vld [vmem:[#allocation5 + $0x16f8] sm:$0xff] }
 0x49e   :  { %9172 = vmatmul.mubr.bf16.vlgmr.msra.gmra.mrb[12].mxu0 %v13062_v25  ;;  %9377 = vmatmul.mubr.bf16.vlgmr.msra.gmra.mrb[12].mxu1 %v13062_v25  ;;  %v11468_v25 = vcombine.low %v655_v22, %v663_v24  ;;  %v11548_v22 = vcombine.low %v735_v2, %v743_v3 }
 0x49f   :  { %9181 = vmatpush1.bf16.msra.mxu0 %v11434_v7  ;;  %9386 = vmatpush1.bf16.msra.mxu1 %v11436_v11  ;;  %v11549_v7 = vcombine.high %v735_v2, %v743_v3  ;;  %v750_v11 = vld [vmem:[#allocation5 + $0x1430] sm:$0xff] }
 0x4a0   :  { %9182 = vmatprep.subr.bf16.mxu0 %v11451_v13  ;;  %9387 = vmatprep.subr.bf16.mxu1 %v11453_v18  ;;  %v758_v13 = vld [vmem:[#allocation5 + $0x1470] sm:$0xff]  ;;  %v751_v18 = vld [vmem:[#allocation5 + $0x1438] sm:$0xff] }
 0x4a1   :  { %9212 = vmatprep.mubr.bf16.mxu0 %v13064_v34  ;;  %9417 = vmatprep.mubr.bf16.mxu1 %v13064_v34  ;;  %v11501_v34 = vcombine.high %v687_v40, %v695_v41  ;;  %v11563_v24 = vcombine.high %v750_v11, %v758_v13  ;;  %v11562_v30 = vcombine.low %v750_v11, %v758_v13  ;;  %v855_v11 = vld [vmem:[#allocation5 + $0x1778] sm:$0xff] }
 0x4a2   :  { %v11564_v31 = vcombine.low %v751_v18, %v759_v19 }
 0x4a3   :  { %9183 = vmatpush1.bf16.msra.mxu0 %v11450_v26  ;;  %9388 = vmatpush1.bf16.msra.mxu1 %v11452_v27  ;;  %v11565_v26 = vcombine.high %v751_v18, %v759_v19  ;;  %v766_v27 = vld [vmem:[#allocation5 + $0x14b0] sm:$0xff] }
 0x4a4   :  { %9184 = vmatprep.subr.bf16.mxu0 %v11467_v28  ;;  %9389 = vmatprep.subr.bf16.mxu1 %v11469_v29  ;;  %v774_v28 = vld [vmem:[#allocation5 + $0x14f0] sm:$0xff]  ;;  %v767_v29 = vld [vmem:[#allocation5 + $0x14b8] sm:$0xff] }
 0x4a5   :  { %v11579_v32 = vcombine.high %v766_v27, %v774_v28  ;;  %v11578_v38 = vcombine.low %v766_v27, %v774_v28  ;;  %v11580_v40 = vcombine.low %v767_v29, %v775_v57  ;;  %v871_v27 = vld [vmem:[#allocation5 + $0x17f8] sm:$0xff] }
 0x4a7   :  { %9185 = vmatpush1.bf16.msra.mxu0 %v11466_v33  ;;  %9390 = vmatpush1.bf16.msra.mxu1 %v11468_v25  ;;  %v11581_v33 = vcombine.high %v767_v29, %v775_v57  ;;  %v782_v25 = vld [vmem:[#allocation5 + $0x1530] sm:$0xff] }
 0x4a8   :  { %9186 = vmatprep.subr.bf16.mxu0 %v11483_v35  ;;  %9391 = vmatprep.subr.bf16.mxu1 %v11485_v36  ;;  %v790_v35 = vld [vmem:[#allocation5 + $0x1570] sm:$0xff]  ;;  %v783_v36 = vld [vmem:[#allocation5 + $0x1538] sm:$0xff] }
 0x4a9   :  { %v11595_v41 = vcombine.high %v782_v25, %v790_v35  ;;  %v11594_v46 = vcombine.low %v782_v25, %v790_v35  ;;  %v11596_v47 = vcombine.low %v783_v36, %v791_v37  ;;  %v887_v25 = vld [vmem:[#allocation5 + $0x1878] sm:$0xff] }
 0x4ab   :  { %9187 = vmatpush1.bf16.msra.mxu0 %v11482_v42  ;;  %9392 = vmatpush1.bf16.msra.mxu1 %v11484_v43  ;;  %v11597_v42 = vcombine.high %v783_v36, %v791_v37  ;;  %v798_v43 = vld [vmem:[#allocation5 + $0x15b0] sm:$0xff] }
 0x4ac   :  { %9188 = vmatprep.subr.bf16.mxu0 %v11499_v44  ;;  %9393 = vmatprep.subr.bf16.mxu1 %v11501_v34  ;;  %v806_v44 = vld [vmem:[#allocation5 + $0x15f0] sm:$0xff]  ;;  %v799_v34 = vld [vmem:[#allocation5 + $0x15b8] sm:$0xff] }
 0x4ad   :  { %v11611_v49 = vcombine.high %v798_v43, %v806_v44  ;;  %v11610_v56 = vcombine.low %v798_v43, %v806_v44  ;;  %v11612_v12 = vcombine.low %v799_v34, %v807_v45  ;;  %v903_v43 = vld [vmem:[#allocation5 + $0x18f8] sm:$0xff] }
 0x4af   :  { %9189 = vmatpush1.bf16.msra.mxu0 %v11498_v50  ;;  %9394 = vmatpush1.bf16.msra.mxu1 %v11500_v51  ;;  %v11613_v50 = vcombine.high %v799_v34, %v807_v45  ;;  %v814_v51 = vld [vmem:[#allocation5 + $0x1630] sm:$0xff] }
 0x4b0   :  { %9190 = vmatprep.subr.bf16.mxu0 %v11515_v52  ;;  %9395 = vmatprep.subr.bf16.mxu1 %v11517_v53  ;;  %v822_v52 = vld [vmem:[#allocation5 + $0x1670] sm:$0xff]  ;;  %v815_v53 = vld [vmem:[#allocation5 + $0x1638] sm:$0xff] }
 0x4b1   :  { %v11627_v58 = vcombine.high %v814_v51, %v822_v52  ;;  %v11626_v0 = vcombine.low %v814_v51, %v822_v52  ;;  %v11628_v2 = vcombine.low %v815_v53, %v823_v55  ;;  %v919_v51 = vld [vmem:[#allocation5 + $0x1978] sm:$0xff] }
 0x4b3   :  { %9191 = vmatpush1.bf16.msra.mxu0 %v11514_v59  ;;  %9396 = vmatpush1.bf16.msra.mxu1 %v11516_v60  ;;  %v11629_v59 = vcombine.high %v815_v53, %v823_v55  ;;  %v830_v60 = vld [vmem:[#allocation5 + $0x16b0] sm:$0xff] }
 0x4b4   :  { %9192 = vmatprep.subr.bf16.mxu0 %v11531_v61  ;;  %9397 = vmatprep.subr.bf16.mxu1 %v11533_v62  ;;  %v838_v61 = vld [vmem:[#allocation5 + $0x16f0] sm:$0xff]  ;;  %v831_v62 = vld [vmem:[#allocation5 + $0x16b8] sm:$0xff] }
 0x4b5   :  { %v11643_v3 = vcombine.high %v830_v60, %v838_v61  ;;  %v11642_v13 = vcombine.low %v830_v60, %v838_v61  ;;  %v11644_v18 = vcombine.low %v831_v62, %v839_v63  ;;  %v935_v60 = vld [vmem:[#allocation5 + $0x19f8] sm:$0xff] }
 0x4b7   :  { %9193 = vmatpush1.bf16.msra.mxu0 %v11530_v23  ;;  %9398 = vmatpush1.bf16.msra.mxu1 %v11532_v5  ;;  %v11645_v23 = vcombine.high %v831_v62, %v839_v63  ;;  %v846_v5 = vld [vmem:[#allocation5 + $0x1730] sm:$0xff]  ;;  %v1388_v62 = vlaneseq }
 0x4b8   :  { %9194 = vmatprep.subr.bf16.mxu0 %v11547_v6  ;;  %9399 = vmatprep.subr.bf16.mxu1 %v11549_v7  ;;  %v854_v6 = vld [vmem:[#allocation5 + $0x1770] sm:$0xff]  ;;  %v847_v7 = vld [vmem:[#allocation5 + $0x1738] sm:$0xff] }
 0x4b9   :  { %v11659_v19 = vcombine.high %v846_v5, %v854_v6  ;;  %v11658_v28 = vcombine.low %v846_v5, %v854_v6  ;;  %v11660_v29 = vcombine.low %v847_v7, %v855_v11  ;;  %v951_v5 = vld [vmem:[#allocation5 + $0x1a78] sm:$0xff] }
 0x4bb   :  { %9195 = vmatpush1.bf16.msra.mxu0 %v11546_v21  ;;  %9400 = vmatpush1.bf16.msra.mxu1 %v11548_v22  ;;  %v11661_v21 = vcombine.high %v847_v7, %v855_v11  ;;  %v862_v22 = vld [vmem:[#allocation5 + $0x17b0] sm:$0xff]  ;;  %v13160_v7 = vshrl.u32 %v1388_v62, 7 }
 0x4bc   :  { %9196 = vmatprep.subr.bf16.mxu0 %v11563_v24  ;;  %9401 = vmatprep.subr.bf16.mxu1 %v11565_v26  ;;  %v870_v24 = vld [vmem:[#allocation5 + $0x17f0] sm:$0xff]  ;;  %v863_v26 = vld [vmem:[#allocation5 + $0x17b8] sm:$0xff] }
 0x4bd   :  { %v11675_v57 = vcombine.high %v862_v22, %v870_v24  ;;  %v11674_v35 = vcombine.low %v862_v22, %v870_v24  ;;  %v11676_v36 = vcombine.low %v863_v26, %v871_v27  ;;  %v967_v22 = vld [vmem:[#allocation5 + $0x1af8] sm:$0xff] }
 0x4bf   :  { %9197 = vmatpush1.bf16.msra.mxu0 %v11562_v30  ;;  %9402 = vmatpush1.bf16.msra.mxu1 %v11564_v31  ;;  %v11677_v30 = vcombine.high %v863_v26, %v871_v27  ;;  %v878_v31 = vld [vmem:[#allocation5 + $0x1830] sm:$0xff]  ;;  %v1385_v26 = vld [vmem:[#allocation7 + $0x8] sm:$0xff]  ;;  %v1390_v27 = vsub.s32 0, %v13160_v7 }
 0x4c0   :  { %9198 = vmatprep.subr.bf16.mxu0 %v11579_v32  ;;  %9403 = vmatprep.subr.bf16.mxu1 %v11581_v33  ;;  %v886_v32 = vld [vmem:[#allocation5 + $0x1870] sm:$0xff]  ;;  %v879_v33 = vld [vmem:[#allocation5 + $0x1838] sm:$0xff] }
 0x4c1   :  { %v11691_v37 = vcombine.high %v878_v31, %v886_v32  ;;  %v11690_v44 = vcombine.low %v878_v31, %v886_v32  ;;  %v11692_v34 = vcombine.low %v879_v33, %v887_v25  ;;  %v974_v32 = vld [vmem:[#allocation5 + $0x1b30] sm:$0xff] }
 0x4c3   :  { %9199 = vmatpush1.bf16.msra.mxu0 %v11578_v38  ;;  %9404 = vmatpush1.bf16.msra.mxu1 %v11580_v40  ;;  %v11693_v38 = vcombine.high %v879_v33, %v887_v25  ;;  %v894_v40 = vld [vmem:[#allocation5 + $0x18b0] sm:$0xff]  ;;  %v1402_v25 = vsub.s32 3, %v13160_v7 }
 0x4c4   :  { %9200 = vmatprep.subr.bf16.mxu0 %v11595_v41  ;;  %9405 = vmatprep.subr.bf16.mxu1 %v11597_v42  ;;  %v902_v41 = vld [vmem:[#allocation5 + $0x18f0] sm:$0xff]  ;;  %v895_v42 = vld [vmem:[#allocation5 + $0x18b8] sm:$0xff] }
 0x4c5   :  { %v11707_v45 = vcombine.high %v894_v40, %v902_v41  ;;  %v11706_v52 = vcombine.low %v894_v40, %v902_v41  ;;  %v11708_v53 = vcombine.low %v895_v42, %v903_v43  ;;  %v982_v33 = vld [vmem:[#allocation5 + $0x1b70] sm:$0xff] }
 0x4c7   :  { %9201 = vmatpush1.bf16.msra.mxu0 %v11594_v46  ;;  %9406 = vmatpush1.bf16.msra.mxu1 %v11596_v47  ;;  %v11709_v46 = vcombine.high %v895_v42, %v903_v43  ;;  %v910_v47 = vld [vmem:[#allocation5 + $0x1930] sm:$0xff]  ;;  %v1435_v42 = vrot.slane %v1385_v26, %v1402_v25 }
 0x4c8   :  { %9202 = vmatprep.subr.bf16.mxu0 %v11611_v49  ;;  %9407 = vmatprep.subr.bf16.mxu1 %v11613_v50  ;;  %v918_v49 = vld [vmem:[#allocation5 + $0x1970] sm:$0xff]  ;;  %v911_v50 = vld [vmem:[#allocation5 + $0x1938] sm:$0xff] }
 0x4c9   :  { %v11723_v55 = vcombine.high %v910_v47, %v918_v49  ;;  %v11722_v61 = vcombine.low %v910_v47, %v918_v49  ;;  %v998_v47 = vld [vmem:[#allocation5 + $0x1bf0] sm:$0xff] }
 0x4cb   :  { %9203 = vmatpush1.bf16.msra.mxu0 %v11610_v56  ;;  %9408 = vmatpush1.bf16.msra.mxu1 %v11612_v12  ;;  %v11725_v56 = vcombine.high %v911_v50, %v919_v51  ;;  %v926_v12 = vld [vmem:[#allocation5 + $0x19b0] sm:$0xff] }
 0x4cc   :  { %9204 = vmatprep.subr.bf16.mxu0 %v11627_v58  ;;  %9409 = vmatprep.subr.bf16.mxu1 %v11629_v59  ;;  %v934_v58 = vld [vmem:[#allocation5 + $0x19f0] sm:$0xff]  ;;  %v927_v59 = vld [vmem:[#allocation5 + $0x19b8] sm:$0xff] }
 0x4cd   :  { %v11739_v63 = vcombine.high %v926_v12, %v934_v58  ;;  %v11738_v6 = vcombine.low %v926_v12, %v934_v58 }
 0x4cf   :  { %9205 = vmatpush1.bf16.msra.mxu0 %v11626_v0  ;;  %9410 = vmatpush1.bf16.msra.mxu1 %v11628_v2  ;;  %v11741_v0 = vcombine.high %v927_v59, %v935_v60  ;;  %v942_v2 = vld [vmem:[#allocation5 + $0x1a30] sm:$0xff] }
 0x4d0   :  { %9206 = vmatprep.subr.bf16.mxu0 %v11643_v3  ;;  %9411 = vmatprep.subr.bf16.mxu1 %v11645_v23  ;;  %v950_v3 = vld [vmem:[#allocation5 + $0x1a70] sm:$0xff]  ;;  %v943_v23 = vld [vmem:[#allocation5 + $0x1a38] sm:$0xff] }
 0x4d1   :  { %v11755_v11 = vcombine.high %v942_v2, %v950_v3  ;;  %v11754_v24 = vcombine.low %v942_v2, %v950_v3  ;;  %v1006_v3 = vld [vmem:[#allocation5 + $0x1c30] sm:$0xff] }
 0x4d3   :  { %9207 = vmatpush1.bf16.msra.mxu0 %v11642_v13  ;;  %9412 = vmatpush1.bf16.msra.mxu1 %v11644_v18  ;;  %v11757_v13 = vcombine.high %v943_v23, %v951_v5  ;;  %v958_v18 = vld [vmem:[#allocation5 + $0x1ab0] sm:$0xff] }
 0x4d4   :  { %9208 = vmatprep.subr.bf16.mxu0 %v11659_v19  ;;  %9413 = vmatprep.subr.bf16.mxu1 %v11661_v21  ;;  %v966_v19 = vld [vmem:[#allocation5 + $0x1af0] sm:$0xff]  ;;  %v959_v21 = vld [vmem:[#allocation5 + $0x1ab8] sm:$0xff] }
 0x4d5   :  { %v11773_v31 = vcombine.high %v959_v21, %v967_v22  ;;  %v11770_v41 = vcombine.low %v958_v18, %v966_v19  ;;  %v11772_v43 = vcombine.low %v959_v21, %v967_v22  ;;  %v1030_v21 = vld [vmem:[#allocation5 + $0x1cf0] sm:$0xff]  ;;  %v1023_v22 = vld [vmem:[#allocation5 + $0x1cb8] sm:$0xff] }
 0x4d7   :  { %9209 = vmatpush1.bf16.msra.mxu0 %v11658_v28  ;;  %9414 = vmatpush1.bf16.msra.mxu1 %v11660_v29  ;;  %v11756_v28 = vcombine.low %v943_v23, %v951_v5  ;;  %v11771_v29 = vcombine.high %v958_v18, %v966_v19  ;;  %v1014_v23 = vld [vmem:[#allocation5 + $0x1c70] sm:$0xff]  ;;  %v1007_v5 = vld [vmem:[#allocation5 + $0x1c38] sm:$0xff] }
 0x4d8   :  { %9210 = vmatprep.subr.bf16.mxu0 %v11675_v57  ;;  %9415 = vmatprep.subr.bf16.mxu1 %v11677_v30  ;;  %v1398_v57 = vsub.s32 2, %v13160_v7  ;;  %v1394_v30 = vsub.s32 1, %v13160_v7  ;;  %v1022_v19 = vld [vmem:[#allocation5 + $0x1cb0] sm:$0xff] }
 0x4da   :  { %v1427_v40 = vrot.slane %v1385_v26, %v1394_v30 }
 0x4db   :  { %9211 = vmatpush1.bf16.msra.mxu0 %v11674_v35  ;;  %9416 = vmatpush1.bf16.msra.mxu1 %v11676_v36  ;;  %v1423_v35 = vrot.slane %v1385_v26, %v1390_v27  ;;  %v975_v36 = vld [vmem:[#allocation5 + $0x1b38] sm:$0xff] }
 0x4dc   :  { %9221 = vmatprep.subr.bf16.mxu0 %v11691_v37  ;;  %9426 = vmatprep.subr.bf16.mxu1 %v11693_v38  ;;  %v983_v37 = vld [vmem:[#allocation5 + $0x1b78] sm:$0xff]  ;;  %v1431_v38 = vrot.slane %v1385_v26, %v1398_v57  ;;  %v11818_v26 = vcombine.low %v1006_v3, %v1014_v23 }
 0x4de   :  { %9213 = vmatmul.mubr.bf16.vlgmr.msra.gmra.mrb[12].mxu0 %v13070_v39  ;;  %9418 = vmatmul.mubr.bf16.vlgmr.msra.gmra.mrb[12].mxu1 %v13070_v39  ;;  %v11724_v39 = vcombine.low %v911_v50, %v919_v51 }
 0x4df   :  { %9222 = vmatpush1.bf16.msra.mxu0 %v11690_v44  ;;  %9427 = vmatpush1.bf16.msra.mxu1 %v11692_v34  ;;  %v11787_v44 = vcombine.high %v974_v32, %v982_v33 }
 0x4e0   :  { %9223 = vmatprep.subr.bf16.mxu0 %v11707_v45  ;;  %9428 = vmatprep.subr.bf16.mxu1 %v11709_v46  ;;  %v11789_v45 = vcombine.high %v975_v36, %v983_v37  ;;  %v990_v46 = vld [vmem:[#allocation5 + $0x1bb0] sm:$0xff] }
 0x4e1   :  { %9253 = vmatprep.mubr.bf16.mxu0 %v13072_v48  ;;  %9458 = vmatprep.mubr.bf16.mxu1 %v13072_v48  ;;  %v11740_v48 = vcombine.low %v927_v59, %v935_v60  ;;  %v11786_v59 = vcombine.low %v974_v32, %v982_v33  ;;  %v1038_v32 = vld [vmem:[#allocation5 + $0x1d30] sm:$0xff] }
 0x4e2   :  { %v1046_v33 = vld [vmem:[#allocation5 + $0x1d70] sm:$0xff] }
 0x4e3   :  { %9224 = vmatpush1.bf16.msra.mxu0 %v11706_v52  ;;  %9429 = vmatpush1.bf16.msra.mxu1 %v11708_v53  ;;  %v991_v52 = vld [vmem:[#allocation5 + $0x1bb8] sm:$0xff] }
 0x4e4   :  { %9225 = vmatprep.subr.bf16.mxu0 %v11723_v55  ;;  %9430 = vmatprep.subr.bf16.mxu1 %v11725_v56  ;;  %v999_v53 = vld [vmem:[#allocation5 + $0x1bf8] sm:$0xff] }
 0x4e5   :  { %v11805_v2 = vcombine.high %v991_v52, %v999_v53 }
 0x4e7   :  { %9226 = vmatpush1.bf16.msra.mxu0 %v11722_v61  ;;  %9431 = vmatpush1.bf16.msra.mxu1 %v11724_v39  ;;  %v11788_v39 = vcombine.low %v975_v36, %v983_v37  ;;  %v1047_v36 = vld [vmem:[#allocation5 + $0x1d78] sm:$0xff]  ;;  %v11834_v37 = vcombine.low %v1022_v19, %v1030_v21 }
 0x4e8   :  { %9227 = vmatprep.subr.bf16.mxu0 %v11739_v63  ;;  %9432 = vmatprep.subr.bf16.mxu1 %v11741_v0  ;;  %v11803_v63 = vcombine.high %v990_v46, %v998_v47 }
 0x4eb   :  { %9228 = vmatpush1.bf16.msra.mxu0 %v11738_v6  ;;  %9433 = vmatpush1.bf16.msra.mxu1 %v11740_v48  ;;  %v1015_v6 = vld [vmem:[#allocation5 + $0x1c78] sm:$0xff]  ;;  %v11802_v48 = vcombine.low %v990_v46, %v998_v47 }
 0x4ec   :  { %9229 = vmatprep.subr.bf16.mxu0 %v11755_v11  ;;  %9434 = vmatprep.subr.bf16.mxu1 %v11757_v13  ;;  %v11804_v11 = vcombine.low %v991_v52, %v999_v53  ;;  %v11819_v13 = vcombine.high %v1006_v3, %v1014_v23  ;;  %v11821_v18 = vcombine.high %v1007_v5, %v1015_v6  ;;  %v1078_v52 = vld [vmem:[#allocation5 + $0x1e70] sm:$0xff]  ;;  %v1071_v53 = vld [vmem:[#allocation5 + $0x1e38] sm:$0xff] }
 0x4ef   :  { %9230 = vmatpush1.bf16.msra.mxu0 %v11754_v24  ;;  %9435 = vmatpush1.bf16.msra.mxu1 %v11756_v28  ;;  %v1031_v24 = vld [vmem:[#allocation5 + $0x1cf8] sm:$0xff]  ;;  %v11820_v28 = vcombine.low %v1007_v5, %v1015_v6 }
 0x4f0   :  { %9231 = vmatprep.subr.bf16.mxu0 %v11771_v29  ;;  %9436 = vmatprep.subr.bf16.mxu1 %v11773_v31  ;;  %v11835_v29 = vcombine.high %v1022_v19, %v1030_v21  ;;  %v11837_v31 = vcombine.high %v1023_v22, %v1031_v24 }
 0x4f1   :  { %v8886_v34 = vpop.f32.mrb[8].mxu0  ;;  %v9091_v50 = vpop.f32.mrb[8].mxu1 }
 0x4f2   :  { %v13174_v49 = vadd.f32 %v8886_v34, %v1423_v35  ;;  %v8888_v51 = vpop.f32.mrb[9].mxu0  ;;  %v13176_v55 = vadd.f32 %v9091_v50, %v1431_v38  ;;  %v9093_v12 = vpop.f32.mrb[9].mxu1  ;;  %v1039_v35 = vld [vmem:[#allocation5 + $0x1d38] sm:$0xff]  ;;  %v11836_v38 = vcombine.low %v1023_v22, %v1031_v24 }
 0x4f3   :  { %v13178_v56 = vadd.f32 %v8888_v51, %v1427_v40  ;;  %v8890_v58 = vpop.f32.mrb[10].mxu0  ;;  %9232 = vmatpush1.bf16.msra.mxu0 %v11770_v41  ;;  %v13180_v60 = vadd.f32 %v9093_v12, %v1435_v42  ;;  %v9095_v61 = vpop.f32.mrb[10].mxu1  ;;  %9437 = vmatpush1.bf16.msra.mxu1 %v11772_v43  ;;  %v11851_v40 = vcombine.high %v1038_v32, %v1046_v33  ;;  %v1054_v42 = vld [vmem:[#allocation5 + $0x1db0] sm:$0xff]  ;;  %v1063_v34 = vld [vmem:[#allocation5 + $0x1df8] sm:$0xff] }
 0x4f4   :  { %v8891_v62 = vpop.f32.mrb[11].mxu0  ;;  %9233 = vmatprep.subr.bf16.mxu0 %v11787_v44  ;;  %v9096_v0 = vpop.f32.mrb[11].mxu1  ;;  %9438 = vmatprep.subr.bf16.mxu1 %v11789_v45  ;;  %v11853_v41 = vcombine.high %v1039_v35, %v1047_v36  ;;  %v1062_v43 = vld [vmem:[#allocation5 + $0x1df0] sm:$0xff]  ;;  %v1055_v44 = vld [vmem:[#allocation5 + $0x1db8] sm:$0xff]  ;;  %v11850_v45 = vcombine.low %v1038_v32, %v1046_v33  ;;  %v11852_v46 = vcombine.low %v1039_v35, %v1047_v36 }
 0x4f5   :  { %v11867_v47 = vcombine.high %v1054_v42, %v1062_v43  ;;  %v11869_v50 = vcombine.high %v1055_v44, %v1063_v34  ;;  %v1070_v51 = vld [vmem:[#allocation5 + $0x1e30] sm:$0xff]  ;;  %v1079_v12 = vld [vmem:[#allocation5 + $0x1e78] sm:$0xff]  ;;  %v11866_v58 = vcombine.low %v1054_v42, %v1062_v43 }
 0x4f6   :  { %v11883_v61 = vcombine.high %v1070_v51, %v1078_v52  ;;  %v11885_v62 = vcombine.high %v1071_v53, %v1079_v12  ;;  %v1087_v0 = vld [vmem:[#allocation5 + $0x1eb8] sm:$0xff]  ;;  %v11882_v3 = vcombine.low %v1070_v51, %v1078_v52  ;;  %v11884_v23 = vcombine.low %v1071_v53, %v1079_v12 }
 0x4f7   :  { %9234 = vmatpush1.bf16.msra.mxu0 %v11786_v59  ;;  %9439 = vmatpush1.bf16.msra.mxu1 %v11788_v39  ;;  %v11868_v59 = vcombine.low %v1055_v44, %v1063_v34  ;;  %v1086_v39 = vld [vmem:[#allocation5 + $0x1eb0] sm:$0xff] }
 0x4f8   :  { %9235 = vmatprep.subr.bf16.mxu0 %v11803_v63  ;;  %9440 = vmatprep.subr.bf16.mxu1 %v11805_v2  ;;  %v1094_v63 = vld [vmem:[#allocation5 + $0x1ef0] sm:$0xff]  ;;  %v1095_v2 = vld [vmem:[#allocation5 + $0x1ef8] sm:$0xff] }
 0x4f9   :  { %v11899_v5 = vcombine.high %v1086_v39, %v1094_v63  ;;  %v11901_v6 = vcombine.high %v1087_v0, %v1095_v2  ;;  %v11898_v19 = vcombine.low %v1086_v39, %v1094_v63  ;;  %v11900_v21 = vcombine.low %v1087_v0, %v1095_v2 }
 0x4fb   :  { %9236 = vmatpush1.bf16.msra.mxu0 %v11802_v48  ;;  %9441 = vmatpush1.bf16.msra.mxu1 %v11804_v11  ;;  %v1102_v48 = vld [vmem:[#allocation5 + $0x1f30] sm:$0xff] }
 0x4fc   :  { %9237 = vmatprep.subr.bf16.mxu0 %v11819_v13  ;;  %9442 = vmatprep.subr.bf16.mxu1 %v11821_v18  ;;  %v1110_v11 = vld [vmem:[#allocation5 + $0x1f70] sm:$0xff]  ;;  %v1103_v13 = vld [vmem:[#allocation5 + $0x1f38] sm:$0xff] }
 0x4fd   :  { %v1111_v18 = vld [vmem:[#allocation5 + $0x1f78] sm:$0xff]  ;;  %v11915_v22 = vcombine.high %v1102_v48, %v1110_v11  ;;  %v11914_v32 = vcombine.low %v1102_v48, %v1110_v11 }
 0x4fe   :  { %v11917_v24 = vcombine.high %v1103_v13, %v1111_v18  ;;  %v11916_v33 = vcombine.low %v1103_v13, %v1111_v18  ;;  %v1198_v18 = vld [vmem:[#allocation5 + $0x2230] sm:$0xff] }
 0x4ff   :  { %9238 = vmatpush1.bf16.msra.mxu0 %v11818_v26  ;;  %9443 = vmatpush1.bf16.msra.mxu1 %v11820_v28  ;;  %v1118_v26 = vld [vmem:[#allocation5 + $0x1fb0] sm:$0xff] }
 0x500   :  { %9239 = vmatprep.subr.bf16.mxu0 %v11835_v29  ;;  %9444 = vmatprep.subr.bf16.mxu1 %v11837_v31  ;;  %v1126_v28 = vld [vmem:[#allocation5 + $0x1ff0] sm:$0xff]  ;;  %v1119_v29 = vld [vmem:[#allocation5 + $0x1fb8] sm:$0xff] }
 0x501   :  { %v1127_v31 = vld [vmem:[#allocation5 + $0x1ff8] sm:$0xff]  ;;  %v11931_v35 = vcombine.high %v1118_v26, %v1126_v28  ;;  %v11930_v42 = vcombine.low %v1118_v26, %v1126_v28 }
 0x502   :  { %v11933_v36 = vcombine.high %v1119_v29, %v1127_v31  ;;  %v11932_v43 = vcombine.low %v1119_v29, %v1127_v31  ;;  %v1214_v29 = vld [vmem:[#allocation5 + $0x22b0] sm:$0xff] }
 0x503   :  { %9240 = vmatpush1.bf16.msra.mxu0 %v11834_v37  ;;  %9445 = vmatpush1.bf16.msra.mxu1 %v11836_v38  ;;  %v1134_v37 = vld [vmem:[#allocation5 + $0x2030] sm:$0xff] }
 0x504   :  { %9241 = vmatprep.subr.bf16.mxu0 %v11851_v40  ;;  %9446 = vmatprep.subr.bf16.mxu1 %v11853_v41  ;;  %v1142_v38 = vld [vmem:[#allocation5 + $0x2070] sm:$0xff]  ;;  %v1135_v40 = vld [vmem:[#allocation5 + $0x2038] sm:$0xff] }
 0x505   :  { %v1143_v41 = vld [vmem:[#allocation5 + $0x2078] sm:$0xff]  ;;  %v11947_v44 = vcombine.high %v1134_v37, %v1142_v38  ;;  %v11946_v51 = vcombine.low %v1134_v37, %v1142_v38  ;;  %v1222_v31 = vld [vmem:[#allocation5 + $0x22f0] sm:$0xff] }
 0x506   :  { %v11949_v34 = vcombine.high %v1135_v40, %v1143_v41  ;;  %v11948_v52 = vcombine.low %v1135_v40, %v1143_v41  ;;  %v12027_v37 = vcombine.high %v1214_v29, %v1222_v31  ;;  %v1230_v40 = vld [vmem:[#allocation5 + $0x2330] sm:$0xff] }
 0x507   :  { %9242 = vmatpush1.bf16.msra.mxu0 %v11850_v45  ;;  %9447 = vmatpush1.bf16.msra.mxu1 %v11852_v46  ;;  %v1150_v45 = vld [vmem:[#allocation5 + $0x20b0] sm:$0xff] }
 0x508   :  { %9243 = vmatprep.subr.bf16.mxu0 %v11867_v47  ;;  %9448 = vmatprep.subr.bf16.mxu1 %v11869_v50  ;;  %v1158_v46 = vld [vmem:[#allocation5 + $0x20f0] sm:$0xff]  ;;  %v1151_v47 = vld [vmem:[#allocation5 + $0x20b8] sm:$0xff] }
 0x509   :  { %v1159_v50 = vld [vmem:[#allocation5 + $0x20f8] sm:$0xff]  ;;  %v11963_v53 = vcombine.high %v1150_v45, %v1158_v46  ;;  %v11962_v39 = vcombine.low %v1150_v45, %v1158_v46  ;;  %v1238_v41 = vld [vmem:[#allocation5 + $0x2370] sm:$0xff] }
 0x50a   :  { %v11965_v12 = vcombine.high %v1151_v47, %v1159_v50  ;;  %v11964_v63 = vcombine.low %v1151_v47, %v1159_v50  ;;  %v12043_v45 = vcombine.high %v1230_v40, %v1238_v41  ;;  %v1246_v47 = vld [vmem:[#allocation5 + $0x23b0] sm:$0xff] }
 0x50b   :  { %9244 = vmatpush1.bf16.msra.mxu0 %v11866_v58  ;;  %9449 = vmatpush1.bf16.msra.mxu1 %v11868_v59  ;;  %v1166_v58 = vld [vmem:[#allocation5 + $0x2130] sm:$0xff] }
 0x50c   :  { %9245 = vmatprep.subr.bf16.mxu0 %v11883_v61  ;;  %9450 = vmatprep.subr.bf16.mxu1 %v11885_v62  ;;  %v1174_v59 = vld [vmem:[#allocation5 + $0x2170] sm:$0xff]  ;;  %v1167_v61 = vld [vmem:[#allocation5 + $0x2138] sm:$0xff] }
 0x50d   :  { %v1175_v62 = vld [vmem:[#allocation5 + $0x2178] sm:$0xff]  ;;  %v11979_v0 = vcombine.high %v1166_v58, %v1174_v59  ;;  %v11978_v48 = vcombine.low %v1166_v58, %v1174_v59  ;;  %v1254_v50 = vld [vmem:[#allocation5 + $0x23f0] sm:$0xff] }
 0x50e   :  { %v11981_v2 = vcombine.high %v1167_v61, %v1175_v62  ;;  %v12059_v58 = vcombine.high %v1246_v47, %v1254_v50 }
 0x50f   :  { %9246 = vmatpush1.bf16.msra.mxu0 %v11882_v3  ;;  %9451 = vmatpush1.bf16.msra.mxu1 %v11884_v23  ;;  %v1182_v3 = vld [vmem:[#allocation5 + $0x21b0] sm:$0xff] }
 0x510   :  { %9247 = vmatprep.subr.bf16.mxu0 %v11899_v5  ;;  %9452 = vmatprep.subr.bf16.mxu1 %v11901_v6  ;;  %v1190_v23 = vld [vmem:[#allocation5 + $0x21f0] sm:$0xff]  ;;  %v1183_v5 = vld [vmem:[#allocation5 + $0x21b8] sm:$0xff] }
 0x511   :  { %v1191_v6 = vld [vmem:[#allocation5 + $0x21f8] sm:$0xff]  ;;  %v11995_v11 = vcombine.high %v1182_v3, %v1190_v23 }
 0x512   :  { %v11997_v13 = vcombine.high %v1183_v5, %v1191_v6  ;;  %v11996_v26 = vcombine.low %v1183_v5, %v1191_v6  ;;  %v1278_v5 = vld [vmem:[#allocation5 + $0x24b0] sm:$0xff] }
 0x513   :  { %9248 = vmatpush1.bf16.msra.mxu0 %v11898_v19  ;;  %9453 = vmatpush1.bf16.msra.mxu1 %v11900_v21  ;;  %v1206_v19 = vld [vmem:[#allocation5 + $0x2270] sm:$0xff]  ;;  %v1199_v21 = vld [vmem:[#allocation5 + $0x2238] sm:$0xff] }
 0x514   :  { %9249 = vmatprep.subr.bf16.mxu0 %v11915_v22  ;;  %9454 = vmatprep.subr.bf16.mxu1 %v11917_v24  ;;  %v1207_v22 = vld [vmem:[#allocation5 + $0x2278] sm:$0xff]  ;;  %v11994_v24 = vcombine.low %v1182_v3, %v1190_v23  ;;  %v12011_v28 = vcombine.high %v1198_v18, %v1206_v19  ;;  %v1286_v6 = vld [vmem:[#allocation5 + $0x24f0] sm:$0xff] }
 0x517   :  { %9250 = vmatpush1.bf16.msra.mxu0 %v11914_v32  ;;  %9455 = vmatpush1.bf16.msra.mxu1 %v11916_v33  ;;  %v1215_v32 = vld [vmem:[#allocation5 + $0x22b8] sm:$0xff] }
 0x518   :  { %9251 = vmatprep.subr.bf16.mxu0 %v11931_v35  ;;  %9456 = vmatprep.subr.bf16.mxu1 %v11933_v36  ;;  %v1223_v33 = vld [vmem:[#allocation5 + $0x22f8] sm:$0xff]  ;;  %v12010_v35 = vcombine.low %v1198_v18, %v1206_v19  ;;  %v12012_v36 = vcombine.low %v1199_v21, %v1207_v22  ;;  %v12091_v18 = vcombine.high %v1278_v5, %v1286_v6 }
 0x519   :  { %v12029_v38 = vcombine.high %v1215_v32, %v1223_v33 }
 0x51b   :  { %9252 = vmatpush1.bf16.msra.mxu0 %v11930_v42  ;;  %9457 = vmatpush1.bf16.msra.mxu1 %v11932_v43  ;;  %v1231_v42 = vld [vmem:[#allocation5 + $0x2338] sm:$0xff] }
 0x51c   :  { %9262 = vmatprep.subr.bf16.mxu0 %v11947_v44  ;;  %9467 = vmatprep.subr.bf16.mxu1 %v11949_v34  ;;  %v1239_v43 = vld [vmem:[#allocation5 + $0x2378] sm:$0xff]  ;;  %v12026_v44 = vcombine.low %v1214_v29, %v1222_v31  ;;  %v12028_v34 = vcombine.low %v1215_v32, %v1223_v33  ;;  %v1310_v32 = vld [vmem:[#allocation5 + $0x25b0] sm:$0xff] }
 0x51d   :  { %v12045_v46 = vcombine.high %v1231_v42, %v1239_v43  ;;  %v1318_v33 = vld [vmem:[#allocation5 + $0x25f0] sm:$0xff] }
 0x51e   :  { %9254 = vmatmul.mubr.bf16.vlgmr.msra.gmra.mrb[12].mxu0 %v13078_v54  ;;  %9459 = vmatmul.mubr.bf16.vlgmr.msra.gmra.mrb[12].mxu1 %v13078_v54  ;;  %v11980_v54 = vcombine.low %v1167_v61, %v1175_v62  ;;  %v1262_v61 = vld [vmem:[#allocation5 + $0x2430] sm:$0xff] }
 0x51f   :  { %9263 = vmatpush1.bf16.msra.mxu0 %v11946_v51  ;;  %9468 = vmatpush1.bf16.msra.mxu1 %v11948_v52  ;;  %v1247_v51 = vld [vmem:[#allocation5 + $0x23b8] sm:$0xff]  ;;  %v1270_v62 = vld [vmem:[#allocation5 + $0x2470] sm:$0xff] }
 0x520   :  { %9264 = vmatprep.subr.bf16.mxu0 %v11963_v53  ;;  %9469 = vmatprep.subr.bf16.mxu1 %v11965_v12  ;;  %v1255_v52 = vld [vmem:[#allocation5 + $0x23f8] sm:$0xff]  ;;  %v12042_v53 = vcombine.low %v1230_v40, %v1238_v41  ;;  %v12044_v12 = vcombine.low %v1231_v42, %v1239_v43  ;;  %v12075_v3 = vcombine.high %v1262_v61, %v1270_v62  ;;  %v1326_v42 = vld [vmem:[#allocation5 + $0x2630] sm:$0xff] }
 0x521   :  { %9294 = vmatprep.mubr.bf16.mxu0 %v13080_v1  ;;  %9499 = vmatprep.mubr.bf16.mxu1 %v13080_v1  ;;  %v12013_v1 = vcombine.high %v1199_v21, %v1207_v22  ;;  %v12061_v59 = vcombine.high %v1247_v51, %v1255_v52  ;;  %v1294_v21 = vld [vmem:[#allocation5 + $0x2530] sm:$0xff]  ;;  %v12123_v40 = vcombine.high %v1310_v32, %v1318_v33 }
 0x522   :  { %v1302_v22 = vld [vmem:[#allocation5 + $0x2570] sm:$0xff] }
 0x523   :  { %9265 = vmatpush1.bf16.msra.mxu0 %v11962_v39  ;;  %9470 = vmatpush1.bf16.msra.mxu1 %v11964_v63  ;;  %v1263_v39 = vld [vmem:[#allocation5 + $0x2438] sm:$0xff]  ;;  %v12107_v29 = vcombine.high %v1294_v21, %v1302_v22  ;;  %v1334_v43 = vld [vmem:[#allocation5 + $0x2670] sm:$0xff] }
 0x524   :  { %9266 = vmatprep.subr.bf16.mxu0 %v11979_v0  ;;  %9471 = vmatprep.subr.bf16.mxu1 %v11981_v2  ;;  %v1271_v63 = vld [vmem:[#allocation5 + $0x2478] sm:$0xff]  ;;  %v12058_v0 = vcombine.low %v1246_v47, %v1254_v50  ;;  %v12060_v2 = vcombine.low %v1247_v51, %v1255_v52  ;;  %v12139_v50 = vcombine.high %v1326_v42, %v1334_v43 }
 0x525   :  { %v12077_v23 = vcombine.high %v1263_v39, %v1271_v63 }
 0x527   :  { %9267 = vmatpush1.bf16.msra.mxu0 %v11978_v48  ;;  %9472 = vmatpush1.bf16.msra.mxu1 %v11980_v54  ;;  %v1279_v48 = vld [vmem:[#allocation5 + $0x24b8] sm:$0xff] }
 0x528   :  { %9268 = vmatprep.subr.bf16.mxu0 %v11995_v11  ;;  %9473 = vmatprep.subr.bf16.mxu1 %v11997_v13  ;;  %v1287_v54 = vld [vmem:[#allocation5 + $0x24f8] sm:$0xff]  ;;  %v12074_v11 = vcombine.low %v1262_v61, %v1270_v62  ;;  %v12076_v13 = vcombine.low %v1263_v39, %v1271_v63  ;;  %v12138_v62 = vcombine.low %v1326_v42, %v1334_v43  ;;  %v12656_v43 = vld [vmem:[#allocation8 + $0x50] sm:$0xff]  }
 0x529   :  { %v12093_v19 = vcombine.high %v1279_v48, %v1287_v54  ;;  %v1351_v61 = vld [vmem:[#allocation5 + $0x26f8] sm:$0xff] }
 0x52a   :  { %v12655_v42 = vld [vmem:[#allocation8 + $0x88] sm:$0xff]  }
 0x52b   :  { %9269 = vmatpush1.bf16.msra.mxu0 %v11994_v24  ;;  %9474 = vmatpush1.bf16.msra.mxu1 %v11996_v26  ;;  %v1295_v24 = vld [vmem:[#allocation5 + $0x2538] sm:$0xff] }
 0x52c   :  { %9270 = vmatprep.subr.bf16.mxu0 %v12011_v28  ;;  %9475 = vmatprep.subr.bf16.mxu1 %v12013_v1  ;;  %v1303_v26 = vld [vmem:[#allocation5 + $0x2578] sm:$0xff]  ;;  %v12090_v28 = vcombine.low %v1278_v5, %v1286_v6  ;;  %v12092_v1 = vcombine.low %v1279_v48, %v1287_v54 }
 0x52d   :  { %v12109_v31 = vcombine.high %v1295_v24, %v1303_v26  ;;  %v1359_v5 = vld [vmem:[#allocation5 + $0x2738] sm:$0xff] }
 0x52e   :  { %v1367_v6 = vld [vmem:[#allocation5 + $0x2778] sm:$0xff] }
 0x52f   :  { %9271 = vmatpush1.bf16.msra.mxu0 %v12010_v35  ;;  %9476 = vmatpush1.bf16.msra.mxu1 %v12012_v36  ;;  %v1311_v35 = vld [vmem:[#allocation5 + $0x25b8] sm:$0xff] }
 0x530   :  { %9272 = vmatprep.subr.bf16.mxu0 %v12027_v37  ;;  %9477 = vmatprep.subr.bf16.mxu1 %v12029_v38  ;;  %v1319_v36 = vld [vmem:[#allocation5 + $0x25f8] sm:$0xff]  ;;  %v12106_v37 = vcombine.low %v1294_v21, %v1302_v22  ;;  %v12108_v38 = vcombine.low %v1295_v24, %v1303_v26 }
 0x531   :  { %v12125_v41 = vcombine.high %v1311_v35, %v1319_v36  ;;  %v12124_v47 = vcombine.low %v1311_v35, %v1319_v36  ;;  %v12651_v35 = vld [vmem:[#allocation8 + $0x80] sm:$0xff]   ;;  %v12652_v36 = vld [vmem:[#allocation8 + $0x48] sm:$0xff]  }
 0x533   :  { %9273 = vmatpush1.bf16.msra.mxu0 %v12026_v44  ;;  %9478 = vmatpush1.bf16.msra.mxu1 %v12028_v34  ;;  %v13186_v44 = vld [vmem:[#allocation7] sm:$0xff]  ;;  %v1327_v34 = vld [vmem:[#allocation5 + $0x2638] sm:$0xff] }
 0x534   :  { %9274 = vmatprep.subr.bf16.mxu0 %v12043_v45  ;;  %9479 = vmatprep.subr.bf16.mxu1 %v12045_v46  ;;  %v1335_v45 = vld [vmem:[#allocation5 + $0x2678] sm:$0xff]  ;;  %v12122_v46 = vcombine.low %v1310_v32, %v1318_v33  ;;  %v1395_v51 = vrot.slane %v13186_v44, %v1394_v30  ;;  %v12650_v32 = vld [vmem:[#allocation8] sm:$0xff]  }
 0x535   :  { %v12141_v52 = vcombine.high %v1327_v34, %v1335_v45  ;;  %v12140_v39 = vcombine.low %v1327_v34, %v1335_v45  ;;  %v12657_v34 = vld [vmem:[#allocation8 + $0xd0] sm:$0xff]  }
 0x536   :  { %v12658_v45 = vld [vmem:[#allocation8 + $0x10] sm:$0xff]  }
 0x537   :  { %9275 = vmatpush1.bf16.msra.mxu0 %v12042_v53  ;;  %9480 = vmatpush1.bf16.msra.mxu1 %v12044_v12  ;;  %v1342_v53 = vld [vmem:[#allocation5 + $0x26b0] sm:$0xff] }
 0x538   :  { %9276 = vmatprep.subr.bf16.mxu0 %v12059_v58  ;;  %9481 = vmatprep.subr.bf16.mxu1 %v12061_v59  ;;  %v1350_v12 = vld [vmem:[#allocation5 + $0x26f0] sm:$0xff]  ;;  %v1403_v58 = vrot.slane %v13186_v44, %v1402_v25  ;;  %v1343_v59 = vld [vmem:[#allocation5 + $0x26b8] sm:$0xff] }
 0x539   :  { %v12155_v63 = vcombine.high %v1342_v53, %v1350_v12  ;;  %v12157_v30 = vcombine.high %v1343_v59, %v1351_v61  ;;  %v12154_v25 = vcombine.low %v1342_v53, %v1350_v12  ;;  %v12156_v48 = vcombine.low %v1343_v59, %v1351_v61  ;;  %v12662_v53 = vld [vmem:[#allocation8 + $0x18] sm:$0xff]   ;;  %v12664_v59 = vld [vmem:[#allocation8 + $0x60] sm:$0xff]  }
 0x53a   :  { %v1399_v12 = vrot.slane %v13186_v44, %v1398_v57 }
 0x53b   :  { %9277 = vmatpush1.bf16.msra.mxu0 %v12058_v0  ;;  %9482 = vmatpush1.bf16.msra.mxu1 %v12060_v2  ;;  %v12496_v0 = vadd.f32 %v13108_v17, %v1395_v51  ;;  %v1358_v2 = vld [vmem:[#allocation5 + $0x2730] sm:$0xff]  ;;  %v1375_v17 = vld [vmem:[#allocation5 + $0x27b8] sm:$0xff]  ;;  %v1418_v51 = vsub.s32 7, %v13160_v7 }
 0x53c   :  { %9278 = vmatprep.subr.bf16.mxu0 %v12075_v3  ;;  %9483 = vmatprep.subr.bf16.mxu1 %v12077_v23  ;;  %v1366_v3 = vld [vmem:[#allocation5 + $0x2770] sm:$0xff]  ;;  %v12498_v23 = vadd.f32 %v13110_v20, %v1403_v58  ;;  %v12172_v20 = vcombine.low %v1359_v5, %v1367_v6  ;;  %v12663_v58 = vld [vmem:[#allocation8 + $0x98] sm:$0xff]   ;;  %v12497_v57 = vadd.f32 %v13106_v16, %v1399_v12  ;;  %v12673_v16 = vld [vmem:[#allocation8 + $0xf0] sm:$0xff]  }
 0x53d   :  { %v12171_v54 = vcombine.high %v1358_v2, %v1366_v3  ;;  %12776 = vtanh.f32 %v12496_v0  ;;  %v12170_v21 = vcombine.low %v1358_v2, %v1366_v3  ;;  %v12667_v0 = vld [vmem:[#allocation8 + $0xa0] sm:$0xff]   ;;  %v12669_v3 = vld [vmem:[#allocation8 + $0xe8] sm:$0xff]  }
 0x53e   :  { %12778 = vtanh.f32 %v12498_v23 }
 0x53f   :  { %9279 = vmatpush1.bf16.msra.mxu0 %v12074_v11  ;;  %9484 = vmatpush1.bf16.msra.mxu1 %v12076_v13  ;;  %v12173_v11 = vcombine.high %v1359_v5, %v1367_v6  ;;  %v1374_v13 = vld [vmem:[#allocation5 + $0x27b0] sm:$0xff]  ;;  %v12670_v5 = vld [vmem:[#allocation8 + $0x28] sm:$0xff]   ;;  %v12672_v6 = vld [vmem:[#allocation8 + $0x70] sm:$0xff]  }
 0x540   :  { %9280 = vmatprep.subr.bf16.mxu0 %v12091_v18  ;;  %9485 = vmatprep.subr.bf16.mxu1 %v12093_v19  ;;  %v1382_v18 = vld [vmem:[#allocation5 + $0x27f0] sm:$0xff]  ;;  %v1383_v19 = vld [vmem:[#allocation5 + $0x27f8] sm:$0xff] }
 0x541   :  { %v12187_v22 = vcombine.high %v1374_v13, %v1382_v18  ;;  %v12189_v24 = vcombine.high %v1375_v17, %v1383_v19  ;;  %v12186_v26 = vcombine.low %v1374_v13, %v1382_v18  ;;  %v12680_v13 = vld [vmem:[#allocation8 + $0x140] sm:$0xff]  }
 0x543   :  { %9281 = vmatpush1.bf16.msra.mxu0 %v12090_v28  ;;  %9486 = vmatpush1.bf16.msra.mxu1 %v12092_v1  ;;  %v12188_v28 = vcombine.low %v1375_v17, %v1383_v19  ;;  %v12648_v1 = vld [vmem:[#allocation8 + $0x40] sm:$0xff]  }
 0x544   :  { %9282 = vmatprep.subr.bf16.mxu0 %v12107_v29  ;;  %9487 = vmatprep.subr.bf16.mxu1 %v12109_v31  ;;  %v12649_v29 = vld [vmem:[#allocation8 + $0xc0] sm:$0xff]  }
 0x545   :  { %v12681_v17 = vld [vmem:[#allocation8 + $0x1c0] sm:$0xff]  }
 0x547   :  { %9283 = vmatpush1.bf16.msra.mxu0 %v12106_v37  ;;  %9488 = vmatpush1.bf16.msra.mxu1 %v12108_v38  ;;  %v12777_v31 = vpop.eup %12776  ;;  %v12653_v38 = vld [vmem:[#allocation8 + $0xc8] sm:$0xff]  }
 0x548   :  { %9284 = vmatprep.subr.bf16.mxu0 %v12123_v40  ;;  %9489 = vmatprep.subr.bf16.mxu1 %v12125_v41  ;;  %v12779_v33 = vpop.eup %12778  ;;  %v9525_v37 = vpack.c.bf16 %v12777_v31, %v12777_v31  ;;  %v12654_v41 = vld [vmem:[#allocation8 + $0x8] sm:$0xff]  }
 0x549   :  { %v9527_v40 = vpack.c.bf16 %v12779_v33, %v12779_v33  ;;  %v12685_v31 = vld [vmem:[#allocation8 + $0x1c8] sm:$0xff]  }
 0x54a   :  { %v12686_v33 = vld [vmem:[#allocation8 + $0x108] sm:$0xff]  }
 0x54b   :  { %9285 = vmatpush1.bf16.msra.mxu0 %v12122_v46  ;;  %9490 = vmatpush1.bf16.msra.mxu1 %v12124_v47  ;;  %v12659_v46 = vld [vmem:[#allocation8 + $0x90] sm:$0xff]   ;;  %v12660_v47 = vld [vmem:[#allocation8 + $0x58] sm:$0xff]  }
 0x54c   :  { %9286 = vmatprep.subr.bf16.mxu0 %v12139_v50  ;;  %9491 = vmatprep.subr.bf16.mxu1 %v12141_v52  ;;  %v1410_v50 = vsub.s32 5, %v13160_v7  ;;  %v1391_v52 = vrot.slane %v13186_v44, %v1390_v27  ;;  %v1419_v27 = vrot.slane %v13186_v44, %v1418_v51 }
 0x54e   :  { %v1411_v61 = vrot.slane %v13186_v44, %v1410_v50  ;;  %v12502_v23 = vadd.f32 %v13138_v15, %v1419_v27  ;;  %v12677_v15 = vld [vmem:[#allocation8 + $0xf8] sm:$0xff]   ;;  %v12701_v27 = vld [vmem:[#allocation8 + $0x1e8] sm:$0xff]  }
 0x54f   :  { %9287 = vmatpush1.bf16.msra.mxu0 %v12138_v62  ;;  %9492 = vmatpush1.bf16.msra.mxu1 %v12140_v39  ;;  %v12665_v62 = vld [vmem:[#allocation8 + $0xe0] sm:$0xff]   ;;  %v12495_v39 = vadd.f32 %v13104_v10, %v1391_v52  ;;  %v12671_v10 = vld [vmem:[#allocation8 + $0xa8] sm:$0xff]  }
 0x550   :  { %9288 = vmatprep.subr.bf16.mxu0 %v12155_v63  ;;  %9493 = vmatprep.subr.bf16.mxu1 %v12157_v30  ;;  %v12666_v63 = vld [vmem:[#allocation8 + $0x20] sm:$0xff]   ;;  %v12668_v30 = vld [vmem:[#allocation8 + $0x68] sm:$0xff]   ;;  %v12500_v2 = vadd.f32 %v13136_v9, %v1411_v61  ;;  %v12675_v9 = vld [vmem:[#allocation8 + $0xb0] sm:$0xff]  }
 0x551   :  { %12780 = vtanh.f32 %v12495_v39  ;;  %v12696_v52 = vld [vmem:[#allocation8 + $0x160] sm:$0xff]   ;;  %v12703_v39 = vld [vmem:[#allocation8 + $0x1a8] sm:$0xff]  }
 0x552   :  { %12782 = vtanh.f32 %v12497_v57  ;;  %v12699_v61 = vld [vmem:[#allocation8 + $0x1a0] sm:$0xff]   ;;  %v12707_v57 = vld [vmem:[#allocation8 + $0x1b0] sm:$0xff]  }
 0x553   :  { %9289 = vmatpush1.bf16.msra.mxu0 %v12154_v25  ;;  %9494 = vmatpush1.bf16.msra.mxu1 %v12156_v48  ;;  %12784 = vtanh.f32 %v12500_v2  ;;  %v12674_v25 = vld [vmem:[#allocation8 + $0x30] sm:$0xff]   ;;  %v12676_v48 = vld [vmem:[#allocation8 + $0x78] sm:$0xff]  }
 0x554   :  { %9290 = vmatprep.subr.bf16.mxu0 %v12171_v54  ;;  %9495 = vmatprep.subr.bf16.mxu1 %v12173_v11  ;;  %12786 = vtanh.f32 %v12502_v23  ;;  %v12678_v54 = vld [vmem:[#allocation8 + $0x38] sm:$0xff]   ;;  %v12712_v23 = vld [vmem:[#allocation8 + $0x240] sm:$0xff]  }
 0x555   :  { %v12679_v11 = vld [vmem:[#allocation8 + $0xb8] sm:$0xff]  }
 0x556   :  { %v12710_v2 = vld [vmem:[#allocation8 + $0x138] sm:$0xff]  }
 0x557   :  { %9291 = vmatpush1.bf16.msra.mxu0 %v12170_v21  ;;  %9496 = vmatpush1.bf16.msra.mxu1 %v12172_v20  ;;  %v12682_v20 = vld [vmem:[#allocation8 + $0x100] sm:$0xff]  }
 0x558   :  { %9292 = vmatprep.subr.bf16.mxu0 %v12187_v22  ;;  %9497 = vmatprep.subr.bf16.mxu1 %v12189_v24 }
 0x55b   :  { %9293 = vmatpush1.bf16.msra.mxu0 %v12186_v26  ;;  %9498 = vmatpush1.bf16.msra.mxu1 %v12188_v28  ;;  %v12781_v18 = vpop.eup %12780  ;;  %v12683_v26 = vld [vmem:[#allocation8 + $0x180] sm:$0xff]  }
 0x55c   :  { %12319 = vmatprep.subr.bf16.mxu0 %v12648_v1  ;;  %12341 = vmatprep.subr.bf16.mxu1 %v12649_v29  ;;  %v12783_v19 = vpop.eup %12782  ;;  %v9524_v24 = vpack.c.bf16 %v12781_v18, %v12781_v18  ;;  %v12684_v1 = vld [vmem:[#allocation8 + $0x148] sm:$0xff]  }
 0x55d   :  { %v12785_v21 = vpop.eup %12784  ;;  %v9526_v28 = vpack.c.bf16 %v12783_v19, %v12783_v19  ;;  %v12718_v18 = vld [vmem:[#allocation8 + $0x208] sm:$0xff]   ;;  %v12720_v19 = vld [vmem:[#allocation8 + $0x250] sm:$0xff]  }
 0x55e   :  { %9295 = vmatmul.mubr.bf16.vlgmr.msra.gmra.mrb[12].mxu0 %v13086_v14  ;;  %9500 = vmatmul.mubr.bf16.vlgmr.msra.gmra.mrb[12].mxu1 %v13086_v14  ;;  %v12661_v14 = vld [vmem:[#allocation8 + $0xd8] sm:$0xff]   ;;  %v12787_v22 = vpop.eup %12786  ;;  %v9529_v29 = vpack.c.bf16 %v12785_v21, %v12785_v21  ;;  %v12721_v21 = vld [vmem:[#allocation8 + $0x2d0] sm:$0xff]  }
 0x55f   :  { %12320 = vmatpush3.bf16.msra.mxu0 %v12650_v32  ;;  %10603 = vmatprep.mubr.bf16.mxu0 %v9525_v37  ;;  %v9531_v32 = vpack.c.bf16 %v12787_v22, %v12787_v22  ;;  %v12689_v37 = vld [vmem:[#allocation8 + $0x1d0] sm:$0xff]  }
 0x560   :  { %12342 = vmatpush3.bf16.msra.mxu1 %v12651_v35  ;;  %10643 = vmatprep.mubr.bf16.mxu1 %v9527_v40  ;;  %v12687_v35 = vld [vmem:[#allocation8 + $0x188] sm:$0xff]   ;;  %v12690_v40 = vld [vmem:[#allocation8 + $0x110] sm:$0xff]  }
 0x561   :  { %12321 = vmatprep.subr.bf16.mxu0 %v12652_v36  ;;  %12343 = vmatprep.subr.bf16.mxu1 %v12653_v38  ;;  %v12688_v36 = vld [vmem:[#allocation8 + $0x150] sm:$0xff]   ;;  %v1406_v38 = vsub.s32 4, %v13160_v7 }
 0x562   :  { %v12723_v22 = vld [vmem:[#allocation8 + $0x290] sm:$0xff]  }
 0x563   :  { %12322 = vmatpush3.bf16.msra.mxu0 %v12654_v41  ;;  %v1414_v41 = vsub.s32 6, %v13160_v7 }
 0x564   :  { %12344 = vmatpush3.bf16.msra.mxu1 %v12655_v42  ;;  %12323 = vmatprep.subr.bf16.mxu0 %v12656_v43  ;;  %v12691_v42 = vld [vmem:[#allocation8 + $0x190] sm:$0xff]   ;;  %v12692_v43 = vld [vmem:[#allocation8 + $0x158] sm:$0xff]  }
 0x565   :  { %12345 = vmatprep.subr.bf16.mxu1 %v12657_v34  ;;  %v12693_v34 = vld [vmem:[#allocation8 + $0x1d8] sm:$0xff]  }
 0x567   :  { %12324 = vmatpush3.bf16.msra.mxu0 %v12658_v45  ;;  %v1407_v45 = vrot.slane %v13186_v44, %v1406_v38 }
 0x568   :  { %12346 = vmatpush3.bf16.msra.mxu1 %v12659_v46  ;;  %12325 = vmatprep.subr.bf16.mxu0 %v12660_v47  ;;  %v12694_v46 = vld [vmem:[#allocation8 + $0x118] sm:$0xff]   ;;  %v1415_v47 = vrot.slane %v13186_v44, %v1414_v41  ;;  %v12702_v44 = vld [vmem:[#allocation8 + $0x128] sm:$0xff]  }
 0x569   :  { %12347 = vmatprep.subr.bf16.mxu1 %v12661_v14  ;;  %v12695_v14 = vld [vmem:[#allocation8 + $0x198] sm:$0xff]   ;;  %v12499_v12 = vadd.f32 %v13132_v4, %v1407_v45  ;;  %v12705_v4 = vld [vmem:[#allocation8 + $0x1f0] sm:$0xff]  }
 0x56a   :  { %v12739_v45 = vld [vmem:[#allocation8 + $0x2b0] sm:$0xff]  }
 0x56b   :  { %12326 = vmatpush3.bf16.msra.mxu0 %v12662_v53  ;;  %v12697_v53 = vld [vmem:[#allocation8 + $0x1e0] sm:$0xff]   ;;  %12788 = vtanh.f32 %v12499_v12 }
 0x56c   :  { %12348 = vmatpush3.bf16.msra.mxu1 %v12663_v58  ;;  %12327 = vmatprep.subr.bf16.mxu0 %v12664_v59  ;;  %v12698_v58 = vld [vmem:[#allocation8 + $0x120] sm:$0xff]   ;;  %v12501_v59 = vadd.f32 %v13134_v8, %v1415_v47  ;;  %v12706_v8 = vld [vmem:[#allocation8 + $0x130] sm:$0xff]   ;;  %v12741_v47 = vld [vmem:[#allocation8 + $0x2f8] sm:$0xff]  }
 0x56d   :  { %12349 = vmatprep.subr.bf16.mxu1 %v12665_v62  ;;  %v12700_v62 = vld [vmem:[#allocation8 + $0x168] sm:$0xff]  }
 0x56e   :  { %12790 = vtanh.f32 %v12501_v59 }
 0x56f   :  { %12328 = vmatpush3.bf16.msra.mxu0 %v12666_v63  ;;  %v12704_v63 = vld [vmem:[#allocation8 + $0x170] sm:$0xff]   ;;  %12792 = vtanh.f32 %v13178_v56  ;;  %v12713_v56 = vld [vmem:[#allocation8 + $0x2c0] sm:$0xff]  }
 0x570   :  { %12350 = vmatpush3.bf16.msra.mxu1 %v12667_v0  ;;  %12329 = vmatprep.subr.bf16.mxu0 %v12668_v30  ;;  %12794 = vtanh.f32 %v13180_v60  ;;  %v12708_v0 = vld [vmem:[#allocation8 + $0x178] sm:$0xff]   ;;  %v12714_v60 = vld [vmem:[#allocation8 + $0x200] sm:$0xff]  }
 0x571   :  { %12351 = vmatprep.subr.bf16.mxu1 %v12669_v3  ;;  %v12709_v30 = vld [vmem:[#allocation8 + $0x1f8] sm:$0xff]   ;;  %12796 = vtanh.f32 %v13174_v49 }
 0x572   :  { %v12711_v3 = vld [vmem:[#allocation8 + $0x1b8] sm:$0xff]   ;;  %12798 = vtanh.f32 %v13176_v55  ;;  %v12744_v55 = vld [vmem:[#allocation8 + $0x340] sm:$0xff]  }
 0x573   :  { %12330 = vmatpush3.bf16.msra.mxu0 %v12670_v5  ;;  %v12742_v49 = vld [vmem:[#allocation8 + $0x238] sm:$0xff]  }
 0x574   :  { %12352 = vmatpush3.bf16.msra.mxu1 %v12671_v10  ;;  %12331 = vmatprep.subr.bf16.mxu0 %v12672_v6 }
 0x575   :  { %12353 = vmatprep.subr.bf16.mxu1 %v12673_v16  ;;  %v12789_v5 = vpop.eup %12788 }
 0x577   :  { %12332 = vmatpush3.bf16.msra.mxu0 %v12674_v25  ;;  %v9528_v25 = vpack.c.bf16 %v12789_v5, %v12789_v5  ;;  %v12760_v5 = vld [vmem:[#allocation8 + $0x360] sm:$0xff]  }
 0x578   :  { %12354 = vmatpush3.bf16.msra.mxu1 %v12675_v9  ;;  %12333 = vmatprep.subr.bf16.mxu0 %v12676_v48  ;;  %v12791_v10 = vpop.eup %12790  ;;  %v12715_v9 = vld [vmem:[#allocation8 + $0x280] sm:$0xff]  }
 0x579   :  { %12355 = vmatprep.subr.bf16.mxu1 %v12677_v15  ;;  %v12793_v6 = vpop.eup %12792  ;;  %v9530_v48 = vpack.c.bf16 %v12791_v10, %v12791_v10  ;;  %v12716_v15 = vld [vmem:[#allocation8 + $0x248] sm:$0xff]   ;;  %v12762_v10 = vld [vmem:[#allocation8 + $0x320] sm:$0xff]  }
 0x57a   :  { %v12795_v16 = vpop.eup %12794 }
 0x57b   :  { %12334 = vmatpush3.bf16.msra.mxu0 %v12678_v54  ;;  %v9533_v54 = vpack.c.bf16 %v12793_v6, %v12793_v6  ;;  %v12763_v6 = vld [vmem:[#allocation8 + $0x3a0] sm:$0xff]  }
 0x57c   :  { %12356 = vmatpush3.bf16.msra.mxu1 %v12679_v11  ;;  %12363 = vmatprep.subr.bf16.mxu0 %v12680_v13  ;;  %v12717_v11 = vld [vmem:[#allocation8 + $0x2c8] sm:$0xff]   ;;  %v9535_v13 = vpack.c.bf16 %v12795_v16, %v12795_v16 }
 0x57d   :  { %12385 = vmatprep.subr.bf16.mxu1 %v12681_v17  ;;  %v12719_v17 = vld [vmem:[#allocation8 + $0x288] sm:$0xff]  }
 0x57e   :  { %10604 = vmatmul.mubr.bf16.vlgmr.msra.gmra.mrb[16].mxu0 %v9524_v24  ;;  %v12724_v24 = vld [vmem:[#allocation8 + $0x258] sm:$0xff]   ;;  %v12765_v16 = vld [vmem:[#allocation8 + $0x3e8] sm:$0xff]  }
 0x57f   :  { %10644 = vmatmul.mubr.bf16.vlgmr.msra.gmra.mrb[16].mxu1 %v9526_v28  ;;  %12364 = vmatpush3.bf16.msra.mxu0 %v12682_v20  ;;  %v12722_v20 = vld [vmem:[#allocation8 + $0x210] sm:$0xff]   ;;  %v12726_v28 = vld [vmem:[#allocation8 + $0x218] sm:$0xff]  }
 0x580   :  { %10683 = vmatprep.mubr.bf16.mxu0 %v9529_v29  ;;  %12386 = vmatpush3.bf16.msra.mxu1 %v12683_v26  ;;  %v12725_v26 = vld [vmem:[#allocation8 + $0x2d8] sm:$0xff]   ;;  %v12728_v29 = vld [vmem:[#allocation8 + $0x260] sm:$0xff]  }
 0x581   :  { %10723 = vmatprep.mubr.bf16.mxu1 %v9531_v32  ;;  %12365 = vmatprep.subr.bf16.mxu0 %v12684_v1  ;;  %v12727_v1 = vld [vmem:[#allocation8 + $0x298] sm:$0xff]   ;;  %v12730_v32 = vld [vmem:[#allocation8 + $0x220] sm:$0xff]  }
 0x582   :  { %12387 = vmatprep.subr.bf16.mxu1 %v12685_v31  ;;  %v12729_v31 = vld [vmem:[#allocation8 + $0x2e0] sm:$0xff]  }
 0x583   :  { %12366 = vmatpush3.bf16.msra.mxu0 %v12686_v33  ;;  %v12731_v33 = vld [vmem:[#allocation8 + $0x2a0] sm:$0xff]  }
 0x584   :  { %12388 = vmatpush3.bf16.msra.mxu1 %v12687_v35  ;;  %12367 = vmatprep.subr.bf16.mxu0 %v12688_v36  ;;  %v12732_v35 = vld [vmem:[#allocation8 + $0x268] sm:$0xff]  }
 0x585   :  { %12389 = vmatprep.subr.bf16.mxu1 %v12689_v37  ;;  %v12733_v36 = vld [vmem:[#allocation8 + $0x2e8] sm:$0xff]  }
 0x586   :  { %v12734_v37 = vld [vmem:[#allocation8 + $0x228] sm:$0xff]  }
 0x587   :  { %12368 = vmatpush3.bf16.msra.mxu0 %v12690_v40  ;;  %v12735_v40 = vld [vmem:[#allocation8 + $0x2a8] sm:$0xff]  }
 0x588   :  { %12390 = vmatpush3.bf16.msra.mxu1 %v12691_v42  ;;  %12369 = vmatprep.subr.bf16.mxu0 %v12692_v43  ;;  %v12736_v42 = vld [vmem:[#allocation8 + $0x270] sm:$0xff]  }
 0x589   :  { %12391 = vmatprep.subr.bf16.mxu1 %v12693_v34  ;;  %v12737_v43 = vld [vmem:[#allocation8 + $0x2f0] sm:$0xff]  }
 0x58a   :  { %v12738_v34 = vld [vmem:[#allocation8 + $0x230] sm:$0xff]  }
 0x58b   :  { %12370 = vmatpush3.bf16.msra.mxu0 %v12694_v46  ;;  %v12740_v46 = vld [vmem:[#allocation8 + $0x278] sm:$0xff]  }
 0x58c   :  { %12392 = vmatpush3.bf16.msra.mxu1 %v12695_v14  ;;  %12371 = vmatprep.subr.bf16.mxu0 %v12696_v52  ;;  %v12743_v14 = vld [vmem:[#allocation8 + $0x2b8] sm:$0xff]   ;;  %v12797_v52 = vpop.eup %12796 }
 0x58d   :  { %12393 = vmatprep.subr.bf16.mxu1 %v12697_v53  ;;  %v12745_v53 = vld [vmem:[#allocation8 + $0x3c0] sm:$0xff]   ;;  %v12799_v12 = vpop.eup %12798  ;;  %v9532_v59 = vpack.c.bf16 %v12797_v52, %v12797_v52 }
 0x58f   :  { %12372 = vmatpush3.bf16.msra.mxu0 %v12698_v58  ;;  %v12746_v58 = vld [vmem:[#allocation8 + $0x300] sm:$0xff]  }
 0x590   :  { %12394 = vmatpush3.bf16.msra.mxu1 %v12699_v61  ;;  %12373 = vmatprep.subr.bf16.mxu0 %v12700_v62  ;;  %v12747_v61 = vld [vmem:[#allocation8 + $0x380] sm:$0xff]   ;;  %v12748_v62 = vld [vmem:[#allocation8 + $0x348] sm:$0xff]  }
 0x591   :  { %12395 = vmatprep.subr.bf16.mxu1 %v12701_v27  ;;  %v9534_v27 = vpack.c.bf16 %v12799_v12, %v12799_v12 }
 0x593   :  { %12374 = vmatpush3.bf16.msra.mxu0 %v12702_v44  ;;  %v12749_v44 = vld [vmem:[#allocation8 + $0x3c8] sm:$0xff]  }
 0x594   :  { %12396 = vmatpush3.bf16.msra.mxu1 %v12703_v39  ;;  %12375 = vmatprep.subr.bf16.mxu0 %v12704_v63  ;;  %v12750_v39 = vld [vmem:[#allocation8 + $0x308] sm:$0xff]  }
 0x595   :  { %12397 = vmatprep.subr.bf16.mxu1 %v12705_v4  ;;  %v12751_v63 = vld [vmem:[#allocation8 + $0x388] sm:$0xff]   ;;  %v12752_v4 = vld [vmem:[#allocation8 + $0x350] sm:$0xff]  }
 0x597   :  { %12376 = vmatpush3.bf16.msra.mxu0 %v12706_v8  ;;  %v12753_v8 = vld [vmem:[#allocation8 + $0x3d0] sm:$0xff]  }
 0x598   :  { %12398 = vmatpush3.bf16.msra.mxu1 %v12707_v57  ;;  %12377 = vmatprep.subr.bf16.mxu0 %v12708_v0  ;;  %v12754_v57 = vld [vmem:[#allocation8 + $0x310] sm:$0xff]  }
 0x599   :  { %12399 = vmatprep.subr.bf16.mxu1 %v12709_v30  ;;  %v12755_v0 = vld [vmem:[#allocation8 + $0x390] sm:$0xff]   ;;  %v12756_v30 = vld [vmem:[#allocation8 + $0x358] sm:$0xff]  }
 0x59b   :  { %12378 = vmatpush3.bf16.msra.mxu0 %v12710_v2  ;;  %v12757_v2 = vld [vmem:[#allocation8 + $0x3d8] sm:$0xff]  }
 0x59c   :  { %12400 = vmatpush3.bf16.msra.mxu1 %v12711_v3  ;;  %12407 = vmatprep.subr.bf16.mxu0 %v12712_v23  ;;  %v12758_v3 = vld [vmem:[#allocation8 + $0x318] sm:$0xff]  }
 0x59d   :  { %12429 = vmatprep.subr.bf16.mxu1 %v12713_v56  ;;  %v12759_v23 = vld [vmem:[#allocation8 + $0x398] sm:$0xff]   ;;  %v12761_v56 = vld [vmem:[#allocation8 + $0x3e0] sm:$0xff]  }
 0x59e   :  { %10684 = vmatmul.mubr.bf16.vlgmr.msra.gmra.mrb[20].mxu0 %v9528_v25  ;;  %v12766_v25 = vld [vmem:[#allocation8 + $0x328] sm:$0xff]  }
 0x59f   :  { %10724 = vmatmul.mubr.bf16.vlgmr.msra.gmra.mrb[20].mxu1 %v9530_v48  ;;  %12408 = vmatpush3.bf16.msra.mxu0 %v12714_v60  ;;  %v12764_v60 = vld [vmem:[#allocation8 + $0x368] sm:$0xff]   ;;  %v12768_v48 = vld [vmem:[#allocation8 + $0x370] sm:$0xff]  }
 0x5a0   :  { %10763 = vmatprep.mubr.bf16.mxu0 %v9533_v54  ;;  %12430 = vmatpush3.bf16.msra.mxu1 %v12715_v9  ;;  %v12767_v9 = vld [vmem:[#allocation8 + $0x3a8] sm:$0xff]   ;;  %v12770_v54 = vld [vmem:[#allocation8 + $0x330] sm:$0xff]  }
 0x5a1   :  { %10803 = vmatprep.mubr.bf16.mxu1 %v9535_v13  ;;  %12409 = vmatprep.subr.bf16.mxu0 %v12716_v15  ;;  %v12769_v15 = vld [vmem:[#allocation8 + $0x3f0] sm:$0xff]   ;;  %v12772_v13 = vld [vmem:[#allocation8 + $0x378] sm:$0xff]  }
 0x5a2   :  { %12431 = vmatprep.subr.bf16.mxu1 %v12717_v11  ;;  %v12771_v11 = vld [vmem:[#allocation8 + $0x3b0] sm:$0xff]  }
 0x5a3   :  { %12410 = vmatpush3.bf16.msra.mxu0 %v12718_v18  ;;  %v12773_v18 = vld [vmem:[#allocation8 + $0x3f8] sm:$0xff]  }
 0x5a4   :  { %12432 = vmatpush3.bf16.msra.mxu1 %v12719_v17  ;;  %12411 = vmatprep.subr.bf16.mxu0 %v12720_v19  ;;  %v12774_v17 = vld [vmem:[#allocation8 + $0x338] sm:$0xff]  }
 0x5a5   :  { %12433 = vmatprep.subr.bf16.mxu1 %v12721_v21  ;;  %v12775_v19 = vld [vmem:[#allocation8 + $0x3b8] sm:$0xff]  }
 0x5a6   :  { %v12810_v21 = vld [vmem:[#allocation7 + $0x8] sm:$0xff] }
 0x5a7   :  { %12412 = vmatpush3.bf16.msra.mxu0 %v12722_v20  ;;  %v1439_v20 = vrot.slane %v12810_v21, %v1406_v38 }
 0x5a8   :  { %12434 = vmatpush3.bf16.msra.mxu1 %v12723_v22  ;;  %12413 = vmatprep.subr.bf16.mxu0 %v12724_v24  ;;  %v1447_v22 = vrot.slane %v12810_v21, %v1414_v41  ;;  %v1443_v24 = vrot.slane %v12810_v21, %v1410_v50 }
 0x5a9   :  { %12435 = vmatprep.subr.bf16.mxu1 %v12725_v26  ;;  %v1451_v26 = vrot.slane %v12810_v21, %v1418_v51 }
 0x5ab   :  { %12414 = vmatpush3.bf16.msra.mxu0 %v12726_v28 }
 0x5ac   :  { %12436 = vmatpush3.bf16.msra.mxu1 %v12727_v1  ;;  %12415 = vmatprep.subr.bf16.mxu0 %v12728_v29 }
 0x5ad   :  { %12437 = vmatprep.subr.bf16.mxu1 %v12729_v31 }
 0x5af   :  { %12416 = vmatpush3.bf16.msra.mxu0 %v12730_v32 }
 0x5b0   :  { %12438 = vmatpush3.bf16.msra.mxu1 %v12731_v33  ;;  %12417 = vmatprep.subr.bf16.mxu0 %v12732_v35 }
 0x5b1   :  { %12439 = vmatprep.subr.bf16.mxu1 %v12733_v36 }
 0x5b3   :  { %12418 = vmatpush3.bf16.msra.mxu0 %v12734_v37 }
 0x5b4   :  { %12440 = vmatpush3.bf16.msra.mxu1 %v12735_v40  ;;  %12419 = vmatprep.subr.bf16.mxu0 %v12736_v42 }
 0x5b5   :  { %12441 = vmatprep.subr.bf16.mxu1 %v12737_v43 }
 0x5b7   :  { %12420 = vmatpush3.bf16.msra.mxu0 %v12738_v34 }
 0x5b8   :  { %12442 = vmatpush3.bf16.msra.mxu1 %v12739_v45  ;;  %12421 = vmatprep.subr.bf16.mxu0 %v12740_v46 }
 0x5b9   :  { %12443 = vmatprep.subr.bf16.mxu1 %v12741_v47 }
 0x5bb   :  { %12422 = vmatpush3.bf16.msra.mxu0 %v12742_v49 }
 0x5bc   :  { %12444 = vmatpush3.bf16.msra.mxu1 %v12743_v14  ;;  %12451 = vmatprep.subr.bf16.mxu0 %v12744_v55  ;;  %v12190_v14 = vld [vmem:[#allocation10] ss:$0 sm:$0xff] }
 0x5bd   :  { %12473 = vmatprep.subr.bf16.mxu1 %v12745_v53 }
 0x5be   :  { %10764 = vmatmul.mubr.bf16.vlgmr.msra.gmra.mrb[24].mxu0 %v9532_v59 }
 0x5bf   :  { %10804 = vmatmul.mubr.bf16.vlgmr.msra.gmra.mrb[24].mxu1 %v9534_v27  ;;  %12452 = vmatpush3.bf16.msra.mxu0 %v12746_v58 }
 0x5c0   :  { %12474 = vmatpush3.bf16.msra.mxu1 %v12747_v61  ;;  %12453 = vmatprep.subr.bf16.mxu0 %v12748_v62 }
 0x5c1   :  { %12475 = vmatprep.subr.bf16.mxu1 %v12749_v44 }
 0x5c3   :  { %12454 = vmatpush3.bf16.msra.mxu0 %v12750_v39 }
 0x5c4   :  { %12476 = vmatpush3.bf16.msra.mxu1 %v12751_v63  ;;  %12455 = vmatprep.subr.bf16.mxu0 %v12752_v4 }
 0x5c5   :  { %12477 = vmatprep.subr.bf16.mxu1 %v12753_v8 }
 0x5c7   :  { %12456 = vmatpush3.bf16.msra.mxu0 %v12754_v57 }
 0x5c8   :  { %12478 = vmatpush3.bf16.msra.mxu1 %v12755_v0  ;;  %12457 = vmatprep.subr.bf16.mxu0 %v12756_v30 }
 0x5c9   :  { %12479 = vmatprep.subr.bf16.mxu1 %v12757_v2 }
 0x5cb   :  { %12458 = vmatpush3.bf16.msra.mxu0 %v12758_v3 }
 0x5cc   :  { %12480 = vmatpush3.bf16.msra.mxu1 %v12759_v23  ;;  %12459 = vmatprep.subr.bf16.mxu0 %v12760_v5 }
 0x5cd   :  { %12481 = vmatprep.subr.bf16.mxu1 %v12761_v56 }
 0x5cf   :  { %12460 = vmatpush3.bf16.msra.mxu0 %v12762_v10 }
 0x5d0   :  { %12482 = vmatpush3.bf16.msra.mxu1 %v12763_v6  ;;  %12461 = vmatprep.subr.bf16.mxu0 %v12764_v60 }
 0x5d1   :  { %12483 = vmatprep.subr.bf16.mxu1 %v12765_v16 }
 0x5d3   :  { %12462 = vmatpush3.bf16.msra.mxu0 %v12766_v25 }
 0x5d4   :  { %12484 = vmatpush3.bf16.msra.mxu1 %v12767_v9  ;;  %12463 = vmatprep.subr.bf16.mxu0 %v12768_v48 }
 0x5d5   :  { %12485 = vmatprep.subr.bf16.mxu1 %v12769_v15 }
 0x5d7   :  { %12464 = vmatpush3.bf16.msra.mxu0 %v12770_v54 }
 0x5d8   :  { %12486 = vmatpush3.bf16.msra.mxu1 %v12771_v11  ;;  %12465 = vmatprep.subr.bf16.mxu0 %v12772_v13 }
 0x5d9   :  { %12487 = vmatprep.subr.bf16.mxu1 %v12773_v18 }
 0x5db   :  { %12466 = vmatpush3.bf16.msra.mxu0 %v12774_v17 }
 0x5dc   :  { %12488 = vmatpush3.bf16.msra.mxu1 %v12775_v19 }
 0x631   :  { %v9296_v28 = vpop.f32.mrb[12].mxu0  ;;  %v9501_v29 = vpop.f32.mrb[12].mxu1 }
 0x632   :  { %v12507_v1 = vadd.f32 %v9296_v28, %v1439_v20  ;;  %v9298_v31 = vpop.f32.mrb[13].mxu0  ;;  %v12509_v32 = vadd.f32 %v9501_v29, %v1447_v22  ;;  %v9503_v35 = vpop.f32.mrb[13].mxu1 }
 0x633   :  { %v12508_v33 = vadd.f32 %v9298_v31, %v1443_v24  ;;  %v9300_v36 = vpop.f32.mrb[14].mxu0  ;;  %v12510_v37 = vadd.f32 %v9503_v35, %v1451_v26  ;;  %v9505_v38 = vpop.f32.mrb[14].mxu1 }
 0x634   :  { %12800 = vtanh.f32 %v12507_v1  ;;  %v9301_v40 = vpop.f32.mrb[15].mxu0  ;;  %v9506_v41 = vpop.f32.mrb[15].mxu1 }
 0x635   :  { %12802 = vtanh.f32 %v12509_v32 }
 0x636   :  { %12804 = vtanh.f32 %v12508_v33 }
 0x637   :  { %12806 = vtanh.f32 %v12510_v37 }
 0x63e   :  { %v12801_v50 = vpop.eup %12800 }
 0x63f   :  { %v12803_v42 = vpop.eup %12802  ;;  %v9536_v34 = vpack.c.bf16 %v12801_v50, %v12801_v50 }
 0x640   :  { %v12805_v7 = vpop.eup %12804  ;;  %v9538_v46 = vpack.c.bf16 %v12803_v42, %v12803_v42 }
 0x641   :  { %v12807_v51 = vpop.eup %12806  ;;  %v9537_v43 = vpack.c.bf16 %v12805_v7, %v12805_v7 }
 0x642   :  { %v9539_v45 = vpack.c.bf16 %v12807_v51, %v12807_v51 }
 0x643   :  { %10843 = vmatprep.mubr.bf16.mxu0 %v9537_v43 }
 0x644   :  { %10883 = vmatprep.mubr.bf16.mxu1 %v9539_v45  ;;  %10844 = vmatmul.mubr.bf16.vlgmr.msra.gmra.mrb[28].mxu0 %v9536_v34 }
 0x645   :  { %10884 = vmatmul.mubr.bf16.vlgmr.msra.gmra.mrb[28].mxu1 %v9538_v46 }
 0x651   :  { %v12335_v47 = vpop.f32.mrb[16].mxu0 }
 0x652   :  { %v12357_v49 = vpop.f32.mrb[16].mxu1  ;;  %v12336_v55 = vpop.f32.mrb[17].mxu0 }
 0x653   :  { %v12337_v52 = vadd.f32 %v12336_v55, %v12335_v47  ;;  %v12358_v53 = vpop.f32.mrb[17].mxu1  ;;  %v12338_v12 = vpop.f32.mrb[18].mxu0 }
 0x654   :  { %v12359_v58 = vadd.f32 %v12358_v53, %v12357_v49  ;;  %v12360_v59 = vpop.f32.mrb[18].mxu1  ;;  %v12339_v61 = vpop.f32.mrb[19].mxu0 }
 0x655   :  { %v10606_v62 = vadd.f32 %v12337_v52, %v12190_v14  ;;  %v12361_v27 = vpop.f32.mrb[19].mxu1 }
 0x657   :  { %v10646_v44 = vadd.f32 %v12359_v58, %v10606_v62 }
 0x671   :  { %v12379_v39 = vpop.f32.mrb[20].mxu0 }
 0x672   :  { %v12401_v63 = vpop.f32.mrb[20].mxu1  ;;  %v12380_v4 = vpop.f32.mrb[21].mxu0 }
 0x673   :  { %v12381_v8 = vadd.f32 %v12380_v4, %v12379_v39  ;;  %v12402_v57 = vpop.f32.mrb[21].mxu1  ;;  %v12382_v0 = vpop.f32.mrb[22].mxu0 }
 0x674   :  { %v12403_v30 = vadd.f32 %v12402_v57, %v12401_v63  ;;  %v12404_v2 = vpop.f32.mrb[22].mxu1  ;;  %v12383_v3 = vpop.f32.mrb[23].mxu0 }
 0x675   :  { %v10686_v23 = vadd.f32 %v12381_v8, %v10646_v44  ;;  %v12405_v5 = vpop.f32.mrb[23].mxu1 }
 0x677   :  { %v10726_v56 = vadd.f32 %v12403_v30, %v10686_v23 }
 0x691   :  { %v12423_v10 = vpop.f32.mrb[24].mxu0 }
 0x692   :  { %v12445_v6 = vpop.f32.mrb[24].mxu1  ;;  %v12424_v60 = vpop.f32.mrb[25].mxu0 }
 0x693   :  { %v12425_v16 = vadd.f32 %v12424_v60, %v12423_v10  ;;  %v12446_v25 = vpop.f32.mrb[25].mxu1  ;;  %v12426_v9 = vpop.f32.mrb[26].mxu0 }
 0x694   :  { %v12447_v48 = vadd.f32 %v12446_v25, %v12445_v6  ;;  %v12448_v15 = vpop.f32.mrb[26].mxu1  ;;  %v12427_v54 = vpop.f32.mrb[27].mxu0 }
 0x695   :  { %v10766_v11 = vadd.f32 %v12425_v16, %v10726_v56  ;;  %v12449_v13 = vpop.f32.mrb[27].mxu1 }
 0x697   :  { %v10806_v18 = vadd.f32 %v12447_v48, %v10766_v11 }
 0x717   :  { %v12467_v17 = vpop.f32.mrb[28].mxu0 }
 0x718   :  { %v12489_v19 = vpop.f32.mrb[28].mxu1  ;;  %v12468_v21 = vpop.f32.mrb[29].mxu0 }
 0x719   :  { %v12469_v20 = vadd.f32 %v12468_v21, %v12467_v17  ;;  %v12490_v22 = vpop.f32.mrb[29].mxu1  ;;  %v12470_v24 = vpop.f32.mrb[30].mxu0 }
 0x71a   :  { %v12491_v26 = vadd.f32 %v12490_v22, %v12489_v19  ;;  %v12492_v28 = vpop.f32.mrb[30].mxu1  ;;  %v12471_v1 = vpop.f32.mrb[31].mxu0 }
 0x71b   :  { %v10846_v29 = vadd.f32 %v12469_v20, %v10806_v18  ;;  %v12493_v31 = vpop.f32.mrb[31].mxu1 }
 0x71d   :  { %v10886_v32 = vadd.f32 %v12491_v26, %v10846_v29 }
 0x71f   :  { %12808 = vtanh.f32 %v10886_v32 }
 0x729   :  { %v12809_v33 = vpop.eup %12808 }
 0x72a   :  { %10892 = vst [vmem:[#allocation11] sm:$0xff] %v12809_v33 }
 0x72b   :  { %12932 = shalt.err (!%p12929_p2)
}
 0x72c   :  { %s12933_s29 = scalar_lea.hbm %s13255_s5, 128 }
 0x72d   :  { %p12934_p3 = scmp.ne.s32.totalorder %s13255_s5, %s12933_s29  ;;  %p12937_p4 = scmp.lt.u32.totalorder %s12933_s29, %s13255_s5 }
 0x72f   :  { %p12939_p5 = pnand %p12937_p4, %p12934_p3 }
 0x731   :  { %12942 = shalt.err (!%p12939_p5)
}
 0x732   :  { %10902 = dma.vmem_to_hbm [thread:$0]  %s10900_s27, 128, %s13255_s5, [#allocation4]  }
 0x733   :  { %12949 = dma.done.wait [#allocation4], 128  }
 0x734   :  { %12950 = vsyncadd [#allocation4], 4294967168 }
 0x735   :  { %10906 = vsyncpa [#allocation3], 1 }
 0x736   :  { %10907 = vsyncpa [#allocation6], 1 }
 0x737   :  { %10908 = vsyncpa [#allocation9], 1 }
 0x738   :  { %10909 = vsyncpa [#allocation4], 1 }

</bundles_post_ra>
